<compile_context>
chip_gen: v7x
topology: tpu7x:2x2x1
jax: 0.10.0
libtpu: 0.0.40
codegen_flags: <defaults>
</compile_context>

<pallas_src>
import functools

import jax
import jax.numpy as jnp
from jax.experimental import pallas as pl
from jax.experimental.pallas import tpu as pltpu


def _round_up(x, m):
    return (x + m - 1) // m * m


def _pick_row_tile(H, W_f, N, ca_p, cb_p, cm_p, cout,
                   budget_bytes=20 * 1024 * 1024):
    # Candidate tile heights: multiples of 8 dividing H (plus the whole image),
    # largest first — fewer grid steps and less halo duplication.
    cands = []
    for t in (H, 64, 32, 16, 8):
        if t <= H and H % t == 0 and (t % 8 == 0 or t == H) and t not in cands:
            cands.append(t)

    def vmem_est(th):
        li, lm, lo = (th + 8) * W_f, (th + 4) * W_f, th * W_f
        b = 2 * (ca_p + cb_p) * li * 2                 # 2x-buffered bf16 input slabs
        b += cm_p * lm * (4 + 2)                       # f32 conv1 acc + bf16 intermediate
        b += (ca_p + cb_p) * lm * 2 + cm_p * lo * 2    # live tap-slice temporaries
        b += 3 * cout * lo * 4                         # f32 conv2 acc + 2x-buffered out
        b += 2 * lm * 2                                # mask
        return b

    fits = [t for t in cands if int(vmem_est(t) * 1.3) <= budget_bytes]
    if not fits:
        fits = [cands[-1]]
    # Prefer the largest tile that still leaves >= 2 grid steps overall (keeps
    # both v7x TensorCores busy even at batch 1); otherwise take the largest
    # fitting tile (fewest steps / least halo duplication: best for v5e/v6e).
    for t in fits:
        if N * (H // t) >= 2:
            return t
    return fits[0]


def _fused_double_conv_kernel(xa_ref, xb_ref, w1a_ref, w1b_ref, w2_ref,
                              b1_ref, b2_ref, mask_ref, o_ref, *, W_f, TH):
    # xa_ref/xb_ref: (1, 1, C*_p, (TH+8)*W_f) bf16  flattened row-block slabs
    # w1a/w1b_ref : (9, Cm_p, C*_p) bf16            per-tap conv1 weights (BN-scaled)
    # w2_ref      : (9, Cout, Cm_p) bf16            per-tap conv2 weights (BN-scaled)
    # b1/b2_ref   : (C, 1) f32                      folded conv+BN bias
    # mask_ref    : (1, 1, (TH+4)*W_f) bf16         1 inside the image, 0 on padding
    # o_ref       : (1, Cout, TH*W_f)               lane-dense output block
    LM = (TH + 4) * W_f                  # conv1 output length (2-row halo each side)
    LO = TH * W_f                        # conv2 output length
    # Tap (ky, kx) of a 3x3 conv == static lane shift on the flattened plane.
    shifts = [(ky + 1) * W_f + (kx - 1) for ky in range(3) for kx in range(3)]

    xa = xa_ref[0, 0]                    # (Ca_p, (TH+8)*W_f) bf16
    xb = xb_ref[0, 0]                    # (Cb_p, (TH+8)*W_f) bf16

    # conv1 (+ folded BN scale in weights): 9 per-tap dots accumulated in f32.
    # The channel concat [x2, x1] is implicit in summing xa- and xb-contributions.
    y1 = None
    for t, s in enumerate(shifts):
        d = jnp.dot(w1a_ref[t], xa[:, s:s + LM], preferred_element_type=jnp.float32)
        d = d + jnp.dot(w1b_ref[t], xb[:, s:s + LM], preferred_element_type=jnp.float32)
        y1 = d if y1 is None else y1 + d
    y1 = jnp.maximum(y1 + b1_ref[...], 0.0)
    # Zero out-of-image rows / pad columns (this *is* conv2's zero padding),
    # applied in bf16 after the downcast. Intermediate never leaves VMEM/vregs.
    mid = y1.astype(jnp.bfloat16) * mask_ref[0]

    # conv2 (+ folded BN) with the same per-tap accumulation.
    y2 = None
    for t, s in enumerate(shifts):
        d = jnp.dot(w2_ref[t], mid[:, s:s + LO], preferred_element_type=jnp.float32)
        y2 = d if y2 is None else y2 + d
    y2 = jnp.maximum(y2 + b2_ref[...], 0.0)
    o_ref[0] = y2.astype(o_ref.dtype)    # lane-dense (Cout, TH*W_f) store


def _fold_bn(conv_bias, gamma, beta, run_mean, run_var, eps=1e-5):
    scale = gamma / jnp.sqrt(run_var + eps)
    bias = (conv_bias - run_mean) * scale + beta
    return scale, bias


def _w_to_taps(w, scale, cout_pad, cin_pad):
    # torch (Cout, Cin, 3, 3) -> (9, cout_pad, cin_pad) bf16, tap-major, with the
    # folded BN scale multiplied in (in f32, before the bf16 cast).
    cout, cin = w.shape[0], w.shape[1]
    w = w * scale[:, None, None, None]
    w = jnp.pad(w, ((0, cout_pad - cout), (0, cin_pad - cin), (0, 0), (0, 0)))
    return jnp.transpose(w, (2, 3, 0, 1)).reshape(9, cout_pad, cin_pad).astype(jnp.bfloat16)


def _prep_input(x, W_f, TH, R, c_pad):
    # (N, C, H, W) -> per-row-block flattened bf16 slabs (N, R, c_pad, (TH+8)*W_f),
    # each block carrying its 4-row halo.  bf16-first halves the prep traffic; with
    # R == 1 (whole-image tile) it is a plain pad + reshape (no gather at all).
    # TODO(synk): for very large images, replace the R>1 gather with in-kernel
    # overlapping-window DMA (memory_space=pl.ANY + pltpu.make_async_copy).
    N, C, H, W = x.shape
    x = jnp.pad(x.astype(jnp.bfloat16),
                ((0, 0), (0, c_pad - C), (4, 4), (2, W_f - W - 2)))
    if R == 1:
        return x.reshape(N, 1, c_pad, (H + 8) * W_f)
    rows = jnp.arange(R)[:, None] * TH + jnp.arange(TH + 8)[None, :]   # (R, TH+8)
    xb = x[:, :, rows, :]                                              # (N,Cp,R,TH+8,W_f)
    return jnp.transpose(xb, (0, 2, 1, 3, 4)).reshape(N, R, c_pad, (TH + 8) * W_f)


def fused_double_conv(xa, xb, conv1, conv2, eps=1e-5):
    """double_conv applied to the implicit concat [xa, xb] along channels (NCHW)."""
    N, Ca, H, W = xa.shape
    Cb = xb.shape[1]
    w1, cb1, g1, bt1, rm1, rv1 = conv1
    w2, cb2, g2, bt2, rm2, rv2 = conv2
    Cmid, Cout = w1.shape[0], w2.shape[0]

    CP = 16                                   # bf16 sublane packing for channel (K) dims
    Ca_p, Cb_p = _round_up(Ca, CP), _round_up(Cb, CP)
    Cm_p = _round_up(Cmid, CP)

    W_f = _round_up(W + 4, 16)                # flat row width (2 pad cols each side)
    TH = _pick_row_tile(H, W_f, N, Ca_p, Cb_p, Cm_p, Cout)
    R = H // TH
    LI, LM, LO = (TH + 8) * W_f, (TH + 4) * W_f, TH * W_f

    # Fold conv bias + inference BatchNorm; scale goes into the weights (f32),
    # only the bias (+ ReLU) remains in-kernel.
    s1, fb1 = _fold_bn(cb1, g1, bt1, rm1, rv1, eps)
    s2, fb2 = _fold_bn(cb2, g2, bt2, rm2, rv2, eps)
    b1p = jnp.pad(fb1, (0, Cm_p - Cmid)).reshape(Cm_p, 1).astype(jnp.float32)
    b2p = fb2.reshape(Cout, 1).astype(jnp.float32)

    W1a = _w_to_taps(w1[:, :Ca], s1, Cm_p, Ca_p)
    W1b = _w_to_taps(w1[:, Ca:], s1, Cm_p, Cb_p)
    W2t = _w_to_taps(w2, s2, Cout, Cm_p)

    # Validity mask for the conv1 result (supplies conv2's zero padding), bf16.
    u = jnp.arange(TH + 4)
    q = jnp.arange(W_f)
    img_row = jnp.arange(R)[:, None] * TH + u[None, :] - 2
    row_ok = (img_row >= 0) & (img_row < H)
    col_ok = (q >= 2) & (q < W + 2)
    mask = (row_ok[:, :, None] & col_ok[None, None, :]).astype(jnp.bfloat16)
    mask = mask.reshape(R, 1, LM)

    XA = _prep_input(xa, W_f, TH, R, Ca_p)
    XB = _prep_input(xb, W_f, TH, R, Cb_p)

    kernel = functools.partial(_fused_double_conv_kernel, W_f=W_f, TH=TH)

    def build(single_buffer_consts):
        kw = ({"pipeline_mode": pl.Buffered(buffer_count=1)}
              if single_buffer_consts else {})
        grid_spec = pltpu.PrefetchScalarGridSpec(
            num_scalar_prefetch=0,
            grid=(N, R),
            in_specs=[
                pl.BlockSpec((1, 1, Ca_p, LI), lambda n, r: (n, r, 0, 0)),
                pl.BlockSpec((1, 1, Cb_p, LI), lambda n, r: (n, r, 0, 0)),
                pl.BlockSpec((9, Cm_p, Ca_p), lambda n, r: (0, 0, 0), **kw),
                pl.BlockSpec((9, Cm_p, Cb_p), lambda n, r: (0, 0, 0), **kw),
                pl.BlockSpec((9, Cout, Cm_p), lambda n, r: (0, 0, 0), **kw),
                pl.BlockSpec((Cm_p, 1), lambda n, r: (0, 0), **kw),
                pl.BlockSpec((Cout, 1), lambda n, r: (0, 0), **kw),
                pl.BlockSpec((1, 1, LM), lambda n, r: (r, 0, 0)),
            ],
            out_specs=pl.BlockSpec((1, Cout, LO), lambda n, r: (n, 0, r)),
        )
        return pl.pallas_call(
            kernel,
            out_shape=jax.ShapeDtypeStruct((N, Cout, H * W_f), xa.dtype),
            grid_spec=grid_spec,
            compiler_params=pltpu.CompilerParams(
                dimension_semantics=("parallel", "parallel"),
                vmem_limit_bytes=48 * 1024 * 1024,
            ),
        )

    args = (XA, XB, W1a, W1b, W2t, b1p, b2p, mask)
    try:
        out_flat = jax.block_until_ready(build(True)(*args))
    except Exception:
        # pipeline_mode=pl.Buffered(1) not supported by this build: fall back to
        # default double-buffered constants (tiny at these sizes).
        out_flat = build(False)(*args)

    # Drop the flat-layout pad columns; result is already NCHW.
    # TODO(synk): if the downstream consumer can take the padded (H, W_f) slab,
    # return it as-is and slice once at the very end of the network.
    return out_flat.reshape(N, Cout, H, W_f)[:, :, :, 2:2 + W]


# TODO(synk): bilinear 2x upsample + boundary F.pad are cheap gather/layout glue
# kept in plain JAX (no Pallas win at these sizes); interpolation weights in f32.
def bilinear_upsample2x_align_corners(x_nchw):
    """PyTorch nn.Upsample(scale_factor=2, mode='bilinear', align_corners=True)."""
    N, C, H, W = x_nchw.shape

    def coords(in_size, out_size):
        if in_size == 1:
            z = jnp.zeros((out_size,), jnp.int32)
            return z, z, jnp.zeros((out_size,), jnp.float32)
        src = jnp.arange(out_size, dtype=jnp.float32) * ((in_size - 1) / (out_size - 1))
        i0 = jnp.floor(src).astype(jnp.int32)
        i1 = jnp.minimum(i0 + 1, in_size - 1)
        return i0, i1, src - i0.astype(jnp.float32)

    y0, y1, fy = coords(H, 2 * H)
    x0, x1, fx = coords(W, 2 * W)
    xf = x_nchw.astype(jnp.float32)
    rows = (xf[:, :, y0, :] * (1.0 - fy)[None, None, :, None]
            + xf[:, :, y1, :] * fy[None, None, :, None])
    out = (rows[:, :, :, x0] * (1.0 - fx)[None, None, None, :]
           + rows[:, :, :, x1] * fx[None, None, None, :])
    return out.astype(x_nchw.dtype)


def up_forward(params, x1, x2):
    """Forward pass of `up`. x1: (N, in_ch//2, H, W), x2: (N, in_ch//2, 2H, 2W), NCHW."""
    x1u = bilinear_upsample2x_align_corners(x1)
    diffY = x2.shape[2] - x1u.shape[2]
    diffX = x2.shape[3] - x1u.shape[3]
    # lax.pad also handles negative padding (cropping), matching F.pad semantics.
    x1u = jax.lax.pad(
        x1u, jnp.array(0, x1u.dtype),
        [(0, 0, 0), (0, 0, 0),
         (diffY // 2, diffY - diffY // 2, 0),
         (diffX // 2, diffX - diffX // 2, 0)])
    # torch.cat([x2, x1], dim=1) is done implicitly inside the fused kernel.
    return fused_double_conv(x2, x1u, params["conv1"], params["conv2"])


def make_params(key, in_ch, out_ch):
    ks = jax.random.split(key, 4)

    def conv_bn(kw, kb, cin, cout):
        return (
            0.1 * jax.random.normal(kw, (cout, cin, 3, 3), jnp.float32),  # conv weight
            0.1 * jax.random.normal(kb, (cout,), jnp.float32),            # conv bias
            jnp.ones((cout,), jnp.float32),   # BN gamma
            jnp.zeros((cout,), jnp.float32),  # BN beta
            jnp.zeros((cout,), jnp.float32),  # BN running_mean
            jnp.ones((cout,), jnp.float32),   # BN running_var
        )

    return {
        "conv1": conv_bn(ks[0], ks[1], in_ch, out_ch),
        "conv2": conv_bn(ks[2], ks[3], out_ch, out_ch),
    }


if __name__ == "__main__":
    key = jax.random.PRNGKey(0)
    k_x1, k_x2, k_p = jax.random.split(key, 3)

    in_ch, out_ch = 8, 8          # concat channels = 8 (4 from x2 + 4 from upsampled x1)
    N, H, W = 2, 16, 16           # x1 spatial 16x16, x2 spatial 32x32

    x1 = jax.random.normal(k_x1, (N, in_ch // 2, H, W), jnp.float32)
    x2 = jax.random.normal(k_x2, (N, in_ch // 2, 2 * H, 2 * W), jnp.float32)
    params = make_params(k_p, in_ch, out_ch)

    out = up_forward(params, x1, x2)
    jax.block_until_ready(out)
    assert out.shape == (N, out_ch, 2 * H, 2 * W)
    print("KERNEL_OK")
</pallas_src>

<mosaic_0001>
module attributes {stable_mosaic.version = 11 : i64} {
  func.func @_fused_double_conv_kernel(%arg0: i32, %arg1: i32, %arg2: memref<1x1x16x1920xbf16, #tpu.memory_space<vmem>>, %arg3: memref<1x1x16x1920xbf16, #tpu.memory_space<vmem>>, %arg4: memref<9x16x16xbf16, #tpu.memory_space<vmem>>, %arg5: memref<9x16x16xbf16, #tpu.memory_space<vmem>>, %arg6: memref<9x8x16xbf16, #tpu.memory_space<vmem>>, %arg7: memref<16x1xf32, #tpu.memory_space<vmem>>, %arg8: memref<8x1xf32, #tpu.memory_space<vmem>>, %arg9: memref<1x1x1728xbf16, #tpu.memory_space<vmem>>, %arg10: memref<1x8x1536xf32, #tpu.memory_space<vmem>>) attributes {dimension_semantics = [#tpu.dimension_semantics<parallel>, #tpu.dimension_semantics<parallel>], iteration_bounds = array<i64: 2, 1>, scalar_prefetch = 0 : i64, scratch_operands = 0 : i64, tpu.core_type = #tpu.core_type<tc>, window_params = [{transform_indices = @transform_0, window_bounds = array<i64: 1, 1, 16, 1920>}, {transform_indices = @transform_1, window_bounds = array<i64: 1, 1, 16, 1920>}, {pipeline_mode = #tpu.pipeline_mode<synchronous>, transform_indices = @transform_2, window_bounds = array<i64: 9, 16, 16>}, {pipeline_mode = #tpu.pipeline_mode<synchronous>, transform_indices = @transform_3, window_bounds = array<i64: 9, 16, 16>}, {pipeline_mode = #tpu.pipeline_mode<synchronous>, transform_indices = @transform_4, window_bounds = array<i64: 9, 8, 16>}, {pipeline_mode = #tpu.pipeline_mode<synchronous>, transform_indices = @transform_5, window_bounds = array<i64: 16, 1>}, {pipeline_mode = #tpu.pipeline_mode<synchronous>, transform_indices = @transform_6, window_bounds = array<i64: 8, 1>}, {transform_indices = @transform_7, window_bounds = array<i64: 1, 1, 1728>}, {transform_indices = @transform_8, window_bounds = array<i64: 1, 8, 1536>}]} {
    %c0 = arith.constant 0 : index
    %c0_0 = arith.constant 0 : index
    %c0_1 = arith.constant 0 : index
    %c0_2 = arith.constant 0 : index
    %0 = vector.load %arg2[%c0, %c0_0, %c0_1, %c0_2] : memref<1x1x16x1920xbf16, #tpu.memory_space<vmem>>, vector<1x1x16x1920xbf16>
    %1 = vector.shape_cast %0 : vector<1x1x16x1920xbf16> to vector<16x1920xbf16>
    %c0_3 = arith.constant 0 : index
    %c0_4 = arith.constant 0 : index
    %c0_5 = arith.constant 0 : index
    %c0_6 = arith.constant 0 : index
    %2 = vector.load %arg3[%c0_3, %c0_4, %c0_5, %c0_6] : memref<1x1x16x1920xbf16, #tpu.memory_space<vmem>>, vector<1x1x16x1920xbf16>
    %3 = vector.shape_cast %2 : vector<1x1x16x1920xbf16> to vector<16x1920xbf16>
    %c0_7 = arith.constant 0 : index
    %c0_8 = arith.constant 0 : index
    %c0_9 = arith.constant 0 : index
    %4 = vector.load %arg4[%c0_7, %c0_8, %c0_9] : memref<9x16x16xbf16, #tpu.memory_space<vmem>>, vector<1x16x16xbf16>
    %5 = vector.shape_cast %4 : vector<1x16x16xbf16> to vector<16x16xbf16>
    %6 = vector.extract_strided_slice %1 {offsets = [0, 47], sizes = [16, 1728], strides = [1, 1]} : vector<16x1920xbf16> to vector<16x1728xbf16>
    %cst = arith.constant dense<0.000000e+00> : vector<16x1728xf32>
    %7 = tpu.matmul %5, %6, %cst {dimension_numbers = #tpu.dot_dimension_numbers<[1], [0], [0], [1], [0, 0, 1, 1], [], []>} : vector<16x16xbf16>, vector<16x1728xbf16>, vector<16x1728xf32> -> vector<16x1728xf32>
    %c0_10 = arith.constant 0 : index
    %c0_11 = arith.constant 0 : index
    %c0_12 = arith.constant 0 : index
    %8 = vector.load %arg5[%c0_10, %c0_11, %c0_12] : memref<9x16x16xbf16, #tpu.memory_space<vmem>>, vector<1x16x16xbf16>
    %9 = vector.shape_cast %8 : vector<1x16x16xbf16> to vector<16x16xbf16>
    %10 = vector.extract_strided_slice %3 {offsets = [0, 47], sizes = [16, 1728], strides = [1, 1]} : vector<16x1920xbf16> to vector<16x1728xbf16>
    %cst_13 = arith.constant dense<0.000000e+00> : vector<16x1728xf32>
    %11 = tpu.matmul %9, %10, %cst_13 {dimension_numbers = #tpu.dot_dimension_numbers<[1], [0], [0], [1], [0, 0, 1, 1], [], []>} : vector<16x16xbf16>, vector<16x1728xbf16>, vector<16x1728xf32> -> vector<16x1728xf32>
    %12 = arith.addf %7, %11 : vector<16x1728xf32>
    %c1 = arith.constant 1 : index
    %c0_14 = arith.constant 0 : index
    %c0_15 = arith.constant 0 : index
    %13 = vector.load %arg4[%c1, %c0_14, %c0_15] : memref<9x16x16xbf16, #tpu.memory_space<vmem>>, vector<1x16x16xbf16>
    %14 = vector.shape_cast %13 : vector<1x16x16xbf16> to vector<16x16xbf16>
    %15 = vector.extract_strided_slice %1 {offsets = [0, 48], sizes = [16, 1728], strides = [1, 1]} : vector<16x1920xbf16> to vector<16x1728xbf16>
    %cst_16 = arith.constant dense<0.000000e+00> : vector<16x1728xf32>
    %16 = tpu.matmul %14, %15, %cst_16 {dimension_numbers = #tpu.dot_dimension_numbers<[1], [0], [0], [1], [0, 0, 1, 1], [], []>} : vector<16x16xbf16>, vector<16x1728xbf16>, vector<16x1728xf32> -> vector<16x1728xf32>
    %c1_17 = arith.constant 1 : index
    %c0_18 = arith.constant 0 : index
    %c0_19 = arith.constant 0 : index
    %17 = vector.load %arg5[%c1_17, %c0_18, %c0_19] : memref<9x16x16xbf16, #tpu.memory_space<vmem>>, vector<1x16x16xbf16>
    %18 = vector.shape_cast %17 : vector<1x16x16xbf16> to vector<16x16xbf16>
    %19 = vector.extract_strided_slice %3 {offsets = [0, 48], sizes = [16, 1728], strides = [1, 1]} : vector<16x1920xbf16> to vector<16x1728xbf16>
    %cst_20 = arith.constant dense<0.000000e+00> : vector<16x1728xf32>
    %20 = tpu.matmul %18, %19, %cst_20 {dimension_numbers = #tpu.dot_dimension_numbers<[1], [0], [0], [1], [0, 0, 1, 1], [], []>} : vector<16x16xbf16>, vector<16x1728xbf16>, vector<16x1728xf32> -> vector<16x1728xf32>
    %21 = arith.addf %16, %20 : vector<16x1728xf32>
    %22 = arith.addf %12, %21 : vector<16x1728xf32>
    %c2 = arith.constant 2 : index
    %c0_21 = arith.constant 0 : index
    %c0_22 = arith.constant 0 : index
    %23 = vector.load %arg4[%c2, %c0_21, %c0_22] : memref<9x16x16xbf16, #tpu.memory_space<vmem>>, vector<1x16x16xbf16>
    %24 = vector.shape_cast %23 : vector<1x16x16xbf16> to vector<16x16xbf16>
    %25 = vector.extract_strided_slice %1 {offsets = [0, 49], sizes = [16, 1728], strides = [1, 1]} : vector<16x1920xbf16> to vector<16x1728xbf16>
    %cst_23 = arith.constant dense<0.000000e+00> : vector<16x1728xf32>
    %26 = tpu.matmul %24, %25, %cst_23 {dimension_numbers = #tpu.dot_dimension_numbers<[1], [0], [0], [1], [0, 0, 1, 1], [], []>} : vector<16x16xbf16>, vector<16x1728xbf16>, vector<16x1728xf32> -> vector<16x1728xf32>
    %c2_24 = arith.constant 2 : index
    %c0_25 = arith.constant 0 : index
    %c0_26 = arith.constant 0 : index
    %27 = vector.load %arg5[%c2_24, %c0_25, %c0_26] : memref<9x16x16xbf16, #tpu.memory_space<vmem>>, vector<1x16x16xbf16>
    %28 = vector.shape_cast %27 : vector<1x16x16xbf16> to vector<16x16xbf16>
    %29 = vector.extract_strided_slice %3 {offsets = [0, 49], sizes = [16, 1728], strides = [1, 1]} : vector<16x1920xbf16> to vector<16x1728xbf16>
    %cst_27 = arith.constant dense<0.000000e+00> : vector<16x1728xf32>
    %30 = tpu.matmul %28, %29, %cst_27 {dimension_numbers = #tpu.dot_dimension_numbers<[1], [0], [0], [1], [0, 0, 1, 1], [], []>} : vector<16x16xbf16>, vector<16x1728xbf16>, vector<16x1728xf32> -> vector<16x1728xf32>
    %31 = arith.addf %26, %30 : vector<16x1728xf32>
    %32 = arith.addf %22, %31 : vector<16x1728xf32>
    %c3 = arith.constant 3 : index
    %c0_28 = arith.constant 0 : index
    %c0_29 = arith.constant 0 : index
    %33 = vector.load %arg4[%c3, %c0_28, %c0_29] : memref<9x16x16xbf16, #tpu.memory_space<vmem>>, vector<1x16x16xbf16>
    %34 = vector.shape_cast %33 : vector<1x16x16xbf16> to vector<16x16xbf16>
    %35 = vector.extract_strided_slice %1 {offsets = [0, 95], sizes = [16, 1728], strides = [1, 1]} : vector<16x1920xbf16> to vector<16x1728xbf16>
    %cst_30 = arith.constant dense<0.000000e+00> : vector<16x1728xf32>
    %36 = tpu.matmul %34, %35, %cst_30 {dimension_numbers = #tpu.dot_dimension_numbers<[1], [0], [0], [1], [0, 0, 1, 1], [], []>} : vector<16x16xbf16>, vector<16x1728xbf16>, vector<16x1728xf32> -> vector<16x1728xf32>
    %c3_31 = arith.constant 3 : index
    %c0_32 = arith.constant 0 : index
    %c0_33 = arith.constant 0 : index
    %37 = vector.load %arg5[%c3_31, %c0_32, %c0_33] : memref<9x16x16xbf16, #tpu.memory_space<vmem>>, vector<1x16x16xbf16>
    %38 = vector.shape_cast %37 : vector<1x16x16xbf16> to vector<16x16xbf16>
    %39 = vector.extract_strided_slice %3 {offsets = [0, 95], sizes = [16, 1728], strides = [1, 1]} : vector<16x1920xbf16> to vector<16x1728xbf16>
    %cst_34 = arith.constant dense<0.000000e+00> : vector<16x1728xf32>
    %40 = tpu.matmul %38, %39, %cst_34 {dimension_numbers = #tpu.dot_dimension_numbers<[1], [0], [0], [1], [0, 0, 1, 1], [], []>} : vector<16x16xbf16>, vector<16x1728xbf16>, vector<16x1728xf32> -> vector<16x1728xf32>
    %41 = arith.addf %36, %40 : vector<16x1728xf32>
    %42 = arith.addf %32, %41 : vector<16x1728xf32>
    %c4 = arith.constant 4 : index
    %c0_35 = arith.constant 0 : index
    %c0_36 = arith.constant 0 : index
    %43 = vector.load %arg4[%c4, %c0_35, %c0_36] : memref<9x16x16xbf16, #tpu.memory_space<vmem>>, vector<1x16x16xbf16>
    %44 = vector.shape_cast %43 : vector<1x16x16xbf16> to vector<16x16xbf16>
    %45 = vector.extract_strided_slice %1 {offsets = [0, 96], sizes = [16, 1728], strides = [1, 1]} : vector<16x1920xbf16> to vector<16x1728xbf16>
    %cst_37 = arith.constant dense<0.000000e+00> : vector<16x1728xf32>
    %46 = tpu.matmul %44, %45, %cst_37 {dimension_numbers = #tpu.dot_dimension_numbers<[1], [0], [0], [1], [0, 0, 1, 1], [], []>} : vector<16x16xbf16>, vector<16x1728xbf16>, vector<16x1728xf32> -> vector<16x1728xf32>
    %c4_38 = arith.constant 4 : index
    %c0_39 = arith.constant 0 : index
    %c0_40 = arith.constant 0 : index
    %47 = vector.load %arg5[%c4_38, %c0_39, %c0_40] : memref<9x16x16xbf16, #tpu.memory_space<vmem>>, vector<1x16x16xbf16>
    %48 = vector.shape_cast %47 : vector<1x16x16xbf16> to vector<16x16xbf16>
    %49 = vector.extract_strided_slice %3 {offsets = [0, 96], sizes = [16, 1728], strides = [1, 1]} : vector<16x1920xbf16> to vector<16x1728xbf16>
    %cst_41 = arith.constant dense<0.000000e+00> : vector<16x1728xf32>
    %50 = tpu.matmul %48, %49, %cst_41 {dimension_numbers = #tpu.dot_dimension_numbers<[1], [0], [0], [1], [0, 0, 1, 1], [], []>} : vector<16x16xbf16>, vector<16x1728xbf16>, vector<16x1728xf32> -> vector<16x1728xf32>
    %51 = arith.addf %46, %50 : vector<16x1728xf32>
    %52 = arith.addf %42, %51 : vector<16x1728xf32>
    %c5 = arith.constant 5 : index
    %c0_42 = arith.constant 0 : index
    %c0_43 = arith.constant 0 : index
    %53 = vector.load %arg4[%c5, %c0_42, %c0_43] : memref<9x16x16xbf16, #tpu.memory_space<vmem>>, vector<1x16x16xbf16>
    %54 = vector.shape_cast %53 : vector<1x16x16xbf16> to vector<16x16xbf16>
    %55 = vector.extract_strided_slice %1 {offsets = [0, 97], sizes = [16, 1728], strides = [1, 1]} : vector<16x1920xbf16> to vector<16x1728xbf16>
    %cst_44 = arith.constant dense<0.000000e+00> : vector<16x1728xf32>
    %56 = tpu.matmul %54, %55, %cst_44 {dimension_numbers = #tpu.dot_dimension_numbers<[1], [0], [0], [1], [0, 0, 1, 1], [], []>} : vector<16x16xbf16>, vector<16x1728xbf16>, vector<16x1728xf32> -> vector<16x1728xf32>
    %c5_45 = arith.constant 5 : index
    %c0_46 = arith.constant 0 : index
    %c0_47 = arith.constant 0 : index
    %57 = vector.load %arg5[%c5_45, %c0_46, %c0_47] : memref<9x16x16xbf16, #tpu.memory_space<vmem>>, vector<1x16x16xbf16>
    %58 = vector.shape_cast %57 : vector<1x16x16xbf16> to vector<16x16xbf16>
    %59 = vector.extract_strided_slice %3 {offsets = [0, 97], sizes = [16, 1728], strides = [1, 1]} : vector<16x1920xbf16> to vector<16x1728xbf16>
    %cst_48 = arith.constant dense<0.000000e+00> : vector<16x1728xf32>
    %60 = tpu.matmul %58, %59, %cst_48 {dimension_numbers = #tpu.dot_dimension_numbers<[1], [0], [0], [1], [0, 0, 1, 1], [], []>} : vector<16x16xbf16>, vector<16x1728xbf16>, vector<16x1728xf32> -> vector<16x1728xf32>
    %61 = arith.addf %56, %60 : vector<16x1728xf32>
    %62 = arith.addf %52, %61 : vector<16x1728xf32>
    %c6 = arith.constant 6 : index
    %c0_49 = arith.constant 0 : index
    %c0_50 = arith.constant 0 : index
    %63 = vector.load %arg4[%c6, %c0_49, %c0_50] : memref<9x16x16xbf16, #tpu.memory_space<vmem>>, vector<1x16x16xbf16>
    %64 = vector.shape_cast %63 : vector<1x16x16xbf16> to vector<16x16xbf16>
    %65 = vector.extract_strided_slice %1 {offsets = [0, 143], sizes = [16, 1728], strides = [1, 1]} : vector<16x1920xbf16> to vector<16x1728xbf16>
    %cst_51 = arith.constant dense<0.000000e+00> : vector<16x1728xf32>
    %66 = tpu.matmul %64, %65, %cst_51 {dimension_numbers = #tpu.dot_dimension_numbers<[1], [0], [0], [1], [0, 0, 1, 1], [], []>} : vector<16x16xbf16>, vector<16x1728xbf16>, vector<16x1728xf32> -> vector<16x1728xf32>
    %c6_52 = arith.constant 6 : index
    %c0_53 = arith.constant 0 : index
    %c0_54 = arith.constant 0 : index
    %67 = vector.load %arg5[%c6_52, %c0_53, %c0_54] : memref<9x16x16xbf16, #tpu.memory_space<vmem>>, vector<1x16x16xbf16>
    %68 = vector.shape_cast %67 : vector<1x16x16xbf16> to vector<16x16xbf16>
    %69 = vector.extract_strided_slice %3 {offsets = [0, 143], sizes = [16, 1728], strides = [1, 1]} : vector<16x1920xbf16> to vector<16x1728xbf16>
    %cst_55 = arith.constant dense<0.000000e+00> : vector<16x1728xf32>
    %70 = tpu.matmul %68, %69, %cst_55 {dimension_numbers = #tpu.dot_dimension_numbers<[1], [0], [0], [1], [0, 0, 1, 1], [], []>} : vector<16x16xbf16>, vector<16x1728xbf16>, vector<16x1728xf32> -> vector<16x1728xf32>
    %71 = arith.addf %66, %70 : vector<16x1728xf32>
    %72 = arith.addf %62, %71 : vector<16x1728xf32>
    %c7 = arith.constant 7 : index
    %c0_56 = arith.constant 0 : index
    %c0_57 = arith.constant 0 : index
    %73 = vector.load %arg4[%c7, %c0_56, %c0_57] : memref<9x16x16xbf16, #tpu.memory_space<vmem>>, vector<1x16x16xbf16>
    %74 = vector.shape_cast %73 : vector<1x16x16xbf16> to vector<16x16xbf16>
    %75 = vector.extract_strided_slice %1 {offsets = [0, 144], sizes = [16, 1728], strides = [1, 1]} : vector<16x1920xbf16> to vector<16x1728xbf16>
    %cst_58 = arith.constant dense<0.000000e+00> : vector<16x1728xf32>
    %76 = tpu.matmul %74, %75, %cst_58 {dimension_numbers = #tpu.dot_dimension_numbers<[1], [0], [0], [1], [0, 0, 1, 1], [], []>} : vector<16x16xbf16>, vector<16x1728xbf16>, vector<16x1728xf32> -> vector<16x1728xf32>
    %c7_59 = arith.constant 7 : index
    %c0_60 = arith.constant 0 : index
    %c0_61 = arith.constant 0 : index
    %77 = vector.load %arg5[%c7_59, %c0_60, %c0_61] : memref<9x16x16xbf16, #tpu.memory_space<vmem>>, vector<1x16x16xbf16>
    %78 = vector.shape_cast %77 : vector<1x16x16xbf16> to vector<16x16xbf16>
    %79 = vector.extract_strided_slice %3 {offsets = [0, 144], sizes = [16, 1728], strides = [1, 1]} : vector<16x1920xbf16> to vector<16x1728xbf16>
    %cst_62 = arith.constant dense<0.000000e+00> : vector<16x1728xf32>
    %80 = tpu.matmul %78, %79, %cst_62 {dimension_numbers = #tpu.dot_dimension_numbers<[1], [0], [0], [1], [0, 0, 1, 1], [], []>} : vector<16x16xbf16>, vector<16x1728xbf16>, vector<16x1728xf32> -> vector<16x1728xf32>
    %81 = arith.addf %76, %80 : vector<16x1728xf32>
    %82 = arith.addf %72, %81 : vector<16x1728xf32>
    %c8 = arith.constant 8 : index
    %c0_63 = arith.constant 0 : index
    %c0_64 = arith.constant 0 : index
    %83 = vector.load %arg4[%c8, %c0_63, %c0_64] : memref<9x16x16xbf16, #tpu.memory_space<vmem>>, vector<1x16x16xbf16>
    %84 = vector.shape_cast %83 : vector<1x16x16xbf16> to vector<16x16xbf16>
    %85 = vector.extract_strided_slice %1 {offsets = [0, 145], sizes = [16, 1728], strides = [1, 1]} : vector<16x1920xbf16> to vector<16x1728xbf16>
    %cst_65 = arith.constant dense<0.000000e+00> : vector<16x1728xf32>
    %86 = tpu.matmul %84, %85, %cst_65 {dimension_numbers = #tpu.dot_dimension_numbers<[1], [0], [0], [1], [0, 0, 1, 1], [], []>} : vector<16x16xbf16>, vector<16x1728xbf16>, vector<16x1728xf32> -> vector<16x1728xf32>
    %c8_66 = arith.constant 8 : index
    %c0_67 = arith.constant 0 : index
    %c0_68 = arith.constant 0 : index
    %87 = vector.load %arg5[%c8_66, %c0_67, %c0_68] : memref<9x16x16xbf16, #tpu.memory_space<vmem>>, vector<1x16x16xbf16>
    %88 = vector.shape_cast %87 : vector<1x16x16xbf16> to vector<16x16xbf16>
    %89 = vector.extract_strided_slice %3 {offsets = [0, 145], sizes = [16, 1728], strides = [1, 1]} : vector<16x1920xbf16> to vector<16x1728xbf16>
    %cst_69 = arith.constant dense<0.000000e+00> : vector<16x1728xf32>
    %90 = tpu.matmul %88, %89, %cst_69 {dimension_numbers = #tpu.dot_dimension_numbers<[1], [0], [0], [1], [0, 0, 1, 1], [], []>} : vector<16x16xbf16>, vector<16x1728xbf16>, vector<16x1728xf32> -> vector<16x1728xf32>
    %91 = arith.addf %86, %90 : vector<16x1728xf32>
    %92 = arith.addf %82, %91 : vector<16x1728xf32>
    %c0_70 = arith.constant 0 : index
    %c0_71 = arith.constant 0 : index
    %93 = vector.load %arg7[%c0_70, %c0_71] : memref<16x1xf32, #tpu.memory_space<vmem>>, vector<16x1xf32>
    %94 = vector.broadcast %93 : vector<16x1xf32> to vector<16x1728xf32>
    %95 = arith.addf %92, %94 : vector<16x1728xf32>
    %cst_72 = arith.constant 0.000000e+00 : f32
    %96 = vector.broadcast %cst_72 : f32 to vector<16x1728xf32>
    %97 = arith.maximumf %95, %96 : vector<16x1728xf32>
    %98 = arith.truncf %97 : vector<16x1728xf32> to vector<16x1728xbf16>
    %c0_73 = arith.constant 0 : index
    %c0_74 = arith.constant 0 : index
    %c0_75 = arith.constant 0 : index
    %99 = vector.load %arg9[%c0_73, %c0_74, %c0_75] : memref<1x1x1728xbf16, #tpu.memory_space<vmem>>, vector<1x1x1728xbf16>
    %100 = vector.shape_cast %99 : vector<1x1x1728xbf16> to vector<1x1728xbf16>
    %101 = vector.broadcast %100 : vector<1x1728xbf16> to vector<16x1728xbf16>
    %102 = arith.mulf %98, %101 : vector<16x1728xbf16>
    %c0_76 = arith.constant 0 : index
    %c0_77 = arith.constant 0 : index
    %c0_78 = arith.constant 0 : index
    %103 = vector.load %arg6[%c0_76, %c0_77, %c0_78] : memref<9x8x16xbf16, #tpu.memory_space<vmem>>, vector<1x8x16xbf16>
    %104 = vector.shape_cast %103 : vector<1x8x16xbf16> to vector<8x16xbf16>
    %105 = vector.extract_strided_slice %102 {offsets = [0, 47], sizes = [16, 1536], strides = [1, 1]} : vector<16x1728xbf16> to vector<16x1536xbf16>
    %cst_79 = arith.constant dense<0.000000e+00> : vector<8x1536xf32>
    %106 = tpu.matmul %104, %105, %cst_79 {dimension_numbers = #tpu.dot_dimension_numbers<[1], [0], [0], [1], [0, 0, 1, 1], [], []>} : vector<8x16xbf16>, vector<16x1536xbf16>, vector<8x1536xf32> -> vector<8x1536xf32>
    %c1_80 = arith.constant 1 : index
    %c0_81 = arith.constant 0 : index
    %c0_82 = arith.constant 0 : index
    %107 = vector.load %arg6[%c1_80, %c0_81, %c0_82] : memref<9x8x16xbf16, #tpu.memory_space<vmem>>, vector<1x8x16xbf16>
    %108 = vector.shape_cast %107 : vector<1x8x16xbf16> to vector<8x16xbf16>
    %109 = vector.extract_strided_slice %102 {offsets = [0, 48], sizes = [16, 1536], strides = [1, 1]} : vector<16x1728xbf16> to vector<16x1536xbf16>
    %cst_83 = arith.constant dense<0.000000e+00> : vector<8x1536xf32>
    %110 = tpu.matmul %108, %109, %cst_83 {dimension_numbers = #tpu.dot_dimension_numbers<[1], [0], [0], [1], [0, 0, 1, 1], [], []>} : vector<8x16xbf16>, vector<16x1536xbf16>, vector<8x1536xf32> -> vector<8x1536xf32>
    %111 = arith.addf %106, %110 : vector<8x1536xf32>
    %c2_84 = arith.constant 2 : index
    %c0_85 = arith.constant 0 : index
    %c0_86 = arith.constant 0 : index
    %112 = vector.load %arg6[%c2_84, %c0_85, %c0_86] : memref<9x8x16xbf16, #tpu.memory_space<vmem>>, vector<1x8x16xbf16>
    %113 = vector.shape_cast %112 : vector<1x8x16xbf16> to vector<8x16xbf16>
    %114 = vector.extract_strided_slice %102 {offsets = [0, 49], sizes = [16, 1536], strides = [1, 1]} : vector<16x1728xbf16> to vector<16x1536xbf16>
    %cst_87 = arith.constant dense<0.000000e+00> : vector<8x1536xf32>
    %115 = tpu.matmul %113, %114, %cst_87 {dimension_numbers = #tpu.dot_dimension_numbers<[1], [0], [0], [1], [0, 0, 1, 1], [], []>} : vector<8x16xbf16>, vector<16x1536xbf16>, vector<8x1536xf32> -> vector<8x1536xf32>
    %116 = arith.addf %111, %115 : vector<8x1536xf32>
    %c3_88 = arith.constant 3 : index
    %c0_89 = arith.constant 0 : index
    %c0_90 = arith.constant 0 : index
    %117 = vector.load %arg6[%c3_88, %c0_89, %c0_90] : memref<9x8x16xbf16, #tpu.memory_space<vmem>>, vector<1x8x16xbf16>
    %118 = vector.shape_cast %117 : vector<1x8x16xbf16> to vector<8x16xbf16>
    %119 = vector.extract_strided_slice %102 {offsets = [0, 95], sizes = [16, 1536], strides = [1, 1]} : vector<16x1728xbf16> to vector<16x1536xbf16>
    %cst_91 = arith.constant dense<0.000000e+00> : vector<8x1536xf32>
    %120 = tpu.matmul %118, %119, %cst_91 {dimension_numbers = #tpu.dot_dimension_numbers<[1], [0], [0], [1], [0, 0, 1, 1], [], []>} : vector<8x16xbf16>, vector<16x1536xbf16>, vector<8x1536xf32> -> vector<8x1536xf32>
    %121 = arith.addf %116, %120 : vector<8x1536xf32>
    %c4_92 = arith.constant 4 : index
    %c0_93 = arith.constant 0 : index
    %c0_94 = arith.constant 0 : index
    %122 = vector.load %arg6[%c4_92, %c0_93, %c0_94] : memref<9x8x16xbf16, #tpu.memory_space<vmem>>, vector<1x8x16xbf16>
    %123 = vector.shape_cast %122 : vector<1x8x16xbf16> to vector<8x16xbf16>
    %124 = vector.extract_strided_slice %102 {offsets = [0, 96], sizes = [16, 1536], strides = [1, 1]} : vector<16x1728xbf16> to vector<16x1536xbf16>
    %cst_95 = arith.constant dense<0.000000e+00> : vector<8x1536xf32>
    %125 = tpu.matmul %123, %124, %cst_95 {dimension_numbers = #tpu.dot_dimension_numbers<[1], [0], [0], [1], [0, 0, 1, 1], [], []>} : vector<8x16xbf16>, vector<16x1536xbf16>, vector<8x1536xf32> -> vector<8x1536xf32>
    %126 = arith.addf %121, %125 : vector<8x1536xf32>
    %c5_96 = arith.constant 5 : index
    %c0_97 = arith.constant 0 : index
    %c0_98 = arith.constant 0 : index
    %127 = vector.load %arg6[%c5_96, %c0_97, %c0_98] : memref<9x8x16xbf16, #tpu.memory_space<vmem>>, vector<1x8x16xbf16>
    %128 = vector.shape_cast %127 : vector<1x8x16xbf16> to vector<8x16xbf16>
    %129 = vector.extract_strided_slice %102 {offsets = [0, 97], sizes = [16, 1536], strides = [1, 1]} : vector<16x1728xbf16> to vector<16x1536xbf16>
    %cst_99 = arith.constant dense<0.000000e+00> : vector<8x1536xf32>
    %130 = tpu.matmul %128, %129, %cst_99 {dimension_numbers = #tpu.dot_dimension_numbers<[1], [0], [0], [1], [0, 0, 1, 1], [], []>} : vector<8x16xbf16>, vector<16x1536xbf16>, vector<8x1536xf32> -> vector<8x1536xf32>
    %131 = arith.addf %126, %130 : vector<8x1536xf32>
    %c6_100 = arith.constant 6 : index
    %c0_101 = arith.constant 0 : index
    %c0_102 = arith.constant 0 : index
    %132 = vector.load %arg6[%c6_100, %c0_101, %c0_102] : memref<9x8x16xbf16, #tpu.memory_space<vmem>>, vector<1x8x16xbf16>
    %133 = vector.shape_cast %132 : vector<1x8x16xbf16> to vector<8x16xbf16>
    %134 = vector.extract_strided_slice %102 {offsets = [0, 143], sizes = [16, 1536], strides = [1, 1]} : vector<16x1728xbf16> to vector<16x1536xbf16>
    %cst_103 = arith.constant dense<0.000000e+00> : vector<8x1536xf32>
    %135 = tpu.matmul %133, %134, %cst_103 {dimension_numbers = #tpu.dot_dimension_numbers<[1], [0], [0], [1], [0, 0, 1, 1], [], []>} : vector<8x16xbf16>, vector<16x1536xbf16>, vector<8x1536xf32> -> vector<8x1536xf32>
    %136 = arith.addf %131, %135 : vector<8x1536xf32>
    %c7_104 = arith.constant 7 : index
    %c0_105 = arith.constant 0 : index
    %c0_106 = arith.constant 0 : index
    %137 = vector.load %arg6[%c7_104, %c0_105, %c0_106] : memref<9x8x16xbf16, #tpu.memory_space<vmem>>, vector<1x8x16xbf16>
    %138 = vector.shape_cast %137 : vector<1x8x16xbf16> to vector<8x16xbf16>
    %139 = vector.extract_strided_slice %102 {offsets = [0, 144], sizes = [16, 1536], strides = [1, 1]} : vector<16x1728xbf16> to vector<16x1536xbf16>
    %cst_107 = arith.constant dense<0.000000e+00> : vector<8x1536xf32>
    %140 = tpu.matmul %138, %139, %cst_107 {dimension_numbers = #tpu.dot_dimension_numbers<[1], [0], [0], [1], [0, 0, 1, 1], [], []>} : vector<8x16xbf16>, vector<16x1536xbf16>, vector<8x1536xf32> -> vector<8x1536xf32>
    %141 = arith.addf %136, %140 : vector<8x1536xf32>
    %c8_108 = arith.constant 8 : index
    %c0_109 = arith.constant 0 : index
    %c0_110 = arith.constant 0 : index
    %142 = vector.load %arg6[%c8_108, %c0_109, %c0_110] : memref<9x8x16xbf16, #tpu.memory_space<vmem>>, vector<1x8x16xbf16>
    %143 = vector.shape_cast %142 : vector<1x8x16xbf16> to vector<8x16xbf16>
    %144 = vector.extract_strided_slice %102 {offsets = [0, 145], sizes = [16, 1536], strides = [1, 1]} : vector<16x1728xbf16> to vector<16x1536xbf16>
    %cst_111 = arith.constant dense<0.000000e+00> : vector<8x1536xf32>
    %145 = tpu.matmul %143, %144, %cst_111 {dimension_numbers = #tpu.dot_dimension_numbers<[1], [0], [0], [1], [0, 0, 1, 1], [], []>} : vector<8x16xbf16>, vector<16x1536xbf16>, vector<8x1536xf32> -> vector<8x1536xf32>
    %146 = arith.addf %141, %145 : vector<8x1536xf32>
    %c0_112 = arith.constant 0 : index
    %c0_113 = arith.constant 0 : index
    %147 = vector.load %arg8[%c0_112, %c0_113] : memref<8x1xf32, #tpu.memory_space<vmem>>, vector<8x1xf32>
    %148 = vector.broadcast %147 : vector<8x1xf32> to vector<8x1536xf32>
    %149 = arith.addf %146, %148 : vector<8x1536xf32>
    %cst_114 = arith.constant 0.000000e+00 : f32
    %150 = vector.broadcast %cst_114 : f32 to vector<8x1536xf32>
    %151 = arith.maximumf %149, %150 : vector<8x1536xf32>
    %c0_115 = arith.constant 0 : index
    %c0_116 = arith.constant 0 : index
    %c0_117 = arith.constant 0 : index
    %152 = vector.load %arg10[%c0_115, %c0_116, %c0_117] : memref<1x8x1536xf32, #tpu.memory_space<vmem>>, vector<1x8x1536xf32>
    %153 = vector.shape_cast %152 : vector<1x8x1536xf32> to vector<8x1536xf32>
    %154 = vector.shape_cast %151 : vector<8x1536xf32> to vector<1x8x1536xf32>
    tpu.vector_store %arg10[%c0_115, %c0_116, %c0_117], %154 {strides = array<i32>} : memref<1x8x1536xf32, #tpu.memory_space<vmem>>, vector<1x8x1536xf32>,
    return
  }
  func.func @transform_0(%arg0: i32, %arg1: i32) -> (i32, i32, i32, i32) {
    %c0_i32 = arith.constant 0 : i32
    %c0_i32_0 = arith.constant 0 : i32
    %c0_i32_1 = arith.constant 0 : i32
    return %arg0, %arg1, %c0_i32, %c0_i32_0 : i32, i32, i32, i32
  }
  func.func @transform_1(%arg0: i32, %arg1: i32) -> (i32, i32, i32, i32) {
    %c0_i32 = arith.constant 0 : i32
    %c0_i32_0 = arith.constant 0 : i32
    %c0_i32_1 = arith.constant 0 : i32
    return %arg0, %arg1, %c0_i32, %c0_i32_0 : i32, i32, i32, i32
  }
  func.func @transform_2(%arg0: i32, %arg1: i32) -> (i32, i32, i32) {
    %c0_i32 = arith.constant 0 : i32
    %c0_i32_0 = arith.constant 0 : i32
    %c0_i32_1 = arith.constant 0 : i32
    %c0_i32_2 = arith.constant 0 : i32
    return %c0_i32, %c0_i32_0, %c0_i32_1 : i32, i32, i32
  }
  func.func @transform_3(%arg0: i32, %arg1: i32) -> (i32, i32, i32) {
    %c0_i32 = arith.constant 0 : i32
    %c0_i32_0 = arith.constant 0 : i32
    %c0_i32_1 = arith.constant 0 : i32
    %c0_i32_2 = arith.constant 0 : i32
    return %c0_i32, %c0_i32_0, %c0_i32_1 : i32, i32, i32
  }
  func.func @transform_4(%arg0: i32, %arg1: i32) -> (i32, i32, i32) {
    %c0_i32 = arith.constant 0 : i32
    %c0_i32_0 = arith.constant 0 : i32
    %c0_i32_1 = arith.constant 0 : i32
    %c0_i32_2 = arith.constant 0 : i32
    return %c0_i32, %c0_i32_0, %c0_i32_1 : i32, i32, i32
  }
  func.func @transform_5(%arg0: i32, %arg1: i32) -> (i32, i32) {
    %c0_i32 = arith.constant 0 : i32
    %c0_i32_0 = arith.constant 0 : i32
    %c0_i32_1 = arith.constant 0 : i32
    return %c0_i32, %c0_i32_0 : i32, i32
  }
  func.func @transform_6(%arg0: i32, %arg1: i32) -> (i32, i32) {
    %c0_i32 = arith.constant 0 : i32
    %c0_i32_0 = arith.constant 0 : i32
    %c0_i32_1 = arith.constant 0 : i32
    return %c0_i32, %c0_i32_0 : i32, i32
  }
  func.func @transform_7(%arg0: i32, %arg1: i32) -> (i32, i32, i32) {
    %c0_i32 = arith.constant 0 : i32
    %c0_i32_0 = arith.constant 0 : i32
    %c0_i32_1 = arith.constant 0 : i32
    return %arg1, %c0_i32, %c0_i32_0 : i32, i32, i32
  }
  func.func @transform_8(%arg0: i32, %arg1: i32) -> (i32, i32, i32) {
    %c0_i32 = arith.constant 0 : i32
    %c0_i32_0 = arith.constant 0 : i32
    return %arg0, %c0_i32, %arg1 : i32, i32, i32
  }
}

module attributes {stable_mosaic.version = 11 : i64} {
  func.func @_fused_double_conv_kernel(%arg0: i32, %arg1: i32, %arg2: memref<1x1x16x1920xbf16, #tpu.memory_space<vmem>>, %arg3: memref<1x1x16x1920xbf16, #tpu.memory_space<vmem>>, %arg4: memref<9x16x16xbf16, #tpu.memory_space<vmem>>, %arg5: memref<9x16x16xbf16, #tpu.memory_space<vmem>>, %arg6: memref<9x8x16xbf16, #tpu.memory_space<vmem>>, %arg7: memref<16x1xf32, #tpu.memory_space<vmem>>, %arg8: memref<8x1xf32, #tpu.memory_space<vmem>>, %arg9: memref<1x1x1728xbf16, #tpu.memory_space<vmem>>, %arg10: memref<1x8x1536xf32, #tpu.memory_space<vmem>>) attributes {dimension_semantics = [#tpu.dimension_semantics<parallel>, #tpu.dimension_semantics<parallel>], iteration_bounds = array<i64: 2, 1>, scalar_prefetch = 0 : i64, scratch_operands = 0 : i64, tpu.core_type = #tpu.core_type<tc>, window_params = [{transform_indices = @transform_0, window_bounds = array<i64: 1, 1, 16, 1920>}, {transform_indices = @transform_1, window_bounds = array<i64: 1, 1, 16, 1920>}, {pipeline_mode = #tpu.pipeline_mode<synchronous>, transform_indices = @transform_2, window_bounds = array<i64: 9, 16, 16>}, {pipeline_mode = #tpu.pipeline_mode<synchronous>, transform_indices = @transform_3, window_bounds = array<i64: 9, 16, 16>}, {pipeline_mode = #tpu.pipeline_mode<synchronous>, transform_indices = @transform_4, window_bounds = array<i64: 9, 8, 16>}, {pipeline_mode = #tpu.pipeline_mode<synchronous>, transform_indices = @transform_5, window_bounds = array<i64: 16, 1>}, {pipeline_mode = #tpu.pipeline_mode<synchronous>, transform_indices = @transform_6, window_bounds = array<i64: 8, 1>}, {transform_indices = @transform_7, window_bounds = array<i64: 1, 1, 1728>}, {transform_indices = @transform_8, window_bounds = array<i64: 1, 8, 1536>}]} {
    %c0 = arith.constant 0 : index
    %c0_0 = arith.constant 0 : index
    %c0_1 = arith.constant 0 : index
    %c0_2 = arith.constant 0 : index
    %0 = vector.load %arg2[%c0, %c0_0, %c0_1, %c0_2] : memref<1x1x16x1920xbf16, #tpu.memory_space<vmem>>, vector<1x1x16x1920xbf16>
    %1 = vector.shape_cast %0 : vector<1x1x16x1920xbf16> to vector<16x1920xbf16>
    %c0_3 = arith.constant 0 : index
    %c0_4 = arith.constant 0 : index
    %c0_5 = arith.constant 0 : index
    %c0_6 = arith.constant 0 : index
    %2 = vector.load %arg3[%c0_3, %c0_4, %c0_5, %c0_6] : memref<1x1x16x1920xbf16, #tpu.memory_space<vmem>>, vector<1x1x16x1920xbf16>
    %3 = vector.shape_cast %2 : vector<1x1x16x1920xbf16> to vector<16x1920xbf16>
    %c0_7 = arith.constant 0 : index
    %c0_8 = arith.constant 0 : index
    %c0_9 = arith.constant 0 : index
    %4 = vector.load %arg4[%c0_7, %c0_8, %c0_9] : memref<9x16x16xbf16, #tpu.memory_space<vmem>>, vector<1x16x16xbf16>
    %5 = vector.shape_cast %4 : vector<1x16x16xbf16> to vector<16x16xbf16>
    %6 = vector.extract_strided_slice %1 {offsets = [0, 47], sizes = [16, 1728], strides = [1, 1]} : vector<16x1920xbf16> to vector<16x1728xbf16>
    %cst = arith.constant dense<0.000000e+00> : vector<16x1728xf32>
    %7 = tpu.matmul %5, %6, %cst {dimension_numbers = #tpu.dot_dimension_numbers<[1], [0], [0], [1], [0, 0, 1, 1], [], []>} : vector<16x16xbf16>, vector<16x1728xbf16>, vector<16x1728xf32> -> vector<16x1728xf32>
    %c0_10 = arith.constant 0 : index
    %c0_11 = arith.constant 0 : index
    %c0_12 = arith.constant 0 : index
    %8 = vector.load %arg5[%c0_10, %c0_11, %c0_12] : memref<9x16x16xbf16, #tpu.memory_space<vmem>>, vector<1x16x16xbf16>
    %9 = vector.shape_cast %8 : vector<1x16x16xbf16> to vector<16x16xbf16>
    %10 = vector.extract_strided_slice %3 {offsets = [0, 47], sizes = [16, 1728], strides = [1, 1]} : vector<16x1920xbf16> to vector<16x1728xbf16>
    %cst_13 = arith.constant dense<0.000000e+00> : vector<16x1728xf32>
    %11 = tpu.matmul %9, %10, %cst_13 {dimension_numbers = #tpu.dot_dimension_numbers<[1], [0], [0], [1], [0, 0, 1, 1], [], []>} : vector<16x16xbf16>, vector<16x1728xbf16>, vector<16x1728xf32> -> vector<16x1728xf32>
    %12 = arith.addf %7, %11 : vector<16x1728xf32>
    %c1 = arith.constant 1 : index
    %c0_14 = arith.constant 0 : index
    %c0_15 = arith.constant 0 : index
    %13 = vector.load %arg4[%c1, %c0_14, %c0_15] : memref<9x16x16xbf16, #tpu.memory_space<vmem>>, vector<1x16x16xbf16>
    %14 = vector.shape_cast %13 : vector<1x16x16xbf16> to vector<16x16xbf16>
    %15 = vector.extract_strided_slice %1 {offsets = [0, 48], sizes = [16, 1728], strides = [1, 1]} : vector<16x1920xbf16> to vector<16x1728xbf16>
    %cst_16 = arith.constant dense<0.000000e+00> : vector<16x1728xf32>
    %16 = tpu.matmul %14, %15, %cst_16 {dimension_numbers = #tpu.dot_dimension_numbers<[1], [0], [0], [1], [0, 0, 1, 1], [], []>} : vector<16x16xbf16>, vector<16x1728xbf16>, vector<16x1728xf32> -> vector<16x1728xf32>
    %c1_17 = arith.constant 1 : index
    %c0_18 = arith.constant 0 : index
    %c0_19 = arith.constant 0 : index
    %17 = vector.load %arg5[%c1_17, %c0_18, %c0_19] : memref<9x16x16xbf16, #tpu.memory_space<vmem>>, vector<1x16x16xbf16>
    %18 = vector.shape_cast %17 : vector<1x16x16xbf16> to vector<16x16xbf16>
    %19 = vector.extract_strided_slice %3 {offsets = [0, 48], sizes = [16, 1728], strides = [1, 1]} : vector<16x1920xbf16> to vector<16x1728xbf16>
    %cst_20 = arith.constant dense<0.000000e+00> : vector<16x1728xf32>
    %20 = tpu.matmul %18, %19, %cst_20 {dimension_numbers = #tpu.dot_dimension_numbers<[1], [0], [0], [1], [0, 0, 1, 1], [], []>} : vector<16x16xbf16>, vector<16x1728xbf16>, vector<16x1728xf32> -> vector<16x1728xf32>
    %21 = arith.addf %16, %20 : vector<16x1728xf32>
    %22 = arith.addf %12, %21 : vector<16x1728xf32>
    %c2 = arith.constant 2 : index
    %c0_21 = arith.constant 0 : index
    %c0_22 = arith.constant 0 : index
    %23 = vector.load %arg4[%c2, %c0_21, %c0_22] : memref<9x16x16xbf16, #tpu.memory_space<vmem>>, vector<1x16x16xbf16>
    %24 = vector.shape_cast %23 : vector<1x16x16xbf16> to vector<16x16xbf16>
    %25 = vector.extract_strided_slice %1 {offsets = [0, 49], sizes = [16, 1728], strides = [1, 1]} : vector<16x1920xbf16> to vector<16x1728xbf16>
    %cst_23 = arith.constant dense<0.000000e+00> : vector<16x1728xf32>
    %26 = tpu.matmul %24, %25, %cst_23 {dimension_numbers = #tpu.dot_dimension_numbers<[1], [0], [0], [1], [0, 0, 1, 1], [], []>} : vector<16x16xbf16>, vector<16x1728xbf16>, vector<16x1728xf32> -> vector<16x1728xf32>
    %c2_24 = arith.constant 2 : index
    %c0_25 = arith.constant 0 : index
    %c0_26 = arith.constant 0 : index
    %27 = vector.load %arg5[%c2_24, %c0_25, %c0_26] : memref<9x16x16xbf16, #tpu.memory_space<vmem>>, vector<1x16x16xbf16>
    %28 = vector.shape_cast %27 : vector<1x16x16xbf16> to vector<16x16xbf16>
    %29 = vector.extract_strided_slice %3 {offsets = [0, 49], sizes = [16, 1728], strides = [1, 1]} : vector<16x1920xbf16> to vector<16x1728xbf16>
    %cst_27 = arith.constant dense<0.000000e+00> : vector<16x1728xf32>
    %30 = tpu.matmul %28, %29, %cst_27 {dimension_numbers = #tpu.dot_dimension_numbers<[1], [0], [0], [1], [0, 0, 1, 1], [], []>} : vector<16x16xbf16>, vector<16x1728xbf16>, vector<16x1728xf32> -> vector<16x1728xf32>
    %31 = arith.addf %26, %30 : vector<16x1728xf32>
    %32 = arith.addf %22, %31 : vector<16x1728xf32>
    %c3 = arith.constant 3 : index
    %c0_28 = arith.constant 0 : index
    %c0_29 = arith.constant 0 : index
    %33 = vector.load %arg4[%c3, %c0_28, %c0_29] : memref<9x16x16xbf16, #tpu.memory_space<vmem>>, vector<1x16x16xbf16>
    %34 = vector.shape_cast %33 : vector<1x16x16xbf16> to vector<16x16xbf16>
    %35 = vector.extract_strided_slice %1 {offsets = [0, 95], sizes = [16, 1728], strides = [1, 1]} : vector<16x1920xbf16> to vector<16x1728xbf16>
    %cst_30 = arith.constant dense<0.000000e+00> : vector<16x1728xf32>
    %36 = tpu.matmul %34, %35, %cst_30 {dimension_numbers = #tpu.dot_dimension_numbers<[1], [0], [0], [1], [0, 0, 1, 1], [], []>} : vector<16x16xbf16>, vector<16x1728xbf16>, vector<16x1728xf32> -> vector<16x1728xf32>
    %c3_31 = arith.constant 3 : index
    %c0_32 = arith.constant 0 : index
    %c0_33 = arith.constant 0 : index
    %37 = vector.load %arg5[%c3_31, %c0_32, %c0_33] : memref<9x16x16xbf16, #tpu.memory_space<vmem>>, vector<1x16x16xbf16>
    %38 = vector.shape_cast %37 : vector<1x16x16xbf16> to vector<16x16xbf16>
    %39 = vector.extract_strided_slice %3 {offsets = [0, 95], sizes = [16, 1728], strides = [1, 1]} : vector<16x1920xbf16> to vector<16x1728xbf16>
    %cst_34 = arith.constant dense<0.000000e+00> : vector<16x1728xf32>
    %40 = tpu.matmul %38, %39, %cst_34 {dimension_numbers = #tpu.dot_dimension_numbers<[1], [0], [0], [1], [0, 0, 1, 1], [], []>} : vector<16x16xbf16>, vector<16x1728xbf16>, vector<16x1728xf32> -> vector<16x1728xf32>
    %41 = arith.addf %36, %40 : vector<16x1728xf32>
    %42 = arith.addf %32, %41 : vector<16x1728xf32>
    %c4 = arith.constant 4 : index
    %c0_35 = arith.constant 0 : index
    %c0_36 = arith.constant 0 : index
    %43 = vector.load %arg4[%c4, %c0_35, %c0_36] : memref<9x16x16xbf16, #tpu.memory_space<vmem>>, vector<1x16x16xbf16>
    %44 = vector.shape_cast %43 : vector<1x16x16xbf16> to vector<16x16xbf16>
    %45 = vector.extract_strided_slice %1 {offsets = [0, 96], sizes = [16, 1728], strides = [1, 1]} : vector<16x1920xbf16> to vector<16x1728xbf16>
    %cst_37 = arith.constant dense<0.000000e+00> : vector<16x1728xf32>
    %46 = tpu.matmul %44, %45, %cst_37 {dimension_numbers = #tpu.dot_dimension_numbers<[1], [0], [0], [1], [0, 0, 1, 1], [], []>} : vector<16x16xbf16>, vector<16x1728xbf16>, vector<16x1728xf32> -> vector<16x1728xf32>
    %c4_38 = arith.constant 4 : index
    %c0_39 = arith.constant 0 : index
    %c0_40 = arith.constant 0 : index
    %47 = vector.load %arg5[%c4_38, %c0_39, %c0_40] : memref<9x16x16xbf16, #tpu.memory_space<vmem>>, vector<1x16x16xbf16>
    %48 = vector.shape_cast %47 : vector<1x16x16xbf16> to vector<16x16xbf16>
    %49 = vector.extract_strided_slice %3 {offsets = [0, 96], sizes = [16, 1728], strides = [1, 1]} : vector<16x1920xbf16> to vector<16x1728xbf16>
    %cst_41 = arith.constant dense<0.000000e+00> : vector<16x1728xf32>
    %50 = tpu.matmul %48, %49, %cst_41 {dimension_numbers = #tpu.dot_dimension_numbers<[1], [0], [0], [1], [0, 0, 1, 1], [], []>} : vector<16x16xbf16>, vector<16x1728xbf16>, vector<16x1728xf32> -> vector<16x1728xf32>
    %51 = arith.addf %46, %50 : vector<16x1728xf32>
    %52 = arith.addf %42, %51 : vector<16x1728xf32>
    %c5 = arith.constant 5 : index
    %c0_42 = arith.constant 0 : index
    %c0_43 = arith.constant 0 : index
    %53 = vector.load %arg4[%c5, %c0_42, %c0_43] : memref<9x16x16xbf16, #tpu.memory_space<vmem>>, vector<1x16x16xbf16>
    %54 = vector.shape_cast %53 : vector<1x16x16xbf16> to vector<16x16xbf16>
    %55 = vector.extract_strided_slice %1 {offsets = [0, 97], sizes = [16, 1728], strides = [1, 1]} : vector<16x1920xbf16> to vector<16x1728xbf16>
    %cst_44 = arith.constant dense<0.000000e+00> : vector<16x1728xf32>
    %56 = tpu.matmul %54, %55, %cst_44 {dimension_numbers = #tpu.dot_dimension_numbers<[1], [0], [0], [1], [0, 0, 1, 1], [], []>} : vector<16x16xbf16>, vector<16x1728xbf16>, vector<16x1728xf32> -> vector<16x1728xf32>
    %c5_45 = arith.constant 5 : index
    %c0_46 = arith.constant 0 : index
    %c0_47 = arith.constant 0 : index
    %57 = vector.load %arg5[%c5_45, %c0_46, %c0_47] : memref<9x16x16xbf16, #tpu.memory_space<vmem>>, vector<1x16x16xbf16>
    %58 = vector.shape_cast %57 : vector<1x16x16xbf16> to vector<16x16xbf16>
    %59 = vector.extract_strided_slice %3 {offsets = [0, 97], sizes = [16, 1728], strides = [1, 1]} : vector<16x1920xbf16> to vector<16x1728xbf16>
    %cst_48 = arith.constant dense<0.000000e+00> : vector<16x1728xf32>
    %60 = tpu.matmul %58, %59, %cst_48 {dimension_numbers = #tpu.dot_dimension_numbers<[1], [0], [0], [1], [0, 0, 1, 1], [], []>} : vector<16x16xbf16>, vector<16x1728xbf16>, vector<16x1728xf32> -> vector<16x1728xf32>
    %61 = arith.addf %56, %60 : vector<16x1728xf32>
    %62 = arith.addf %52, %61 : vector<16x1728xf32>
    %c6 = arith.constant 6 : index
    %c0_49 = arith.constant 0 : index
    %c0_50 = arith.constant 0 : index
    %63 = vector.load %arg4[%c6, %c0_49, %c0_50] : memref<9x16x16xbf16, #tpu.memory_space<vmem>>, vector<1x16x16xbf16>
    %64 = vector.shape_cast %63 : vector<1x16x16xbf16> to vector<16x16xbf16>
    %65 = vector.extract_strided_slice %1 {offsets = [0, 143], sizes = [16, 1728], strides = [1, 1]} : vector<16x1920xbf16> to vector<16x1728xbf16>
    %cst_51 = arith.constant dense<0.000000e+00> : vector<16x1728xf32>
    %66 = tpu.matmul %64, %65, %cst_51 {dimension_numbers = #tpu.dot_dimension_numbers<[1], [0], [0], [1], [0, 0, 1, 1], [], []>} : vector<16x16xbf16>, vector<16x1728xbf16>, vector<16x1728xf32> -> vector<16x1728xf32>
    %c6_52 = arith.constant 6 : index
    %c0_53 = arith.constant 0 : index
    %c0_54 = arith.constant 0 : index
    %67 = vector.load %arg5[%c6_52, %c0_53, %c0_54] : memref<9x16x16xbf16, #tpu.memory_space<vmem>>, vector<1x16x16xbf16>
    %68 = vector.shape_cast %67 : vector<1x16x16xbf16> to vector<16x16xbf16>
    %69 = vector.extract_strided_slice %3 {offsets = [0, 143], sizes = [16, 1728], strides = [1, 1]} : vector<16x1920xbf16> to vector<16x1728xbf16>
    %cst_55 = arith.constant dense<0.000000e+00> : vector<16x1728xf32>
    %70 = tpu.matmul %68, %69, %cst_55 {dimension_numbers = #tpu.dot_dimension_numbers<[1], [0], [0], [1], [0, 0, 1, 1], [], []>} : vector<16x16xbf16>, vector<16x1728xbf16>, vector<16x1728xf32> -> vector<16x1728xf32>
    %71 = arith.addf %66, %70 : vector<16x1728xf32>
    %72 = arith.addf %62, %71 : vector<16x1728xf32>
    %c7 = arith.constant 7 : index
    %c0_56 = arith.constant 0 : index
    %c0_57 = arith.constant 0 : index
    %73 = vector.load %arg4[%c7, %c0_56, %c0_57] : memref<9x16x16xbf16, #tpu.memory_space<vmem>>, vector<1x16x16xbf16>
    %74 = vector.shape_cast %73 : vector<1x16x16xbf16> to vector<16x16xbf16>
    %75 = vector.extract_strided_slice %1 {offsets = [0, 144], sizes = [16, 1728], strides = [1, 1]} : vector<16x1920xbf16> to vector<16x1728xbf16>
    %cst_58 = arith.constant dense<0.000000e+00> : vector<16x1728xf32>
    %76 = tpu.matmul %74, %75, %cst_58 {dimension_numbers = #tpu.dot_dimension_numbers<[1], [0], [0], [1], [0, 0, 1, 1], [], []>} : vector<16x16xbf16>, vector<16x1728xbf16>, vector<16x1728xf32> -> vector<16x1728xf32>
    %c7_59 = arith.constant 7 : index
    %c0_60 = arith.constant 0 : index
    %c0_61 = arith.constant 0 : index
    %77 = vector.load %arg5[%c7_59, %c0_60, %c0_61] : memref<9x16x16xbf16, #tpu.memory_space<vmem>>, vector<1x16x16xbf16>
    %78 = vector.shape_cast %77 : vector<1x16x16xbf16> to vector<16x16xbf16>
    %79 = vector.extract_strided_slice %3 {offsets = [0, 144], sizes = [16, 1728], strides = [1, 1]} : vector<16x1920xbf16> to vector<16x1728xbf16>
    %cst_62 = arith.constant dense<0.000000e+00> : vector<16x1728xf32>
    %80 = tpu.matmul %78, %79, %cst_62 {dimension_numbers = #tpu.dot_dimension_numbers<[1], [0], [0], [1], [0, 0, 1, 1], [], []>} : vector<16x16xbf16>, vector<16x1728xbf16>, vector<16x1728xf32> -> vector<16x1728xf32>
    %81 = arith.addf %76, %80 : vector<16x1728xf32>
    %82 = arith.addf %72, %81 : vector<16x1728xf32>
    %c8 = arith.constant 8 : index
    %c0_63 = arith.constant 0 : index
    %c0_64 = arith.constant 0 : index
    %83 = vector.load %arg4[%c8, %c0_63, %c0_64] : memref<9x16x16xbf16, #tpu.memory_space<vmem>>, vector<1x16x16xbf16>
    %84 = vector.shape_cast %83 : vector<1x16x16xbf16> to vector<16x16xbf16>
    %85 = vector.extract_strided_slice %1 {offsets = [0, 145], sizes = [16, 1728], strides = [1, 1]} : vector<16x1920xbf16> to vector<16x1728xbf16>
    %cst_65 = arith.constant dense<0.000000e+00> : vector<16x1728xf32>
    %86 = tpu.matmul %84, %85, %cst_65 {dimension_numbers = #tpu.dot_dimension_numbers<[1], [0], [0], [1], [0, 0, 1, 1], [], []>} : vector<16x16xbf16>, vector<16x1728xbf16>, vector<16x1728xf32> -> vector<16x1728xf32>
    %c8_66 = arith.constant 8 : index
    %c0_67 = arith.constant 0 : index
    %c0_68 = arith.constant 0 : index
    %87 = vector.load %arg5[%c8_66, %c0_67, %c0_68] : memref<9x16x16xbf16, #tpu.memory_space<vmem>>, vector<1x16x16xbf16>
    %88 = vector.shape_cast %87 : vector<1x16x16xbf16> to vector<16x16xbf16>
    %89 = vector.extract_strided_slice %3 {offsets = [0, 145], sizes = [16, 1728], strides = [1, 1]} : vector<16x1920xbf16> to vector<16x1728xbf16>
    %cst_69 = arith.constant dense<0.000000e+00> : vector<16x1728xf32>
    %90 = tpu.matmul %88, %89, %cst_69 {dimension_numbers = #tpu.dot_dimension_numbers<[1], [0], [0], [1], [0, 0, 1, 1], [], []>} : vector<16x16xbf16>, vector<16x1728xbf16>, vector<16x1728xf32> -> vector<16x1728xf32>
    %91 = arith.addf %86, %90 : vector<16x1728xf32>
    %92 = arith.addf %82, %91 : vector<16x1728xf32>
    %c0_70 = arith.constant 0 : index
    %c0_71 = arith.constant 0 : index
    %93 = vector.load %arg7[%c0_70, %c0_71] : memref<16x1xf32, #tpu.memory_space<vmem>>, vector<16x1xf32>
    %94 = vector.broadcast %93 : vector<16x1xf32> to vector<16x1728xf32>
    %95 = arith.addf %92, %94 : vector<16x1728xf32>
    %cst_72 = arith.constant 0.000000e+00 : f32
    %96 = vector.broadcast %cst_72 : f32 to vector<16x1728xf32>
    %97 = arith.maximumf %95, %96 : vector<16x1728xf32>
    %98 = arith.truncf %97 : vector<16x1728xf32> to vector<16x1728xbf16>
    %c0_73 = arith.constant 0 : index
    %c0_74 = arith.constant 0 : index
    %c0_75 = arith.constant 0 : index
    %99 = vector.load %arg9[%c0_73, %c0_74, %c0_75] : memref<1x1x1728xbf16, #tpu.memory_space<vmem>>, vector<1x1x1728xbf16>
    %100 = vector.shape_cast %99 : vector<1x1x1728xbf16> to vector<1x1728xbf16>
    %101 = vector.broadcast %100 : vector<1x1728xbf16> to vector<16x1728xbf16>
    %102 = arith.mulf %98, %101 : vector<16x1728xbf16>
    %c0_76 = arith.constant 0 : index
    %c0_77 = arith.constant 0 : index
    %c0_78 = arith.constant 0 : index
    %103 = vector.load %arg6[%c0_76, %c0_77, %c0_78] : memref<9x8x16xbf16, #tpu.memory_space<vmem>>, vector<1x8x16xbf16>
    %104 = vector.shape_cast %103 : vector<1x8x16xbf16> to vector<8x16xbf16>
    %105 = vector.extract_strided_slice %102 {offsets = [0, 47], sizes = [16, 1536], strides = [1, 1]} : vector<16x1728xbf16> to vector<16x1536xbf16>
    %cst_79 = arith.constant dense<0.000000e+00> : vector<8x1536xf32>
    %106 = tpu.matmul %104, %105, %cst_79 {dimension_numbers = #tpu.dot_dimension_numbers<[1], [0], [0], [1], [0, 0, 1, 1], [], []>} : vector<8x16xbf16>, vector<16x1536xbf16>, vector<8x1536xf32> -> vector<8x1536xf32>
    %c1_80 = arith.constant 1 : index
    %c0_81 = arith.constant 0 : index
    %c0_82 = arith.constant 0 : index
    %107 = vector.load %arg6[%c1_80, %c0_81, %c0_82] : memref<9x8x16xbf16, #tpu.memory_space<vmem>>, vector<1x8x16xbf16>
    %108 = vector.shape_cast %107 : vector<1x8x16xbf16> to vector<8x16xbf16>
    %109 = vector.extract_strided_slice %102 {offsets = [0, 48], sizes = [16, 1536], strides = [1, 1]} : vector<16x1728xbf16> to vector<16x1536xbf16>
    %cst_83 = arith.constant dense<0.000000e+00> : vector<8x1536xf32>
    %110 = tpu.matmul %108, %109, %cst_83 {dimension_numbers = #tpu.dot_dimension_numbers<[1], [0], [0], [1], [0, 0, 1, 1], [], []>} : vector<8x16xbf16>, vector<16x1536xbf16>, vector<8x1536xf32> -> vector<8x1536xf32>
    %111 = arith.addf %106, %110 : vector<8x1536xf32>
    %c2_84 = arith.constant 2 : index
    %c0_85 = arith.constant 0 : index
    %c0_86 = arith.constant 0 : index
    %112 = vector.load %arg6[%c2_84, %c0_85, %c0_86] : memref<9x8x16xbf16, #tpu.memory_space<vmem>>, vector<1x8x16xbf16>
    %113 = vector.shape_cast %112 : vector<1x8x16xbf16> to vector<8x16xbf16>
    %114 = vector.extract_strided_slice %102 {offsets = [0, 49], sizes = [16, 1536], strides = [1, 1]} : vector<16x1728xbf16> to vector<16x1536xbf16>
    %cst_87 = arith.constant dense<0.000000e+00> : vector<8x1536xf32>
    %115 = tpu.matmul %113, %114, %cst_87 {dimension_numbers = #tpu.dot_dimension_numbers<[1], [0], [0], [1], [0, 0, 1, 1], [], []>} : vector<8x16xbf16>, vector<16x1536xbf16>, vector<8x1536xf32> -> vector<8x1536xf32>
    %116 = arith.addf %111, %115 : vector<8x1536xf32>
    %c3_88 = arith.constant 3 : index
    %c0_89 = arith.constant 0 : index
    %c0_90 = arith.constant 0 : index
    %117 = vector.load %arg6[%c3_88, %c0_89, %c0_90] : memref<9x8x16xbf16, #tpu.memory_space<vmem>>, vector<1x8x16xbf16>
    %118 = vector.shape_cast %117 : vector<1x8x16xbf16> to vector<8x16xbf16>
    %119 = vector.extract_strided_slice %102 {offsets = [0, 95], sizes = [16, 1536], strides = [1, 1]} : vector<16x1728xbf16> to vector<16x1536xbf16>
    %cst_91 = arith.constant dense<0.000000e+00> : vector<8x1536xf32>
    %120 = tpu.matmul %118, %119, %cst_91 {dimension_numbers = #tpu.dot_dimension_numbers<[1], [0], [0], [1], [0, 0, 1, 1], [], []>} : vector<8x16xbf16>, vector<16x1536xbf16>, vector<8x1536xf32> -> vector<8x1536xf32>
    %121 = arith.addf %116, %120 : vector<8x1536xf32>
    %c4_92 = arith.constant 4 : index
    %c0_93 = arith.constant 0 : index
    %c0_94 = arith.constant 0 : index
    %122 = vector.load %arg6[%c4_92, %c0_93, %c0_94] : memref<9x8x16xbf16, #tpu.memory_space<vmem>>, vector<1x8x16xbf16>
    %123 = vector.shape_cast %122 : vector<1x8x16xbf16> to vector<8x16xbf16>
    %124 = vector.extract_strided_slice %102 {offsets = [0, 96], sizes = [16, 1536], strides = [1, 1]} : vector<16x1728xbf16> to vector<16x1536xbf16>
    %cst_95 = arith.constant dense<0.000000e+00> : vector<8x1536xf32>
    %125 = tpu.matmul %123, %124, %cst_95 {dimension_numbers = #tpu.dot_dimension_numbers<[1], [0], [0], [1], [0, 0, 1, 1], [], []>} : vector<8x16xbf16>, vector<16x1536xbf16>, vector<8x1536xf32> -> vector<8x1536xf32>
    %126 = arith.addf %121, %125 : vector<8x1536xf32>
    %c5_96 = arith.constant 5 : index
    %c0_97 = arith.constant 0 : index
    %c0_98 = arith.constant 0 : index
    %127 = vector.load %arg6[%c5_96, %c0_97, %c0_98] : memref<9x8x16xbf16, #tpu.memory_space<vmem>>, vector<1x8x16xbf16>
    %128 = vector.shape_cast %127 : vector<1x8x16xbf16> to vector<8x16xbf16>
    %129 = vector.extract_strided_slice %102 {offsets = [0, 97], sizes = [16, 1536], strides = [1, 1]} : vector<16x1728xbf16> to vector<16x1536xbf16>
    %cst_99 = arith.constant dense<0.000000e+00> : vector<8x1536xf32>
    %130 = tpu.matmul %128, %129, %cst_99 {dimension_numbers = #tpu.dot_dimension_numbers<[1], [0], [0], [1], [0, 0, 1, 1], [], []>} : vector<8x16xbf16>, vector<16x1536xbf16>, vector<8x1536xf32> -> vector<8x1536xf32>
    %131 = arith.addf %126, %130 : vector<8x1536xf32>
    %c6_100 = arith.constant 6 : index
    %c0_101 = arith.constant 0 : index
    %c0_102 = arith.constant 0 : index
    %132 = vector.load %arg6[%c6_100, %c0_101, %c0_102] : memref<9x8x16xbf16, #tpu.memory_space<vmem>>, vector<1x8x16xbf16>
    %133 = vector.shape_cast %132 : vector<1x8x16xbf16> to vector<8x16xbf16>
    %134 = vector.extract_strided_slice %102 {offsets = [0, 143], sizes = [16, 1536], strides = [1, 1]} : vector<16x1728xbf16> to vector<16x1536xbf16>
    %cst_103 = arith.constant dense<0.000000e+00> : vector<8x1536xf32>
    %135 = tpu.matmul %133, %134, %cst_103 {dimension_numbers = #tpu.dot_dimension_numbers<[1], [0], [0], [1], [0, 0, 1, 1], [], []>} : vector<8x16xbf16>, vector<16x1536xbf16>, vector<8x1536xf32> -> vector<8x1536xf32>
    %136 = arith.addf %131, %135 : vector<8x1536xf32>
    %c7_104 = arith.constant 7 : index
    %c0_105 = arith.constant 0 : index
    %c0_106 = arith.constant 0 : index
    %137 = vector.load %arg6[%c7_104, %c0_105, %c0_106] : memref<9x8x16xbf16, #tpu.memory_space<vmem>>, vector<1x8x16xbf16>
    %138 = vector.shape_cast %137 : vector<1x8x16xbf16> to vector<8x16xbf16>
    %139 = vector.extract_strided_slice %102 {offsets = [0, 144], sizes = [16, 1536], strides = [1, 1]} : vector<16x1728xbf16> to vector<16x1536xbf16>
    %cst_107 = arith.constant dense<0.000000e+00> : vector<8x1536xf32>
    %140 = tpu.matmul %138, %139, %cst_107 {dimension_numbers = #tpu.dot_dimension_numbers<[1], [0], [0], [1], [0, 0, 1, 1], [], []>} : vector<8x16xbf16>, vector<16x1536xbf16>, vector<8x1536xf32> -> vector<8x1536xf32>
    %141 = arith.addf %136, %140 : vector<8x1536xf32>
    %c8_108 = arith.constant 8 : index
    %c0_109 = arith.constant 0 : index
    %c0_110 = arith.constant 0 : index
    %142 = vector.load %arg6[%c8_108, %c0_109, %c0_110] : memref<9x8x16xbf16, #tpu.memory_space<vmem>>, vector<1x8x16xbf16>
    %143 = vector.shape_cast %142 : vector<1x8x16xbf16> to vector<8x16xbf16>
    %144 = vector.extract_strided_slice %102 {offsets = [0, 145], sizes = [16, 1536], strides = [1, 1]} : vector<16x1728xbf16> to vector<16x1536xbf16>
    %cst_111 = arith.constant dense<0.000000e+00> : vector<8x1536xf32>
    %145 = tpu.matmul %143, %144, %cst_111 {dimension_numbers = #tpu.dot_dimension_numbers<[1], [0], [0], [1], [0, 0, 1, 1], [], []>} : vector<8x16xbf16>, vector<16x1536xbf16>, vector<8x1536xf32> -> vector<8x1536xf32>
    %146 = arith.addf %141, %145 : vector<8x1536xf32>
    %c0_112 = arith.constant 0 : index
    %c0_113 = arith.constant 0 : index
    %147 = vector.load %arg8[%c0_112, %c0_113] : memref<8x1xf32, #tpu.memory_space<vmem>>, vector<8x1xf32>
    %148 = vector.broadcast %147 : vector<8x1xf32> to vector<8x1536xf32>
    %149 = arith.addf %146, %148 : vector<8x1536xf32>
    %cst_114 = arith.constant 0.000000e+00 : f32
    %150 = vector.broadcast %cst_114 : f32 to vector<8x1536xf32>
    %151 = arith.maximumf %149, %150 : vector<8x1536xf32>
    %c0_115 = arith.constant 0 : index
    %c0_116 = arith.constant 0 : index
    %c0_117 = arith.constant 0 : index
    %152 = vector.load %arg10[%c0_115, %c0_116, %c0_117] : memref<1x8x1536xf32, #tpu.memory_space<vmem>>, vector<1x8x1536xf32>
    %153 = vector.shape_cast %152 : vector<1x8x1536xf32> to vector<8x1536xf32>
    %154 = vector.shape_cast %151 : vector<8x1536xf32> to vector<1x8x1536xf32>
    tpu.vector_store %arg10[%c0_115, %c0_116, %c0_117], %154 {strides = array<i32>} : memref<1x8x1536xf32, #tpu.memory_space<vmem>>, vector<1x8x1536xf32>,
    return
  }
  func.func @transform_0(%arg0: i32, %arg1: i32) -> (i32, i32, i32, i32) {
    %c0_i32 = arith.constant 0 : i32
    %c0_i32_0 = arith.constant 0 : i32
    %c0_i32_1 = arith.constant 0 : i32
    return %arg0, %arg1, %c0_i32, %c0_i32_0 : i32, i32, i32, i32
  }
  func.func @transform_1(%arg0: i32, %arg1: i32) -> (i32, i32, i32, i32) {
    %c0_i32 = arith.constant 0 : i32
    %c0_i32_0 = arith.constant 0 : i32
    %c0_i32_1 = arith.constant 0 : i32
    return %arg0, %arg1, %c0_i32, %c0_i32_0 : i32, i32, i32, i32
  }
  func.func @transform_2(%arg0: i32, %arg1: i32) -> (i32, i32, i32) {
    %c0_i32 = arith.constant 0 : i32
    %c0_i32_0 = arith.constant 0 : i32
    %c0_i32_1 = arith.constant 0 : i32
    %c0_i32_2 = arith.constant 0 : i32
    return %c0_i32, %c0_i32_0, %c0_i32_1 : i32, i32, i32
  }
  func.func @transform_3(%arg0: i32, %arg1: i32) -> (i32, i32, i32) {
    %c0_i32 = arith.constant 0 : i32
    %c0_i32_0 = arith.constant 0 : i32
    %c0_i32_1 = arith.constant 0 : i32
    %c0_i32_2 = arith.constant 0 : i32
    return %c0_i32, %c0_i32_0, %c0_i32_1 : i32, i32, i32
  }
  func.func @transform_4(%arg0: i32, %arg1: i32) -> (i32, i32, i32) {
    %c0_i32 = arith.constant 0 : i32
    %c0_i32_0 = arith.constant 0 : i32
    %c0_i32_1 = arith.constant 0 : i32
    %c0_i32_2 = arith.constant 0 : i32
    return %c0_i32, %c0_i32_0, %c0_i32_1 : i32, i32, i32
  }
  func.func @transform_5(%arg0: i32, %arg1: i32) -> (i32, i32) {
    %c0_i32 = arith.constant 0 : i32
    %c0_i32_0 = arith.constant 0 : i32
    %c0_i32_1 = arith.constant 0 : i32
    return %c0_i32, %c0_i32_0 : i32, i32
  }
  func.func @transform_6(%arg0: i32, %arg1: i32) -> (i32, i32) {
    %c0_i32 = arith.constant 0 : i32
    %c0_i32_0 = arith.constant 0 : i32
    %c0_i32_1 = arith.constant 0 : i32
    return %c0_i32, %c0_i32_0 : i32, i32
  }
  func.func @transform_7(%arg0: i32, %arg1: i32) -> (i32, i32, i32) {
    %c0_i32 = arith.constant 0 : i32
    %c0_i32_0 = arith.constant 0 : i32
    %c0_i32_1 = arith.constant 0 : i32
    return %arg1, %c0_i32, %c0_i32_0 : i32, i32, i32
  }
  func.func @transform_8(%arg0: i32, %arg1: i32) -> (i32, i32, i32) {
    %c0_i32 = arith.constant 0 : i32
    %c0_i32_0 = arith.constant 0 : i32
    return %arg0, %c0_i32, %arg1 : i32, i32, i32
  }
}

</mosaic_0001>

<bundles_post_ra>
// kernel: tpu_custom_call.1
= control target key start
LH: loop header
LB: loop body
LE: loop exit
PB: predicated region body
PF: predicated region fallthrough
CT: control target
= control target key end

     0   :  { %s15345_s0 = inlined_call_operand.hbm [shape: bf16[2,1,16,1920], index: 0, kind: input, shape index: {}]   ;;  %s15346_s1 = inlined_call_operand.hbm [shape: bf16[2,1,16,1920], index: 1, kind: input, shape index: {}]   ;;  %s15347_s2 = inlined_call_operand.hbm [shape: bf16[9,16,16], index: 2, kind: input, shape index: {}]   ;;  %s15348_s3 = inlined_call_operand.hbm [shape: bf16[9,16,16], index: 3, kind: input, shape index: {}]   ;;  %s15349_s4 = inlined_call_operand.vmem [shape: bf16[9,8,16], index: 4, kind: input, shape index: {}]   ;;  %s15350_s5 = inlined_call_operand.vmem [shape: f32[16,1], index: 5, kind: input, shape index: {}]   ;;  %s15351_s6 = inlined_call_operand.vmem [shape: f32[8,1], index: 6, kind: input, shape index: {}]   ;;  %s15352_s7 = inlined_call_operand.vmem [shape: bf16[1,1,1728], index: 7, kind: input, shape index: {}]   ;;  %s15353_s8 = inlined_call_operand.hbm [shape: f32[2,8,1536], index: 8, kind: output, shape index: {}]  }
   0x1   :  { %15372 = sst [smem:[#allocation29_spill]] %s15345_s0 }
   0x2   :  { %15373 = sst [smem:[#allocation30_spill]] %s15347_s2 }
   0x3   :  { %15374 = sst [smem:[#allocation31_spill]] %s15348_s3 }
   0x4   :  { %13 = vsyncpa [#allocation3], 0 }
   0x5   :  { %15 = vsyncpa [#allocation3 + $0x1], 0 }
   0x6   :  { %16 = vsyncpa [#allocation6], 0 }
   0x7   :  { %18 = vsyncpa [#allocation6 + $0x1], 0 }
   0x8   :  { %19 = vsyncpa [#allocation9], 0 }
   0x9   :  { %20 = vsyncpa [#allocation4], 0 }
   0xa   :  { %22 = vsyncpa [#allocation4 + $0x1], 0  ;;  %s11956_s27 = smov 0   ;;  %s11958_s28 = smov 0  }
   0xb   :  { %s11960_s29 = smov 0   ;;  %s11962_s30 = smov 0  }
   0xc   :  { %s11964_s9 = smov 0   ;;  %s11966_s10 = smov 0  }
   0xd LB: > { %15375 = sst [smem:[#allocation16_spill]] %s11869_s27  ;;  %s11987_s11 = sadd.s32 4294967295, %s11889_s10   ;;  %s11889_s10 = sphi %s11966_s10, %s28_s10   ;;  %s11885_s9 = sphi %s11964_s9, %s15425_s9   ;;  %s11881_s30 = sphi %s11962_s30, %s15424_s30   ;;  %s11877_s29 = sphi %s11960_s29, %s15423_s29   ;;  %s11873_s28 = sphi %s11958_s28, %s15422_s28   ;;  %s11869_s27 = sphi %s11956_s27, %s15421_s27  }
   0xe   : > { %s10748_s12 = sadd.s32 4294967294, %s11889_s10   ;;  %p62_p0 = scmp.ne.s32.totalorder %s11873_s28, %s11869_s27 }
   0xf   : > { %p15354_p1 = scmp.eq.s32.totalorder %s11987_s11, 0  ;;  %p253_p3 = scmp.eq.s32.totalorder %s10748_s12, 1 }
  0x10   : > { %p10749_p5 = scmp.ge.s32.totalorder %s11889_s10, 1  ;;  %p260_p7 = scmp.lt.s32.totalorder %s11889_s10, 3 }
  0x11   : > { %p11996_p4 = por %p15354_p1, %p62_p0  ;;  %p12001_p6 = por %p253_p3, %p62_p0 }
  0x12   : > { %p12006_p8 = pnand %p10749_p5, %p260_p7  ;;  %s11891_s16 = smov [#allocation7]  }
  0x13   : > { %s15376_s13 = scalar_select %p11996_p4, 1, 0 }
  0x14   : > { %s15377_s14 = scalar_select %p12001_p6, 1, 0 }
  0x15   : > { %s272_s17 = sshll.u32 %s11891_s16, 4  ;;  %p11495_p9 = pneg %p12006_p8  ;;  %s12010_s17 = int_to_ptr.vmem [resolvable:$true] %s272_s17 }
  0x16   : > { %15378 = sst [smem:[#allocation17_spill]] %s15377_s14  ;;  %s11892_s19 = smov [#allocation8]  }
  0x17   : > { %p12017_p11 = pnand %p11495_p9, %p15354_p1  ;;  %s285_s20 = sshll.u32 %s11892_s19, 4  ;;  %s12021_s20 = int_to_ptr.vmem [resolvable:$true] %s285_s20 }
  0x18   : > { %s15381_s2 = sld [smem:[#allocation30_spill]] }
  0x19   : > { %p11681_p13 = pneg %p12017_p11 }
  0x1e   : > { %s11679_s23 = scalar_lea.hbm %s15381_s2, 1152 }
  0x1f   : > { %p11680_p12 = scmp.ne.s32.totalorder %s15381_s2, %s11679_s23  ;;  %p11686_p5 = scmp.lt.u32.totalorder %s11679_s23, %s15381_s2 }
  0x21   : > { %p11682_p0 = pnand %p11681_p13, %p11680_p12 }
  0x23   : > { %p11683_p3 = pneg %p11682_p0 }
  0x25   : > { %p11688_p7 = pnand %p11686_p5, %p11683_p3 }
  0x27   : > { %11691 = shalt.err (!%p11688_p7)
}
  0x28   : > { %s11692_s16 = scalar_lea.vmem %s12010_s17, 1152  ;;  %p11700_p2 = scmp.lt.s32.totalorder %s12010_s17, %s12010_s17 }
  0x29   : > { %p11693_p9 = scmp.ne.s32.totalorder %s12010_s17, %s11692_s16  ;;  %p11701_p12 = scmp.lt.s32.totalorder %s11692_s16, %s11692_s16 }
  0x2b   : > { %p11695_p10 = pnand %p11693_p9, %p11681_p13  ;;  %p11702_p0 = por %p11701_p12, %p11700_p2 }
  0x2d   : > { %p11696_p1 = pneg %p11695_p10 }
  0x2f   : > { %p11703_p6 = pnand %p11702_p0, %p11696_p1 }
  0x31   : > { %11706 = shalt.err (!%p11703_p6)
}
  0x32   : > { %s11893_s19 = smov 64   ;;  %s11894_s21 = smov 4  }
  0x33   : > { %11498 = dma.hbm_to_vmem [thread:$0]  (!%p12017_p11), %s15381_s2, 1152, %s12010_s17, [#allocation6], %s11893_s19, %s11893_s19, %s11894_s21  }
  0x34   : > { %s15382_s3 = sld [smem:[#allocation31_spill]] }
  0x3a   : > { %s11707_s26 = scalar_lea.hbm %s15382_s3, 1152 }
  0x3b   : > { %p11708_p2 = scmp.ne.s32.totalorder %s15382_s3, %s11707_s26  ;;  %p11714_p10 = scmp.lt.u32.totalorder %s11707_s26, %s15382_s3 }
  0x3d   : > { %p11710_p1 = pnand %p11708_p2, %p11681_p13 }
  0x3f   : > { %p11711_p6 = pneg %p11710_p1 }
  0x41   : > { %p11716_p3 = pnand %p11714_p10, %p11711_p6 }
  0x43   : > { %11719 = shalt.err (!%p11716_p3)
}
  0x44   : > { %s11720_s17 = scalar_lea.vmem %s12021_s20, 1152  ;;  %p11728_p12 = scmp.lt.s32.totalorder %s12021_s20, %s12021_s20 }
  0x45   : > { %p11721_p5 = scmp.ne.s32.totalorder %s12021_s20, %s11720_s17  ;;  %p11729_p0 = scmp.lt.s32.totalorder %s11720_s17, %s11720_s17 }
  0x47   : > { %p11723_p7 = pnand %p11721_p5, %p11681_p13  ;;  %p11730_p2 = por %p11729_p0, %p11728_p12 }
  0x49   : > { %p11724_p9 = pneg %p11723_p7 }
  0x4b   : > { %p11731_p1 = pnand %p11730_p2, %p11724_p9 }
  0x4d   : > { %11734 = shalt.err (!%p11731_p1)
}
  0x4e   : > { %11501 = dma.hbm_to_vmem [thread:$0]  (!%p12017_p11), %s15382_s3, 1152, %s12021_s20, [#allocation9], %s11893_s19, %s11893_s19, %s11894_s21  }
  0x4f   : > { %s40_s22 = sadd.s32 1, %s11885_s9  ;;  %s49_s23 = sadd.s32 1, %s11877_s29 }
  0x50   : > { %p42_p13 = scmp.ge.s32.totalorder %s40_s22, 2  ;;  %p56_p6 = scmp.ne.s32.totalorder %s11877_s29, %s11873_s28 }
  0x51   : > { %p57_p10 = scmp.eq.s32.totalorder %s11889_s10, 0  ;;  %p11515_p3 = scmp.lt.s32.totalorder %s11889_s10, 2 }
  0x52   : > { %s15427_s22 = smov (%p42_p13, %s40_s22), 0  ;;  %p15384_p7 = scmp.eq.s32.totalorder %s11987_s11, 1 }
  0x53   : > { %15383 = sst [smem:[#allocation18_spill]] %s15427_s22  ;;  %p58_p5 = por %p57_p10, %p56_p6 }
  0x54   : > { %p12085_p9 = por %p15384_p7, %p56_p6  ;;  %s44_s24 = ssub.s32 %s11885_s9, %s15427_s22 }
  0x55   : > { %s315_s25 = sand.u32 1, %s11877_s29   ;;  %p47_p11 = scmp.eq.s32.totalorder %s44_s24, 0 }
  0x56   : > { %s15385_s18 = scalar_select %p12085_p9, 1, 0 }
  0x57   : > { %s12092_s20 = smul.u32 120, %s315_s25  ;;  %p12094_p12 = pnand %p11515_p3, %p58_p5 }
  0x58   : > { %s12099_s21 = scalar_select %p47_p11, %s11877_s29, %s49_s23  }
  0x59   : > { %s15357_s26 = smul.u32 1920, %s11885_s9  ;;  %s319_s12 = scalar_lea.vmem [#allocation2], %s12092_s20 }
  0x5a   : > { %15387 = sst [smem:[#allocation19_spill]] %s12099_s21  ;;  %s328_s16 = sshll.u32 %s319_s12, 4  ;;  %s12110_s16 = int_to_ptr.vmem [resolvable:$true] %s328_s16 }
  0x5b   : > { %s15388_s0 = sld [smem:[#allocation29_spill]]  ;;  %s12112_s24 = scalar_lea.sflag [#allocation3], %s315_s25 }
  0x5c   : > { %p11737_p2 = pneg %p12094_p12 }
  0x61   : > { %s12108_s14 = scalar_lea.hbm %s15388_s0, %s15357_s26  ;;  %s11740_s17 = scalar_lea.hbm %s15388_s0, 3840 }
  0x62   : > { %s11735_s2 = scalar_lea.hbm %s12108_s14, 1920  ;;  %p11741_p6 = scmp.lt.u32.totalorder %s12108_s14, %s15388_s0 }
  0x63   : > { %p11736_p0 = scmp.ne.s32.totalorder %s12108_s14, %s11735_s2  ;;  %p11742_p10 = scmp.lt.u32.totalorder %s11740_s17, %s11735_s2 }
  0x64   : > { %p11744_p5 = scmp.lt.u32.totalorder %s11735_s2, %s12108_s14 }
  0x65   : > { %p11738_p1 = pnand %p11737_p2, %p11736_p0  ;;  %p11743_p3 = por %p11742_p10, %p11741_p6 }
  0x67   : > { %p11739_p13 = pneg %p11738_p1  ;;  %p11745_p7 = por %p11744_p5, %p11743_p3 }
  0x69   : > { %p11746_p11 = pnand %p11745_p7, %p11739_p13 }
  0x6b   : > { %11749 = shalt.err (!%p11746_p11)
}
  0x6c   : > { %s11750_s25 = scalar_lea.vmem %s12110_s16, 1920  ;;  %s11895_s23 = smov [#allocation2]  }
  0x6d   : > { %p11751_p0 = scmp.ne.s32.totalorder %s12110_s16, %s11750_s25  ;;  %s11755_s12 = sshll.u32 %s11895_s23, 4  ;;  %s11756_s12 = int_to_ptr.vmem [resolvable:$false] %s11755_s12 }
  0x6e   : > { %s11757_s26 = scalar_lea.vmem %s11756_s12, 3840  ;;  %p11758_p4 = scmp.lt.s32.totalorder %s12110_s16, %s11756_s12 }
  0x6f   : > { %p11753_p1 = pnand %p11751_p0, %p11737_p2  ;;  %p11759_p6 = scmp.lt.s32.totalorder %s11757_s26, %s11750_s25 }
  0x71   : > { %p11754_p9 = pneg %p11753_p1  ;;  %p11760_p10 = por %p11759_p6, %p11758_p4 }
  0x73   : > { %p11761_p3 = pnand %p11760_p10, %p11754_p9 }
  0x75   : > { %11764 = shalt.err (!%p11761_p3)
}
  0x76   : > { %s11896_s2 = smov 960   ;;  %s11897_s17 = smov 60  }
  0x77   : > { %11505 = dma.hbm_to_vmem [thread:$0]  (!%p12094_p12), %s12108_s14, 1920, %s12110_s16, %s12112_s24, %s11896_s2, %s11896_s2, %s11897_s17  }
  0x78   : > { %s338_s27 = sand.u32 1, %s11889_s10   ;;  %s15389_s25 = smul.u32 1920, %s11885_s9 }
  0x79   : > { %s342_s0 = scalar_lea.vmem [#allocation5], %s12092_s20  ;;  %s12154_s22 = scalar_lea.sflag [#allocation6], %s338_s27 }
  0x7a   : > { %s12149_s26 = scalar_lea.hbm %s15346_s1, %s15389_s25  ;;  %s351_s3 = sshll.u32 %s342_s0, 4  ;;  %s12152_s3 = int_to_ptr.vmem [resolvable:$true] %s351_s3 }
  0x7b   : > { %s11765_s21 = scalar_lea.hbm %s12149_s26, 1920  ;;  %s11770_s24 = scalar_lea.hbm %s15346_s1, 3840 }
  0x7c   : > { %p11766_p4 = scmp.ne.s32.totalorder %s12149_s26, %s11765_s21  ;;  %p11771_p5 = scmp.lt.u32.totalorder %s12149_s26, %s15346_s1 }
  0x7d   : > { %p11772_p7 = scmp.lt.u32.totalorder %s11770_s24, %s11765_s21  ;;  %p11774_p0 = scmp.lt.u32.totalorder %s11765_s21, %s12149_s26 }
  0x7e   : > { %p11768_p9 = pnand %p11766_p4, %p11737_p2 }
  0x7f   : > { %p11773_p11 = por %p11772_p7, %p11771_p5 }
  0x80   : > { %p11769_p13 = pneg %p11768_p9 }
  0x81   : > { %p11775_p1 = por %p11774_p0, %p11773_p11 }
  0x83   : > { %p11776_p6 = pnand %p11775_p1, %p11769_p13 }
  0x85   : > { %11779 = shalt.err (!%p11776_p6)
}
  0x86   : > { %s11780_s0 = scalar_lea.vmem %s12152_s3, 1920  ;;  %s11898_s20 = smov [#allocation5]  }
  0x87   : > { %p11781_p10 = scmp.ne.s32.totalorder %s12152_s3, %s11780_s0  ;;  %s11785_s27 = sshll.u32 %s11898_s20, 4  ;;  %s11786_s27 = int_to_ptr.vmem [resolvable:$false] %s11785_s27 }
  0x88   : > { %s11787_s12 = scalar_lea.vmem %s11786_s27, 3840  ;;  %p11788_p9 = scmp.lt.s32.totalorder %s12152_s3, %s11786_s27 }
  0x89   : > { %p11783_p3 = pnand %p11781_p10, %p11737_p2  ;;  %p11789_p5 = scmp.lt.s32.totalorder %s11787_s12, %s11780_s0 }
  0x8b   : > { %p11784_p4 = pneg %p11783_p3  ;;  %p11790_p7 = por %p11789_p5, %p11788_p9 }
  0x8d   : > { %p11791_p11 = pnand %p11790_p7, %p11784_p4 }
  0x8f   : > { %11794 = shalt.err (!%p11791_p11)
}
  0x90   : > { %11508 = dma.hbm_to_vmem [thread:$0]  (!%p12094_p12), %s12149_s26, 1920, %s12152_s3, %s12154_s22, %s11896_s2, %s11896_s2, %s11897_s17  }
  0x91   : > { %363 = sbr.rel (%p12006_p8) target bundleno = 1696 (0x6a0), region = 52 }
  0x98   : > { %s12186_s21 = sand.u32 1, %s11873_s28   ;;  %p15390_p2 = scmp.ne.s32.totalorder %s15376_s13, 0 }
  0x99   : > { %s11478_s16 = smul.u32 120, %s12186_s21  ;;  %s366_s14 = scalar_lea.sflag [#allocation3], %s12186_s21 }
  0x9b   : > { %s12190_s24 = scalar_lea.vmem [#allocation2], %s11478_s16 }
  0x9c   : > { %11848 = dma.done.wait (%p15390_p2), %s366_s14, 1920  }
  0x9d   : > { %11850 = vsyncadd (%p15390_p2), %s366_s14, 4294965376  ;;  %s374_s3 = sand.u32 1, %s11987_s11   ;;  %s12197_s22 = scalar_lea.vmem [#allocation5], %s11478_s16 }
  0x9e   : > { %s375_s15 = scalar_lea.sflag [#allocation6], %s374_s3 }
  0x9f   : > { %11852 = dma.done.wait (%p15390_p2), %s375_s15, 1920  }
  0xa0   : > { %11854 = vsyncadd (%p15390_p2), %s375_s15, 4294965376  ;;  %p15391_p8 = scmp.eq.s32.totalorder %s11987_s11, 0 }
  0xa2   : > { %11856 = dma.done.wait (%p15391_p8), [#allocation6], 1152   ;;  %p15392_p12 = pmov %p15391_p8 }
  0xa3   : > { %p15393_p13 = pmov %p15391_p8 }
  0xa4   : > { %11858 = vsyncadd (%p15392_p12), [#allocation6], 4294966144 }
  0xa5   : > { %11860 = dma.done.wait (%p15393_p13), [#allocation9], 1152   ;;  %p15394_p0 = pmov %p15391_p8 }
  0xa6   : > { %v15364_v0 = vmov 0   ;;  %v12216_v1 = vld [vmem:[%s12197_s22 + $0x4] ss:$60 sps:$4 sm:$0xff]   ;;  %s11900_s11 = smov 81   ;;  %v12229_v4 = vld [vmem:[%s12197_s22 + $0x14] ss:$60 sps:$4 sm:$0xff]  }
  0xa7   : > { %11862 = vsyncadd (%p15394_p0), [#allocation9], 4294966144  ;;  %623 = vmatprep.mubr.bf16.mxu0 %v15364_v0  ;;  %666 = vmatprep.mubr.bf16.mxu1 %v15364_v0  ;;  %v12219_v2 = vld [vmem:[%s12197_s22] ss:$60 sps:$4 sm:$0xff]   ;;  %v12224_v3 = vld [vmem:[%s12197_s22 + $0x8] ss:$60 sps:$4 sm:$0xff]  }
  0xa8   : > { %11584 = vset.pattern.permute.xlu0 %v15364_v0  ;;  %11585 = vset.pattern.permute.xlu1 %v15364_v0  ;;  %v12234_v5 = vld [vmem:[%s12197_s22 + $0x18] ss:$60 sps:$4 sm:$0xff]   ;;  %v12239_v6 = vld [vmem:[%s12197_s22 + $0x10] ss:$60 sps:$4 sm:$0xff]   ;;  %v12244_v7 = vld [vmem:[%s12197_s22 + $0x24] ss:$60 sps:$4 sm:$0xff]  }
  0xa9   : > { %533 = vrot.lane.b32.xlu0 %v12216_v1, %s11900_s11  ;;  %531 = vrot.lane.b32.xlu1 %v12219_v2, %s11900_s11  ;;  %v12249_v8 = vld [vmem:[%s12197_s22 + $0x28] ss:$60 sps:$4 sm:$0xff]   ;;  %v12254_v9 = vld [vmem:[%s12197_s22 + $0x20] ss:$60 sps:$4 sm:$0xff]   ;;  %s11901_s13 = smov 80   ;;  %s11902_s19 = smov 79  }
  0xaa   : > { %v12259_v10 = vld [vmem:[%s12197_s22 + $0x30] ss:$60 sps:$4 sm:$0xff]   ;;  %v12272_v13 = vld [vmem:[%s12190_s24 + $0x8] ss:$60 sps:$4 sm:$0xff]   ;;  %v12282_v15 = vld [vmem:[%s12190_s24 + $0x14] ss:$60 sps:$4 sm:$0xff]  }
  0xab   : > { %v12264_v11 = vld [vmem:[%s12197_s22 + $0x34] ss:$60 sps:$4 sm:$0xff]   ;;  %v12285_v16 = vld [vmem:[%s12190_s24 + $0x18] ss:$60 sps:$4 sm:$0xff]   ;;  %v12292_v17 = vld [vmem:[%s12190_s24 + $0x10] ss:$60 sps:$4 sm:$0xff]  }
  0xac   : > { %v12269_v12 = vld [vmem:[%s12190_s24 + $0x4] ss:$60 sps:$4 sm:$0xff]   ;;  %v12314_v21 = vld [vmem:[%s12190_s24 + $0x30] ss:$60 sps:$4 sm:$0xff]   ;;  %v12378_v23 = vld [vmem:[%s12197_s22 + $0xc] ss:$60 sps:$4 sm:$0xff]  }
  0xad   : > { %535 = vrot.lane.b32.xlu0 %v12224_v3, %s11900_s11  ;;  %541 = vrot.lane.b32.xlu1 %v12229_v4, %s11900_s11  ;;  %v12275_v14 = vld [vmem:[%s12190_s24] ss:$60 sps:$4 sm:$0xff]   ;;  %v12304_v19 = vld [vmem:[%s12190_s24 + $0x28] ss:$60 sps:$4 sm:$0xff]   ;;  %vm559_vm0 = vcmask 662528   ;;  %vm587_vm1 = vcmask 130048  }
  0xae   : > { %v12295_v18 = vld [vmem:[%s12190_s24 + $0x24] ss:$60 sps:$4 sm:$0xff]   ;;  %15395 = vst [vmem:[#allocation20_spill] sm:$0xff] %v12304_v19  ;;  %v12319_v22 = vld [vmem:[%s12190_s24 + $0x34] ss:$60 sps:$4 sm:$0xff]   ;;  %s11903_s2 = smov 33  }
  0xaf   : > { %v12309_v20 = vld [vmem:[%s12190_s24 + $0x20] ss:$60 sps:$4 sm:$0xff]   ;;  %15397 = vst [vmem:[#allocation22_spill] sm:$0xff] %v12319_v22  ;;  %v12389_v24 = vld [vmem:[%s12197_s22 + $0x1c] ss:$60 sps:$4 sm:$0xff]   ;;  %vm1351_vm2 = vcmask 654336  }
  0xb0   : > { %15396 = vst [vmem:[#allocation21_spill] sm:$0xff] %v12309_v20  ;;  %v12396_v25 = vld [vmem:[%s12197_s22 + $0x2c] ss:$60 sps:$4 sm:$0xff]   ;;  %v12409_v28 = vld [vmem:[%s12190_s24 + $0xc] ss:$60 sps:$4 sm:$0xff]   ;;  %s11904_s17 = smov 32  }
  0xb1   : > { %543 = vrot.lane.b32.xlu0 %v12234_v5, %s11900_s11  ;;  %539 = vrot.lane.b32.xlu1 %v12239_v6, %s11900_s11  ;;  %v12420_v33 = vld [vmem:[#allocation8] sm:$0xff]   ;;  %v12439_v38 = vld [vmem:[%s12190_s24 + $0x1c] ss:$60 sps:$4 sm:$0xff]   ;;  %v12505_v60 = vld [vmem:[#allocation7] sm:$0xff]   ;;  %vm2114_vm3 = vcmask 646144   ;;  %s11905_s26 = smov 31  }
  0xb2   : > { %v12463_v45 = vld [vmem:[%s12190_s24 + $0x2c] ss:$60 sps:$4 sm:$0xff]   ;;  %vm2884_vm4 = vcmask 269312   ;;  %s11906_s25 = smov 113   ;;  %vm3658_vm5 = vcmask 261120   ;;  %s11907_s23 = smov 112  }
  0xb3   : > { %vm4427_vm6 = vcmask 252928   ;;  %s11908_s0 = smov 111   ;;  %vm5194_vm7 = vcmask 924672   ;;  %vm5957_vm8 = vcmask 916480   ;;  %vm6720_vm9 = vcmask 908288   ;;  %p15414_p6 = scmp.ne.s32.totalorder %s15385_s18, 0 }
  0xb4   : > { %s11910_s27 = smov [#allocation10]  }
  0xb5   : > { %549 = vrot.lane.b32.xlu0 %v12244_v7, %s11900_s11  ;;  %551 = vrot.lane.b32.xlu1 %v12249_v8, %s11900_s11  ;;  %s11799_s12 = sshll.u32 %s11910_s27, 4  ;;  %s11800_s12 = int_to_ptr.vmem [resolvable:$false] %s11799_s12 }
  0xb9   : > { %547 = vrot.lane.b32.xlu0 %v12254_v9, %s11900_s11  ;;  %555 = vrot.lane.b32.xlu1 %v12259_v10, %s11900_s11 }
  0xbd   : > { %557 = vrot.lane.b32.xlu0 %v12264_v11, %s11900_s11  ;;  %955 = vrot.lane.b32.xlu1 %v12269_v12, %s11900_s11 }
  0xc1   : > { %957 = vrot.lane.b32.xlu0 %v12272_v13, %s11900_s11  ;;  %953 = vrot.lane.b32.xlu1 %v12275_v14, %s11900_s11 }
  0xc5   : > { %963 = vrot.lane.b32.xlu0 %v12282_v15, %s11900_s11  ;;  %965 = vrot.lane.b32.xlu1 %v12285_v16, %s11900_s11 }
  0xc9   : > { %961 = vrot.lane.b32.xlu0 %v12292_v17, %s11900_s11  ;;  %971 = vrot.lane.b32.xlu1 %v12295_v18, %s11900_s11 }
  0xcd   : > { %973 = vrot.lane.b32.xlu0 %v12304_v19, %s11900_s11  ;;  %969 = vrot.lane.b32.xlu1 %v12309_v20, %s11900_s11 }
  0xd1   : > { %977 = vrot.lane.b32.xlu0 %v12314_v21, %s11900_s11  ;;  %979 = vrot.lane.b32.xlu1 %v12319_v22, %s11900_s11 }
  0xd5   : > { %1325 = vrot.lane.b32.xlu0 %v12216_v1, %s11901_s13  ;;  %1327 = vrot.lane.b32.xlu1 %v12224_v3, %s11901_s13 }
  0xd9   : > { %1323 = vrot.lane.b32.xlu0 %v12219_v2, %s11901_s13  ;;  %1333 = vrot.lane.b32.xlu1 %v12229_v4, %s11901_s13 }
  0xdd   : > { %1335 = vrot.lane.b32.xlu0 %v12234_v5, %s11901_s13  ;;  %1331 = vrot.lane.b32.xlu1 %v12239_v6, %s11901_s13 }
  0xe1   : > { %1341 = vrot.lane.b32.xlu0 %v12244_v7, %s11901_s13  ;;  %1343 = vrot.lane.b32.xlu1 %v12249_v8, %s11901_s13 }
  0xe5   : > { %1339 = vrot.lane.b32.xlu0 %v12254_v9, %s11901_s13  ;;  %1347 = vrot.lane.b32.xlu1 %v12259_v10, %s11901_s13 }
  0xe9   : > { %1349 = vrot.lane.b32.xlu0 %v12264_v11, %s11901_s13  ;;  %1690 = vrot.lane.b32.xlu1 %v12269_v12, %s11901_s13 }
  0xed   : > { %1692 = vrot.lane.b32.xlu0 %v12272_v13, %s11901_s13  ;;  %1688 = vrot.lane.b32.xlu1 %v12275_v14, %s11901_s13 }
  0xf1   : > { %1698 = vrot.lane.b32.xlu0 %v12282_v15, %s11901_s13  ;;  %1700 = vrot.lane.b32.xlu1 %v12285_v16, %s11901_s13 }
  0xf5   : > { %1696 = vrot.lane.b32.xlu0 %v12292_v17, %s11901_s13  ;;  %1706 = vrot.lane.b32.xlu1 %v12295_v18, %s11901_s13 }
  0xf9   : > { %1708 = vrot.lane.b32.xlu0 %v12304_v19, %s11901_s13  ;;  %1704 = vrot.lane.b32.xlu1 %v12309_v20, %s11901_s13 }
  0xfd   : > { %1712 = vrot.lane.b32.xlu0 %v12314_v21, %s11901_s13  ;;  %1714 = vrot.lane.b32.xlu1 %v12319_v22, %s11901_s13 }
 0x101   : > { %2088 = vrot.lane.b32.xlu0 %v12216_v1, %s11902_s19  ;;  %2090 = vrot.lane.b32.xlu1 %v12224_v3, %s11902_s19 }
 0x105   : > { %2086 = vrot.lane.b32.xlu0 %v12219_v2, %s11902_s19  ;;  %2096 = vrot.lane.b32.xlu1 %v12229_v4, %s11902_s19 }
 0x109   : > { %2098 = vrot.lane.b32.xlu0 %v12234_v5, %s11902_s19  ;;  %537 = vrot.lane.b32.xlu1 %v12378_v23, %s11900_s11 }
 0x10d   : > { %2094 = vrot.lane.b32.xlu0 %v12239_v6, %s11902_s19  ;;  %2104 = vrot.lane.b32.xlu1 %v12244_v7, %s11902_s19 }
 0x111   : > { %2106 = vrot.lane.b32.xlu0 %v12249_v8, %s11902_s19  ;;  %545 = vrot.lane.b32.xlu1 %v12389_v24, %s11900_s11 }
 0x115   : > { %2102 = vrot.lane.b32.xlu0 %v12254_v9, %s11902_s19  ;;  %553 = vrot.lane.b32.xlu1 %v12396_v25, %s11900_s11 }
 0x119   : > { %2110 = vrot.lane.b32.xlu0 %v12259_v10, %s11902_s19  ;;  %2112 = vrot.lane.b32.xlu1 %v12264_v11, %s11902_s19 }
 0x11b   : > { %v534_v26 = vpop.permute.xlu0 %533  ;;  %v532_v27 = vpop.permute.xlu1 %531 }
 0x11c   : > { %v560_v32 = vsel %vm559_vm0, %v532_v27, %v534_v26 }
 0x11d   : > { %2453 = vrot.lane.b32.xlu0 %v12269_v12, %s11902_s19  ;;  %2455 = vrot.lane.b32.xlu1 %v12272_v13, %s11902_s19 }
 0x11f   : > { %v12413_v29 = vpop.permute.xlu0 %535  ;;  %v542_v30 = vpop.permute.xlu1 %541 }
 0x120   : > { %v561_v31 = vsel %vm559_vm0, %v534_v26, %v12413_v29 }
 0x121   : > { %591 = vmatprep.subr.bf16.mxu0 %v561_v31  ;;  %959 = vrot.lane.b32.xlu0 %v12409_v28, %s11900_s11 }
 0x122   : > { %2451 = vrot.lane.b32.xlu1 %v12275_v14, %s11902_s19  ;;  %592 = vmatpush1.bf16.msra.mxu0 %v560_v32 }
 0x123   : > { %v12424_v34 = vpop.permute.xlu0 %543  ;;  %v12426_v35 = vpop.permute.xlu1 %539 }
 0x124   : > { %v565_v36 = vsel %vm559_vm0, %v542_v30, %v12424_v34  ;;  %v564_v37 = vsel %vm559_vm0, %v12426_v35, %v542_v30 }
 0x125   : > { %10774 = vmatmul.mubr.msk.bf16.vlgmr.msra.gmra.mrb[0].mxu0 %vm587_vm1, %v12420_v33  ;;  %677 = vmatprep.subr.bf16.mxu0 %v565_v36 }
 0x126   : > { %2461 = vrot.lane.b32.xlu0 %v12282_v15, %s11902_s19  ;;  %2463 = vrot.lane.b32.xlu1 %v12285_v16, %s11902_s19 }
 0x127   : > { %678 = vmatpush1.bf16.msra.mxu0 %v564_v37  ;;  %v550_v39 = vpop.permute.xlu0 %549  ;;  %709 = vmatprep.mubr.bf16.mxu0 %v15364_v0  ;;  %v12442_v40 = vpop.permute.xlu1 %551 }
 0x128   : > { %v569_v41 = vsel %vm559_vm0, %v550_v39, %v12442_v40 }
 0x129   : > { %763 = vmatprep.subr.bf16.mxu0 %v569_v41  ;;  %v12548_v41 = vld [vmem:[%s12197_s22 + $0x38] ss:$60 sps:$4 sm:$0xff]  }
 0x12a   : > { %967 = vrot.lane.b32.xlu0 %v12439_v38, %s11900_s11  ;;  %2459 = vrot.lane.b32.xlu1 %v12292_v17, %s11902_s19 }
 0x12b   : > { %v12450_v42 = vpop.permute.xlu0 %547  ;;  %v12452_v43 = vpop.permute.xlu1 %555 }
 0x12c   : > { %v568_v44 = vsel %vm559_vm0, %v12450_v42, %v550_v39 }
 0x12d   : > { %10776 = vmatmul.mubr.msk.bf16.vlgmr.msra.gmra.mrb[4].mxu0 %vm587_vm1, %v12420_v33 }
 0x12e   : > { %2469 = vrot.lane.b32.xlu0 %v12295_v18, %s11902_s19  ;;  %2471 = vrot.lane.b32.xlu1 %v12304_v19, %s11902_s19 }
 0x12f   : > { %764 = vmatpush1.bf16.msra.mxu0 %v568_v44  ;;  %v558_v46 = vpop.permute.xlu0 %557  ;;  %795 = vmatprep.mubr.bf16.mxu0 %v15364_v0  ;;  %v956_v47 = vpop.permute.xlu1 %955 }
 0x130   : > { %849 = vmatprep.subr.bf16.mxu0 %v558_v46  ;;  %v572_v50 = vsel %vm559_vm0, %v12452_v43, %v558_v46 }
 0x132   : > { %975 = vrot.lane.b32.xlu0 %v12463_v45, %s11900_s11  ;;  %2467 = vrot.lane.b32.xlu1 %v12309_v20, %s11902_s19 }
 0x133   : > { %v12470_v48 = vpop.permute.xlu0 %957  ;;  %v954_v49 = vpop.permute.xlu1 %953 }
 0x134   : > { %v982_v51 = vsel %vm559_vm0, %v956_v47, %v12470_v48  ;;  %v981_v55 = vsel %vm559_vm0, %v954_v49, %v956_v47 }
 0x135   : > { %10778 = vmatmul.mubr.msk.bf16.vlgmr.msra.gmra.mrb[8].mxu0 %vm587_vm1, %v12420_v33 }
 0x136   : > { %1329 = vrot.lane.b32.xlu0 %v12378_v23, %s11901_s13  ;;  %2475 = vrot.lane.b32.xlu1 %v12314_v21, %s11902_s19 }
 0x137   : > { %v964_v52 = vpop.permute.xlu0 %963  ;;  %850 = vmatpush1.bf16.msra.mxu0 %v572_v50  ;;  %881 = vmatprep.mubr.bf16.mxu0 %v15364_v0  ;;  %v12483_v53 = vpop.permute.xlu1 %965 }
 0x138   : > { %1011 = vmatprep.subr.bf16.mxu0 %v982_v51  ;;  %v986_v57 = vsel %vm559_vm0, %v964_v52, %v12483_v53 }
 0x13a   : > { %2477 = vrot.lane.b32.xlu0 %v12319_v22, %s11902_s19  ;;  %2856 = vrot.lane.b32.xlu1 %v12216_v1, %s11903_s2 }
 0x13b   : > { %v12489_v54 = vpop.permute.xlu0 %961  ;;  %v972_v56 = vpop.permute.xlu1 %971 }
 0x13c   : > { %v985_v63 = vsel %vm559_vm0, %v12489_v54, %v964_v52 }
 0x13d   : > { %10780 = vmatmul.mubr.msk.bf16.vlgmr.msra.gmra.mrb[12].mxu0 %vm587_vm1, %v12420_v33 }
 0x13e   : > { %2858 = vrot.lane.b32.xlu0 %v12224_v3, %s11903_s2  ;;  %1337 = vrot.lane.b32.xlu1 %v12389_v24, %s11901_s13 }
 0x13f   : > { %1012 = vmatpush1.bf16.msra.mxu0 %v981_v55  ;;  %v12500_v58 = vpop.permute.xlu0 %973  ;;  %1043 = vmatprep.mubr.bf16.mxu0 %v15364_v0  ;;  %v12503_v59 = vpop.permute.xlu1 %969 }
 0x140   : > { %1097 = vmatprep.subr.bf16.mxu0 %v986_v57  ;;  %v990_v26 = vsel %vm559_vm0, %v972_v56, %v12500_v58  ;;  %v989_v36 = vsel %vm559_vm0, %v12503_v59, %v972_v56 }
 0x142   : > { %2854 = vrot.lane.b32.xlu0 %v12219_v2, %s11903_s2  ;;  %2864 = vrot.lane.b32.xlu1 %v12229_v4, %s11903_s2 }
 0x143   : > { %v12511_v61 = vpop.permute.xlu0 %977  ;;  %v980_v62 = vpop.permute.xlu1 %979 }
 0x144   : > { %v993_v47 = vsel %vm559_vm0, %v12511_v61, %v980_v62 }
 0x145   : > { %10796 = vmatmul.mubr.msk.bf16.vlgmr.msra.gmra.mrb[0].mxu0 %vm587_vm1, %v12505_v60 }
 0x146   : > { %2866 = vrot.lane.b32.xlu0 %v12234_v5, %s11903_s2  ;;  %1345 = vrot.lane.b32.xlu1 %v12396_v25, %s11901_s13 }
 0x147   : > { %1098 = vmatpush1.bf16.msra.mxu0 %v985_v63  ;;  %v1326_v27 = vpop.permute.xlu0 %1325  ;;  %1129 = vmatprep.mubr.bf16.mxu0 %v15364_v0  ;;  %v12524_v30 = vpop.permute.xlu1 %1327 }
 0x148   : > { %1183 = vmatprep.subr.bf16.mxu0 %v990_v26  ;;  %v1353_v49 = vsel %vm1351_vm2, %v1326_v27, %v12524_v30  ;;  %v12583_v26 = vld [vmem:[#allocation8 + $0x8] sm:$0xff]  }
 0x14a   : > { %2862 = vrot.lane.b32.xlu0 %v12239_v6, %s11903_s2  ;;  %2872 = vrot.lane.b32.xlu1 %v12244_v7, %s11903_s2 }
 0x14b   : > { %v1324_v31 = vpop.permute.xlu0 %1323  ;;  %v1334_v32 = vpop.permute.xlu1 %1333 }
 0x14c   : > { %v1352_v55 = vsel %vm1351_vm2, %v1324_v31, %v1326_v27 }
 0x14d   : > { %10798 = vmatmul.mubr.msk.bf16.vlgmr.msra.gmra.mrb[4].mxu0 %vm587_vm1, %v12505_v60 }
 0x14e   : > { %2874 = vrot.lane.b32.xlu0 %v12249_v8, %s11903_s2  ;;  %1694 = vrot.lane.b32.xlu1 %v12409_v28, %s11901_s13 }
 0x14f   : > { %1184 = vmatpush1.bf16.msra.mxu0 %v989_v36  ;;  %v12538_v37 = vpop.permute.xlu0 %1335  ;;  %1215 = vmatprep.mubr.bf16.mxu0 %v15364_v0  ;;  %v12541_v39 = vpop.permute.xlu1 %1331 }
 0x150   : > { %15398 = vst [vmem:[#allocation23_spill] sm:$0xff] %v12538_v37  ;;  %1269 = vmatprep.subr.bf16.mxu0 %v980_v62  ;;  %v1357_v57 = vsel %vm1351_vm2, %v1334_v32, %v12538_v37  ;;  %v1356_v36 = vsel %vm1351_vm2, %v12541_v39, %v1334_v32 }
 0x152   : > { %2870 = vrot.lane.b32.xlu0 %v12254_v9, %s11903_s2  ;;  %2880 = vrot.lane.b32.xlu1 %v12264_v11, %s11903_s2 }
 0x153   : > { %v1342_v44 = vpop.permute.xlu0 %1341  ;;  %v12550_v46 = vpop.permute.xlu1 %1343 }
 0x154   : > { %15399 = vst [vmem:[#allocation24_spill] sm:$0xff] %v12550_v46 }
 0x155   : > { %10800 = vmatmul.mubr.msk.bf16.vlgmr.msra.gmra.mrb[8].mxu0 %vm587_vm1, %v12505_v60 }
 0x156   : > { %2882 = vrot.lane.b32.xlu0 %v12548_v41, %s11903_s2  ;;  %1702 = vrot.lane.b32.xlu1 %v12439_v38, %s11901_s13 }
 0x157   : > { %v12562_v50 = vpop.permute.xlu0 %1339  ;;  %1270 = vmatpush1.bf16.msra.mxu0 %v993_v47  ;;  %1301 = vmatprep.mubr.bf16.mxu0 %v15364_v0  ;;  %v12565_v51 = vpop.permute.xlu1 %1347  ;;  %v1361_v47 = vsel %vm1351_vm2, %v1342_v44, %v12550_v46 }
 0x158   : > { %15400 = vst [vmem:[#allocation25_spill] sm:$0xff] %v12562_v50  ;;  %15401 = vst [vmem:[#allocation26_spill] sm:$0xff] %v12565_v51  ;;  %1382 = vmatprep.subr.bf16.mxu0 %v1353_v49 }
 0x15a   : > { %2878 = vrot.lane.b32.xlu0 %v12259_v10, %s11903_s2  ;;  %3229 = vrot.lane.b32.xlu1 %v12269_v12, %s11903_s2 }
 0x15b   : > { %v1350_v52 = vpop.permute.xlu0 %1349  ;;  %v1691_v56 = vpop.permute.xlu1 %1690 }
 0x15d   : > { %10802 = vmatmul.mubr.msk.bf16.vlgmr.msra.gmra.mrb[12].mxu0 %vm587_vm1, %v12505_v60 }
 0x15e   : > { %3231 = vrot.lane.b32.xlu0 %v12272_v13, %s11903_s2  ;;  %1710 = vrot.lane.b32.xlu1 %v12463_v45, %s11901_s13 }
 0x15f   : > { %1383 = vmatpush1.bf16.msra.mxu0 %v1352_v55  ;;  %v12580_v62 = vpop.permute.xlu0 %1692  ;;  %1414 = vmatprep.mubr.bf16.mxu0 %v15364_v0  ;;  %v1689_v63 = vpop.permute.xlu1 %1688 }
 0x160   : > { %15402 = vst [vmem:[#allocation27_spill] sm:$0xff] %v12580_v62  ;;  %1468 = vmatprep.subr.bf16.mxu0 %v1357_v57 }
 0x162   : > { %3227 = vrot.lane.b32.xlu0 %v12275_v14, %s11903_s2  ;;  %3237 = vrot.lane.b32.xlu1 %v12282_v15, %s11903_s2 }
 0x163   : > { %v12589_v27 = vpop.permute.xlu0 %1698  ;;  %v12591_v31 = vpop.permute.xlu1 %1700 }
 0x164   : > { %15403 = vst [vmem:[#allocation28_spill] sm:$0xff] %v12591_v31 }
 0x165   : > { %10804 = vmatmul.mubr.msk.bf16.vlgmr.msra.gmra.mrb[0].mxu0 %vm587_vm1, %v12583_v26 }
 0x166   : > { %3239 = vrot.lane.b32.xlu0 %v12285_v16, %s11903_s2  ;;  %2092 = vrot.lane.b32.xlu1 %v12378_v23, %s11902_s19 }
 0x167   : > { %1469 = vmatpush1.bf16.msra.mxu0 %v1356_v36  ;;  %v12603_v49 = vpop.permute.xlu0 %1696  ;;  %1500 = vmatprep.mubr.bf16.mxu0 %v15364_v0  ;;  %v12606_v55 = vpop.permute.xlu1 %1706  ;;  %v1360_v36 = vsel %vm1351_vm2, %v12562_v50, %v1342_v44  ;;  %v12634_v44 = vld [vmem:[%s12190_s24 + $0x38] ss:$60 sps:$4 sm:$0xff]  }
 0x168   : > { %1554 = vmatprep.subr.bf16.mxu0 %v1361_v47 }
 0x16a   : > { %3235 = vrot.lane.b32.xlu0 %v12292_v17, %s11903_s2  ;;  %3245 = vrot.lane.b32.xlu1 %v12295_v18, %s11903_s2 }
 0x16b   : > { %v12612_v32 = vpop.permute.xlu0 %1708  ;;  %v12614_v57 = vpop.permute.xlu1 %1704 }
 0x16d   : > { %10806 = vmatmul.mubr.msk.bf16.vlgmr.msra.gmra.mrb[4].mxu0 %vm587_vm1, %v12583_v26 }
 0x16e   : > { %3247 = vrot.lane.b32.xlu0 %v12304_v19, %s11903_s2  ;;  %2100 = vrot.lane.b32.xlu1 %v12389_v24, %s11902_s19 }
 0x16f   : > { %1555 = vmatpush1.bf16.msra.mxu0 %v1360_v36  ;;  %v12624_v47 = vpop.permute.xlu0 %1712  ;;  %1586 = vmatprep.mubr.bf16.mxu0 %v15364_v0  ;;  %v12627_v46 = vpop.permute.xlu1 %1714  ;;  %v1364_v36 = vsel %vm1351_vm2, %v12565_v51, %v1350_v52  ;;  %v1717_v0 = vsel %vm1351_vm2, %v1691_v56, %v12580_v62  ;;  %v1716_v62 = vsel %vm1351_vm2, %v1689_v63, %v1691_v56 }
 0x170   : > { %1640 = vmatprep.subr.bf16.mxu0 %v1350_v52  ;;  %v1721_v56 = vsel %vm1351_vm2, %v12589_v27, %v12591_v31 }
 0x172   : > { %3243 = vrot.lane.b32.xlu0 %v12309_v20, %s11903_s2  ;;  %3253 = vrot.lane.b32.xlu1 %v12319_v22, %s11903_s2  ;;  %v15404_v20 = vmov 0  }
 0x173   : > { %v12636_v37 = vpop.permute.xlu0 %2088  ;;  %v12638_v50 = vpop.permute.xlu1 %2090 }
 0x175   : > { %10808 = vmatmul.mubr.msk.bf16.vlgmr.msra.gmra.mrb[8].mxu0 %vm587_vm1, %v12583_v26 }
 0x176   : > { %3255 = vrot.lane.b32.xlu0 %v12634_v44, %s11903_s2  ;;  %2108 = vrot.lane.b32.xlu1 %v12396_v25, %s11902_s19 }
 0x177   : > { %v12650_v22 = vpop.permute.xlu0 %2086  ;;  %1641 = vmatpush1.bf16.msra.mxu0 %v1364_v36  ;;  %1672 = vmatprep.mubr.bf16.mxu0 %v15404_v20  ;;  %v12653_v19 = vpop.permute.xlu1 %2096 }
 0x178   : > { %1746 = vmatprep.subr.bf16.mxu0 %v1717_v0 }
 0x17a   : > { %3251 = vrot.lane.b32.xlu0 %v12314_v21, %s11903_s2  ;;  %3630 = vrot.lane.b32.xlu1 %v12216_v1, %s11904_s17 }
 0x17b   : > { %v12659_v52 = vpop.permute.xlu0 %2098  ;;  %v538_v51 = vpop.permute.xlu1 %537 }
 0x17c   : > { %v563_v36 = vsel %vm559_vm0, %v538_v51, %v12426_v35  ;;  %v562_v0 = vsel %vm559_vm0, %v12413_v29, %v538_v51  ;;  %v12680_v29 = vld [vmem:[#allocation7 + $0x8] sm:$0xff]  }
 0x17d   : > { %10810 = vmatmul.mubr.msk.bf16.vlgmr.msra.gmra.mrb[12].mxu0 %vm587_vm1, %v12583_v26  ;;  %634 = vmatprep.subr.bf16.mxu1 %v563_v36  ;;  %v1720_v36 = vsel %vm1351_vm2, %v12603_v49, %v12589_v27  ;;  %v1725_v27 = vsel %vm1351_vm2, %v12606_v55, %v12612_v32 }
 0x17e   : > { %3632 = vrot.lane.b32.xlu0 %v12224_v3, %s11904_s17  ;;  %2457 = vrot.lane.b32.xlu1 %v12409_v28, %s11902_s19 }
 0x17f   : > { %1747 = vmatpush1.bf16.msra.mxu0 %v1716_v62  ;;  %v12675_v63 = vpop.permute.xlu0 %2094  ;;  %635 = vmatpush1.bf16.msra.mxu1 %v562_v0  ;;  %v12677_v35 = vpop.permute.xlu1 %2104 }
 0x180   : > { %1778 = vmatprep.mubr.bf16.mxu0 %v15404_v20  ;;  %1832 = vmatprep.subr.bf16.mxu0 %v1721_v56 }
 0x182   : > { %3628 = vrot.lane.b32.xlu0 %v12219_v2, %s11904_s17  ;;  %3638 = vrot.lane.b32.xlu1 %v12229_v4, %s11904_s17 }
 0x183   : > { %10775 = vmatmul.mubr.msk.bf16.vlgmr.msra.gmra.mrb[0].mxu1 %vm587_vm1, %v12420_v33  ;;  %v12688_v51 = vpop.permute.xlu0 %2106  ;;  %v546_v62 = vpop.permute.xlu1 %545 }
 0x184   : > { %752 = vmatprep.mubr.bf16.mxu1 %v15404_v20  ;;  %v567_v0 = vsel %vm559_vm0, %v546_v62, %v12450_v42  ;;  %v566_v56 = vsel %vm559_vm0, %v12424_v34, %v546_v62 }
 0x185   : > { %10812 = vmatmul.mubr.msk.bf16.vlgmr.msra.gmra.mrb[0].mxu0 %vm587_vm1, %v12680_v29  ;;  %720 = vmatprep.subr.bf16.mxu1 %v567_v0 }
 0x186   : > { %3640 = vrot.lane.b32.xlu0 %v12234_v5, %s11904_s17  ;;  %2465 = vrot.lane.b32.xlu1 %v12439_v38, %s11902_s19 }
 0x187   : > { %1833 = vmatpush1.bf16.msra.mxu0 %v1720_v36  ;;  %v12707_v31 = vpop.permute.xlu0 %2102  ;;  %721 = vmatpush1.bf16.msra.mxu1 %v566_v56  ;;  %v554_v42 = vpop.permute.xlu1 %553 }
 0x188   : > { %1864 = vmatprep.mubr.bf16.mxu0 %v15404_v20  ;;  %v571_v34 = vsel %vm559_vm0, %v554_v42, %v12452_v43  ;;  %v570_v62 = vsel %vm559_vm0, %v12442_v40, %v554_v42  ;;  %1918 = vmatprep.subr.bf16.mxu0 %v1725_v27  ;;  %v1724_v40 = vsel %vm1351_vm2, %v12614_v57, %v12606_v55 }
 0x189   : > { %806 = vmatprep.subr.bf16.mxu1 %v571_v34 }
 0x18a   : > { %3636 = vrot.lane.b32.xlu0 %v12239_v6, %s11904_s17  ;;  %3646 = vrot.lane.b32.xlu1 %v12244_v7, %s11904_s17 }
 0x18b   : > { %10777 = vmatmul.mubr.msk.bf16.vlgmr.msra.gmra.mrb[4].mxu1 %vm587_vm1, %v12420_v33  ;;  %v12720_v36 = vpop.permute.xlu0 %2110  ;;  %v12722_v0 = vpop.permute.xlu1 %2112 }
 0x18c   : > { %807 = vmatpush1.bf16.msra.mxu1 %v570_v62  ;;  %838 = vmatprep.mubr.bf16.mxu1 %v15404_v20 }
 0x18d   : > { %10814 = vmatmul.mubr.msk.bf16.vlgmr.msra.gmra.mrb[4].mxu0 %vm587_vm1, %v12680_v29 }
 0x18e   : > { %3648 = vrot.lane.b32.xlu0 %v12249_v8, %s11904_s17  ;;  %2473 = vrot.lane.b32.xlu1 %v12463_v45, %s11902_s19 }
 0x18f   : > { %1919 = vmatpush1.bf16.msra.mxu0 %v1724_v40  ;;  %v12734_v43 = vpop.permute.xlu0 %2453  ;;  %1950 = vmatprep.mubr.bf16.mxu0 %v15404_v20  ;;  %v12737_v56 = vpop.permute.xlu1 %2455 }
 0x190   : > { %2004 = vmatprep.subr.bf16.mxu0 %v12627_v46 }
 0x192   : > { %3644 = vrot.lane.b32.xlu0 %v12254_v9, %s11904_s17  ;;  %3654 = vrot.lane.b32.xlu1 %v12264_v11, %s11904_s17  ;;  %v1728_v9 = vsel %vm1351_vm2, %v12624_v47, %v12627_v46  ;;  %v2115_v46 = vsel %vm2114_vm3, %v12650_v22, %v12636_v37 }
 0x193   : > { %10779 = vmatmul.mubr.msk.bf16.vlgmr.msra.gmra.mrb[8].mxu1 %vm587_vm1, %v12420_v33  ;;  %v960_v55 = vpop.permute.xlu0 %959  ;;  %v2116_v33 = vsel %vm2114_vm3, %v12636_v37, %v12638_v50 }
 0x194   : > { %v12746_v27 = vpop.permute.xlu1 %2451  ;;  %v984_v42 = vsel %vm559_vm0, %v960_v55, %v12489_v54  ;;  %v983_v34 = vsel %vm559_vm0, %v12470_v48, %v960_v55  ;;  %1086 = vmatprep.mubr.bf16.mxu1 %v15404_v20 }
 0x195   : > { %1054 = vmatprep.subr.bf16.mxu1 %v984_v42  ;;  %10816 = vmatmul.mubr.msk.bf16.vlgmr.msra.gmra.mrb[8].mxu0 %vm587_vm1, %v12680_v29  ;;  %v2119_v42 = vsel %vm2114_vm3, %v12675_v63, %v12653_v19 }
 0x196   : > { %3656 = vrot.lane.b32.xlu0 %v12548_v41, %s11904_s17  ;;  %2860 = vrot.lane.b32.xlu1 %v12378_v23, %s11903_s2 }
 0x197   : > { %1055 = vmatpush1.bf16.msra.mxu1 %v983_v34  ;;  %2005 = vmatpush1.bf16.msra.mxu0 %v1728_v9 }
 0x198   : > { %v12765_v48 = vpop.permute.xlu0 %2461  ;;  %v12767_v54 = vpop.permute.xlu1 %2463  ;;  %2036 = vmatprep.mubr.bf16.mxu0 %v15404_v20  ;;  %2145 = vmatprep.subr.bf16.mxu0 %v2116_v33 }
 0x19a   : > { %3652 = vrot.lane.b32.xlu0 %v12259_v10, %s11904_s17  ;;  %3998 = vrot.lane.b32.xlu1 %v12269_v12, %s11904_s17  ;;  %v2120_v12 = vsel %vm2114_vm3, %v12653_v19, %v12659_v52 }
 0x19b   : > { %10797 = vmatmul.mubr.msk.bf16.vlgmr.msra.gmra.mrb[0].mxu1 %vm587_vm1, %v12505_v60 }
 0x19c   : > { %v968_v62 = vpop.permute.xlu0 %967  ;;  %v12779_v40 = vpop.permute.xlu1 %2459  ;;  %1172 = vmatprep.mubr.bf16.mxu1 %v15404_v20 }
 0x19d   : > { %v988_v55 = vsel %vm559_vm0, %v968_v62, %v12503_v59  ;;  %10818 = vmatmul.mubr.msk.bf16.vlgmr.msra.gmra.mrb[12].mxu0 %vm587_vm1, %v12680_v29  ;;  %v987_v10 = vsel %vm559_vm0, %v12483_v53, %v968_v62  ;;  %v12800_v53 = vld [vmem:[#allocation8 + $0x10] sm:$0xff]  }
 0x19e   : > { %4000 = vrot.lane.b32.xlu0 %v12272_v13, %s11904_s17  ;;  %2868 = vrot.lane.b32.xlu1 %v12389_v24, %s11903_s2 }
 0x19f   : > { %1140 = vmatprep.subr.bf16.mxu1 %v988_v55  ;;  %2146 = vmatpush1.bf16.msra.mxu0 %v2115_v46  ;;  %v15407_v46 = vld [vmem:[#allocation23_spill] sm:$0xff]  ;;  %v15408_v55 = vld [vmem:[#allocation21_spill] sm:$0xff] }
 0x1a0   : > { %1141 = vmatpush1.bf16.msra.mxu1 %v987_v10  ;;  %v12795_v22 = vpop.permute.xlu0 %2469  ;;  %v12797_v59 = vpop.permute.xlu1 %2471  ;;  %2177 = vmatprep.mubr.bf16.mxu0 %v15404_v20  ;;  %v15409_v10 = vld [vmem:[#allocation22_spill] sm:$0xff] }
 0x1a1   : > { %2231 = vmatprep.subr.bf16.mxu0 %v2120_v12 }
 0x1a2   : > { %3996 = vrot.lane.b32.xlu0 %v12275_v14, %s11904_s17  ;;  %4006 = vrot.lane.b32.xlu1 %v12282_v15, %s11904_s17  ;;  %v2124_v15 = vsel %vm2114_vm3, %v12677_v35, %v12688_v51 }
 0x1a3   : > { %10799 = vmatmul.mubr.msk.bf16.vlgmr.msra.gmra.mrb[4].mxu1 %vm587_vm1, %v12505_v60 }
 0x1a4   : > { %v976_v13 = vpop.permute.xlu0 %975  ;;  %v12808_v37 = vpop.permute.xlu1 %2467  ;;  %1258 = vmatprep.mubr.bf16.mxu1 %v15404_v20 }
 0x1a5   : > { %v992_v34 = vsel %vm559_vm0, %v976_v13, %v12511_v61  ;;  %10820 = vmatmul.mubr.msk.bf16.vlgmr.msra.gmra.mrb[0].mxu0 %vm587_vm1, %v12800_v53  ;;  %v991_v14 = vsel %vm559_vm0, %v12500_v58, %v976_v13 }
 0x1a6   : > { %4008 = vrot.lane.b32.xlu0 %v12285_v16, %s11904_s17  ;;  %2876 = vrot.lane.b32.xlu1 %v12396_v25, %s11903_s2 }
 0x1a7   : > { %1226 = vmatprep.subr.bf16.mxu1 %v992_v34  ;;  %2232 = vmatpush1.bf16.msra.mxu0 %v2119_v42  ;;  %v2127_v42 = vsel %vm2114_vm3, %v12720_v36, %v12722_v0  ;;  %v2480_v34 = vsel %vm2114_vm3, %v12734_v43, %v12737_v56 }
 0x1a8   : > { %1227 = vmatpush1.bf16.msra.mxu1 %v991_v14  ;;  %v1330_v19 = vpop.permute.xlu0 %1329  ;;  %v12827_v61 = vpop.permute.xlu1 %2475  ;;  %2263 = vmatprep.mubr.bf16.mxu0 %v15404_v20 }
 0x1a9   : > { %v1355_v58 = vsel %vm1351_vm2, %v1330_v19, %v12541_v39  ;;  %v1354_v16 = vsel %vm1351_vm2, %v12524_v30, %v1330_v19  ;;  %2317 = vmatprep.subr.bf16.mxu0 %v2124_v15  ;;  %v2123_v30 = vsel %vm2114_vm3, %v12707_v31, %v12677_v35  ;;  %v15406_v39 = vld [vmem:[#allocation25_spill] sm:$0xff] }
 0x1aa   : > { %4004 = vrot.lane.b32.xlu0 %v12292_v17, %s11904_s17  ;;  %4014 = vrot.lane.b32.xlu1 %v12295_v18, %s11904_s17  ;;  %v15405_v17 = vld [vmem:[#allocation20_spill] sm:$0xff] }
 0x1ab   : > { %10801 = vmatmul.mubr.msk.bf16.vlgmr.msra.gmra.mrb[8].mxu1 %vm587_vm1, %v12505_v60  ;;  %1425 = vmatprep.subr.bf16.mxu1 %v1355_v58  ;;  %v15411_v58 = vld [vmem:[#allocation24_spill] sm:$0xff] }
 0x1ac   : > { %1426 = vmatpush1.bf16.msra.mxu1 %v1354_v16  ;;  %v12840_v9 = vpop.permute.xlu0 %2477  ;;  %v12842_v33 = vpop.permute.xlu1 %2856  ;;  %1457 = vmatprep.mubr.bf16.mxu1 %v15404_v20 }
 0x1ad   : > { %10822 = vmatmul.mubr.msk.bf16.vlgmr.msra.gmra.mrb[4].mxu0 %vm587_vm1, %v12800_v53 }
 0x1ae   : > { %4016 = vrot.lane.b32.xlu0 %v15405_v17, %s11904_s17  ;;  %3233 = vrot.lane.b32.xlu1 %v12409_v28, %s11903_s2 }
 0x1af   : > { %2318 = vmatpush1.bf16.msra.mxu0 %v2123_v30  ;;  %2349 = vmatprep.mubr.bf16.mxu0 %v15404_v20  ;;  %v2479_v30 = vsel %vm2114_vm3, %v12746_v27, %v12734_v43 }
 0x1b0   : > { %v12855_v18 = vpop.permute.xlu0 %2858  ;;  %v1338_v60 = vpop.permute.xlu1 %1337  ;;  %2403 = vmatprep.subr.bf16.mxu0 %v12722_v0  ;;  %v15410_v0 = vld [vmem:[#allocation26_spill] sm:$0xff] }
 0x1b1   : > { %v1359_v35 = vsel %vm1351_vm2, %v1338_v60, %v15406_v39  ;;  %v1358_v62 = vsel %vm1351_vm2, %v15407_v46, %v1338_v60  ;;  %v15412_v39 = vld [vmem:[#allocation27_spill] sm:$0xff]  ;;  %v12922_v46 = vld [vmem:[#allocation7 + $0x10] sm:$0xff]  }
 0x1b2   : > { %4012 = vrot.lane.b32.xlu0 %v15408_v55, %s11904_s17  ;;  %4022 = vrot.lane.b32.xlu1 %v15409_v10, %s11904_s17  ;;  %v15413_v55 = vld [vmem:[#allocation28_spill] sm:$0xff] }
 0x1b3   : > { %10805 = vmatmul.mubr.msk.bf16.vlgmr.msra.gmra.mrb[0].mxu1 %vm587_vm1, %v12583_v26  ;;  %1511 = vmatprep.subr.bf16.mxu1 %v1359_v35 }
 0x1b4   : > { %1512 = vmatpush1.bf16.msra.mxu1 %v1358_v62  ;;  %v12868_v12 = vpop.permute.xlu0 %2854  ;;  %v12870_v13 = vpop.permute.xlu1 %2864  ;;  %1543 = vmatprep.mubr.bf16.mxu1 %v15404_v20 }
 0x1b5   : > { %10824 = vmatmul.mubr.msk.bf16.vlgmr.msra.gmra.mrb[8].mxu0 %vm587_vm1, %v12800_v53 }
 0x1b6   : > { %4024 = vrot.lane.b32.xlu0 %v12634_v44, %s11904_s17  ;;  %3241 = vrot.lane.b32.xlu1 %v12439_v38, %s11903_s2 }
 0x1b7   : > { %2404 = vmatpush1.bf16.msra.mxu0 %v2127_v42  ;;  %2435 = vmatprep.mubr.bf16.mxu0 %v15404_v20 }
 0x1b8   : > { %v12886_v14 = vpop.permute.xlu0 %2866  ;;  %v1346_v15 = vpop.permute.xlu1 %1345  ;;  %2509 = vmatprep.subr.bf16.mxu0 %v2480_v34 }
 0x1b9   : > { %v1363_v19 = vsel %vm1351_vm2, %v1346_v15, %v15410_v0  ;;  %v1362_v16 = vsel %vm1351_vm2, %v15411_v58, %v1346_v15  ;;  %v12983_v15 = vld [vmem:[%s12197_s22 + $0x20] ss:$60 sps:$4 sm:$0xff]   ;;  %v13016_v58 = vld [vmem:[%s12197_s22 + $0x30] ss:$60 sps:$4 sm:$0xff]  }
 0x1ba   : > { %4020 = vrot.lane.b32.xlu0 %v12314_v21, %s11904_s17  ;;  %4399 = vrot.lane.b32.xlu1 %v12216_v1, %s11905_s26  ;;  %v2484_v1 = vsel %vm2114_vm3, %v12765_v48, %v12767_v54 }
 0x1bb   : > { %10807 = vmatmul.mubr.msk.bf16.vlgmr.msra.gmra.mrb[4].mxu1 %vm587_vm1, %v12583_v26  ;;  %1597 = vmatprep.subr.bf16.mxu1 %v1363_v19 }
 0x1bc   : > { %1598 = vmatpush1.bf16.msra.mxu1 %v1362_v16  ;;  %v12901_v17 = vpop.permute.xlu0 %2862  ;;  %v12903_v60 = vpop.permute.xlu1 %2872  ;;  %1629 = vmatprep.mubr.bf16.mxu1 %v15404_v20 }
 0x1bd   : > { %10826 = vmatmul.mubr.msk.bf16.vlgmr.msra.gmra.mrb[12].mxu0 %vm587_vm1, %v12800_v53 }
 0x1be   : > { %4401 = vrot.lane.b32.xlu0 %v12224_v3, %s11905_s26  ;;  %3249 = vrot.lane.b32.xlu1 %v12463_v45, %s11903_s2 }
 0x1bf   : > { %2510 = vmatpush1.bf16.msra.mxu0 %v2479_v30  ;;  %2541 = vmatprep.mubr.bf16.mxu0 %v15404_v20  ;;  %v13041_v30 = vld [vmem:[%s12190_s24 + $0x8] ss:$60 sps:$4 sm:$0xff]  }
 0x1c0   : > { %v12916_v21 = vpop.permute.xlu0 %2874  ;;  %v1695_v43 = vpop.permute.xlu1 %1694  ;;  %2595 = vmatprep.subr.bf16.mxu0 %v2484_v1 }
 0x1c1   : > { %v1719_v27 = vsel %vm1351_vm2, %v1695_v43, %v12603_v49  ;;  %v1718_v35 = vsel %vm1351_vm2, %v15412_v39, %v1695_v43  ;;  %v2483_v49 = vsel %vm2114_vm3, %v12779_v40, %v12765_v48  ;;  %v11654_v39 = vld [vmem:[%s12190_s24] ss:$60 sps:$4 sm:$0xff]  }
 0x1c2   : > { %4397 = vrot.lane.b32.xlu0 %v12219_v2, %s11905_s26  ;;  %4407 = vrot.lane.b32.xlu1 %v12229_v4, %s11905_s26  ;;  %v2488_v2 = vsel %vm2114_vm3, %v12795_v22, %v12797_v59 }
 0x1c3   : > { %10809 = vmatmul.mubr.msk.bf16.vlgmr.msra.gmra.mrb[8].mxu1 %vm587_vm1, %v12583_v26  ;;  %1789 = vmatprep.subr.bf16.mxu1 %v1719_v27  ;;  %v13054_v27 = vld [vmem:[#allocation8 + $0x18] sm:$0xff]  }
 0x1c4   : > { %1790 = vmatpush1.bf16.msra.mxu1 %v1718_v35  ;;  %v12930_v3 = vpop.permute.xlu0 %2870  ;;  %v12932_v62 = vpop.permute.xlu1 %2880  ;;  %1821 = vmatprep.mubr.bf16.mxu1 %v15404_v20 }
 0x1c5   : > { %10828 = vmatmul.mubr.msk.bf16.vlgmr.msra.gmra.mrb[0].mxu0 %vm587_vm1, %v12922_v46 }
 0x1c6   : > { %4409 = vrot.lane.b32.xlu0 %v12234_v5, %s11905_s26  ;;  %3634 = vrot.lane.b32.xlu1 %v12378_v23, %s11904_s17 }
 0x1c7   : > { %2596 = vmatpush1.bf16.msra.mxu0 %v2483_v49  ;;  %2627 = vmatprep.mubr.bf16.mxu0 %v15404_v20  ;;  %v2894_v49 = vsel %vm2884_vm4, %v12903_v60, %v12916_v21 }
 0x1c8   : > { %v12948_v4 = vpop.permute.xlu0 %2882  ;;  %v1703_v26 = vpop.permute.xlu1 %1702  ;;  %2681 = vmatprep.subr.bf16.mxu0 %v2488_v2  ;;  %v13079_v2 = vld [vmem:[%s12190_s24 + $0x18] ss:$60 sps:$4 sm:$0xff]  }
 0x1c9   : > { %v1723_v48 = vsel %vm1351_vm2, %v1703_v26, %v12614_v57  ;;  %v1722_v10 = vsel %vm1351_vm2, %v15413_v55, %v1703_v26  ;;  %v2487_v57 = vsel %vm2114_vm3, %v12808_v37, %v12795_v22 }
 0x1ca   : > { %4405 = vrot.lane.b32.xlu0 %v12239_v6, %s11905_s26  ;;  %4415 = vrot.lane.b32.xlu1 %v12244_v7, %s11905_s26 }
 0x1cb   : > { %10813 = vmatmul.mubr.msk.bf16.vlgmr.msra.gmra.mrb[0].mxu1 %vm587_vm1, %v12680_v29  ;;  %1875 = vmatprep.subr.bf16.mxu1 %v1723_v48 }
 0x1cc   : > { %1876 = vmatpush1.bf16.msra.mxu1 %v1722_v10  ;;  %v12960_v5 = vpop.permute.xlu0 %2878  ;;  %v12962_v42 = vpop.permute.xlu1 %3229  ;;  %1907 = vmatprep.mubr.bf16.mxu1 %v15404_v20  ;;  %v13093_v10 = vld [vmem:[%s12190_s24 + $0x10] ss:$60 sps:$4 sm:$0xff]  }
 0x1cd   : > { %10830 = vmatmul.mubr.msk.bf16.vlgmr.msra.gmra.mrb[4].mxu0 %vm587_vm1, %v12922_v46 }
 0x1ce   : > { %4417 = vrot.lane.b32.xlu0 %v12249_v8, %s11905_s26  ;;  %3642 = vrot.lane.b32.xlu1 %v12389_v24, %s11904_s17 }
 0x1cf   : > { %2682 = vmatpush1.bf16.msra.mxu0 %v2487_v57  ;;  %2713 = vmatprep.mubr.bf16.mxu0 %v15404_v20 }
 0x1d0   : > { %v12975_v6 = vpop.permute.xlu0 %3231  ;;  %v1711_v7 = vpop.permute.xlu1 %1710  ;;  %2767 = vmatprep.subr.bf16.mxu0 %v12840_v9 }
 0x1d1   : > { %v1727_v22 = vsel %vm1351_vm2, %v1711_v7, %v12624_v47  ;;  %v1726_v34 = vsel %vm1351_vm2, %v12612_v32, %v1711_v7  ;;  %v2491_v32 = vsel %vm2114_vm3, %v12827_v61, %v12840_v9  ;;  %v2898_v7 = vsel %vm2884_vm4, %v12932_v62, %v12948_v4 }
 0x1d2   : > { %4413 = vrot.lane.b32.xlu0 %v12983_v15, %s11905_s26  ;;  %4423 = vrot.lane.b32.xlu1 %v12264_v11, %s11905_s26  ;;  %v2886_v11 = vsel %vm2884_vm4, %v12842_v33, %v12855_v18 }
 0x1d3   : > { %10815 = vmatmul.mubr.msk.bf16.vlgmr.msra.gmra.mrb[4].mxu1 %vm587_vm1, %v12680_v29  ;;  %1961 = vmatprep.subr.bf16.mxu1 %v1727_v22  ;;  %v13118_v22 = vld [vmem:[%s12190_s24 + $0x28] ss:$60 sps:$4 sm:$0xff]  }
 0x1d4   : > { %1962 = vmatpush1.bf16.msra.mxu1 %v1726_v34  ;;  %v12991_v8 = vpop.permute.xlu0 %3227  ;;  %v12993_v24 = vpop.permute.xlu1 %3237  ;;  %1993 = vmatprep.mubr.bf16.mxu1 %v15404_v20 }
 0x1d5   : > { %10832 = vmatmul.mubr.msk.bf16.vlgmr.msra.gmra.mrb[8].mxu0 %vm587_vm1, %v12922_v46 }
 0x1d6   : > { %4425 = vrot.lane.b32.xlu0 %v12548_v41, %s11905_s26  ;;  %3650 = vrot.lane.b32.xlu1 %v12396_v25, %s11904_s17  ;;  %v13021_v25 = vld [vmem:[%s12190_s24 + $0x4] ss:$60 sps:$4 sm:$0xff]  }
 0x1d7   : > { %2768 = vmatpush1.bf16.msra.mxu0 %v2491_v32  ;;  %2799 = vmatprep.mubr.bf16.mxu0 %v15404_v20 }
 0x1d8   : > { %v13009_v47 = vpop.permute.xlu0 %3239  ;;  %v2093_v0 = vpop.permute.xlu1 %2092  ;;  %2916 = vmatprep.subr.bf16.mxu0 %v2886_v11  ;;  %v13132_v11 = vld [vmem:[%s12190_s24 + $0x20] ss:$60 sps:$4 sm:$0xff]  }
 0x1d9   : > { %v2118_v9 = vsel %vm2114_vm3, %v2093_v0, %v12675_v63  ;;  %v2117_v19 = vsel %vm2114_vm3, %v12638_v50, %v2093_v0  ;;  %v2885_v63 = vsel %vm2884_vm4, %v12868_v12, %v12842_v33  ;;  %v13137_v0 = vld [vmem:[%s12190_s24 + $0x34] ss:$60 sps:$4 sm:$0xff]  }
 0x1da   : > { %4421 = vrot.lane.b32.xlu0 %v13016_v58, %s11905_s26  ;;  %4767 = vrot.lane.b32.xlu1 %v13021_v25, %s11905_s26 }
 0x1db   : > { %10817 = vmatmul.mubr.msk.bf16.vlgmr.msra.gmra.mrb[8].mxu1 %vm587_vm1, %v12680_v29  ;;  %2188 = vmatprep.subr.bf16.mxu1 %v2118_v9  ;;  %v2890_v29 = vsel %vm2884_vm4, %v12870_v13, %v12886_v14 }
 0x1dc   : > { %2189 = vmatpush1.bf16.msra.mxu1 %v2117_v19  ;;  %v13030_v50 = vpop.permute.xlu0 %3235  ;;  %v13032_v16 = vpop.permute.xlu1 %3245  ;;  %2220 = vmatprep.mubr.bf16.mxu1 %v15404_v20 }
 0x1dd   : > { %10834 = vmatmul.mubr.msk.bf16.vlgmr.msra.gmra.mrb[12].mxu0 %vm587_vm1, %v12922_v46 }
 0x1de   : > { %4769 = vrot.lane.b32.xlu0 %v13041_v30, %s11905_s26  ;;  %4002 = vrot.lane.b32.xlu1 %v12409_v28, %s11904_s17  ;;  %v13059_v28 = vld [vmem:[%s12190_s24 + $0x14] ss:$60 sps:$4 sm:$0xff]  }
 0x1df   : > { %2917 = vmatpush1.bf16.msra.mxu0 %v2885_v63  ;;  %2948 = vmatprep.mubr.bf16.mxu0 %v15404_v20 }
 0x1e0   : > { %v13048_v33 = vpop.permute.xlu0 %3247  ;;  %v2101_v12 = vpop.permute.xlu1 %2100  ;;  %3002 = vmatprep.subr.bf16.mxu0 %v2890_v29  ;;  %v13168_v29 = vld [vmem:[%s12190_s24 + $0x30] ss:$60 sps:$4 sm:$0xff]  }
 0x1e1   : > { %v2122_v1 = vsel %vm2114_vm3, %v2101_v12, %v12707_v31  ;;  %v2121_v43 = vsel %vm2114_vm3, %v12659_v52, %v2101_v12  ;;  %v2889_v52 = vsel %vm2884_vm4, %v12901_v17, %v12870_v13 }
 0x1e2   : > { %4765 = vrot.lane.b32.xlu0 %v11654_v39, %s11905_s26  ;;  %4775 = vrot.lane.b32.xlu1 %v13059_v28, %s11905_s26 }
 0x1e3   : > { %10821 = vmatmul.mubr.msk.bf16.vlgmr.msra.gmra.mrb[0].mxu1 %vm587_vm1, %v12800_v53  ;;  %2274 = vmatprep.subr.bf16.mxu1 %v2122_v1  ;;  %v3262_v1 = vsel %vm2884_vm4, %v12993_v24, %v13009_v47 }
 0x1e4   : > { %2275 = vmatpush1.bf16.msra.mxu1 %v2121_v43  ;;  %v13065_v31 = vpop.permute.xlu0 %3243  ;;  %v13067_v35 = vpop.permute.xlu1 %3253  ;;  %2306 = vmatprep.mubr.bf16.mxu1 %v15404_v20  ;;  %v13193_v43 = vld [vmem:[%s12197_s22 + $0xc] ss:$60 sps:$4 sm:$0xff]  }
 0x1e5   : > { %10837 = vmatmul.mubr.msk.bf16.vlgmr.msra.gmra.mrb[0].mxu0 %vm587_vm1, %v13054_v27 }
 0x1e6   : > { %4777 = vrot.lane.b32.xlu0 %v13079_v2, %s11905_s26  ;;  %4010 = vrot.lane.b32.xlu1 %v12439_v38, %s11904_s17  ;;  %v13098_v38 = vld [vmem:[%s12190_s24 + $0x24] ss:$60 sps:$4 sm:$0xff]  }
 0x1e7   : > { %3003 = vmatpush1.bf16.msra.mxu0 %v2889_v52  ;;  %3034 = vmatprep.mubr.bf16.mxu0 %v15404_v20 }
 0x1e8   : > { %v13086_v13 = vpop.permute.xlu0 %3255  ;;  %v2109_v26 = vpop.permute.xlu1 %2108  ;;  %3088 = vmatprep.subr.bf16.mxu0 %v2894_v49 }
 0x1e9   : > { %v2126_v48 = vsel %vm2114_vm3, %v2109_v26, %v12720_v36  ;;  %v2125_v55 = vsel %vm2114_vm3, %v12688_v51, %v2109_v26  ;;  %v2893_v51 = vsel %vm2884_vm4, %v12930_v3, %v12903_v60  ;;  %v13209_v26 = vld [vmem:[#allocation7 + $0x18] sm:$0xff]  }
 0x1ea   : > { %4773 = vrot.lane.b32.xlu0 %v13093_v10, %s11905_s26  ;;  %4783 = vrot.lane.b32.xlu1 %v13098_v38, %s11905_s26 }
 0x1eb   : > { %10823 = vmatmul.mubr.msk.bf16.vlgmr.msra.gmra.mrb[4].mxu1 %vm587_vm1, %v12800_v53  ;;  %2360 = vmatprep.subr.bf16.mxu1 %v2126_v48  ;;  %v13212_v48 = vld [vmem:[%s12197_s22 + $0x4] ss:$60 sps:$4 sm:$0xff]  }
 0x1ec   : > { %2361 = vmatpush1.bf16.msra.mxu1 %v2125_v55  ;;  %v13104_v57 = vpop.permute.xlu0 %3251  ;;  %v13106_v36 = vpop.permute.xlu1 %3630  ;;  %2392 = vmatprep.mubr.bf16.mxu1 %v15404_v20  ;;  %v13217_v55 = vld [vmem:[%s12197_s22 + $0x18] ss:$60 sps:$4 sm:$0xff]  }
 0x1ed   : > { %10839 = vmatmul.mubr.msk.bf16.vlgmr.msra.gmra.mrb[4].mxu0 %vm587_vm1, %v13054_v27 }
 0x1ee   : > { %4785 = vrot.lane.b32.xlu0 %v13118_v22, %s11905_s26  ;;  %4018 = vrot.lane.b32.xlu1 %v12463_v45, %s11904_s17 }
 0x1ef   : > { %3089 = vmatpush1.bf16.msra.mxu0 %v2893_v51  ;;  %3120 = vmatprep.mubr.bf16.mxu0 %v15404_v20  ;;  %v3261_v51 = vsel %vm2884_vm4, %v13030_v50, %v12993_v24 }
 0x1f0   : > { %v13125_v60 = vpop.permute.xlu0 %3632  ;;  %v2458_v34 = vpop.permute.xlu1 %2457  ;;  %3174 = vmatprep.subr.bf16.mxu0 %v2898_v7  ;;  %v3266_v7 = vsel %vm2884_vm4, %v13032_v16, %v13048_v33 }
 0x1f1   : > { %v2482_v32 = vsel %vm2114_vm3, %v2458_v34, %v12779_v40  ;;  %v2481_v4 = vsel %vm2114_vm3, %v12737_v56, %v2458_v34  ;;  %v2897_v56 = vsel %vm2884_vm4, %v12960_v5, %v12932_v62  ;;  %v13239_v34 = vld [vmem:[%s12197_s22 + $0x2c] ss:$60 sps:$4 sm:$0xff]  }
 0x1f2   : > { %4781 = vrot.lane.b32.xlu0 %v13132_v11, %s11905_s26  ;;  %4791 = vrot.lane.b32.xlu1 %v13137_v0, %s11905_s26 }
 0x1f3   : > { %10825 = vmatmul.mubr.msk.bf16.vlgmr.msra.gmra.mrb[8].mxu1 %vm587_vm1, %v12800_v53  ;;  %2552 = vmatprep.subr.bf16.mxu1 %v2482_v32  ;;  %v3258_v53 = vsel %vm2884_vm4, %v12962_v42, %v12975_v6 }
 0x1f4   : > { %2553 = vmatpush1.bf16.msra.mxu1 %v2481_v4  ;;  %v13143_v45 = vpop.permute.xlu0 %3628  ;;  %v13145_v40 = vpop.permute.xlu1 %3638  ;;  %2584 = vmatprep.mubr.bf16.mxu1 %v15404_v20 }
 0x1f5   : > { %10841 = vmatmul.mubr.msk.bf16.vlgmr.msra.gmra.mrb[8].mxu0 %vm587_vm1, %v13054_v27 }
 0x1f6   : > { %4793 = vrot.lane.b32.xlu0 %v12634_v44, %s11905_s26  ;;  %4403 = vrot.lane.b32.xlu1 %v12378_v23, %s11905_s26  ;;  %v13173_v23 = vld [vmem:[%s12197_s22 + $0x8] ss:$60 sps:$4 sm:$0xff]  }
 0x1f7   : > { %3175 = vmatpush1.bf16.msra.mxu0 %v2897_v56  ;;  %3206 = vmatprep.mubr.bf16.mxu0 %v15404_v20 }
 0x1f8   : > { %v13161_v9 = vpop.permute.xlu0 %3640  ;;  %v2466_v62 = vpop.permute.xlu1 %2465  ;;  %3288 = vmatprep.subr.bf16.mxu0 %v3258_v53  ;;  %v13251_v53 = vld [vmem:[%s12197_s22 + $0x14] ss:$60 sps:$4 sm:$0xff]  }
 0x1f9   : > { %v2486_v19 = vsel %vm2114_vm3, %v2466_v62, %v12808_v37  ;;  %v2485_v63 = vsel %vm2114_vm3, %v12767_v54, %v2466_v62  ;;  %v3257_v54 = vsel %vm2884_vm4, %v12991_v8, %v12962_v42  ;;  %v13198_v42 = vld [vmem:[%s12197_s22 + $0x1c] ss:$60 sps:$4 sm:$0xff]   ;;  %v13256_v62 = vld [vmem:[%s12197_s22 + $0x28] ss:$60 sps:$4 sm:$0xff]  }
 0x1fa   : > { %4789 = vrot.lane.b32.xlu0 %v13168_v29, %s11905_s26  ;;  %5168 = vrot.lane.b32.xlu1 %v13173_v23, %s11906_s25 }
 0x1fb   : > { %10829 = vmatmul.mubr.msk.bf16.vlgmr.msra.gmra.mrb[0].mxu1 %vm587_vm1, %v12922_v46  ;;  %2638 = vmatprep.subr.bf16.mxu1 %v2486_v19 }
 0x1fc   : > { %2639 = vmatpush1.bf16.msra.mxu1 %v2485_v63  ;;  %v13182_v37 = vpop.permute.xlu0 %3636  ;;  %v13184_v12 = vpop.permute.xlu1 %3646  ;;  %2670 = vmatprep.mubr.bf16.mxu1 %v15404_v20  ;;  %v13278_v63 = vld [vmem:[%s12190_s24 + $0xc] ss:$60 sps:$4 sm:$0xff]  }
 0x1fd   : > { %10843 = vmatmul.mubr.msk.bf16.vlgmr.msra.gmra.mrb[12].mxu0 %vm587_vm1, %v13054_v27 }
 0x1fe   : > { %5170 = vrot.lane.b32.xlu0 %v13193_v43, %s11906_s25  ;;  %4411 = vrot.lane.b32.xlu1 %v13198_v42, %s11905_s26 }
 0x1ff   : > { %3289 = vmatpush1.bf16.msra.mxu0 %v3257_v54  ;;  %3320 = vmatprep.mubr.bf16.mxu0 %v15404_v20 }
 0x200   : > { %v13203_v8 = vpop.permute.xlu0 %3648  ;;  %v2474_v39 = vpop.permute.xlu1 %2473  ;;  %3374 = vmatprep.subr.bf16.mxu0 %v3262_v1 }
 0x201   : > { %v2490_v52 = vsel %vm2114_vm3, %v2474_v39, %v12827_v61  ;;  %v2489_v49 = vsel %vm2114_vm3, %v12797_v59, %v2474_v39  ;;  %v13290_v39 = vld [vmem:[%s12197_s22 + $0x24] ss:$60 sps:$4 sm:$0xff]  }
 0x202   : > { %5166 = vrot.lane.b32.xlu0 %v13212_v48, %s11906_s25  ;;  %5176 = vrot.lane.b32.xlu1 %v13217_v55, %s11906_s25 }
 0x203   : > { %10831 = vmatmul.mubr.msk.bf16.vlgmr.msra.gmra.mrb[4].mxu1 %vm587_vm1, %v12922_v46  ;;  %2724 = vmatprep.subr.bf16.mxu1 %v2490_v52  ;;  %v13297_v52 = vld [vmem:[%s12190_s24 + $0x1c] ss:$60 sps:$4 sm:$0xff]  }
 0x204   : > { %2725 = vmatpush1.bf16.msra.mxu1 %v2489_v49  ;;  %v13223_v61 = vpop.permute.xlu0 %3644  ;;  %v13225_v59 = vpop.permute.xlu1 %3654  ;;  %2756 = vmatprep.mubr.bf16.mxu1 %v15404_v20 }
 0x205   : > { %10846 = vmatmul.mubr.msk.bf16.vlgmr.msra.gmra.mrb[0].mxu0 %vm587_vm1, %v13209_v26 }
 0x206   : > { %5178 = vrot.lane.b32.xlu0 %v13198_v42, %s11906_s25  ;;  %4419 = vrot.lane.b32.xlu1 %v13239_v34, %s11905_s26 }
 0x207   : > { %3375 = vmatpush1.bf16.msra.mxu0 %v3261_v51  ;;  %3406 = vmatprep.mubr.bf16.mxu0 %v15404_v20  ;;  %v3660_v51 = vsel %vm3658_vm5, %v13106_v36, %v13125_v60 }
 0x208   : > { %v13244_v24 = vpop.permute.xlu0 %3656  ;;  %v2861_v32 = vpop.permute.xlu1 %2860  ;;  %3460 = vmatprep.subr.bf16.mxu0 %v3266_v7  ;;  %v13315_v7 = vld [vmem:[%s12197_s22 + $0x34] ss:$60 sps:$4 sm:$0xff]  }
 0x209   : > { %v2888_v4 = vsel %vm2884_vm4, %v2861_v32, %v12901_v17  ;;  %v2887_v56 = vsel %vm2884_vm4, %v12855_v18, %v2861_v32  ;;  %v3265_v18 = vsel %vm2884_vm4, %v13065_v31, %v13032_v16 }
 0x20a   : > { %5174 = vrot.lane.b32.xlu0 %v13251_v53, %s11906_s25  ;;  %5184 = vrot.lane.b32.xlu1 %v13256_v62, %s11906_s25 }
 0x20b   : > { %10833 = vmatmul.mubr.msk.bf16.vlgmr.msra.gmra.mrb[8].mxu1 %vm587_vm1, %v12922_v46  ;;  %2959 = vmatprep.subr.bf16.mxu1 %v2888_v4  ;;  %v3270_v46 = vsel %vm2884_vm4, %v13067_v35, %v13086_v13 }
 0x20c   : > { %2960 = vmatpush1.bf16.msra.mxu1 %v2887_v56  ;;  %v13262_v17 = vpop.permute.xlu0 %3652  ;;  %v13264_v19 = vpop.permute.xlu1 %3998  ;;  %2991 = vmatprep.mubr.bf16.mxu1 %v15404_v20 }
 0x20d   : > { %10848 = vmatmul.mubr.msk.bf16.vlgmr.msra.gmra.mrb[4].mxu0 %vm587_vm1, %v13209_v26 }
 0x20e   : > { %5186 = vrot.lane.b32.xlu0 %v13239_v34, %s11906_s25  ;;  %4771 = vrot.lane.b32.xlu1 %v13278_v63, %s11905_s26 }
 0x20f   : > { %3461 = vmatpush1.bf16.msra.mxu0 %v3265_v18  ;;  %3492 = vmatprep.mubr.bf16.mxu0 %v15404_v20  ;;  %v3659_v18 = vsel %vm3658_vm5, %v13143_v45, %v13106_v36  ;;  %v13348_v36 = vld [vmem:[%s12190_s24 + $0x2c] ss:$60 sps:$4 sm:$0xff]  }
 0x210   : > { %v13283_v16 = vpop.permute.xlu0 %4000  ;;  %v2869_v54 = vpop.permute.xlu1 %2868  ;;  %3546 = vmatprep.subr.bf16.mxu0 %v3270_v46 }
 0x211   : > { %v2892_v1 = vsel %vm2884_vm4, %v2869_v54, %v12930_v3  ;;  %v2891_v13 = vsel %vm2884_vm4, %v12886_v14, %v2869_v54  ;;  %v3269_v3 = vsel %vm2884_vm4, %v13104_v57, %v13067_v35 }
 0x212   : > { %5182 = vrot.lane.b32.xlu0 %v13290_v39, %s11906_s25  ;;  %3045 = vmatprep.subr.bf16.mxu1 %v2892_v1 }
 0x213   : > { %10838 = vmatmul.mubr.msk.bf16.vlgmr.msra.gmra.mrb[0].mxu1 %vm587_vm1, %v13054_v27  ;;  %4779 = vrot.lane.b32.xlu1 %v13297_v52, %s11905_s26 }
 0x214   : > { %3046 = vmatpush1.bf16.msra.mxu1 %v2891_v13  ;;  %v13304_v14 = vpop.permute.xlu0 %3996  ;;  %v13306_v49 = vpop.permute.xlu1 %4006  ;;  %3077 = vmatprep.mubr.bf16.mxu1 %v15404_v20  ;;  %v13361_v13 = vld [vmem:[#allocation8 + $0x20] sm:$0xff]  }
 0x215   : > { %10850 = vmatmul.mubr.msk.bf16.vlgmr.msra.gmra.mrb[8].mxu0 %vm587_vm1, %v13209_v26 }
 0x216   : > { %5190 = vrot.lane.b32.xlu0 %v13315_v7, %s11906_s25  ;;  %3547 = vmatpush1.bf16.msra.mxu0 %v3269_v3  ;;  %v3663_v3 = vsel %vm3658_vm5, %v13182_v37, %v13145_v40 }
 0x217   : > { %3578 = vmatprep.mubr.bf16.mxu0 %v15404_v20  ;;  %5192 = vrot.lane.b32.xlu1 %v12548_v41, %s11906_s25 }
 0x218   : > { %v13322_v35 = vpop.permute.xlu0 %4008  ;;  %v2877_v32 = vpop.permute.xlu1 %2876  ;;  %3690 = vmatprep.subr.bf16.mxu0 %v3660_v51  ;;  %v13383_v51 = vld [vmem:[%s12197_s22 + $0x10] ss:$60 sps:$4 sm:$0xff]  }
 0x219   : > { %v2896_v4 = vsel %vm2884_vm4, %v2877_v32, %v12960_v5  ;;  %v2895_v56 = vsel %vm2884_vm4, %v12916_v21, %v2877_v32  ;;  %v3664_v21 = vsel %vm3658_vm5, %v13145_v40, %v13161_v9 }
 0x21a   : > { %5533 = vrot.lane.b32.xlu0 %v13041_v30, %s11906_s25  ;;  %3131 = vmatprep.subr.bf16.mxu1 %v2896_v4 }
 0x21b   : > { %10840 = vmatmul.mubr.msk.bf16.vlgmr.msra.gmra.mrb[4].mxu1 %vm587_vm1, %v13054_v27  ;;  %5535 = vrot.lane.b32.xlu1 %v13278_v63, %s11906_s25 }
 0x21c   : > { %3132 = vmatpush1.bf16.msra.mxu1 %v2895_v56  ;;  %v13337_v41 = vpop.permute.xlu0 %4004  ;;  %v13339_v5 = vpop.permute.xlu1 %4014  ;;  %3163 = vmatprep.mubr.bf16.mxu1 %v15404_v20 }
 0x21d   : > { %10852 = vmatmul.mubr.msk.bf16.vlgmr.msra.gmra.mrb[12].mxu0 %vm587_vm1, %v13209_v26 }
 0x21e   : > { %4787 = vrot.lane.b32.xlu0 %v13348_v36, %s11905_s26  ;;  %3691 = vmatpush1.bf16.msra.mxu0 %v3659_v18  ;;  %v3667_v18 = vsel %vm3658_vm5, %v13223_v61, %v13184_v12 }
 0x21f   : > { %3722 = vmatprep.mubr.bf16.mxu0 %v15404_v20  ;;  %5531 = vrot.lane.b32.xlu1 %v13021_v25, %s11906_s25 }
 0x220   : > { %v13355_v45 = vpop.permute.xlu0 %4016  ;;  %v3234_v46 = vpop.permute.xlu1 %3233  ;;  %3776 = vmatprep.subr.bf16.mxu0 %v3664_v21 }
 0x221   : > { %v3260_v54 = vsel %vm2884_vm4, %v3234_v46, %v13030_v50  ;;  %v3259_v1 = vsel %vm2884_vm4, %v12975_v6, %v3234_v46 }
 0x222   : > { %3331 = vmatprep.subr.bf16.mxu1 %v3260_v54  ;;  %5541 = vrot.lane.b32.xlu0 %v13079_v2, %s11906_s25 }
 0x223   : > { %10842 = vmatmul.mubr.msk.bf16.vlgmr.msra.gmra.mrb[8].mxu1 %vm587_vm1, %v13054_v27  ;;  %5543 = vrot.lane.b32.xlu1 %v13297_v52, %s11906_s25  ;;  %v3668_v27 = vsel %vm3658_vm5, %v13184_v12, %v13203_v8 }
 0x224   : > { %3332 = vmatpush1.bf16.msra.mxu1 %v3259_v1  ;;  %v13372_v50 = vpop.permute.xlu0 %4012  ;;  %v13374_v6 = vpop.permute.xlu1 %4022  ;;  %3363 = vmatprep.mubr.bf16.mxu1 %v15404_v20 }
 0x225   : > { %10854 = vmatmul.mubr.msk.bf16.vlgmr.msra.gmra.mrb[0].mxu0 %vm587_vm1, %v13361_v13 }
 0x226   : > { %3777 = vmatpush1.bf16.msra.mxu0 %v3663_v3  ;;  %5172 = vrot.lane.b32.xlu0 %v13383_v51, %s11906_s25 }
 0x227   : > { %3808 = vmatprep.mubr.bf16.mxu0 %v15404_v20  ;;  %5539 = vrot.lane.b32.xlu1 %v13059_v28, %s11906_s25 }
 0x228   : > { %v13390_v40 = vpop.permute.xlu0 %4024  ;;  %v3242_v32 = vpop.permute.xlu1 %3241  ;;  %3862 = vmatprep.subr.bf16.mxu0 %v3668_v27 }
 0x229   : > { %v3264_v4 = vsel %vm2884_vm4, %v3242_v32, %v13065_v31  ;;  %v3263_v56 = vsel %vm2884_vm4, %v13009_v47, %v3242_v32  ;;  %v3672_v47 = vsel %vm3658_vm5, %v13225_v59, %v13244_v24  ;;  %v3671_v24 = vsel %vm3658_vm5, %v13262_v17, %v13225_v59 }
 0x22a   : > { %3417 = vmatprep.subr.bf16.mxu1 %v3264_v4  ;;  %5549 = vrot.lane.b32.xlu0 %v13118_v22, %s11906_s25 }
 0x22b   : > { %10847 = vmatmul.mubr.msk.bf16.vlgmr.msra.gmra.mrb[0].mxu1 %vm587_vm1, %v13209_v26  ;;  %5551 = vrot.lane.b32.xlu1 %v13348_v36, %s11906_s25 }
 0x22c   : > { %3418 = vmatpush1.bf16.msra.mxu1 %v3263_v56  ;;  %v13405_v21 = vpop.permute.xlu0 %4020  ;;  %v13407_v31 = vpop.permute.xlu1 %4399  ;;  %3449 = vmatprep.mubr.bf16.mxu1 %v15404_v20  ;;  %v4026_v56 = vsel %vm3658_vm5, %v13304_v14, %v13264_v19 }
 0x22d   : > { %10856 = vmatmul.mubr.msk.bf16.vlgmr.msra.gmra.mrb[4].mxu0 %vm587_vm1, %v13361_v13 }
 0x22e   : > { %3863 = vmatpush1.bf16.msra.mxu0 %v3667_v18  ;;  %5180 = vrot.lane.b32.xlu0 %v12983_v15, %s11906_s25 }
 0x22f   : > { %3894 = vmatprep.mubr.bf16.mxu0 %v15404_v20  ;;  %5547 = vrot.lane.b32.xlu1 %v13098_v38, %s11906_s25 }
 0x230   : > { %v13420_v12 = vpop.permute.xlu0 %4401  ;;  %v3250_v46 = vpop.permute.xlu1 %3249  ;;  %3948 = vmatprep.subr.bf16.mxu0 %v3672_v47  ;;  %v13486_v47 = vld [vmem:[#allocation7 + $0x20] sm:$0xff]  }
 0x231   : > { %v3268_v54 = vsel %vm2884_vm4, %v3250_v46, %v13104_v57  ;;  %v3267_v1 = vsel %vm2884_vm4, %v13048_v33, %v3250_v46  ;;  %v4027_v33 = vsel %vm3658_vm5, %v13264_v19, %v13283_v16  ;;  %v4030_v46 = vsel %vm3658_vm5, %v13337_v41, %v13306_v49 }
 0x232   : > { %3503 = vmatprep.subr.bf16.mxu1 %v3268_v54  ;;  %5188 = vrot.lane.b32.xlu0 %v13016_v58, %s11906_s25  ;;  %v4035_v54 = vsel %vm3658_vm5, %v13339_v5, %v13355_v45 }
 0x233   : > { %10849 = vmatmul.mubr.msk.bf16.vlgmr.msra.gmra.mrb[4].mxu1 %vm587_vm1, %v13209_v26  ;;  %5555 = vrot.lane.b32.xlu1 %v13137_v0, %s11906_s25 }
 0x234   : > { %3504 = vmatpush1.bf16.msra.mxu1 %v3267_v1  ;;  %v13435_v3 = vpop.permute.xlu0 %4397  ;;  %v13437_v57 = vpop.permute.xlu1 %4407  ;;  %3535 = vmatprep.mubr.bf16.mxu1 %v15404_v20 }
 0x235   : > { %10858 = vmatmul.mubr.msk.bf16.vlgmr.msra.gmra.mrb[8].mxu0 %vm587_vm1, %v13361_v13 }
 0x236   : > { %3949 = vmatpush1.bf16.msra.mxu0 %v3671_v24  ;;  %3980 = vmatprep.mubr.bf16.mxu0 %v15404_v20 }
 0x237   : > { %5557 = vrot.lane.b32.xlu0 %v12634_v44, %s11906_s25  ;;  %5931 = vrot.lane.b32.xlu1 %v13173_v23, %s11907_s23 }
 0x238   : > { %v13450_v59 = vpop.permute.xlu0 %4409  ;;  %v3635_v27 = vpop.permute.xlu1 %3634  ;;  %4057 = vmatprep.subr.bf16.mxu0 %v4027_v33 }
 0x239   : > { %v3662_v32 = vsel %vm3658_vm5, %v3635_v27, %v13182_v37  ;;  %v3661_v4 = vsel %vm3658_vm5, %v13125_v60, %v3635_v27  ;;  %v4031_v60 = vsel %vm3658_vm5, %v13306_v49, %v13322_v35  ;;  %v4034_v27 = vsel %vm3658_vm5, %v13372_v50, %v13339_v5 }
 0x23a   : > { %3733 = vmatprep.subr.bf16.mxu1 %v3662_v32 }
 0x23b   : > { %10851 = vmatmul.mubr.msk.bf16.vlgmr.msra.gmra.mrb[8].mxu1 %vm587_vm1, %v13209_v26  ;;  %5933 = vrot.lane.b32.xlu0 %v13193_v43, %s11907_s23 }
 0x23c   : > { %3734 = vmatpush1.bf16.msra.mxu1 %v3661_v4  ;;  %v13463_v44 = vpop.permute.xlu0 %4405  ;;  %v13465_v18 = vpop.permute.xlu1 %4415  ;;  %3765 = vmatprep.mubr.bf16.mxu1 %v15404_v20 }
 0x23d   : > { %10860 = vmatmul.mubr.msk.bf16.vlgmr.msra.gmra.mrb[12].mxu0 %vm587_vm1, %v13361_v13  ;;  %5537 = vrot.lane.b32.xlu1 %v13093_v10, %s11906_s25 }
 0x23e   : > { %4058 = vmatpush1.bf16.msra.mxu0 %v4026_v56  ;;  %4089 = vmatprep.mubr.bf16.mxu0 %v15404_v20 }
 0x23f   : > { %5929 = vrot.lane.b32.xlu0 %v13212_v48, %s11907_s23  ;;  %4143 = vmatprep.subr.bf16.mxu0 %v4031_v60  ;;  %v4038_v60 = vsel %vm3658_vm5, %v13405_v21, %v13374_v6 }
 0x240   : > { %v13478_v37 = vpop.permute.xlu0 %4417  ;;  %v3643_v26 = vpop.permute.xlu1 %3642 }
 0x241   : > { %v3666_v19 = vsel %vm3658_vm5, %v3643_v26, %v13223_v61  ;;  %v3665_v14 = vsel %vm3658_vm5, %v13161_v9, %v3643_v26  ;;  %5939 = vrot.lane.b32.xlu1 %v13217_v55, %s11907_s23 }
 0x242   : > { %3819 = vmatprep.subr.bf16.mxu1 %v3666_v19 }
 0x243   : > { %10855 = vmatmul.mubr.msk.bf16.vlgmr.msra.gmra.mrb[0].mxu1 %vm587_vm1, %v13361_v13  ;;  %5941 = vrot.lane.b32.xlu0 %v13198_v42, %s11907_s23 }
 0x244   : > { %3820 = vmatpush1.bf16.msra.mxu1 %v3665_v14  ;;  %v13495_v61 = vpop.permute.xlu0 %4413  ;;  %v13497_v9 = vpop.permute.xlu1 %4423  ;;  %3851 = vmatprep.mubr.bf16.mxu1 %v15404_v20 }
 0x245   : > { %10862 = vmatmul.mubr.msk.bf16.vlgmr.msra.gmra.mrb[0].mxu0 %vm587_vm1, %v13486_v47  ;;  %5545 = vrot.lane.b32.xlu1 %v13132_v11, %s11906_s25 }
 0x246   : > { %4144 = vmatpush1.bf16.msra.mxu0 %v4030_v46  ;;  %4175 = vmatprep.mubr.bf16.mxu0 %v15404_v20 }
 0x247   : > { %5937 = vrot.lane.b32.xlu0 %v13251_v53, %s11907_s23  ;;  %4229 = vmatprep.subr.bf16.mxu0 %v4035_v54  ;;  %v4428_v54 = vsel %vm4427_vm6, %v13435_v3, %v13407_v31 }
 0x248   : > { %v13510_v49 = vpop.permute.xlu0 %4425  ;;  %v3651_v1 = vpop.permute.xlu1 %3650 }
 0x249   : > { %v3670_v24 = vsel %vm3658_vm5, %v3651_v1, %v13262_v17  ;;  %v3669_v33 = vsel %vm3658_vm5, %v13203_v8, %v3651_v1  ;;  %5947 = vrot.lane.b32.xlu1 %v13256_v62, %s11907_s23  ;;  %v4039_v8 = vsel %vm3658_vm5, %v13374_v6, %v13390_v40 }
 0x24a   : > { %3905 = vmatprep.subr.bf16.mxu1 %v3670_v24 }
 0x24b   : > { %10857 = vmatmul.mubr.msk.bf16.vlgmr.msra.gmra.mrb[4].mxu1 %vm587_vm1, %v13361_v13  ;;  %5949 = vrot.lane.b32.xlu0 %v13239_v34, %s11907_s23 }
 0x24c   : > { %3906 = vmatpush1.bf16.msra.mxu1 %v3669_v33  ;;  %v13525_v32 = vpop.permute.xlu0 %4421  ;;  %v13527_v17 = vpop.permute.xlu1 %4767  ;;  %3937 = vmatprep.mubr.bf16.mxu1 %v15404_v20 }
 0x24d   : > { %10864 = vmatmul.mubr.msk.bf16.vlgmr.msra.gmra.mrb[4].mxu0 %vm587_vm1, %v13486_v47  ;;  %5553 = vrot.lane.b32.xlu1 %v13168_v29, %s11906_s25 }
 0x24e   : > { %4230 = vmatpush1.bf16.msra.mxu0 %v4034_v27  ;;  %4261 = vmatprep.mubr.bf16.mxu0 %v15404_v20  ;;  %v13609_v27 = vld [vmem:[#allocation8 + $0x28] sm:$0xff]  }
 0x24f   : > { %5945 = vrot.lane.b32.xlu0 %v13290_v39, %s11907_s23  ;;  %4315 = vmatprep.subr.bf16.mxu0 %v4039_v8  ;;  %v4432_v8 = vsel %vm4427_vm6, %v13463_v44, %v13437_v57 }
 0x250   : > { %v13540_v5 = vpop.permute.xlu0 %4769  ;;  %v4003_v4 = vpop.permute.xlu1 %4002 }
 0x251   : > { %v4029_v40 = vsel %vm3658_vm5, %v4003_v4, %v13337_v41  ;;  %v4028_v56 = vsel %vm3658_vm5, %v13283_v16, %v4003_v4  ;;  %5935 = vrot.lane.b32.xlu1 %v13383_v51, %s11907_s23  ;;  %v4429_v16 = vsel %vm4427_vm6, %v13407_v31, %v13420_v12  ;;  %v4437_v4 = vsel %vm4427_vm6, %v13465_v18, %v13478_v37 }
 0x252   : > { %4100 = vmatprep.subr.bf16.mxu1 %v4029_v40 }
 0x253   : > { %10859 = vmatmul.mubr.msk.bf16.vlgmr.msra.gmra.mrb[8].mxu1 %vm587_vm1, %v13361_v13  ;;  %5953 = vrot.lane.b32.xlu0 %v13315_v7, %s11907_s23  ;;  %v13566_v13 = vld [vmem:[%s12197_s22 + $0x38] ss:$60 sps:$4 sm:$0xff]  }
 0x254   : > { %4101 = vmatpush1.bf16.msra.mxu1 %v4028_v56  ;;  %v13555_v26 = vpop.permute.xlu0 %4765  ;;  %v13557_v41 = vpop.permute.xlu1 %4775  ;;  %4132 = vmatprep.mubr.bf16.mxu1 %v15404_v20 }
 0x255   : > { %10866 = vmatmul.mubr.msk.bf16.vlgmr.msra.gmra.mrb[8].mxu0 %vm587_vm1, %v13486_v47  ;;  %5955 = vrot.lane.b32.xlu1 %v13566_v13, %s11907_s23 }
 0x256   : > { %4316 = vmatpush1.bf16.msra.mxu0 %v4038_v60  ;;  %4347 = vmatprep.mubr.bf16.mxu0 %v15404_v20 }
 0x257   : > { %6296 = vrot.lane.b32.xlu0 %v13041_v30, %s11907_s23  ;;  %4459 = vmatprep.subr.bf16.mxu0 %v4429_v16  ;;  %v4436_v16 = vsel %vm4427_vm6, %v13495_v61, %v13465_v18 }
 0x258   : > { %v13573_v6 = vpop.permute.xlu0 %4777  ;;  %v4011_v19 = vpop.permute.xlu1 %4010 }
 0x259   : > { %v4033_v14 = vsel %vm3658_vm5, %v4011_v19, %v13372_v50  ;;  %v4032_v46 = vsel %vm3658_vm5, %v13322_v35, %v4011_v19  ;;  %6298 = vrot.lane.b32.xlu1 %v13278_v63, %s11907_s23  ;;  %v4433_v35 = vsel %vm4427_vm6, %v13437_v57, %v13450_v59 }
 0x25a   : > { %4186 = vmatprep.subr.bf16.mxu1 %v4033_v14 }
 0x25b   : > { %10863 = vmatmul.mubr.msk.bf16.vlgmr.msra.gmra.mrb[0].mxu1 %vm587_vm1, %v13486_v47  ;;  %5943 = vrot.lane.b32.xlu0 %v12983_v15, %s11907_s23 }
 0x25c   : > { %4187 = vmatpush1.bf16.msra.mxu1 %v4032_v46  ;;  %v13588_v1 = vpop.permute.xlu0 %4773  ;;  %v13590_v50 = vpop.permute.xlu1 %4783  ;;  %4218 = vmatprep.mubr.bf16.mxu1 %v15404_v20  ;;  %v4440_v46 = vsel %vm4427_vm6, %v13525_v32, %v13497_v9 }
 0x25d   : > { %10868 = vmatmul.mubr.msk.bf16.vlgmr.msra.gmra.mrb[12].mxu0 %vm587_vm1, %v13486_v47  ;;  %6294 = vrot.lane.b32.xlu1 %v13021_v25, %s11907_s23 }
 0x25e   : > { %4460 = vmatpush1.bf16.msra.mxu0 %v4428_v54  ;;  %4491 = vmatprep.mubr.bf16.mxu0 %v15404_v20  ;;  %v13679_v54 = vld [vmem:[%s12190_s24 + $0x38] ss:$60 sps:$4 sm:$0xff]  }
 0x25f   : > { %6304 = vrot.lane.b32.xlu0 %v13079_v2, %s11907_s23  ;;  %4545 = vmatprep.subr.bf16.mxu0 %v4433_v35  ;;  %v4796_v35 = vsel %vm4427_vm6, %v13527_v17, %v13540_v5 }
 0x260   : > { %v13603_v31 = vpop.permute.xlu0 %4785  ;;  %v4019_v3 = vpop.permute.xlu1 %4018 }
 0x261   : > { %v4037_v24 = vsel %vm3658_vm5, %v4019_v3, %v13405_v21  ;;  %v4036_v33 = vsel %vm3658_vm5, %v13355_v45, %v4019_v3  ;;  %6306 = vrot.lane.b32.xlu1 %v13297_v52, %s11907_s23 }
 0x262   : > { %4272 = vmatprep.subr.bf16.mxu1 %v4037_v24 }
 0x263   : > { %10865 = vmatmul.mubr.msk.bf16.vlgmr.msra.gmra.mrb[4].mxu1 %vm587_vm1, %v13486_v47  ;;  %5951 = vrot.lane.b32.xlu0 %v13016_v58, %s11907_s23 }
 0x264   : > { %4273 = vmatpush1.bf16.msra.mxu1 %v4036_v33  ;;  %v13620_v21 = vpop.permute.xlu0 %4781  ;;  %v13622_v45 = vpop.permute.xlu1 %4791  ;;  %4304 = vmatprep.mubr.bf16.mxu1 %v15404_v20 }
 0x265   : > { %10870 = vmatmul.mubr.msk.bf16.vlgmr.msra.gmra.mrb[0].mxu0 %vm587_vm1, %v13609_v27  ;;  %6302 = vrot.lane.b32.xlu1 %v13059_v28, %s11907_s23 }
 0x266   : > { %4546 = vmatpush1.bf16.msra.mxu0 %v4432_v8  ;;  %4577 = vmatprep.mubr.bf16.mxu0 %v15404_v20 }
 0x267   : > { %6312 = vrot.lane.b32.xlu0 %v13118_v22, %s11907_s23  ;;  %4631 = vmatprep.subr.bf16.mxu0 %v4437_v4  ;;  %v13734_v4 = vld [vmem:[#allocation7 + $0x28] sm:$0xff]  }
 0x268   : > { %v13635_v57 = vpop.permute.xlu0 %4793  ;;  %v4404_v40 = vpop.permute.xlu1 %4403 }
 0x269   : > { %v4431_v56 = vsel %vm4427_vm6, %v4404_v40, %v13463_v44  ;;  %v4430_v60 = vsel %vm4427_vm6, %v13420_v12, %v4404_v40  ;;  %6314 = vrot.lane.b32.xlu1 %v13348_v36, %s11907_s23  ;;  %v4441_v12 = vsel %vm4427_vm6, %v13497_v9, %v13510_v49 }
 0x26a   : > { %4502 = vmatprep.subr.bf16.mxu1 %v4431_v56 }
 0x26b   : > { %10867 = vmatmul.mubr.msk.bf16.vlgmr.msra.gmra.mrb[8].mxu1 %vm587_vm1, %v13486_v47  ;;  %6300 = vrot.lane.b32.xlu0 %v13093_v10, %s11907_s23 }
 0x26c   : > { %4503 = vmatpush1.bf16.msra.mxu1 %v4430_v60  ;;  %v13650_v19 = vpop.permute.xlu0 %4789  ;;  %v13652_v44 = vpop.permute.xlu1 %5168  ;;  %4534 = vmatprep.mubr.bf16.mxu1 %v15404_v20 }
 0x26d   : > { %10872 = vmatmul.mubr.msk.bf16.vlgmr.msra.gmra.mrb[4].mxu0 %vm587_vm1, %v13609_v27  ;;  %6310 = vrot.lane.b32.xlu1 %v13098_v38, %s11907_s23 }
 0x26e   : > { %4632 = vmatpush1.bf16.msra.mxu0 %v4436_v16  ;;  %4663 = vmatprep.mubr.bf16.mxu0 %v15404_v20 }
 0x26f   : > { %6308 = vrot.lane.b32.xlu0 %v13132_v11, %s11907_s23  ;;  %4717 = vmatprep.subr.bf16.mxu0 %v4441_v12 }
 0x270   : > { %v13665_v18 = vpop.permute.xlu0 %5170  ;;  %v4412_v47 = vpop.permute.xlu1 %4411 }
 0x271   : > { %v4435_v14 = vsel %vm4427_vm6, %v4412_v47, %v13495_v61  ;;  %v4434_v49 = vsel %vm4427_vm6, %v13450_v59, %v4412_v47  ;;  %6318 = vrot.lane.b32.xlu1 %v13137_v0, %s11907_s23 }
 0x272   : > { %4588 = vmatprep.subr.bf16.mxu1 %v4435_v14 }
 0x273   : > { %10871 = vmatmul.mubr.msk.bf16.vlgmr.msra.gmra.mrb[0].mxu1 %vm587_vm1, %v13609_v27  ;;  %6320 = vrot.lane.b32.xlu0 %v13679_v54, %s11907_s23 }
 0x274   : > { %4589 = vmatpush1.bf16.msra.mxu1 %v4434_v49  ;;  %v13683_v61 = vpop.permute.xlu0 %5166  ;;  %v13685_v59 = vpop.permute.xlu1 %5176  ;;  %4620 = vmatprep.mubr.bf16.mxu1 %v15404_v20 }
 0x275   : > { %10874 = vmatmul.mubr.msk.bf16.vlgmr.msra.gmra.mrb[8].mxu0 %vm587_vm1, %v13609_v27  ;;  %6694 = vrot.lane.b32.xlu1 %v13173_v23, %s11908_s0  ;;  %v4795_v23 = vsel %vm4427_vm6, %v13555_v26, %v13527_v17 }
 0x276   : > { %4718 = vmatpush1.bf16.msra.mxu0 %v4440_v46  ;;  %4749 = vmatprep.mubr.bf16.mxu0 %v15404_v20 }
 0x277   : > { %6696 = vrot.lane.b32.xlu0 %v13193_v43, %s11908_s0  ;;  %4826 = vmatprep.subr.bf16.mxu0 %v4796_v35 }
 0x278   : > { %v13698_v9 = vpop.permute.xlu0 %5178  ;;  %v4420_v3 = vpop.permute.xlu1 %4419 }
 0x279   : > { %v4439_v24 = vsel %vm4427_vm6, %v4420_v3, %v13525_v32  ;;  %v4438_v33 = vsel %vm4427_vm6, %v13478_v37, %v4420_v3  ;;  %6316 = vrot.lane.b32.xlu1 %v13168_v29, %s11907_s23  ;;  %v4800_v37 = vsel %vm4427_vm6, %v13557_v41, %v13573_v6  ;;  %v13928_v3 = vld [vmem:[#allocation7 + $0x30] sm:$0xff]  }
 0x27a   : > { %4674 = vmatprep.subr.bf16.mxu1 %v4439_v24 }
 0x27b   : > { %10873 = vmatmul.mubr.msk.bf16.vlgmr.msra.gmra.mrb[4].mxu1 %vm587_vm1, %v13609_v27  ;;  %6692 = vrot.lane.b32.xlu0 %v13212_v48, %s11908_s0 }
 0x27c   : > { %4675 = vmatpush1.bf16.msra.mxu1 %v4438_v33  ;;  %v13713_v43 = vpop.permute.xlu0 %5174  ;;  %v13715_v32 = vpop.permute.xlu1 %5184  ;;  %4706 = vmatprep.mubr.bf16.mxu1 %v15404_v20 }
 0x27d   : > { %10876 = vmatmul.mubr.msk.bf16.vlgmr.msra.gmra.mrb[12].mxu0 %vm587_vm1, %v13609_v27  ;;  %6702 = vrot.lane.b32.xlu1 %v13217_v55, %s11908_s0 }
 0x27e   : > { %4827 = vmatpush1.bf16.msra.mxu0 %v4795_v23  ;;  %4858 = vmatprep.mubr.bf16.mxu0 %v15404_v20 }
 0x27f   : > { %6704 = vrot.lane.b32.xlu0 %v13198_v42, %s11908_s0  ;;  %4912 = vmatprep.subr.bf16.mxu0 %v4800_v37  ;;  %v4799_v42 = vsel %vm4427_vm6, %v13588_v1, %v13557_v41 }
 0x280   : > { %v13728_v48 = vpop.permute.xlu0 %5186  ;;  %v4772_v17 = vpop.permute.xlu1 %4771 }
 0x281   : > { %v4798_v26 = vsel %vm4427_vm6, %v4772_v17, %v13588_v1  ;;  %v4797_v8 = vsel %vm4427_vm6, %v13540_v5, %v4772_v17  ;;  %6698 = vrot.lane.b32.xlu1 %v13383_v51, %s11908_s0  ;;  %v4804_v51 = vsel %vm4427_vm6, %v13590_v50, %v13603_v31 }
 0x282   : > { %4869 = vmatprep.subr.bf16.mxu1 %v4798_v26 }
 0x283   : > { %10875 = vmatmul.mubr.msk.bf16.vlgmr.msra.gmra.mrb[8].mxu1 %vm587_vm1, %v13609_v27  ;;  %6700 = vrot.lane.b32.xlu0 %v13251_v53, %s11908_s0  ;;  %v4803_v27 = vsel %vm4427_vm6, %v13620_v21, %v13590_v50 }
 0x284   : > { %4870 = vmatpush1.bf16.msra.mxu1 %v4797_v8  ;;  %v13745_v55 = vpop.permute.xlu0 %5182  ;;  %4901 = vmatprep.mubr.bf16.mxu1 %v15404_v20 }
 0x285   : > { %v4780_v5 = vpop.permute.xlu1 %4779  ;;  %10878 = vmatmul.mubr.msk.bf16.vlgmr.msra.gmra.mrb[0].mxu0 %vm587_vm1, %v13734_v4  ;;  %6710 = vrot.lane.b32.xlu1 %v13256_v62, %s11908_s0 }
 0x286   : > { %4913 = vmatpush1.bf16.msra.mxu0 %v4799_v42  ;;  %v4802_v53 = vsel %vm4427_vm6, %v4780_v5, %v13620_v21  ;;  %4944 = vmatprep.mubr.bf16.mxu0 %v15404_v20  ;;  %v4801_v62 = vsel %vm4427_vm6, %v13573_v6, %v4780_v5 }
 0x287   : > { %4955 = vmatprep.subr.bf16.mxu1 %v4802_v53  ;;  %6712 = vrot.lane.b32.xlu0 %v13239_v34, %s11908_s0 }
 0x288   : > { %v13760_v41 = vpop.permute.xlu0 %5190  ;;  %4998 = vmatprep.subr.bf16.mxu0 %v4804_v51 }
 0x289   : > { %v13762_v1 = vpop.permute.xlu1 %5192  ;;  %6706 = vrot.lane.b32.xlu1 %v12983_v15, %s11908_s0  ;;  %v4808_v15 = vsel %vm4427_vm6, %v13622_v45, %v13635_v57 }
 0x28b   : > { %10879 = vmatmul.mubr.msk.bf16.vlgmr.msra.gmra.mrb[0].mxu1 %vm587_vm1, %v13734_v4  ;;  %6708 = vrot.lane.b32.xlu0 %v13290_v39, %s11908_s0 }
 0x28c   : > { %4956 = vmatpush1.bf16.msra.mxu1 %v4801_v62  ;;  %v13775_v34 = vpop.permute.xlu0 %5533  ;;  %4987 = vmatprep.mubr.bf16.mxu1 %v15404_v20 }
 0x28d   : > { %10880 = vmatmul.mubr.msk.bf16.vlgmr.msra.gmra.mrb[4].mxu0 %vm587_vm1, %v13734_v4  ;;  %v13783_v6 = vpop.permute.xlu1 %5535  ;;  %6714 = vrot.lane.b32.xlu1 %v13016_v58, %s11908_s0  ;;  %v4807_v58 = vsel %vm4427_vm6, %v13650_v19, %v13622_v45 }
 0x28e   : > { %4999 = vmatpush1.bf16.msra.mxu0 %v4803_v27  ;;  %5030 = vmatprep.mubr.bf16.mxu0 %v15404_v20  ;;  %v5560_v35 = vsel %vm5194_vm7, %v13775_v34, %v13783_v6 }
 0x28f   : > { %6716 = vrot.lane.b32.xlu0 %v13315_v7, %s11908_s0  ;;  %5084 = vmatprep.subr.bf16.mxu0 %v4808_v15 }
 0x290   : > { %v4788_v39 = vpop.permute.xlu0 %4787 }
 0x291   : > { %v4806_v50 = vsel %vm4427_vm6, %v4788_v39, %v13650_v19  ;;  %v4805_v21 = vsel %vm4427_vm6, %v13603_v31, %v4788_v39  ;;  %v13794_v57 = vpop.permute.xlu1 %5531  ;;  %6718 = vrot.lane.b32.xlu1 %v13566_v13, %s11908_s0  ;;  %v5196_v13 = vsel %vm5194_vm7, %v13652_v44, %v13665_v18 }
 0x292   : > { %5041 = vmatprep.subr.bf16.mxu1 %v4806_v50  ;;  %v13993_v50 = vld [vmem:[#allocation8 + $0x38] sm:$0xff]  }
 0x293   : > { %10881 = vmatmul.mubr.msk.bf16.vlgmr.msra.gmra.mrb[4].mxu1 %vm587_vm1, %v13734_v4  ;;  %7059 = vrot.lane.b32.xlu0 %v13041_v30, %s11908_s0 }
 0x294   : > { %5042 = vmatpush1.bf16.msra.mxu1 %v4805_v21  ;;  %v13805_v7 = vpop.permute.xlu0 %5541  ;;  %5073 = vmatprep.mubr.bf16.mxu1 %v15404_v20 }
 0x295   : > { %10882 = vmatmul.mubr.msk.bf16.vlgmr.msra.gmra.mrb[8].mxu0 %vm587_vm1, %v13734_v4  ;;  %v13813_v31 = vpop.permute.xlu1 %5543  ;;  %7061 = vrot.lane.b32.xlu1 %v13278_v63, %s11908_s0  ;;  %v5195_v63 = vsel %vm5194_vm7, %v13683_v61, %v13652_v44 }
 0x296   : > { %5085 = vmatpush1.bf16.msra.mxu0 %v4807_v58  ;;  %5116 = vmatprep.mubr.bf16.mxu0 %v15404_v20 }
 0x297   : > { %7057 = vrot.lane.b32.xlu0 %v13021_v25, %s11908_s0  ;;  %5225 = vmatprep.subr.bf16.mxu0 %v5196_v13 }
 0x298   : > { %v5173_v30 = vpop.permute.xlu0 %5172 }
 0x299   : > { %v5198_v45 = vsel %vm5194_vm7, %v5173_v30, %v13713_v43  ;;  %v5197_v40 = vsel %vm5194_vm7, %v13665_v18, %v5173_v30  ;;  %v13824_v56 = vpop.permute.xlu1 %5539  ;;  %7063 = vrot.lane.b32.xlu1 %v13093_v10, %s11908_s0  ;;  %v5200_v10 = vsel %vm5194_vm7, %v13685_v59, %v13698_v9  ;;  %v5204_v18 = vsel %vm5194_vm7, %v13715_v32, %v13728_v48 }
 0x29a   : > { %5268 = vmatprep.subr.bf16.mxu1 %v5198_v45 }
 0x29b   : > { %10883 = vmatmul.mubr.msk.bf16.vlgmr.msra.gmra.mrb[8].mxu1 %vm587_vm1, %v13734_v4  ;;  %7065 = vrot.lane.b32.xlu0 %v13059_v28, %s11908_s0  ;;  %v13848_v28 = vld [vmem:[#allocation8 + $0x30] sm:$0xff]  }
 0x29c   : > { %5269 = vmatpush1.bf16.msra.mxu1 %v5197_v40  ;;  %v13835_v25 = vpop.permute.xlu0 %5549  ;;  %5300 = vmatprep.mubr.bf16.mxu1 %v15404_v20 }
 0x29d   : > { %10884 = vmatmul.mubr.msk.bf16.vlgmr.msra.gmra.mrb[12].mxu0 %vm587_vm1, %v13734_v4  ;;  %v13843_v60 = vpop.permute.xlu1 %5551  ;;  %7067 = vrot.lane.b32.xlu1 %v13079_v2, %s11908_s0  ;;  %v5199_v2 = vsel %vm5194_vm7, %v13713_v43, %v13685_v59 }
 0x29e   : > { %5226 = vmatpush1.bf16.msra.mxu0 %v5195_v63  ;;  %5257 = vmatprep.mubr.bf16.mxu0 %v15404_v20  ;;  %v5568_v51 = vsel %vm5194_vm7, %v13835_v25, %v13843_v60 }
 0x29f   : > { %7069 = vrot.lane.b32.xlu0 %v13297_v52, %s11908_s0  ;;  %5311 = vmatprep.subr.bf16.mxu0 %v5200_v10 }
 0x2a0   : > { %v5181_v16 = vpop.permute.xlu0 %5180 }
 0x2a1   : > { %v5202_v19 = vsel %vm5194_vm7, %v5181_v16, %v13745_v55  ;;  %v5201_v44 = vsel %vm5194_vm7, %v13698_v9, %v5181_v16  ;;  %v13856_v12 = vpop.permute.xlu1 %5547  ;;  %7071 = vrot.lane.b32.xlu1 %v13132_v11, %s11908_s0  ;;  %v7444_v16 = vld [vmem:[%s15350_s5] sm:$0xff] }
 0x2a2   : > { %5354 = vmatprep.subr.bf16.mxu1 %v5202_v19  ;;  %v7445_v19 = vld [vmem:[%s15350_s5 + $0x8] sm:$0xff] }
 0x2a3   : > { %10887 = vmatmul.mubr.msk.bf16.vlgmr.msra.gmra.mrb[0].mxu1 %vm587_vm1, %v13848_v28  ;;  %7073 = vrot.lane.b32.xlu0 %v13098_v38, %s11908_s0 }
 0x2a4   : > { %5355 = vmatpush1.bf16.msra.mxu1 %v5201_v44  ;;  %5386 = vmatprep.mubr.bf16.mxu1 %v15404_v20  ;;  %v5189_v52 = vpop.permute.xlu0 %5188 }
 0x2a5   : > { %10886 = vmatmul.mubr.msk.bf16.vlgmr.msra.gmra.mrb[0].mxu0 %vm587_vm1, %v13848_v28  ;;  %v13873_v11 = vpop.permute.xlu1 %5555  ;;  %7075 = vrot.lane.b32.xlu1 %v13118_v22, %s11908_s0  ;;  %v5206_v47 = vsel %vm5194_vm7, %v5189_v52, %v13760_v41  ;;  %v5205_v38 = vsel %vm5194_vm7, %v13728_v48, %v5189_v52  ;;  %v5203_v22 = vsel %vm5194_vm7, %v13745_v55, %v13715_v32 }
 0x2a6   : > { %5312 = vmatpush1.bf16.msra.mxu0 %v5199_v2  ;;  %5343 = vmatprep.mubr.bf16.mxu0 %v15404_v20  ;;  %v5559_v32 = vsel %vm5194_vm7, %v13794_v57, %v13775_v34  ;;  %v5564_v48 = vsel %vm5194_vm7, %v13805_v7, %v13813_v31  ;;  %v5563_v55 = vsel %vm5194_vm7, %v13824_v56, %v13805_v7 }
 0x2a7   : > { %7077 = vrot.lane.b32.xlu0 %v13348_v36, %s11908_s0  ;;  %5397 = vmatprep.subr.bf16.mxu0 %v5204_v18  ;;  %v5567_v34 = vsel %vm5194_vm7, %v13856_v12, %v13835_v25 }
 0x2a8   : > { %5440 = vmatprep.subr.bf16.mxu1 %v5206_v47 }
 0x2a9   : > { %v13884_v14 = vpop.permute.xlu0 %5557  ;;  %v13886_v49 = vpop.permute.xlu1 %5931  ;;  %7079 = vrot.lane.b32.xlu1 %v13168_v29, %s11908_s0 }
 0x2aa   : > { %v5571_v7 = vsel %vm5194_vm7, %v13873_v11, %v13884_v14 }
 0x2ab   : > { %10889 = vmatmul.mubr.msk.bf16.vlgmr.msra.gmra.mrb[4].mxu1 %vm587_vm1, %v13848_v28  ;;  %7081 = vrot.lane.b32.xlu0 %v13137_v0, %s11908_s0 }
 0x2ac   : > { %5441 = vmatpush1.bf16.msra.mxu1 %v5205_v38  ;;  %5472 = vmatprep.mubr.bf16.mxu1 %v15404_v20 }
 0x2ad   : > { %10888 = vmatmul.mubr.msk.bf16.vlgmr.msra.gmra.mrb[4].mxu0 %vm587_vm1, %v13848_v28  ;;  %v13900_v36 = vpop.permute.xlu0 %5933  ;;  %7083 = vrot.lane.b32.xlu1 %v13679_v54, %s11908_s0  ;;  %v5207_v54 = vsel %vm5194_vm7, %v13760_v41, %v13762_v1 }
 0x2ae   : > { %5398 = vmatpush1.bf16.msra.mxu0 %v5203_v22  ;;  %5429 = vmatprep.mubr.bf16.mxu0 %v15404_v20 }
 0x2af   : > { %v5538_v29 = vpop.permute.xlu1 %5537  ;;  %5483 = vmatprep.subr.bf16.mxu0 %v13762_v1  ;;  %7448 = vperm.xlu0 %11584, %v7444_v16  }
 0x2b0   : > { %v5562_v0 = vsel %vm5194_vm7, %v5538_v29, %v13824_v56  ;;  %v5561_v46 = vsel %vm5194_vm7, %v13783_v6, %v5538_v29 }
 0x2b1   : > { %5632 = vmatprep.subr.bf16.mxu1 %v5562_v0  ;;  %v13910_v61 = vpop.permute.xlu0 %5929  ;;  %7453 = vperm.xlu1 %11585, %v7445_v19  }
 0x2b2   : > { %v5958_v25 = vsel %vm5957_vm8, %v13910_v61, %v13886_v49 }
 0x2b3   : > { %10891 = vmatmul.mubr.msk.bf16.vlgmr.msra.gmra.mrb[8].mxu1 %vm587_vm1, %v13848_v28  ;;  %v13914_v59 = vpop.permute.xlu1 %5939 }
 0x2b4   : > { %5633 = vmatpush1.bf16.msra.mxu1 %v5561_v46  ;;  %5664 = vmatprep.mubr.bf16.mxu1 %v15404_v20 }
 0x2b5   : > { %10890 = vmatmul.mubr.msk.bf16.vlgmr.msra.gmra.mrb[8].mxu0 %vm587_vm1, %v13848_v28  ;;  %v13925_v9 = vpop.permute.xlu0 %5941 }
 0x2b6   : > { %5484 = vmatpush1.bf16.msra.mxu0 %v5207_v54  ;;  %5515 = vmatprep.mubr.bf16.mxu0 %v15404_v20 }
 0x2b7   : > { %v5546_v24 = vpop.permute.xlu1 %5545  ;;  %5589 = vmatprep.subr.bf16.mxu0 %v5560_v35 }
 0x2b8   : > { %v5566_v33 = vsel %vm5194_vm7, %v5546_v24, %v13856_v12  ;;  %v5565_v23 = vsel %vm5194_vm7, %v13813_v31, %v5546_v24  ;;  %v5959_v31 = vsel %vm5957_vm8, %v13886_v49, %v13900_v36  ;;  %v14068_v49 = vld [vmem:[#allocation7 + $0x38] sm:$0xff]  }
 0x2b9   : > { %5718 = vmatprep.subr.bf16.mxu1 %v5566_v33  ;;  %v13934_v43 = vpop.permute.xlu0 %5937 }
 0x2bb   : > { %10895 = vmatmul.mubr.msk.bf16.vlgmr.msra.gmra.mrb[0].mxu1 %vm587_vm1, %v13928_v3  ;;  %v13941_v37 = vpop.permute.xlu1 %5947 }
 0x2bc   : > { %5719 = vmatpush1.bf16.msra.mxu1 %v5565_v23  ;;  %5750 = vmatprep.mubr.bf16.mxu1 %v15404_v20 }
 0x2bd   : > { %10892 = vmatmul.mubr.msk.bf16.vlgmr.msra.gmra.mrb[12].mxu0 %vm587_vm1, %v13848_v28  ;;  %v13949_v17 = vpop.permute.xlu0 %5949 }
 0x2be   : > { %5590 = vmatpush1.bf16.msra.mxu0 %v5559_v32  ;;  %5621 = vmatprep.mubr.bf16.mxu0 %v15404_v20  ;;  %v5967_v38 = vsel %vm5957_vm8, %v13941_v37, %v13949_v17 }
 0x2bf   : > { %v5554_v26 = vpop.permute.xlu1 %5553  ;;  %5675 = vmatprep.subr.bf16.mxu0 %v5564_v48 }
 0x2c0   : > { %v5570_v8 = vsel %vm5194_vm7, %v5554_v26, %v13873_v11  ;;  %v5569_v4 = vsel %vm5194_vm7, %v13843_v60, %v5554_v26  ;;  %v5963_v60 = vsel %vm5957_vm8, %v13914_v59, %v13925_v9  ;;  %v5962_v11 = vsel %vm5957_vm8, %v13934_v43, %v13914_v59 }
 0x2c1   : > { %5804 = vmatprep.subr.bf16.mxu1 %v5570_v8  ;;  %v13956_v42 = vpop.permute.xlu0 %5945 }
 0x2c2   : > { %v5966_v0 = vsel %vm5957_vm8, %v13956_v42, %v13941_v37 }
 0x2c3   : > { %10897 = vmatmul.mubr.msk.bf16.vlgmr.msra.gmra.mrb[4].mxu1 %vm587_vm1, %v13928_v3  ;;  %v5936_v5 = vpop.permute.xlu1 %5935 }
 0x2c4   : > { %5805 = vmatpush1.bf16.msra.mxu1 %v5569_v4  ;;  %5836 = vmatprep.mubr.bf16.mxu1 %v15404_v20  ;;  %v5961_v53 = vsel %vm5957_vm8, %v5936_v5, %v13934_v43  ;;  %v5960_v62 = vsel %vm5957_vm8, %v13900_v36, %v5936_v5 }
 0x2c5   : > { %10894 = vmatmul.mubr.msk.bf16.vlgmr.msra.gmra.mrb[0].mxu0 %vm587_vm1, %v13928_v3  ;;  %v13971_v41 = vpop.permute.xlu0 %5953  ;;  %6031 = vmatprep.subr.bf16.mxu1 %v5961_v53 }
 0x2c6   : > { %5676 = vmatpush1.bf16.msra.mxu0 %v5563_v55  ;;  %5707 = vmatprep.mubr.bf16.mxu0 %v15404_v20  ;;  %v14134_v55 = vld [vmem:[#allocation8 + $0x40] sm:$0xff]  }
 0x2c7   : > { %5761 = vmatprep.subr.bf16.mxu0 %v5568_v51  ;;  %v13974_v1 = vpop.permute.xlu1 %5955 }
 0x2c9   : > { %v13978_v27 = vpop.permute.xlu0 %6296 }
 0x2cb   : > { %10899 = vmatmul.mubr.msk.bf16.vlgmr.msra.gmra.mrb[8].mxu1 %vm587_vm1, %v13928_v3  ;;  %v13985_v15 = vpop.permute.xlu1 %6298 }
 0x2cc   : > { %6032 = vmatpush1.bf16.msra.mxu1 %v5960_v62  ;;  %6063 = vmatprep.mubr.bf16.mxu1 %v15404_v20  ;;  %v6323_v33 = vsel %vm5957_vm8, %v13978_v27, %v13985_v15 }
 0x2cd   : > { %10896 = vmatmul.mubr.msk.bf16.vlgmr.msra.gmra.mrb[4].mxu0 %vm587_vm1, %v13928_v3  ;;  %v5944_v6 = vpop.permute.xlu0 %5943 }
 0x2ce   : > { %5762 = vmatpush1.bf16.msra.mxu0 %v5567_v34  ;;  %5793 = vmatprep.mubr.bf16.mxu0 %v15404_v20  ;;  %v5965_v39 = vsel %vm5957_vm8, %v5944_v6, %v13956_v42  ;;  %v5964_v57 = vsel %vm5957_vm8, %v13925_v9, %v5944_v6 }
 0x2cf   : > { %6117 = vmatprep.subr.bf16.mxu1 %v5965_v39  ;;  %v13995_v21 = vpop.permute.xlu1 %6294  ;;  %5847 = vmatprep.subr.bf16.mxu0 %v13884_v14 }
 0x2d1   : > { %v14000_v58 = vpop.permute.xlu0 %6304 }
 0x2d3   : > { %10903 = vmatmul.mubr.msk.bf16.vlgmr.msra.gmra.mrb[0].mxu1 %vm587_vm1, %v13993_v50  ;;  %v14007_v13 = vpop.permute.xlu1 %6306 }
 0x2d4   : > { %6118 = vmatpush1.bf16.msra.mxu1 %v5964_v57  ;;  %6149 = vmatprep.mubr.bf16.mxu1 %v15404_v20  ;;  %v6327_v8 = vsel %vm5957_vm8, %v14000_v58, %v14007_v13 }
 0x2d5   : > { %10898 = vmatmul.mubr.msk.bf16.vlgmr.msra.gmra.mrb[8].mxu0 %vm587_vm1, %v13928_v3  ;;  %v5952_v30 = vpop.permute.xlu0 %5951 }
 0x2d6   : > { %5848 = vmatpush1.bf16.msra.mxu0 %v5571_v7  ;;  %5879 = vmatprep.mubr.bf16.mxu0 %v15404_v20  ;;  %v5969_v45 = vsel %vm5957_vm8, %v5952_v30, %v13971_v41  ;;  %v5968_v56 = vsel %vm5957_vm8, %v13949_v17, %v5952_v30  ;;  %v6322_v17 = vsel %vm5957_vm8, %v13995_v21, %v13978_v27 }
 0x2d7   : > { %5988 = vmatprep.subr.bf16.mxu0 %v5959_v31  ;;  %6203 = vmatprep.subr.bf16.mxu1 %v5969_v45  ;;  %v14018_v40 = vpop.permute.xlu1 %6302 }
 0x2d9   : > { %v14022_v63 = vpop.permute.xlu0 %6312 }
 0x2db   : > { %10905 = vmatmul.mubr.msk.bf16.vlgmr.msra.gmra.mrb[4].mxu1 %vm587_vm1, %v13993_v50  ;;  %v14029_v10 = vpop.permute.xlu1 %6314 }
 0x2dc   : > { %6204 = vmatpush1.bf16.msra.mxu1 %v5968_v56  ;;  %6235 = vmatprep.mubr.bf16.mxu1 %v15404_v20  ;;  %v6331_v27 = vsel %vm5957_vm8, %v14022_v63, %v14029_v10 }
 0x2dd   : > { %10900 = vmatmul.mubr.msk.bf16.vlgmr.msra.gmra.mrb[12].mxu0 %vm587_vm1, %v13928_v3  ;;  %v6301_v28 = vpop.permute.xlu0 %6300  ;;  %v5970_v3 = vsel %vm5957_vm8, %v13971_v41, %v13974_v1 }
 0x2de   : > { %5989 = vmatpush1.bf16.msra.mxu0 %v5958_v25  ;;  %6020 = vmatprep.mubr.bf16.mxu0 %v15404_v20  ;;  %v6325_v44 = vsel %vm5957_vm8, %v6301_v28, %v14018_v40  ;;  %v6324_v2 = vsel %vm5957_vm8, %v13985_v15, %v6301_v28  ;;  %v14195_v25 = vld [vmem:[#allocation7 + $0x40] sm:$0xff]  }
 0x2df   : > { %6074 = vmatprep.subr.bf16.mxu0 %v5963_v60  ;;  %6395 = vmatprep.subr.bf16.mxu1 %v6325_v44  ;;  %v14046_v12 = vpop.permute.xlu1 %6310 }
 0x2e1   : > { %v6309_v52 = vpop.permute.xlu0 %6308 }
 0x2e2   : > { %v6329_v18 = vsel %vm5957_vm8, %v6309_v52, %v14046_v12  ;;  %v6328_v36 = vsel %vm5957_vm8, %v14007_v13, %v6309_v52 }
 0x2e3   : > { %10907 = vmatmul.mubr.msk.bf16.vlgmr.msra.gmra.mrb[8].mxu1 %vm587_vm1, %v13993_v50  ;;  %v14057_v47 = vpop.permute.xlu1 %6318 }
 0x2e4   : > { %6396 = vmatpush1.bf16.msra.mxu1 %v6324_v2  ;;  %6427 = vmatprep.mubr.bf16.mxu1 %v15404_v20 }
 0x2e5   : > { %10902 = vmatmul.mubr.msk.bf16.vlgmr.msra.gmra.mrb[0].mxu0 %vm587_vm1, %v13993_v50  ;;  %v14065_v14 = vpop.permute.xlu0 %6320  ;;  %6481 = vmatprep.subr.bf16.mxu1 %v6329_v18 }
 0x2e6   : > { %6075 = vmatpush1.bf16.msra.mxu0 %v5962_v11  ;;  %6106 = vmatprep.mubr.bf16.mxu0 %v15404_v20  ;;  %v6334_v30 = vsel %vm5957_vm8, %v14057_v47, %v14065_v14 }
 0x2e7   : > { %6160 = vmatprep.subr.bf16.mxu0 %v5967_v38  ;;  %v14070_v22 = vpop.permute.xlu1 %6694 }
 0x2e9   : > { %v14074_v29 = vpop.permute.xlu0 %6696 }
 0x2eb   : > { %10911 = vmatmul.mubr.msk.bf16.vlgmr.msra.gmra.mrb[0].mxu1 %vm587_vm1, %v14068_v49  ;;  %v6317_v46 = vpop.permute.xlu1 %6316 }
 0x2ec   : > { %6482 = vmatpush1.bf16.msra.mxu1 %v6328_v36  ;;  %6513 = vmatprep.mubr.bf16.mxu1 %v15404_v20  ;;  %v6333_v61 = vsel %vm5957_vm8, %v6317_v46, %v14057_v47  ;;  %v6332_v35 = vsel %vm5957_vm8, %v14029_v10, %v6317_v46 }
 0x2ed   : > { %10904 = vmatmul.mubr.msk.bf16.vlgmr.msra.gmra.mrb[4].mxu0 %vm587_vm1, %v13993_v50  ;;  %v14086_v59 = vpop.permute.xlu0 %6692  ;;  %6567 = vmatprep.subr.bf16.mxu1 %v6333_v61 }
 0x2ee   : > { %6161 = vmatpush1.bf16.msra.mxu0 %v5966_v0  ;;  %6192 = vmatprep.mubr.bf16.mxu0 %v15404_v20  ;;  %v6721_v16 = vsel %vm6720_vm9, %v14086_v59, %v14070_v22  ;;  %v11909_v59 = vmov 1966171168  }
 0x2ef   : > { %v14089_v54 = vpop.permute.xlu1 %6702  ;;  %6246 = vmatprep.subr.bf16.mxu0 %v13974_v1  ;;  %v6326_v1 = vsel %vm5957_vm8, %v14018_v40, %v14000_v58  ;;  %v6722_v40 = vsel %vm6720_vm9, %v14070_v22, %v14074_v29 }
 0x2f1   : > { %v14094_v9 = vpop.permute.xlu0 %6704 }
 0x2f2   : > { %v6726_v44 = vsel %vm6720_vm9, %v14089_v54, %v14094_v9 }
 0x2f3   : > { %10913 = vmatmul.mubr.msk.bf16.vlgmr.msra.gmra.mrb[4].mxu1 %vm587_vm1, %v14068_v49  ;;  %v6699_v24 = vpop.permute.xlu1 %6698 }
 0x2f4   : > { %6568 = vmatpush1.bf16.msra.mxu1 %v6332_v35  ;;  %6599 = vmatprep.mubr.bf16.mxu1 %v15404_v20  ;;  %v6723_v37 = vsel %vm6720_vm9, %v14074_v29, %v6699_v24  ;;  %v7534_v35 = vlaneseq }
 0x2f5   : > { %10906 = vmatmul.mubr.msk.bf16.vlgmr.msra.gmra.mrb[8].mxu0 %vm587_vm1, %v13993_v50  ;;  %v14107_v23 = vpop.permute.xlu0 %6700 }
 0x2f6   : > { %6247 = vmatpush1.bf16.msra.mxu0 %v5970_v3  ;;  %6278 = vmatprep.mubr.bf16.mxu0 %v15404_v20  ;;  %v6724_v43 = vsel %vm6720_vm9, %v6699_v24, %v14107_v23  ;;  %v6725_v18 = vsel %vm6720_vm9, %v14107_v23, %v14089_v54  ;;  %v7532_v54 = vunpack.c.l.s4 %v11909_v59  ;;  %v7535_v3 = vshrl.u32 %v7534_v35, 7 }
 0x2f7   : > { %6352 = vmatprep.subr.bf16.mxu0 %v6323_v33  ;;  %6794 = vmatprep.subr.bf16.mxu1 %v6724_v43  ;;  %v14112_v32 = vpop.permute.xlu1 %6710  ;;  %v7526_v33 = vld [vmem:[%s15352_s7] sm:$0xff] }
 0x2f9   : > { %v14116_v48 = vpop.permute.xlu0 %6712 }
 0x2fa   : > { %v6730_v11 = vsel %vm6720_vm9, %v14112_v32, %v14116_v48 }
 0x2fb   : > { %10915 = vmatmul.mubr.msk.bf16.vlgmr.msra.gmra.mrb[8].mxu1 %vm587_vm1, %v14068_v49  ;;  %v6707_v26 = vpop.permute.xlu1 %6706 }
 0x2fc   : > { %6795 = vmatpush1.bf16.msra.mxu1 %v6723_v37  ;;  %6826 = vmatprep.mubr.bf16.mxu1 %v15404_v20  ;;  %v6727_v51 = vsel %vm6720_vm9, %v14094_v9, %v6707_v26  ;;  %v7533_v9 = vunpack.c.0.s8 %v7532_v54  ;;  %v7530_v54 = vcombine.high %v7526_v33, %v7526_v33 }
 0x2fd   : > { %10908 = vmatmul.mubr.msk.bf16.vlgmr.msra.gmra.mrb[12].mxu0 %vm587_vm1, %v13993_v50  ;;  %v14129_v4 = vpop.permute.xlu0 %6708  ;;  %v6330_v50 = vsel %vm5957_vm8, %v14046_v12, %v14022_v63 }
 0x2fe   : > { %6353 = vmatpush1.bf16.msra.mxu0 %v6322_v17  ;;  %6384 = vmatprep.mubr.bf16.mxu0 %v15404_v20  ;;  %v6728_v42 = vsel %vm6720_vm9, %v6707_v26, %v14129_v4  ;;  %v6729_v47 = vsel %vm6720_vm9, %v14129_v4, %v14112_v32  ;;  %v14269_v24 = vsub.s32 %v7533_v9, %v7535_v3 }
 0x2ff   : > { %6438 = vmatprep.subr.bf16.mxu0 %v6327_v8  ;;  %6880 = vmatprep.subr.bf16.mxu1 %v6728_v42  ;;  %v6715_v5 = vpop.permute.xlu1 %6714 }
 0x300   : > { %v6731_v6 = vsel %vm6720_vm9, %v14116_v48, %v6715_v5  ;;  %v7537_v23 = vrot.slane %v7526_v33, %v14269_v24  ;;  %v7544_v35 = vrot.slane %v7530_v54, %v14269_v24 }
 0x301   : > { %v14138_v53 = vpop.permute.xlu0 %6716 }
 0x302   : > { %v6732_v41 = vsel %vm6720_vm9, %v6715_v5, %v14138_v53  ;;  %v7545_v43 = vcombine.high %v7537_v23, %v7537_v23  ;;  %v14276_v32 = vrot.slane %v7537_v23, %v14269_v24  ;;  %v14290_v5 = vsub.s32 0, %v7535_v3  ;;  %v7527_v3 = vld [vmem:[%s15352_s7 + $0x8] sm:$0x3f] }
 0x303   : > { %10919 = vmatmul.mubr.msk.bf16.vlgmr.msra.gmra.mrb[0].mxu1 %vm587_vm1, %v14134_v55  ;;  %v14147_v62 = vpop.permute.xlu1 %6718  ;;  %v7546_v9 = vcombine.high %v7544_v35, %v7544_v35 }
 0x304   : > { %6881 = vmatpush1.bf16.msra.mxu1 %v6727_v51  ;;  %6912 = vmatprep.mubr.bf16.mxu1 %v15404_v20  ;;  %v6733_v38 = vsel %vm6720_vm9, %v14138_v53, %v14147_v62  ;;  %v14279_v37 = vrot.slane %v7545_v43, %v14269_v24  ;;  %v7575_v48 = vcombine.high %v14276_v32, %v14276_v32 }
 0x305   : > { %10910 = vmatmul.mubr.msk.bf16.vlgmr.msra.gmra.mrb[0].mxu0 %vm587_vm1, %v14068_v49  ;;  %v14155_v34 = vpop.permute.xlu0 %7059  ;;  %6966 = vmatprep.subr.bf16.mxu1 %v6732_v41 }
 0x306   : > { %6439 = vmatpush1.bf16.msra.mxu0 %v6326_v1  ;;  %6470 = vmatprep.mubr.bf16.mxu0 %v15404_v20  ;;  %v7641_v51 = vpack.i.b16 %v7575_v48, %v7575_v48 }
 0x307   : > { %6524 = vmatprep.subr.bf16.mxu0 %v6331_v27  ;;  %v14158_v15 = vpop.permute.xlu1 %7061 }
 0x309   : > { %v14162_v39 = vpop.permute.xlu0 %7057 }
 0x30b   : > { %10921 = vmatmul.mubr.msk.bf16.vlgmr.msra.gmra.mrb[4].mxu1 %vm587_vm1, %v14134_v55  ;;  %v7064_v21 = vpop.permute.xlu1 %7063 }
 0x30c   : > { %6967 = vmatpush1.bf16.msra.mxu1 %v6731_v6  ;;  %6998 = vmatprep.mubr.bf16.mxu1 %v15404_v20  ;;  %v7087_v13 = vsel %vm6720_vm9, %v14158_v15, %v7064_v21  ;;  %v7646_v6 = vrot.slane %v7641_v51, %v14290_v5 }
 0x30d   : > { %10912 = vmatmul.mubr.msk.bf16.vlgmr.msra.gmra.mrb[4].mxu0 %vm587_vm1, %v14068_v49  ;;  %v14172_v57 = vpop.permute.xlu0 %7065 }
 0x30e   : > { %6525 = vmatpush1.bf16.msra.mxu0 %v6330_v50  ;;  %6556 = vmatprep.mubr.bf16.mxu0 %v15404_v20  ;;  %v7088_v58 = vsel %vm6720_vm9, %v7064_v21, %v14172_v57 }
 0x30f   : > { %7158 = vmatprep.subr.bf16.mxu1 %v7088_v58  ;;  %v14177_v7 = vpop.permute.xlu1 %7067  ;;  %6610 = vmatprep.subr.bf16.mxu0 %v14065_v14  ;;  %v7086_v14 = vsel %vm6720_vm9, %v14155_v34, %v14158_v15 }
 0x310   : > { %v7089_v36 = vsel %vm6720_vm9, %v14172_v57, %v14177_v7 }
 0x311   : > { %v7070_v31 = vpop.permute.xlu0 %7069 }
 0x312   : > { %v7090_v22 = vsel %vm6720_vm9, %v14177_v7, %v7070_v31 }
 0x313   : > { %10923 = vmatmul.mubr.msk.bf16.vlgmr.msra.gmra.mrb[8].mxu1 %vm587_vm1, %v14134_v55  ;;  %v7072_v45 = vpop.permute.xlu1 %7071 }
 0x314   : > { %7159 = vmatpush1.bf16.msra.mxu1 %v7087_v13  ;;  %7190 = vmatprep.mubr.bf16.mxu1 %v15404_v20  ;;  %v7091_v60 = vsel %vm6720_vm9, %v7070_v31, %v7072_v45 }
 0x315   : > { %10914 = vmatmul.mubr.msk.bf16.vlgmr.msra.gmra.mrb[8].mxu0 %vm587_vm1, %v14068_v49  ;;  %v7074_v56 = vpop.permute.xlu0 %7073 }
 0x316   : > { %6611 = vmatpush1.bf16.msra.mxu0 %v6334_v30  ;;  %6642 = vmatprep.mubr.bf16.mxu0 %v15404_v20  ;;  %v7092_v63 = vsel %vm6720_vm9, %v7072_v45, %v7074_v56 }
 0x317   : > { %6751 = vmatprep.subr.bf16.mxu0 %v6722_v40  ;;  %7244 = vmatprep.subr.bf16.mxu1 %v7092_v63  ;;  %v7076_v10 = vpop.permute.xlu1 %7075 }
 0x318   : > { %v7093_v0 = vsel %vm6720_vm9, %v7074_v56, %v7076_v10 }
 0x319   : > { %v7078_v28 = vpop.permute.xlu0 %7077 }
 0x31a   : > { %v7094_v29 = vsel %vm6720_vm9, %v7076_v10, %v7078_v28 }
 0x31b   : > { %10927 = vmatmul.mubr.msk.bf16.vlgmr.msra.gmra.mrb[0].mxu1 %vm587_vm1, %v14195_v25  ;;  %v7080_v19 = vpop.permute.xlu1 %7079 }
 0x31c   : > { %7245 = vmatpush1.bf16.msra.mxu1 %v7091_v60  ;;  %7276 = vmatprep.mubr.bf16.mxu1 %v15404_v20  ;;  %v7095_v52 = vsel %vm6720_vm9, %v7078_v28, %v7080_v19 }
 0x31d   : > { %10916 = vmatmul.mubr.msk.bf16.vlgmr.msra.gmra.mrb[12].mxu0 %vm587_vm1, %v14068_v49  ;;  %v7082_v12 = vpop.permute.xlu0 %7081  ;;  %v7085_v49 = vsel %vm6720_vm9, %v14162_v39, %v14155_v34 }
 0x31e   : > { %6752 = vmatpush1.bf16.msra.mxu0 %v6721_v16  ;;  %6783 = vmatprep.mubr.bf16.mxu0 %v15404_v20  ;;  %v7096_v2 = vsel %vm6720_vm9, %v7080_v19, %v7082_v12 }
 0x31f   : > { %6837 = vmatprep.subr.bf16.mxu0 %v6726_v44  ;;  %7330 = vmatprep.subr.bf16.mxu1 %v7096_v2  ;;  %v7084_v46 = vpop.permute.xlu1 %7083 }
 0x320   : > { %v7097_v61 = vsel %vm6720_vm9, %v7082_v12, %v7084_v46 }
 0x323   : > { %10929 = vmatmul.mubr.msk.bf16.vlgmr.msra.gmra.mrb[4].mxu1 %vm587_vm1, %v14195_v25 }
 0x324   : > { %7331 = vmatpush1.bf16.msra.mxu1 %v7095_v52  ;;  %7362 = vmatprep.mubr.bf16.mxu1 %v15404_v20 }
 0x325   : > { %10918 = vmatmul.mubr.msk.bf16.vlgmr.msra.gmra.mrb[0].mxu0 %vm587_vm1, %v14134_v55 }
 0x326   : > { %6838 = vmatpush1.bf16.msra.mxu0 %v6725_v18  ;;  %6869 = vmatprep.mubr.bf16.mxu0 %v15404_v20 }
 0x327   : > { %6923 = vmatprep.subr.bf16.mxu0 %v6730_v11 }
 0x32b   : > { %10931 = vmatmul.mubr.msk.bf16.vlgmr.msra.gmra.mrb[8].mxu1 %vm587_vm1, %v14195_v25 }
 0x32c   : > { %7839 = vmatprep.mubr.bf16.mxu1 %v15404_v20 }
 0x32d   : > { %10920 = vmatmul.mubr.msk.bf16.vlgmr.msra.gmra.mrb[4].mxu0 %vm587_vm1, %v14134_v55 }
 0x32e   : > { %6924 = vmatpush1.bf16.msra.mxu0 %v6729_v47  ;;  %6955 = vmatprep.mubr.bf16.mxu0 %v15404_v20  ;;  %v14283_v17 = vpop.permute.xlu0 %7448 }
 0x32f   : > { %7009 = vmatprep.subr.bf16.mxu0 %v14147_v62 }
 0x330   : > { %v14285_v8 = vpop.permute.xlu1 %7453 }
 0x335   : > { %10922 = vmatmul.mubr.msk.bf16.vlgmr.msra.gmra.mrb[8].mxu0 %vm587_vm1, %v14134_v55 }
 0x336   : > { %7010 = vmatpush1.bf16.msra.mxu0 %v6733_v38  ;;  %7041 = vmatprep.mubr.bf16.mxu0 %v15404_v20 }
 0x337   : > { %7115 = vmatprep.subr.bf16.mxu0 %v7086_v14 }
 0x33d   : > { %10924 = vmatmul.mubr.msk.bf16.vlgmr.msra.gmra.mrb[12].mxu0 %vm587_vm1, %v14134_v55  ;;  %v7577_v55 = vcombine.high %v14279_v37, %v14279_v37 }
 0x33e   : > { %7116 = vmatpush1.bf16.msra.mxu0 %v7085_v49  ;;  %7147 = vmatprep.mubr.bf16.mxu0 %v15404_v20 }
 0x33f   : > { %7201 = vmatprep.subr.bf16.mxu0 %v7090_v22  ;;  %v7648_v39 = vpack.i.b16 %v7577_v55, %v7577_v55  ;;  %v7586_v55 = vrot.slane %v7527_v3, %v14269_v24 }
 0x341   : > { %v7653_v13 = vrot.slane %v7648_v39, %v14290_v5  ;;  %v7594_v39 = vcombine.high %v7586_v55, %v7586_v55 }
 0x345   : > { %10926 = vmatmul.mubr.msk.bf16.vlgmr.msra.gmra.mrb[0].mxu0 %vm587_vm1, %v14195_v25 }
 0x346   : > { %7202 = vmatpush1.bf16.msra.mxu0 %v7089_v36  ;;  %7233 = vmatprep.mubr.bf16.mxu0 %v15404_v20 }
 0x347   : > { %7287 = vmatprep.subr.bf16.mxu0 %v7094_v29 }
 0x34d   : > { %10928 = vmatmul.mubr.msk.bf16.vlgmr.msra.gmra.mrb[4].mxu0 %vm587_vm1, %v14195_v25 }
 0x34e   : > { %7288 = vmatpush1.bf16.msra.mxu0 %v7093_v0  ;;  %7319 = vmatprep.mubr.bf16.mxu0 %v15404_v20 }
 0x34f   : > { %7373 = vmatprep.subr.bf16.mxu0 %v7084_v46 }
 0x355   : > { %10930 = vmatmul.mubr.msk.bf16.vlgmr.msra.gmra.mrb[8].mxu0 %vm587_vm1, %v14195_v25 }
 0x356   : > { %7374 = vmatpush1.bf16.msra.mxu0 %v7097_v61  ;;  %7405 = vmatprep.mubr.bf16.mxu0 %v15404_v20 }
 0x35d   : > { %10932 = vmatmul.mubr.msk.bf16.vlgmr.msra.gmra.mrb[12].mxu0 %vm587_vm1, %v14195_v25 }
 0x35e   : > { %8752 = vmatprep.mubr.bf16.mxu0 %v15404_v20 }
 0x3ee   : > { %v7192_v26 = vpop.f32.mrb[0].mxu1 }
 0x3ef   : > { %v7458_v4 = vadd.f32 %v14283_v17, %v7192_v26  ;;  %v7194_v42 = vpop.f32.mrb[1].mxu1 }
 0x3f0   : > { %v7459_v53 = vadd.f32 %v14283_v17, %v7194_v42  ;;  %v7196_v41 = vpop.f32.mrb[2].mxu1  ;;  %v7634_v42 = vpack.i.b16 %v14279_v37, %v14279_v37 }
 0x3f1   : > { %v7198_v1 = vpop.f32.mrb[3].mxu1  ;;  %v7472_v62 = vadd.f32 %v14285_v8, %v7196_v41  ;;  %v7486_v34 = vmax.f32 %v7458_v4, 0.0  ;;  %v7574_v41 = vrot.slane %v7546_v9, %v14269_v24 }
 0x3f2   : > { %v7473_v27 = vadd.f32 %v14285_v8, %v7198_v1  ;;  %v7487_v50 = vmax.f32 %v7459_v53, 0.0  ;;  %v7560_v53 = vrot.slane %v7544_v35, %v14269_v24  ;;  %v7639_v37 = vrot.slane %v7634_v42, %v14290_v5 }
 0x3f3   : > { %v7500_v15 = vmax.f32 %v7472_v62, 0.0 }
 0x3f4   : > { %v7501_v21 = vmax.f32 %v7473_v27, 0.0 }
 0x3f5   : > { %v7514_v57 = vpack.c.bf16 %v7500_v15, %v7486_v34  ;;  %v7627_v15 = vpack.i.b16 %v14276_v32, %v14276_v32 }
 0x3f6   : > { %v7515_v58 = vpack.c.bf16 %v7501_v21, %v7487_v50  ;;  %v7278_v7 = vpop.f32.mrb[4].mxu1  ;;  %v7576_v21 = vcombine.high %v7560_v53, %v7560_v53 }
 0x3f7   : > { %v14297_v31 = vmul.bf16 %v7646_v6, %v7514_v57  ;;  %v7462_v30 = vadd.f32 %v14283_v17, %v7278_v7  ;;  %v7280_v45 = vpop.f32.mrb[5].mxu1  ;;  %v7578_v57 = vcombine.high %v7574_v41, %v7574_v41 }
 0x3f8   : > { %v7463_v40 = vadd.f32 %v14283_v17, %v7280_v45  ;;  %v7282_v56 = vpop.f32.mrb[6].mxu1  ;;  %v14305_v60 = vmul.bf16 %v7653_v13, %v7515_v58  ;;  %v7655_v45 = vpack.i.b16 %v7560_v53, %v7560_v53 }
 0x3f9   : > { %v7476_v63 = vadd.f32 %v14285_v8, %v7282_v56  ;;  %v7284_v25 = vpop.f32.mrb[7].mxu1  ;;  %7758 = vrot.lane.b32.xlu0 %v14297_v31, %s11901_s13  ;;  %v7490_v28 = vmax.f32 %v7462_v30, 0.0  ;;  %v7632_v56 = vrot.slane %v7627_v15, %v14290_v5 }
 0x3fa   : > { %v7477_v10 = vadd.f32 %v14285_v8, %v7284_v25  ;;  %v7491_v19 = vmax.f32 %v7463_v40, 0.0  ;;  %v7579_v40 = vcombine.high %v7527_v3, %v7527_v3 }
 0x3fb   : > { %v7504_v16 = vmax.f32 %v7476_v63, 0.0 }
 0x3fc   : > { %v7505_v44 = vmax.f32 %v7477_v10, 0.0  ;;  %v7662_v10 = vpack.i.b16 %v7574_v41, %v7574_v41 }
 0x3fd   : > { %v14307_v12 = vpack.c.bf16 %v7504_v16, %v7490_v28  ;;  %7760 = vrot.lane.b32.xlu0 %v14305_v60, %s11901_s13  ;;  %v7602_v28 = vrot.slane %v7586_v55, %v14269_v24  ;;  %v7616_v16 = vrot.slane %v7594_v39, %v14269_v24 }
 0x3fe   : > { %v14311_v2 = vpack.c.bf16 %v7505_v44, %v7491_v19  ;;  %v7364_v52 = vpop.f32.mrb[8].mxu1 }
 0x3ff   : > { %v7466_v18 = vadd.f32 %v14283_v17, %v7364_v52  ;;  %v7366_v11 = vpop.f32.mrb[9].mxu1  ;;  %v7669_v52 = vpack.i.b16 %v7576_v21, %v7576_v21  ;;  %v7625_v54 = vcombine.high %v7616_v16, %v7616_v16 }
 0x400   : > { %v7467_v47 = vadd.f32 %v14283_v17, %v7366_v11  ;;  %v7368_v38 = vpop.f32.mrb[10].mxu1 }
 0x401   : > { %v7480_v14 = vadd.f32 %v14285_v8, %v7368_v38  ;;  %v7370_v49 = vpop.f32.mrb[11].mxu1  ;;  %v7494_v36 = vmax.f32 %v7466_v18, 0.0  ;;  %v7676_v18 = vpack.i.b16 %v7578_v57, %v7578_v57  ;;  %v7674_v55 = vrot.slane %v7669_v52, %v14290_v5 }
 0x402   : > { %v7481_v22 = vadd.f32 %v14285_v8, %v7370_v49  ;;  %v7495_v0 = vmax.f32 %v7467_v47, 0.0  ;;  %v7593_v49 = vrot.slane %v7579_v40, %v14269_v24 }
 0x403   : > { %v7508_v29 = vmax.f32 %v7480_v14, 0.0  ;;  %v7660_v14 = vrot.slane %v7655_v45, %v14290_v5 }
 0x404   : > { %v7509_v46 = vmax.f32 %v7481_v22, 0.0  ;;  %v7595_v42 = vcombine.high %v7593_v49, %v7593_v49  ;;  %v7609_v21 = vrot.slane %v7593_v49, %v14269_v24 }
 0x405   : > { %v14317_v61 = vpack.c.bf16 %v7508_v29, %v7494_v36 }
 0x406   : > { %v14319_v59 = vpack.c.bf16 %v7509_v46, %v7495_v0  ;;  %v7667_v0 = vrot.slane %v7662_v10, %v14290_v5  ;;  %v7624_v46 = vcombine.high %v7602_v28, %v7602_v28  ;;  %v7623_v57 = vrot.slane %v7595_v42, %v14269_v24 }
 0x408   : > { %v7718_v10 = vpack.i.b16 %v7623_v57, %v7623_v57 }
 0x40a   : > { %v7723_v49 = vrot.slane %v7718_v10, %v14290_v5 }
 0x418   : > { %v7149_v23 = vpop.f32.mrb[0].mxu0 }
 0x419   : > { %v7456_v43 = vadd.f32 %v14283_v17, %v7149_v23  ;;  %v7151_v48 = vpop.f32.mrb[1].mxu0  ;;  %v7683_v23 = vpack.i.b16 %v7602_v28, %v7602_v28 }
 0x41a   : > { %v7457_v26 = vadd.f32 %v14283_v17, %v7151_v48  ;;  %v7153_v4 = vpop.f32.mrb[2].mxu0 }
 0x41b   : > { %v7470_v33 = vadd.f32 %v14285_v8, %v7153_v4  ;;  %v7155_v51 = vpop.f32.mrb[3].mxu0  ;;  %v7484_v62 = vmax.f32 %v7456_v43, 0.0  ;;  %v7690_v43 = vpack.i.b16 %v7616_v16, %v7616_v16  ;;  %v7688_v15 = vrot.slane %v7683_v23, %v14290_v5 }
 0x41c   : > { %v7471_v1 = vadd.f32 %v14285_v8, %v7155_v51  ;;  %v7485_v34 = vmax.f32 %v7457_v26, 0.0 }
 0x41d   : > { %v7498_v27 = vmax.f32 %v7470_v33, 0.0  ;;  %v7681_v33 = vrot.slane %v7676_v18, %v14290_v5 }
 0x41e   : > { %v7499_v6 = vmax.f32 %v7471_v1, 0.0  ;;  %v7697_v1 = vpack.i.b16 %v7624_v46, %v7624_v46 }
 0x41f   : > { %v7512_v50 = vpack.c.bf16 %v7498_v27, %v7484_v62  ;;  %v7704_v62 = vpack.i.b16 %v7625_v54, %v7625_v54 }
 0x420   : > { %v7513_v58 = vpack.c.bf16 %v7499_v6, %v7485_v34  ;;  %v7235_v7 = vpop.f32.mrb[4].mxu0 }
 0x421   : > { %v7460_v13 = vadd.f32 %v14283_v17, %v7235_v7  ;;  %v7237_v30 = vpop.f32.mrb[5].mxu0  ;;  %v14350_v22 = vmul.bf16 %v7632_v56, %v7512_v50  ;;  %v14377_v7 = vmul.bf16 %v7681_v33, %v14311_v2  ;;  %v7702_v2 = vrot.slane %v7697_v1, %v14290_v5 }
 0x422   : > { %v14339_v63 = vmul.bf16 %v7639_v37, %v7513_v58  ;;  %v7461_v32 = vadd.f32 %v14283_v17, %v7237_v30  ;;  %v7239_v25 = vpop.f32.mrb[6].mxu0  ;;  %v7695_v37 = vrot.slane %v7690_v43, %v14290_v5  ;;  %v14374_v58 = vmul.bf16 %v7674_v55, %v14307_v12  ;;  %v14516_v43 = vld [vmem:[%s15349_s4 + $0x4] sm:$0xf] }
 0x423   : > { %v7474_v19 = vadd.f32 %v14285_v8, %v7239_v25  ;;  %v7241_v44 = vpop.f32.mrb[7].mxu0  ;;  %v7488_v47 = vmax.f32 %v7460_v13, 0.0  ;;  %v7711_v25 = vpack.i.b16 %v7609_v21, %v7609_v21  ;;  %v7709_v28 = vrot.slane %v7704_v62, %v14290_v5 }
 0x424   : > { %v7475_v11 = vadd.f32 %v14285_v8, %v7241_v44  ;;  %7756 = vrot.lane.b32.xlu1 %v14339_v63, %s11901_s13  ;;  %v7489_v36 = vmax.f32 %v7461_v32, 0.0 }
 0x425   : > { %v7502_v38 = vmax.f32 %v7474_v19, 0.0 }
 0x426   : > { %v7503_v29 = vmax.f32 %v7475_v11, 0.0 }
 0x427   : > { %v7516_v35 = vpack.c.bf16 %v7502_v38, %v7488_v47 }
 0x428   : > { %v7517_v9 = vpack.c.bf16 %v7503_v29, %v7489_v36  ;;  %v7321_v3 = vpop.f32.mrb[8].mxu0  ;;  %7754 = vrot.lane.b32.xlu1 %v14350_v22, %s11901_s13  ;;  %v14403_v36 = vmul.bf16 %v7709_v28, %v14319_v59 }
 0x429   : > { %v14355_v48 = vmul.bf16 %v7660_v14, %v7516_v35  ;;  %v7464_v26 = vadd.f32 %v14283_v17, %v7321_v3  ;;  %v7323_v4 = vpop.f32.mrb[9].mxu0  ;;  %v7716_v14 = vrot.slane %v7711_v25, %v14290_v5 }
 0x42a   : > { %v14360_v51 = vmul.bf16 %v7667_v0, %v7517_v9  ;;  %v7465_v53 = vadd.f32 %v14283_v17, %v7323_v4  ;;  %v7325_v41 = vpop.f32.mrb[10].mxu0 }
 0x42b   : > { %v7478_v27 = vadd.f32 %v14285_v8, %v7325_v41  ;;  %v7327_v34 = vpop.f32.mrb[11].mxu0  ;;  %v7492_v39 = vmax.f32 %v7464_v26, 0.0 }
 0x42c   : > { %v7479_v6 = vadd.f32 %v14285_v8, %v7327_v34  ;;  %7764 = vrot.lane.b32.xlu0 %v14360_v51, %s11901_s13  ;;  %7762 = vrot.lane.b32.xlu1 %v14355_v48, %s11901_s13  ;;  %v7493_v13 = vmax.f32 %v7465_v53, 0.0 }
 0x42d   : > { %v7506_v50 = vmax.f32 %v7478_v27, 0.0 }
 0x42e   : > { %v7507_v30 = vmax.f32 %v7479_v6, 0.0 }
 0x42f   : > { %v7520_v45 = vpack.c.bf16 %v7506_v50, %v7492_v39 }
 0x430   : > { %v7521_v40 = vpack.c.bf16 %v7507_v30, %v7493_v13  ;;  %v7407_v56 = vpop.f32.mrb[12].mxu0  ;;  %7768 = vrot.lane.b32.xlu0 %v14377_v7, %s11901_s13  ;;  %7766 = vrot.lane.b32.xlu1 %v14374_v58, %s11901_s13 }
 0x431   : > { %v14383_v32 = vmul.bf16 %v7688_v15, %v7520_v45  ;;  %v7468_v24 = vadd.f32 %v14283_v17, %v7407_v56  ;;  %v7409_v12 = vpop.f32.mrb[13].mxu0 }
 0x432   : > { %v14388_v16 = vmul.bf16 %v7695_v37, %v7521_v40  ;;  %v7469_v19 = vadd.f32 %v14283_v17, %v7409_v12  ;;  %v7411_v44 = vpop.f32.mrb[14].mxu0  ;;  %v14400_v17 = vmul.bf16 %v7702_v2, %v14317_v61 }
 0x433   : > { %v7482_v52 = vadd.f32 %v14285_v8, %v7411_v44  ;;  %v7413_v18 = vpop.f32.mrb[15].mxu0  ;;  %v7496_v47 = vmax.f32 %v7468_v24, 0.0 }
 0x434   : > { %v7483_v11 = vadd.f32 %v14285_v8, %v7413_v18  ;;  %7772 = vrot.lane.b32.xlu0 %v14388_v16, %s11901_s13  ;;  %7770 = vrot.lane.b32.xlu1 %v14383_v32, %s11901_s13  ;;  %v7497_v29 = vmax.f32 %v7469_v19, 0.0 }
 0x435   : > { %v7510_v38 = vmax.f32 %v7482_v52, 0.0 }
 0x436   : > { %v7511_v8 = vmax.f32 %v7483_v11, 0.0 }
 0x437   : > { %v7524_v0 = vpack.c.bf16 %v7510_v38, %v7496_v47 }
 0x438   : > { %v7525_v46 = vpack.c.bf16 %v7511_v8, %v7497_v29  ;;  %7776 = vrot.lane.b32.xlu0 %v14403_v36, %s11901_s13  ;;  %7774 = vrot.lane.b32.xlu1 %v14400_v17, %s11901_s13 }
 0x439   : > { %v14409_v54 = vmul.bf16 %v7716_v14, %v7524_v0  ;;  %v14616_v14 = vld [vmem:[%s15349_s4] sm:$0xf] }
 0x43a   : > { %v14411_v35 = vmul.bf16 %v7723_v49, %v7525_v46 }
 0x43c   : > { %8055 = vrot.lane.b32.xlu0 %v14339_v63, %s11900_s11  ;;  %7778 = vrot.lane.b32.xlu1 %v14409_v54, %s11901_s13  ;;  %s11479_s13 = smul.u32 96, %s12186_s21 }
 0x440   : > { %8053 = vrot.lane.b32.xlu0 %v14350_v22, %s11900_s11  ;;  %8057 = vrot.lane.b32.xlu1 %v14297_v31, %s11900_s11 }
 0x444   : > { %8061 = vrot.lane.b32.xlu0 %v14355_v48, %s11900_s11  ;;  %8059 = vrot.lane.b32.xlu1 %v14305_v60, %s11900_s11 }
 0x448   : > { %8065 = vrot.lane.b32.xlu0 %v14374_v58, %s11900_s11  ;;  %8063 = vrot.lane.b32.xlu1 %v14360_v51, %s11900_s11 }
 0x44c   : > { %8069 = vrot.lane.b32.xlu0 %v14383_v32, %s11900_s11  ;;  %8067 = vrot.lane.b32.xlu1 %v14377_v7, %s11900_s11 }
 0x450   : > { %8073 = vrot.lane.b32.xlu0 %v14400_v17, %s11900_s11  ;;  %8071 = vrot.lane.b32.xlu1 %v14388_v16, %s11900_s11 }
 0x454   : > { %8077 = vrot.lane.b32.xlu0 %v14409_v54, %s11900_s11  ;;  %8075 = vrot.lane.b32.xlu1 %v14403_v36, %s11900_s11 }
 0x458   : > { %8358 = vrot.lane.b32.xlu0 %v14297_v31, %s11902_s19  ;;  %8356 = vrot.lane.b32.xlu1 %v14339_v63, %s11902_s19 }
 0x45c   : > { %8360 = vrot.lane.b32.xlu0 %v14305_v60, %s11902_s19  ;;  %8354 = vrot.lane.b32.xlu1 %v14350_v22, %s11902_s19 }
 0x460   : > { %8364 = vrot.lane.b32.xlu0 %v14360_v51, %s11902_s19  ;;  %8362 = vrot.lane.b32.xlu1 %v14355_v48, %s11902_s19 }
 0x464   : > { %8368 = vrot.lane.b32.xlu0 %v14377_v7, %s11902_s19  ;;  %8366 = vrot.lane.b32.xlu1 %v14374_v58, %s11902_s19 }
 0x468   : > { %8372 = vrot.lane.b32.xlu0 %v14388_v16, %s11902_s19  ;;  %8370 = vrot.lane.b32.xlu1 %v14383_v32, %s11902_s19 }
 0x46b   : > { %v7759_v5 = vpop.permute.xlu0 %7758 }
 0x46c   : > { %8376 = vrot.lane.b32.xlu0 %v14403_v36, %s11902_s19  ;;  %8374 = vrot.lane.b32.xlu1 %v14400_v17, %s11902_s19 }
 0x46f   : > { %v7761_v9 = vpop.permute.xlu0 %7760 }
 0x470   : > { %8669 = vrot.lane.b32.xlu0 %v14339_v63, %s11903_s2  ;;  %8671 = vrot.lane.b32.xlu1 %v14297_v31, %s11903_s2  ;;  %v7782_v55 = vsel %vm1351_vm2, %v7759_v5, %v7761_v9 }
 0x474   : > { %8673 = vrot.lane.b32.xlu0 %v14305_v60, %s11903_s2  ;;  %8675 = vrot.lane.b32.xlu1 %v14355_v48, %s11903_s2 }
 0x478   : > { %8667 = vrot.lane.b32.xlu0 %v14350_v22, %s11903_s2  ;;  %8677 = vrot.lane.b32.xlu1 %v14360_v51, %s11903_s2 }
 0x47c   : > { %8679 = vrot.lane.b32.xlu0 %v14374_v58, %s11903_s2  ;;  %8378 = vrot.lane.b32.xlu1 %v14409_v54, %s11902_s19  ;;  %s15267_s19 = scalar_lea.vmem [#allocation10], %s11479_s13 }
 0x480   : > { %8683 = vrot.lane.b32.xlu0 %v14383_v32, %s11903_s2  ;;  %8681 = vrot.lane.b32.xlu1 %v14377_v7, %s11903_s2 }
 0x484   : > { %8687 = vrot.lane.b32.xlu0 %v14400_v17, %s11903_s2  ;;  %8685 = vrot.lane.b32.xlu1 %v14388_v16, %s11903_s2 }
 0x488   : > { %8984 = vrot.lane.b32.xlu0 %v14297_v31, %s11904_s17  ;;  %8689 = vrot.lane.b32.xlu1 %v14403_v36, %s11903_s2 }
 0x48c   : > { %8988 = vrot.lane.b32.xlu0 %v14355_v48, %s11904_s17  ;;  %8982 = vrot.lane.b32.xlu1 %v14339_v63, %s11904_s17 }
 0x490   : > { %8691 = vrot.lane.b32.xlu0 %v14409_v54, %s11903_s2  ;;  %8986 = vrot.lane.b32.xlu1 %v14305_v60, %s11904_s17  ;;  %s11480_s2 = smul.u32 1536, %s11881_s30  ;;  %s10587_s30 = scalar_lea.sflag [#allocation4], %s12186_s21 }
 0x494   : > { %8990 = vrot.lane.b32.xlu0 %v14360_v51, %s11904_s17  ;;  %8980 = vrot.lane.b32.xlu1 %v14350_v22, %s11904_s17 }
 0x496   : > { %v7757_v61 = vpop.permute.xlu1 %7756 }
 0x497   : > { %v7781_v59 = vsel %vm1351_vm2, %v7757_v61, %v7759_v5 }
 0x498   : > { %7807 = vmatprep.subr.bf16.mxu1 %v7781_v59  ;;  %8994 = vrot.lane.b32.xlu0 %v14377_v7, %s11904_s17 }
 0x499   : > { %8992 = vrot.lane.b32.xlu1 %v14374_v58, %s11904_s17 }
 0x49a   : > { %v7755_v3 = vpop.permute.xlu1 %7754 }
 0x49b   : > { %v7780_v23 = vsel %vm1351_vm2, %v7755_v3, %v7757_v61 }
 0x49c   : > { %8998 = vrot.lane.b32.xlu0 %v14388_v16, %s11904_s17  ;;  %7808 = vmatpush1.bf16.msra.mxu1 %v7780_v23 }
 0x49d   : > { %8996 = vrot.lane.b32.xlu1 %v14383_v32, %s11904_s17 }
 0x49e   : > { %v7765_v26 = vpop.permute.xlu0 %7764  ;;  %v7763_v4 = vpop.permute.xlu1 %7762 }
 0x49f   : > { %10934 = vmatmul.mubr.msk.bf16.vlgmr.msra.gmra.mrb[12].mxu1 %vm587_vm1, %v14516_v43  ;;  %v7783_v42 = vsel %vm1351_vm2, %v7761_v9, %v7763_v4  ;;  %v7784_v27 = vsel %vm1351_vm2, %v7763_v4, %v7765_v26 }
 0x4a0   : > { %9002 = vrot.lane.b32.xlu0 %v14403_v36, %s11904_s17  ;;  %7848 = vmatprep.subr.bf16.mxu1 %v7783_v42 }
 0x4a1   : > { %9000 = vrot.lane.b32.xlu1 %v14400_v17, %s11904_s17  ;;  %7849 = vmatpush1.bf16.msra.mxu1 %v7782_v55 }
 0x4a2   : > { %v7769_v33 = vpop.permute.xlu0 %7768  ;;  %v7767_v53 = vpop.permute.xlu1 %7766  ;;  %7880 = vmatprep.mubr.bf16.mxu1 %v15404_v20 }
 0x4a3   : > { %v7785_v41 = vsel %vm1351_vm2, %v7765_v26, %v7767_v53  ;;  %v7786_v50 = vsel %vm1351_vm2, %v7767_v53, %v7769_v33 }
 0x4a4   : > { %9295 = vrot.lane.b32.xlu0 %v14339_v63, %s11905_s26  ;;  %7889 = vmatprep.subr.bf16.mxu1 %v7785_v41 }
 0x4a5   : > { %9297 = vrot.lane.b32.xlu1 %v14297_v31, %s11905_s26 }
 0x4a6   : > { %v7773_v1 = vpop.permute.xlu0 %7772  ;;  %v7771_v62 = vpop.permute.xlu1 %7770 }
 0x4a7   : > { %10935 = vmatmul.mubr.msk.bf16.vlgmr.msra.gmra.mrb[16].mxu1 %vm587_vm1, %v14516_v43  ;;  %v7787_v34 = vsel %vm1351_vm2, %v7769_v33, %v7771_v62  ;;  %v7788_v45 = vsel %vm1351_vm2, %v7771_v62, %v7773_v1 }
 0x4a8   : > { %7890 = vmatpush1.bf16.msra.mxu1 %v7784_v27  ;;  %9299 = vrot.lane.b32.xlu0 %v14305_v60, %s11905_s26 }
 0x4a9   : > { %9301 = vrot.lane.b32.xlu1 %v14355_v48, %s11905_s26  ;;  %7930 = vmatprep.subr.bf16.mxu1 %v7787_v34 }
 0x4aa   : > { %v7777_v15 = vpop.permute.xlu0 %7776  ;;  %v7775_v6 = vpop.permute.xlu1 %7774  ;;  %7921 = vmatprep.mubr.bf16.mxu1 %v15404_v20 }
 0x4ab   : > { %v7789_v21 = vsel %vm1351_vm2, %v7773_v1, %v7775_v6  ;;  %v7790_v10 = vsel %vm1351_vm2, %v7775_v6, %v7777_v15 }
 0x4ac   : > { %9293 = vrot.lane.b32.xlu0 %v14350_v22, %s11905_s26 }
 0x4ad   : > { %9004 = vrot.lane.b32.xlu1 %v14409_v54, %s11904_s17  ;;  %s10603_s17 = sshll.u32 %s15267_s19, 4  ;;  %s15296_s17 = int_to_ptr.vmem [resolvable:$true] %s10603_s17 }
 0x4ae   : > { %v8056_v37 = vpop.permute.xlu0 %8055  ;;  %v7779_v39 = vpop.permute.xlu1 %7778  ;;  %s11795_s20 = scalar_lea.vmem %s15296_s17, 1536  ;;  %p11802_p4 = scmp.lt.s32.totalorder %s15296_s17, %s11800_s12 }
 0x4af   : > { %10936 = vmatmul.mubr.msk.bf16.vlgmr.msra.gmra.mrb[20].mxu1 %vm587_vm1, %v14516_v43  ;;  %v7791_v40 = vsel %vm1351_vm2, %v7777_v15, %v7779_v39  ;;  %p11796_p1 = scmp.ne.s32.totalorder %s15296_s17, %s11795_s20 }
 0x4b0   : > { %7931 = vmatpush1.bf16.msra.mxu1 %v7786_v50  ;;  %9305 = vrot.lane.b32.xlu0 %v14374_v58, %s11905_s26 }
 0x4b1   : > { %9303 = vrot.lane.b32.xlu1 %v14360_v51, %s11905_s26  ;;  %7971 = vmatprep.subr.bf16.mxu1 %v7789_v21  ;;  %v14717_v21 = vld [vmem:[%s15349_s4 + $0xc] sm:$0xf]  ;;  %p11797_p10 = pnand %p11796_p1, %p15414_p6 }
 0x4b2   : > { %v8054_v22 = vpop.permute.xlu0 %8053  ;;  %v8058_v57 = vpop.permute.xlu1 %8057  ;;  %7962 = vmatprep.mubr.bf16.mxu1 %v15404_v20 }
 0x4b3   : > { %v8080_v2 = vsel %vm559_vm0, %v8056_v37, %v8058_v57  ;;  %v8079_v18 = vsel %vm559_vm0, %v8054_v22, %v8056_v37  ;;  %p11798_p3 = pneg %p11797_p10 }
 0x4b4   : > { %9309 = vrot.lane.b32.xlu0 %v14383_v32, %s11905_s26 }
 0x4b5   : > { %9307 = vrot.lane.b32.xlu1 %v14377_v7, %s11905_s26 }
 0x4b6   : > { %v8062_v13 = vpop.permute.xlu0 %8061  ;;  %v8060_v30 = vpop.permute.xlu1 %8059 }
 0x4b7   : > { %10937 = vmatmul.mubr.msk.bf16.vlgmr.msra.gmra.mrb[24].mxu1 %vm587_vm1, %v14516_v43  ;;  %v8082_v11 = vsel %vm559_vm0, %v8060_v30, %v8062_v13  ;;  %v8081_v8 = vsel %vm559_vm0, %v8058_v57, %v8060_v30 }
 0x4b8   : > { %7972 = vmatpush1.bf16.msra.mxu1 %v7788_v45  ;;  %9313 = vrot.lane.b32.xlu0 %v14400_v17, %s11905_s26 }
 0x4b9   : > { %9311 = vrot.lane.b32.xlu1 %v14388_v16, %s11905_s26  ;;  %8012 = vmatprep.subr.bf16.mxu1 %v7791_v40 }
 0x4ba   : > { %v14568_v56 = vpop.permute.xlu0 %8065  ;;  %v8064_v24 = vpop.permute.xlu1 %8063  ;;  %8003 = vmatprep.mubr.bf16.mxu1 %v15404_v20 }
 0x4bb   : > { %v8084_v0 = vsel %vm559_vm0, %v8064_v24, %v14568_v56  ;;  %v8083_v9 = vsel %vm559_vm0, %v8062_v13, %v8064_v24 }
 0x4bc   : > { %9611 = vrot.lane.b32.xlu0 %v14305_v60, %s11906_s25 }
 0x4bd   : > { %9315 = vrot.lane.b32.xlu1 %v14403_v36, %s11905_s26 }
 0x4be   : > { %v14575_v12 = vpop.permute.xlu0 %8069  ;;  %v8068_v25 = vpop.permute.xlu1 %8067 }
 0x4bf   : > { %10938 = vmatmul.mubr.msk.bf16.vlgmr.msra.gmra.mrb[28].mxu1 %vm587_vm1, %v14516_v43  ;;  %v8086_v3 = vsel %vm559_vm0, %v8068_v25, %v14575_v12  ;;  %v8085_v42 = vsel %vm559_vm0, %v14568_v56, %v8068_v25 }
 0x4c0   : > { %8013 = vmatpush1.bf16.msra.mxu1 %v7790_v10  ;;  %9317 = vrot.lane.b32.xlu0 %v14409_v54, %s11905_s26 }
 0x4c1   : > { %9609 = vrot.lane.b32.xlu1 %v14297_v31, %s11906_s25  ;;  %8106 = vmatprep.subr.bf16.mxu1 %v8080_v2 }
 0x4c2   : > { %v14585_v28 = vpop.permute.xlu0 %8073  ;;  %v14587_v19 = vpop.permute.xlu1 %8071  ;;  %8044 = vmatprep.mubr.bf16.mxu1 %v15404_v20 }
 0x4c3   : > { %v8088_v33 = vsel %vm559_vm0, %v14587_v19, %v14585_v28  ;;  %v8087_v34 = vsel %vm559_vm0, %v14575_v12, %v14587_v19 }
 0x4c4   : > { %9615 = vrot.lane.b32.xlu0 %v14360_v51, %s11906_s25 }
 0x4c5   : > { %9613 = vrot.lane.b32.xlu1 %v14355_v48, %s11906_s25 }
 0x4c6   : > { %v14594_v44 = vpop.permute.xlu0 %8077  ;;  %v14596_v52 = vpop.permute.xlu1 %8075 }
 0x4c7   : > { %10939 = vmatmul.mubr.msk.bf16.vlgmr.msra.gmra.mrb[32].mxu1 %vm587_vm1, %v14516_v43  ;;  %v8090_v6 = vsel %vm559_vm0, %v14596_v52, %v14594_v44  ;;  %v8089_v13 = vsel %vm559_vm0, %v14585_v28, %v14596_v52 }
 0x4c8   : > { %8107 = vmatpush1.bf16.msra.mxu1 %v8079_v18  ;;  %9617 = vrot.lane.b32.xlu0 %v14374_v58, %s11906_s25 }
 0x4c9   : > { %9607 = vrot.lane.b32.xlu1 %v14339_v63, %s11906_s25  ;;  %8147 = vmatprep.subr.bf16.mxu1 %v8082_v11 }
 0x4ca   : > { %v14606_v47 = vpop.permute.xlu0 %8358  ;;  %v14608_v38 = vpop.permute.xlu1 %8356  ;;  %8138 = vmatprep.mubr.bf16.mxu1 %v15404_v20 }
 0x4cb   : > { %v8381_v45 = vsel %vm2114_vm3, %v14608_v38, %v14606_v47 }
 0x4cc   : > { %9621 = vrot.lane.b32.xlu0 %v14383_v32, %s11906_s25 }
 0x4cd   : > { %9619 = vrot.lane.b32.xlu1 %v14377_v7, %s11906_s25 }
 0x4ce   : > { %v14620_v49 = vpop.permute.xlu0 %8360  ;;  %v14622_v29 = vpop.permute.xlu1 %8354 }
 0x4cf   : > { %10940 = vmatmul.mubr.msk.bf16.vlgmr.msra.gmra.mrb[36].mxu1 %vm587_vm1, %v14616_v14  ;;  %v8380_v10 = vsel %vm2114_vm3, %v14622_v29, %v14608_v38  ;;  %v8382_v52 = vsel %vm2114_vm3, %v14606_v47, %v14620_v49 }
 0x4d0   : > { %8148 = vmatpush1.bf16.msra.mxu1 %v8081_v8  ;;  %9625 = vrot.lane.b32.xlu0 %v14400_v17, %s11906_s25 }
 0x4d1   : > { %9623 = vrot.lane.b32.xlu1 %v14388_v16, %s11906_s25  ;;  %8188 = vmatprep.subr.bf16.mxu1 %v8084_v0 }
 0x4d2   : > { %v14633_v46 = vpop.permute.xlu0 %8364  ;;  %v14635_v5 = vpop.permute.xlu1 %8362  ;;  %8179 = vmatprep.mubr.bf16.mxu1 %v15404_v20 }
 0x4d4   : > { %9922 = vrot.lane.b32.xlu0 %v14297_v31, %s11907_s23 }
 0x4d5   : > { %9627 = vrot.lane.b32.xlu1 %v14403_v36, %s11906_s25 }
 0x4d6   : > { %v14642_v61 = vpop.permute.xlu0 %8368  ;;  %v14644_v59 = vpop.permute.xlu1 %8366 }
 0x4d7   : > { %10941 = vmatmul.mubr.msk.bf16.vlgmr.msra.gmra.mrb[40].mxu1 %vm587_vm1, %v14616_v14  ;;  %v8386_v0 = vsel %vm2114_vm3, %v14644_v59, %v14642_v61 }
 0x4d8   : > { %8189 = vmatpush1.bf16.msra.mxu1 %v8083_v9  ;;  %9629 = vrot.lane.b32.xlu0 %v14409_v54, %s11906_s25 }
 0x4d9   : > { %9924 = vrot.lane.b32.xlu1 %v14305_v60, %s11907_s23  ;;  %8229 = vmatprep.subr.bf16.mxu1 %v8086_v3 }
 0x4da   : > { %v14655_v23 = vpop.permute.xlu0 %8372  ;;  %v14657_v43 = vpop.permute.xlu1 %8370  ;;  %8220 = vmatprep.mubr.bf16.mxu1 %v15404_v20 }
 0x4dc   : > { %9926 = vrot.lane.b32.xlu0 %v14355_v48, %s11907_s23 }
 0x4dd   : > { %9631 = vrot.lane.b32.xlu1 %v14411_v35, %s11906_s25 }
 0x4de   : > { %v14664_v26 = vpop.permute.xlu0 %8376  ;;  %v14666_v4 = vpop.permute.xlu1 %8374 }
 0x4df   : > { %v14673_v55 = vsel %vm2114_vm3, %v14666_v4, %v14664_v26  ;;  %10942 = vmatmul.mubr.msk.bf16.vlgmr.msra.gmra.mrb[44].mxu1 %vm587_vm1, %v14616_v14 }
 0x4e0   : > { %8230 = vmatpush1.bf16.msra.mxu1 %v8085_v42  ;;  %9920 = vrot.lane.b32.xlu0 %v14339_v63, %s11907_s23 }
 0x4e1   : > { %9928 = vrot.lane.b32.xlu1 %v14360_v51, %s11907_s23  ;;  %8270 = vmatprep.subr.bf16.mxu1 %v8088_v33 }
 0x4e2   : > { %v8670_v53 = vpop.permute.xlu0 %8669  ;;  %v8672_v41 = vpop.permute.xlu1 %8671  ;;  %8261 = vmatprep.mubr.bf16.mxu1 %v15404_v20 }
 0x4e3   : > { %v8694_v1 = vsel %vm2884_vm4, %v8670_v53, %v8672_v41 }
 0x4e4   : > { %9932 = vrot.lane.b32.xlu0 %v14377_v7, %s11907_s23  ;;  %8720 = vmatprep.subr.bf16.mxu0 %v8694_v1 }
 0x4e5   : > { %9930 = vrot.lane.b32.xlu1 %v14374_v58, %s11907_s23 }
 0x4e6   : > { %v14690_v62 = vpop.permute.xlu0 %8673  ;;  %v14692_v27 = vpop.permute.xlu1 %8675 }
 0x4e7   : > { %v14699_v15 = vsel %vm2884_vm4, %v8672_v41, %v14690_v62  ;;  %10943 = vmatmul.mubr.msk.bf16.vlgmr.msra.gmra.mrb[48].mxu1 %vm587_vm1, %v14616_v14 }
 0x4e8   : > { %8271 = vmatpush1.bf16.msra.mxu1 %v8087_v34  ;;  %9936 = vrot.lane.b32.xlu0 %v14388_v16, %s11907_s23  ;;  %v8696_v34 = vsel %vm2884_vm4, %v14690_v62, %v14692_v27 }
 0x4e9   : > { %9934 = vrot.lane.b32.xlu1 %v14383_v32, %s11907_s23  ;;  %8311 = vmatprep.subr.bf16.mxu1 %v8090_v6 }
 0x4ea   : > { %v8668_v37 = vpop.permute.xlu0 %8667  ;;  %v8678_v39 = vpop.permute.xlu1 %8677  ;;  %8302 = vmatprep.mubr.bf16.mxu1 %v15404_v20 }
 0x4eb   : > { %v8693_v50 = vsel %vm2884_vm4, %v8668_v37, %v8670_v53  ;;  %v8697_v40 = vsel %vm2884_vm4, %v14692_v27, %v8678_v39  ;;  %v14908_v37 = vld [vmem:[%s15349_s4 + $0x14] sm:$0xf] }
 0x4ec   : > { %9940 = vrot.lane.b32.xlu0 %v14403_v36, %s11907_s23  ;;  %8721 = vmatpush1.bf16.msra.mxu0 %v8693_v50 }
 0x4ed   : > { %9938 = vrot.lane.b32.xlu1 %v14400_v17, %s11907_s23 }
 0x4ee   : > { %v14721_v22 = vpop.permute.xlu0 %8679  ;;  %v14723_v57 = vpop.permute.xlu1 %8378 }
 0x4ef   : > { %10944 = vmatmul.mubr.msk.bf16.vlgmr.msra.gmra.mrb[52].mxu1 %vm587_vm1, %v14616_v14  ;;  %v8698_v30 = vsel %vm2884_vm4, %v8678_v39, %v14721_v22  ;;  %10954 = vmatmul.mubr.msk.bf16.vlgmr.msra.gmra.mrb[16].mxu0 %vm587_vm1, %v14717_v21  ;;  %v8391_v33 = vsel %vm2114_vm3, %v14664_v26, %v14723_v57 }
 0x4f0   : > { %8312 = vmatpush1.bf16.msra.mxu1 %v8089_v13  ;;  %9944 = vrot.lane.b32.xlu0 %v14411_v35, %s11907_s23 }
 0x4f1   : > { %9942 = vrot.lane.b32.xlu1 %v14409_v54, %s11907_s23  ;;  %8407 = vmatprep.subr.bf16.mxu1 %v8381_v45  ;;  %s15294_s23 = scalar_lea.hbm %s15353_s8, %s11480_s2 }
 0x4f2   : > { %8802 = vmatprep.subr.bf16.mxu0 %v8698_v30  ;;  %v14743_v56 = vpop.permute.xlu0 %8683  ;;  %v14745_v24 = vpop.permute.xlu1 %8681  ;;  %8343 = vmatprep.mubr.bf16.mxu1 %v15404_v20 }
 0x4f3   : > { %8803 = vmatpush1.bf16.msra.mxu0 %v8697_v40  ;;  %8834 = vmatprep.mubr.bf16.mxu0 %v15404_v20  ;;  %v8700_v57 = vsel %vm2884_vm4, %v14745_v24, %v14743_v56 }
 0x4f4   : > { %10237 = vrot.lane.b32.xlu0 %v14305_v60, %s11908_s0 }
 0x4f5   : > { %10235 = vrot.lane.b32.xlu1 %v14297_v31, %s11908_s0  ;;  %v8383_v31 = vsel %vm2114_vm3, %v14620_v49, %v14635_v5  ;;  %v14837_v49 = vld [vmem:[%s15349_s4 + $0x10] sm:$0xf] }
 0x4f6   : > { %v14753_v12 = vpop.permute.xlu0 %8687  ;;  %v8686_v25 = vpop.permute.xlu1 %8685 }
 0x4f7   : > { %10945 = vmatmul.mubr.msk.bf16.vlgmr.msra.gmra.mrb[56].mxu1 %vm587_vm1, %v14616_v14  ;;  %v8702_v2 = vsel %vm2884_vm4, %v8686_v25, %v14753_v12  ;;  %10956 = vmatmul.mubr.msk.bf16.vlgmr.msra.gmra.mrb[20].mxu0 %vm587_vm1, %v14717_v21  ;;  %v8701_v60 = vsel %vm2884_vm4, %v14743_v56, %v8686_v25  ;;  %v8699_v56 = vsel %vm2884_vm4, %v14721_v22, %v14745_v24 }
 0x4f8   : > { %8408 = vmatpush1.bf16.msra.mxu1 %v8380_v10  ;;  %10241 = vrot.lane.b32.xlu0 %v14360_v51, %s11908_s0  ;;  %v14784_v51 = vld [vmem:[%s15349_s4 + $0x8] sm:$0xf] }
 0x4f9   : > { %10239 = vrot.lane.b32.xlu1 %v14355_v48, %s11908_s0  ;;  %8448 = vmatprep.subr.bf16.mxu1 %v8383_v31 }
 0x4fa   : > { %8884 = vmatprep.subr.bf16.mxu0 %v8702_v2  ;;  %v14773_v28 = vpop.permute.xlu0 %8984  ;;  %v14775_v19 = vpop.permute.xlu1 %8689  ;;  %8439 = vmatprep.mubr.bf16.mxu1 %v15404_v20 }
 0x4fb   : > { %8885 = vmatpush1.bf16.msra.mxu0 %v8701_v60  ;;  %8916 = vmatprep.mubr.bf16.mxu0 %v15404_v20  ;;  %v8703_v24 = vsel %vm2884_vm4, %v14753_v12, %v14775_v19  ;;  %v14974_v12 = vld [vmem:[%s15349_s4 + $0x18] sm:$0xf] }
 0x4fc   : > { %10243 = vrot.lane.b32.xlu0 %v14374_v58, %s11908_s0 }
 0x4fd   : > { %10233 = vrot.lane.b32.xlu1 %v14339_v63, %s11908_s0  ;;  %v8385_v63 = vsel %vm2114_vm3, %v14633_v46, %v14644_v59 }
 0x4fe   : > { %v14788_v48 = vpop.permute.xlu0 %8988  ;;  %v8983_v44 = vpop.permute.xlu1 %8982 }
 0x4ff   : > { %10947 = vmatmul.mubr.msk.bf16.vlgmr.msra.gmra.mrb[60].mxu1 %vm587_vm1, %v14784_v51  ;;  %v9007_v58 = vsel %vm3658_vm5, %v8983_v44, %v14773_v28  ;;  %10958 = vmatmul.mubr.msk.bf16.vlgmr.msra.gmra.mrb[24].mxu0 %vm587_vm1, %v14717_v21 }
 0x500   : > { %8449 = vmatpush1.bf16.msra.mxu1 %v8382_v52  ;;  %10247 = vrot.lane.b32.xlu0 %v14383_v32, %s11908_s0 }
 0x501   : > { %10245 = vrot.lane.b32.xlu1 %v14377_v7, %s11908_s0  ;;  %8489 = vmatprep.subr.bf16.mxu1 %v8385_v63  ;;  %v8384_v7 = vsel %vm2114_vm3, %v14635_v5, %v14633_v46 }
 0x502   : > { %9033 = vmatprep.subr.bf16.mxu0 %v9007_v58  ;;  %v14806_v18 = vpop.permute.xlu0 %8691  ;;  %v14808_v11 = vpop.permute.xlu1 %8986  ;;  %8480 = vmatprep.mubr.bf16.mxu1 %v15404_v20 }
 0x503   : > { %9065 = vmatprep.mubr.bf16.mxu0 %v15404_v20  ;;  %v8704_v10 = vsel %vm2884_vm4, %v14775_v19, %v14806_v18  ;;  %v9008_v18 = vsel %vm3658_vm5, %v14773_v28, %v14808_v11 }
 0x504   : > { %10251 = vrot.lane.b32.xlu0 %v14400_v17, %s11908_s0  ;;  %v8387_v17 = vsel %vm2114_vm3, %v14642_v61, %v14657_v43 }
 0x505   : > { %10249 = vrot.lane.b32.xlu1 %v14388_v16, %s11908_s0  ;;  %v10544_v16 = vld [vmem:[%s15351_s6] sm:$0xff] }
 0x506   : > { %v8991_v32 = vpop.permute.xlu0 %8990  ;;  %v8981_v47 = vpop.permute.xlu1 %8980 }
 0x507   : > { %v9006_v38 = vsel %vm3658_vm5, %v8981_v47, %v8983_v44  ;;  %10948 = vmatmul.mubr.msk.bf16.vlgmr.msra.gmra.mrb[64].mxu1 %vm587_vm1, %v14784_v51  ;;  %v9010_v29 = vsel %vm3658_vm5, %v14788_v48, %v8991_v32  ;;  %v9009_v44 = vsel %vm3658_vm5, %v14808_v11, %v14788_v48 }
 0x508   : > { %8490 = vmatpush1.bf16.msra.mxu1 %v8384_v7  ;;  %10255 = vrot.lane.b32.xlu0 %v14409_v54, %s11908_s0 }
 0x509   : > { %10253 = vrot.lane.b32.xlu1 %v14403_v36, %s11908_s0  ;;  %8530 = vmatprep.subr.bf16.mxu1 %v8387_v17 }
 0x50a   : > { %9034 = vmatpush1.bf16.msra.mxu0 %v9006_v38  ;;  %v14832_v14 = vpop.permute.xlu0 %8994  ;;  %8521 = vmatprep.mubr.bf16.mxu1 %v15404_v20 }
 0x50b   : > { %v14840_v54 = vpop.permute.xlu1 %8992 }
 0x50c   : > { %10547 = vperm.xlu0 %11584, %v10544_v16   ;;  %v9011_v36 = vsel %vm3658_vm5, %v8991_v32, %v14840_v54  ;;  %v9012_v38 = vsel %vm3658_vm5, %v14840_v54, %v14832_v14 }
 0x50d   : > { %10961 = vmatmul.mubr.msk.bf16.vlgmr.msra.gmra.mrb[28].mxu0 %vm587_vm1, %v14837_v49  ;;  %10257 = vrot.lane.b32.xlu1 %v14411_v35, %s11908_s0  ;;  %v8389_v35 = vsel %vm2114_vm3, %v14655_v23, %v14666_v4  ;;  %v8388_v4 = vsel %vm2114_vm3, %v14657_v43, %v14655_v23  ;;  %s11801_s0 = scalar_lea.vmem %s11800_s12, 3072 }
 0x50e   : > { %9115 = vmatprep.subr.bf16.mxu0 %v9011_v36  ;;  %v8999_v8 = vpop.permute.xlu0 %8998  ;;  %9147 = vmatprep.mubr.bf16.mxu0 %v15404_v20  ;;  %p11803_p9 = scmp.lt.s32.totalorder %s11801_s0, %s11795_s20 }
 0x50f   : > { %9116 = vmatpush1.bf16.msra.mxu0 %v9010_v29  ;;  %v14854_v46 = vpop.permute.xlu1 %8996  ;;  %10949 = vmatmul.mubr.msk.bf16.vlgmr.msra.gmra.mrb[68].mxu1 %vm587_vm1, %v14784_v51 }
 0x510   : > { %8531 = vmatpush1.bf16.msra.mxu1 %v8386_v0  ;;  %8562 = vmatprep.mubr.bf16.mxu1 %v15404_v20  ;;  %v9014_v59 = vsel %vm3658_vm5, %v14854_v46, %v8999_v8  ;;  %v9013_v32 = vsel %vm3658_vm5, %v14832_v14, %v14854_v46  ;;  %p11804_p5 = por %p11803_p9, %p11802_p4 }
 0x511   : > { %8571 = vmatprep.subr.bf16.mxu1 %v8389_v35 }
 0x512   : > { %v14862_v5 = vpop.permute.xlu0 %9002  ;;  %p11805_p7 = pnand %p11804_p5, %p11798_p3 }
 0x513   : > { %v14864_v9 = vpop.permute.xlu1 %9000 }
 0x514   : > { %v9015_v61 = vsel %vm3658_vm5, %v8999_v8, %v14864_v9  ;;  %v9016_v46 = vsel %vm3658_vm5, %v14864_v9, %v14862_v5 }
 0x515   : > { %10963 = vmatmul.mubr.msk.bf16.vlgmr.msra.gmra.mrb[32].mxu0 %vm587_vm1, %v14837_v49  ;;  %9197 = vmatprep.subr.bf16.mxu0 %v9015_v61 }
 0x516   : > { %9198 = vmatpush1.bf16.msra.mxu0 %v9014_v59  ;;  %v9296_v3 = vpop.permute.xlu0 %9295  ;;  %9229 = vmatprep.mubr.bf16.mxu0 %v15404_v20 }
 0x517   : > { %v14876_v42 = vpop.permute.xlu1 %9297  ;;  %10950 = vmatmul.mubr.msk.bf16.vlgmr.msra.gmra.mrb[72].mxu1 %vm587_vm1, %v14784_v51 }
 0x518   : > { %8572 = vmatpush1.bf16.msra.mxu1 %v8388_v4  ;;  %v9320_v53 = vsel %vm4427_vm6, %v9296_v3, %v14876_v42  ;;  %8603 = vmatprep.mubr.bf16.mxu1 %v15404_v20 }
 0x519   : > { %8612 = vmatprep.subr.bf16.mxu1 %v8391_v33  ;;  %9346 = vmatprep.subr.bf16.mxu0 %v9320_v53 }
 0x51a   : > { %v14886_v41 = vpop.permute.xlu0 %9299 }
 0x51b   : > { %v14888_v23 = vpop.permute.xlu1 %9301  ;;  %v9321_v33 = vsel %vm4427_vm6, %v14876_v42, %v14886_v41 }
 0x51c   : > { %v9322_v61 = vsel %vm4427_vm6, %v14886_v41, %v14888_v23 }
 0x51d   : > { %10965 = vmatmul.mubr.msk.bf16.vlgmr.msra.gmra.mrb[36].mxu0 %vm587_vm1, %v14837_v49 }
 0x51e   : > { %v9294_v43 = vpop.permute.xlu0 %9293  ;;  %9378 = vmatprep.mubr.bf16.mxu0 %v15404_v20 }
 0x51f   : > { %v9319_v1 = vsel %vm4427_vm6, %v9294_v43, %v9296_v3  ;;  %v14894_v26 = vpop.permute.xlu1 %9004  ;;  %10951 = vmatmul.mubr.msk.bf16.vlgmr.msra.gmra.mrb[76].mxu1 %vm587_vm1, %v14784_v51  ;;  %v15044_v3 = vld [vmem:[%s15349_s4 + $0x1c] sm:$0xf] }
 0x520   : > { %8613 = vmatpush1.bf16.msra.mxu1 %v14673_v55  ;;  %9347 = vmatpush1.bf16.msra.mxu0 %v9319_v1  ;;  %v9017_v16 = vsel %vm3658_vm5, %v14862_v5, %v14894_v26 }
 0x521   : > { %8761 = vmatprep.subr.bf16.mxu1 %v8696_v34  ;;  %8644 = vmatprep.mubr.bf16.mxu1 %v15404_v20 }
 0x522   : > { %v14903_v6 = vpop.permute.xlu0 %9305 }
 0x523   : > { %v9304_v39 = vpop.permute.xlu1 %9303 }
 0x524   : > { %v9323_v50 = vsel %vm4427_vm6, %v14888_v23, %v9304_v39  ;;  %v9324_v55 = vsel %vm4427_vm6, %v9304_v39, %v14903_v6 }
 0x525   : > { %10968 = vmatmul.mubr.msk.bf16.vlgmr.msra.gmra.mrb[40].mxu0 %vm587_vm1, %v14908_v37  ;;  %9428 = vmatprep.subr.bf16.mxu0 %v9324_v55 }
 0x526   : > { %9429 = vmatpush1.bf16.msra.mxu0 %v9323_v50  ;;  %v14916_v62 = vpop.permute.xlu0 %9309  ;;  %9460 = vmatprep.mubr.bf16.mxu0 %v15404_v20 }
 0x527   : > { %v14919_v27 = vpop.permute.xlu1 %9307  ;;  %10952 = vmatmul.mubr.msk.bf16.vlgmr.msra.gmra.mrb[80].mxu1 %vm587_vm1, %v14784_v51 }
 0x528   : > { %8762 = vmatpush1.bf16.msra.mxu1 %v14699_v15  ;;  %8793 = vmatprep.mubr.bf16.mxu1 %v15404_v20  ;;  %v9326_v43 = vsel %vm4427_vm6, %v14919_v27, %v14916_v62  ;;  %v9325_v26 = vsel %vm4427_vm6, %v14903_v6, %v14919_v27 }
 0x529   : > { %8843 = vmatprep.subr.bf16.mxu1 %v8700_v57 }
 0x52a   : > { %v14928_v13 = vpop.permute.xlu0 %9313 }
 0x52b   : > { %v9312_v30 = vpop.permute.xlu1 %9311 }
 0x52c   : > { %v9327_v45 = vsel %vm4427_vm6, %v14916_v62, %v9312_v30  ;;  %v9328_v40 = vsel %vm4427_vm6, %v9312_v30, %v14928_v13 }
 0x52d   : > { %10970 = vmatmul.mubr.msk.bf16.vlgmr.msra.gmra.mrb[44].mxu0 %vm587_vm1, %v14908_v37  ;;  %9510 = vmatprep.subr.bf16.mxu0 %v9328_v40 }
 0x52e   : > { %9511 = vmatpush1.bf16.msra.mxu0 %v9327_v45  ;;  %v14936_v15 = vpop.permute.xlu0 %9611  ;;  %9542 = vmatprep.mubr.bf16.mxu0 %v15404_v20 }
 0x52f   : > { %v14942_v25 = vpop.permute.xlu1 %9315  ;;  %10955 = vmatmul.mubr.msk.bf16.vlgmr.msra.gmra.mrb[84].mxu1 %vm587_vm1, %v14717_v21 }
 0x530   : > { %8844 = vmatpush1.bf16.msra.mxu1 %v8699_v56  ;;  %8875 = vmatprep.mubr.bf16.mxu1 %v15404_v20  ;;  %v9329_v57 = vsel %vm4427_vm6, %v14928_v13, %v14942_v25 }
 0x531   : > { %8925 = vmatprep.subr.bf16.mxu1 %v8704_v10 }
 0x532   : > { %v14950_v2 = vpop.permute.xlu0 %9317 }
 0x533   : > { %v9610_v60 = vpop.permute.xlu1 %9609  ;;  %v9330_v50 = vsel %vm4427_vm6, %v14942_v25, %v14950_v2 }
 0x534   : > { %v9634_v31 = vsel %vm5194_vm7, %v9610_v60, %v14936_v15 }
 0x535   : > { %10972 = vmatmul.mubr.msk.bf16.vlgmr.msra.gmra.mrb[48].mxu0 %vm587_vm1, %v14908_v37  ;;  %9660 = vmatprep.subr.bf16.mxu0 %v9634_v31 }
 0x536   : > { %v14956_v22 = vpop.permute.xlu0 %9615  ;;  %9692 = vmatprep.mubr.bf16.mxu0 %v15404_v20 }
 0x537   : > { %v14962_v51 = vpop.permute.xlu1 %9613  ;;  %10957 = vmatmul.mubr.msk.bf16.vlgmr.msra.gmra.mrb[88].mxu1 %vm587_vm1, %v14717_v21 }
 0x538   : > { %8926 = vmatpush1.bf16.msra.mxu1 %v8703_v24  ;;  %8957 = vmatprep.mubr.bf16.mxu1 %v15404_v20  ;;  %v9636_v45 = vsel %vm5194_vm7, %v14962_v51, %v14956_v22  ;;  %v9635_v10 = vsel %vm5194_vm7, %v14936_v15, %v14962_v51 }
 0x539   : > { %9074 = vmatprep.subr.bf16.mxu1 %v9009_v44 }
 0x53a   : > { %v9618_v52 = vpop.permute.xlu0 %9617 }
 0x53b   : > { %v9608_v58 = vpop.permute.xlu1 %9607  ;;  %v9637_v7 = vsel %vm5194_vm7, %v14956_v22, %v9618_v52  ;;  %v15123_v22 = vld [vmem:[%s15349_s4 + $0x20] sm:$0xf] }
 0x53c   : > { %v9633_v63 = vsel %vm5194_vm7, %v9608_v58, %v9610_v60 }
 0x53d   : > { %9661 = vmatpush1.bf16.msra.mxu0 %v9633_v63 }
 0x53e   : > { %v14976_v19 = vpop.permute.xlu0 %9621 }
 0x53f   : > { %v14981_v48 = vpop.permute.xlu1 %9619  ;;  %10959 = vmatmul.mubr.msk.bf16.vlgmr.msra.gmra.mrb[92].mxu1 %vm587_vm1, %v14717_v21 }
 0x540   : > { %9075 = vmatpush1.bf16.msra.mxu1 %v9008_v18  ;;  %10975 = vmatmul.mubr.msk.bf16.vlgmr.msra.gmra.mrb[52].mxu0 %vm587_vm1, %v14974_v12  ;;  %v9638_v47 = vsel %vm5194_vm7, %v9618_v52, %v14981_v48  ;;  %v9639_v18 = vsel %vm5194_vm7, %v14981_v48, %v14976_v19 }
 0x541   : > { %9156 = vmatprep.subr.bf16.mxu1 %v9013_v32  ;;  %9742 = vmatprep.subr.bf16.mxu0 %v9638_v47 }
 0x542   : > { %9743 = vmatpush1.bf16.msra.mxu0 %v9637_v7  ;;  %v9626_v28 = vpop.permute.xlu0 %9625  ;;  %9106 = vmatprep.mubr.bf16.mxu1 %v15404_v20 }
 0x543   : > { %v14995_v21 = vpop.permute.xlu1 %9623  ;;  %9774 = vmatprep.mubr.bf16.mxu0 %v15404_v20 }
 0x544   : > { %v9641_v29 = vsel %vm5194_vm7, %v14995_v21, %v9626_v28  ;;  %v9640_v31 = vsel %vm5194_vm7, %v14976_v19, %v14995_v21 }
 0x546   : > { %v9923_v11 = vpop.permute.xlu0 %9922 }
 0x547   : > { %v15001_v17 = vpop.permute.xlu1 %9627  ;;  %10962 = vmatmul.mubr.msk.bf16.vlgmr.msra.gmra.mrb[96].mxu1 %vm587_vm1, %v14837_v49 }
 0x548   : > { %9157 = vmatpush1.bf16.msra.mxu1 %v9012_v38  ;;  %10977 = vmatmul.mubr.msk.bf16.vlgmr.msra.gmra.mrb[56].mxu0 %vm587_vm1, %v14974_v12  ;;  %v9642_v36 = vsel %vm5194_vm7, %v9626_v28, %v15001_v17 }
 0x549   : > { %9238 = vmatprep.subr.bf16.mxu1 %v9017_v16  ;;  %9824 = vmatprep.subr.bf16.mxu0 %v9642_v36 }
 0x54a   : > { %9825 = vmatpush1.bf16.msra.mxu0 %v9641_v29  ;;  %v15014_v14 = vpop.permute.xlu0 %9629  ;;  %9188 = vmatprep.mubr.bf16.mxu1 %v15404_v20 }
 0x54b   : > { %v15017_v54 = vpop.permute.xlu1 %9924  ;;  %9856 = vmatprep.mubr.bf16.mxu0 %v15404_v20  ;;  %v9643_v36 = vsel %vm5194_vm7, %v15001_v17, %v15014_v14 }
 0x54c   : > { %v9947_v8 = vsel %vm5957_vm8, %v9923_v11, %v15017_v54 }
 0x54d   : > { %9973 = vmatprep.subr.bf16.mxu0 %v9947_v8 }
 0x54e   : > { %v15022_v0 = vpop.permute.xlu0 %9926 }
 0x54f   : > { %v15027_v35 = vpop.permute.xlu1 %9631  ;;  %10964 = vmatmul.mubr.msk.bf16.vlgmr.msra.gmra.mrb[100].mxu1 %vm587_vm1, %v14837_v49 }
 0x550   : > { %9239 = vmatpush1.bf16.msra.mxu1 %v9016_v46  ;;  %10979 = vmatmul.mubr.msk.bf16.vlgmr.msra.gmra.mrb[60].mxu0 %vm587_vm1, %v14974_v12  ;;  %v9644_v47 = vsel %vm5194_vm7, %v15014_v14, %v15027_v35  ;;  %v9948_v14 = vsel %vm5957_vm8, %v15017_v54, %v15022_v0 }
 0x551   : > { %9387 = vmatprep.subr.bf16.mxu1 %v9322_v61  ;;  %9270 = vmatprep.mubr.bf16.mxu1 %v15404_v20 }
 0x552   : > { %v9921_v59 = vpop.permute.xlu0 %9920  ;;  %10005 = vmatprep.mubr.bf16.mxu0 %v15404_v20 }
 0x553   : > { %v9946_v5 = vsel %vm5957_vm8, %v9921_v59, %v9923_v11  ;;  %v15039_v9 = vpop.permute.xlu1 %9928 }
 0x554   : > { %9974 = vmatpush1.bf16.msra.mxu0 %v9946_v5  ;;  %v9949_v29 = vsel %vm5957_vm8, %v15022_v0, %v15039_v9 }
 0x556   : > { %v15046_v4 = vpop.permute.xlu0 %9932 }
 0x557   : > { %v9931_v53 = vpop.permute.xlu1 %9930  ;;  %10966 = vmatmul.mubr.msk.bf16.vlgmr.msra.gmra.mrb[104].mxu1 %vm587_vm1, %v14837_v49 }
 0x558   : > { %v9950_v23 = vsel %vm5957_vm8, %v15039_v9, %v9931_v53  ;;  %9388 = vmatpush1.bf16.msra.mxu1 %v9321_v33  ;;  %10982 = vmatmul.mubr.msk.bf16.vlgmr.msra.gmra.mrb[64].mxu0 %vm587_vm1, %v15044_v3  ;;  %v9951_v1 = vsel %vm5957_vm8, %v9931_v53, %v15046_v4 }
 0x559   : > { %9469 = vmatprep.subr.bf16.mxu1 %v9326_v43  ;;  %10055 = vmatprep.subr.bf16.mxu0 %v9951_v1 }
 0x55a   : > { %10056 = vmatpush1.bf16.msra.mxu0 %v9950_v23  ;;  %v15062_v42 = vpop.permute.xlu0 %9936  ;;  %9419 = vmatprep.mubr.bf16.mxu1 %v15404_v20 }
 0x55b   : > { %v15065_v49 = vpop.permute.xlu1 %9934  ;;  %10087 = vmatprep.mubr.bf16.mxu0 %v15404_v20 }
 0x55c   : > { %v9953_v61 = vsel %vm5957_vm8, %v15065_v49, %v15062_v42  ;;  %v9952_v54 = vsel %vm5957_vm8, %v15046_v4, %v15065_v49 }
 0x55e   : > { %v15068_v41 = vpop.permute.xlu0 %9940 }
 0x55f   : > { %v9939_v34 = vpop.permute.xlu1 %9938  ;;  %10969 = vmatmul.mubr.msk.bf16.vlgmr.msra.gmra.mrb[108].mxu1 %vm587_vm1, %v14908_v37 }
 0x560   : > { %v9954_v39 = vsel %vm5957_vm8, %v15062_v42, %v9939_v34  ;;  %9470 = vmatpush1.bf16.msra.mxu1 %v9325_v26  ;;  %10984 = vmatmul.mubr.msk.bf16.vlgmr.msra.gmra.mrb[68].mxu0 %vm587_vm1, %v15044_v3  ;;  %v9955_v55 = vsel %vm5957_vm8, %v9939_v34, %v15068_v41 }
 0x561   : > { %9551 = vmatprep.subr.bf16.mxu1 %v9330_v50  ;;  %10137 = vmatprep.subr.bf16.mxu0 %v9955_v55 }
 0x562   : > { %10138 = vmatpush1.bf16.msra.mxu0 %v9954_v39  ;;  %v15084_v6 = vpop.permute.xlu0 %9944  ;;  %9501 = vmatprep.mubr.bf16.mxu1 %v15404_v20 }
 0x563   : > { %v15087_v62 = vpop.permute.xlu1 %9942  ;;  %10169 = vmatprep.mubr.bf16.mxu0 %v15404_v20 }
 0x564   : > { %v9956_v1 = vsel %vm5957_vm8, %v15068_v41, %v15087_v62 }
 0x566   : > { %v15090_v27 = vpop.permute.xlu0 %10237 }
 0x567   : > { %v10236_v30 = vpop.permute.xlu1 %10235  ;;  %10971 = vmatmul.mubr.msk.bf16.vlgmr.msra.gmra.mrb[112].mxu1 %vm587_vm1, %v14908_v37 }
 0x568   : > { %9552 = vmatpush1.bf16.msra.mxu1 %v9329_v57  ;;  %10986 = vmatmul.mubr.msk.bf16.vlgmr.msra.gmra.mrb[72].mxu0 %vm587_vm1, %v15044_v3  ;;  %v10260_v40 = vsel %vm6720_vm9, %v10236_v30, %v15090_v27 }
 0x569   : > { %9701 = vmatprep.subr.bf16.mxu1 %v9636_v45  ;;  %10286 = vmatprep.subr.bf16.mxu0 %v10260_v40 }
 0x56a   : > { %v15104_v56 = vpop.permute.xlu0 %10241  ;;  %9583 = vmatprep.mubr.bf16.mxu1 %v15404_v20  ;;  %10318 = vmatprep.mubr.bf16.mxu0 %v15404_v20 }
 0x56b   : > { %v15108_v13 = vpop.permute.xlu1 %10239 }
 0x56c   : > { %v10262_v4 = vsel %vm6720_vm9, %v15108_v13, %v15104_v56  ;;  %v10261_v39 = vsel %vm6720_vm9, %v15090_v27, %v15108_v13 }
 0x56e   : > { %v10244_v25 = vpop.permute.xlu0 %10243 }
 0x56f   : > { %v10234_v2 = vpop.permute.xlu1 %10233  ;;  %10973 = vmatmul.mubr.msk.bf16.vlgmr.msra.gmra.mrb[116].mxu1 %vm587_vm1, %v14908_v37  ;;  %v10263_v58 = vsel %vm6720_vm9, %v15104_v56, %v10244_v25 }
 0x570   : > { %v10259_v60 = vsel %vm6720_vm9, %v10234_v2, %v10236_v30  ;;  %9702 = vmatpush1.bf16.msra.mxu1 %v9635_v10  ;;  %9733 = vmatprep.mubr.bf16.mxu1 %v15404_v20 }
 0x571   : > { %9783 = vmatprep.subr.bf16.mxu1 %v9640_v31  ;;  %10287 = vmatpush1.bf16.msra.mxu0 %v10259_v60 }
 0x572   : > { %v15125_v15 = vpop.f32.mrb[12].mxu1  ;;  %v15131_v51 = vpop.permute.xlu0 %10247 }
 0x573   : > { %v15127_v24 = vpop.permute.xlu1 %10245  ;;  %v15129_v37 = vpop.f32.mrb[13].mxu1 }
 0x574   : > { %10989 = vmatmul.mubr.msk.bf16.vlgmr.msra.gmra.mrb[76].mxu0 %vm587_vm1, %v15123_v22  ;;  %v10264_v44 = vsel %vm6720_vm9, %v10244_v25, %v15127_v24  ;;  %v7845_v52 = vpop.f32.mrb[14].mxu1 }
 0x575   : > { %10368 = vmatprep.subr.bf16.mxu0 %v10264_v44  ;;  %v7846_v63 = vpop.f32.mrb[15].mxu1  ;;  %10400 = vmatprep.mubr.bf16.mxu0 %v15404_v20 }
 0x576   : > { %10369 = vmatpush1.bf16.msra.mxu0 %v10263_v58  ;;  %v10252_v7 = vpop.permute.xlu0 %10251 }
 0x577   : > { %v15143_v32 = vpop.permute.xlu1 %10249  ;;  %10976 = vmatmul.mubr.msk.bf16.vlgmr.msra.gmra.mrb[120].mxu1 %vm587_vm1, %v14974_v12 }
 0x578   : > { %9784 = vmatpush1.bf16.msra.mxu1 %v9639_v18  ;;  %9815 = vmatprep.mubr.bf16.mxu1 %v15404_v20  ;;  %v10267_v38 = vsel %vm6720_vm9, %v15143_v32, %v10252_v7  ;;  %v10266_v41 = vsel %vm6720_vm9, %v15131_v51, %v15143_v32 }
 0x579   : > { %9865 = vmatprep.subr.bf16.mxu1 %v9644_v47 }
 0x57a   : > { %v15151_v28 = vpop.f32.mrb[16].mxu1  ;;  %v10256_v45 = vpop.permute.xlu0 %10255 }
 0x57b   : > { %v15153_v21 = vpop.permute.xlu1 %10253  ;;  %v15155_v11 = vpop.f32.mrb[17].mxu1 }
 0x57c   : > { %10991 = vmatmul.mubr.msk.bf16.vlgmr.msra.gmra.mrb[80].mxu0 %vm587_vm1, %v15123_v22  ;;  %v10268_v19 = vsel %vm6720_vm9, %v10252_v7, %v15153_v21  ;;  %v7886_v48 = vpop.f32.mrb[18].mxu1  ;;  %v10269_v31 = vsel %vm6720_vm9, %v15153_v21, %v10256_v45 }
 0x57d   : > { %10450 = vmatprep.subr.bf16.mxu0 %v10268_v19  ;;  %v7887_v16 = vpop.f32.mrb[19].mxu1  ;;  %10482 = vmatprep.mubr.bf16.mxu0 %v15404_v20 }
 0x57e   : > { %10451 = vmatpush1.bf16.msra.mxu0 %v10267_v38 }
 0x57f   : > { %10978 = vmatmul.mubr.msk.bf16.vlgmr.msra.gmra.mrb[124].mxu1 %vm587_vm1, %v14974_v12  ;;  %v10258_v30 = vpop.permute.xlu1 %10257 }
 0x580   : > { %9866 = vmatpush1.bf16.msra.mxu1 %v9643_v36  ;;  %9897 = vmatprep.mubr.bf16.mxu1 %v15404_v20  ;;  %v10270_v40 = vsel %vm6720_vm9, %v10256_v45, %v10258_v30 }
 0x581   : > { %10014 = vmatprep.subr.bf16.mxu1 %v9949_v29 }
 0x582   : > { %v15173_v8 = vpop.f32.mrb[20].mxu1 }
 0x583   : > { %v15175_v46 = vpop.f32.mrb[21].mxu1 }
 0x584   : > { %10993 = vmatmul.mubr.msk.bf16.vlgmr.msra.gmra.mrb[84].mxu0 %vm587_vm1, %v15123_v22  ;;  %v7927_v35 = vpop.f32.mrb[22].mxu1 }
 0x585   : > { %v7928_v17 = vpop.f32.mrb[23].mxu1 }
 0x587   : > { %10980 = vmatmul.mubr.msk.bf16.vlgmr.msra.gmra.mrb[128].mxu1 %vm587_vm1, %v14974_v12  ;;  %v9957_v12 = vsel %vm5957_vm8, %v15087_v62, %v15084_v6 }
 0x588   : > { %10015 = vmatpush1.bf16.msra.mxu1 %v9948_v14  ;;  %10046 = vmatprep.mubr.bf16.mxu1 %v15404_v20 }
 0x589   : > { %10096 = vmatprep.subr.bf16.mxu1 %v9953_v61 }
 0x58a   : > { %v7964_v59 = vpop.f32.mrb[24].mxu1 }
 0x58b   : > { %v15188_v5 = vpop.f32.mrb[25].mxu1 }
 0x58c   : > { %v7968_v9 = vpop.f32.mrb[26].mxu1 }
 0x58d   : > { %v7969_v33 = vpop.f32.mrb[27].mxu1 }
 0x58f   : > { %10983 = vmatmul.mubr.msk.bf16.vlgmr.msra.gmra.mrb[132].mxu1 %vm587_vm1, %v15044_v3 }
 0x590   : > { %10097 = vmatpush1.bf16.msra.mxu1 %v9952_v54  ;;  %10128 = vmatprep.mubr.bf16.mxu1 %v15404_v20 }
 0x591   : > { %10178 = vmatprep.subr.bf16.mxu1 %v9957_v12 }
 0x592   : > { %v8005_v0 = vpop.f32.mrb[28].mxu1 }
 0x593   : > { %v8007_v53 = vpop.f32.mrb[29].mxu1 }
 0x594   : > { %v8009_v23 = vpop.f32.mrb[30].mxu1 }
 0x595   : > { %v8010_v43 = vpop.f32.mrb[31].mxu1 }
 0x597   : > { %10985 = vmatmul.mubr.msk.bf16.vlgmr.msra.gmra.mrb[136].mxu1 %vm587_vm1, %v15044_v3 }
 0x598   : > { %10179 = vmatpush1.bf16.msra.mxu1 %v9956_v1  ;;  %10210 = vmatprep.mubr.bf16.mxu1 %v15404_v20 }
 0x599   : > { %10327 = vmatprep.subr.bf16.mxu1 %v10262_v4 }
 0x59a   : > { %v8046_v42 = vpop.f32.mrb[32].mxu1 }
 0x59b   : > { %v8048_v49 = vpop.f32.mrb[33].mxu1 }
 0x59c   : > { %v8050_v26 = vpop.f32.mrb[34].mxu1 }
 0x59d   : > { %v8051_v34 = vpop.f32.mrb[35].mxu1 }
 0x59f   : > { %10987 = vmatmul.mubr.msk.bf16.vlgmr.msra.gmra.mrb[140].mxu1 %vm587_vm1, %v15044_v3  ;;  %v10265_v3 = vsel %vm6720_vm9, %v15127_v24, %v15131_v51 }
 0x5a0   : > { %10328 = vmatpush1.bf16.msra.mxu1 %v10261_v39  ;;  %10359 = vmatprep.mubr.bf16.mxu1 %v15404_v20 }
 0x5a1   : > { %10409 = vmatprep.subr.bf16.mxu1 %v10266_v41 }
 0x5a2   : > { %v8140_v50 = vpop.f32.mrb[36].mxu1 }
 0x5a3   : > { %v8141_v55 = vadd.f32 %v8140_v50, %v15125_v15  ;;  %v8142_v6 = vpop.f32.mrb[37].mxu1 }
 0x5a4   : > { %v8143_v62 = vadd.f32 %v8142_v6, %v15129_v37  ;;  %v8144_v57 = vpop.f32.mrb[38].mxu1 }
 0x5a5   : > { %v8145_v27 = vpop.f32.mrb[39].mxu1 }
 0x5a7   : > { %10990 = vmatmul.mubr.msk.bf16.vlgmr.msra.gmra.mrb[144].mxu1 %vm587_vm1, %v15123_v22 }
 0x5a8   : > { %10410 = vmatpush1.bf16.msra.mxu1 %v10265_v3  ;;  %10441 = vmatprep.mubr.bf16.mxu1 %v15404_v20 }
 0x5a9   : > { %10491 = vmatprep.subr.bf16.mxu1 %v10270_v40 }
 0x5aa   : > { %v8181_v56 = vpop.f32.mrb[40].mxu1 }
 0x5ab   : > { %v8182_v13 = vadd.f32 %v8181_v56, %v15151_v28  ;;  %v8183_v25 = vpop.f32.mrb[41].mxu1 }
 0x5ac   : > { %v8184_v10 = vadd.f32 %v8183_v25, %v15155_v11  ;;  %v8185_v2 = vpop.f32.mrb[42].mxu1 }
 0x5ad   : > { %v8186_v60 = vpop.f32.mrb[43].mxu1 }
 0x5af   : > { %10992 = vmatmul.mubr.msk.bf16.vlgmr.msra.gmra.mrb[148].mxu1 %vm587_vm1, %v15123_v22 }
 0x5b0   : > { %10492 = vmatpush1.bf16.msra.mxu1 %v10269_v31  ;;  %10523 = vmatprep.mubr.bf16.mxu1 %v15404_v20 }
 0x5b2   : > { %v8222_v15 = vpop.f32.mrb[44].mxu1 }
 0x5b3   : > { %v8223_v24 = vadd.f32 %v8222_v15, %v15173_v8  ;;  %v8224_v37 = vpop.f32.mrb[45].mxu1 }
 0x5b4   : > { %v8225_v51 = vadd.f32 %v8224_v37, %v15175_v46  ;;  %v8226_v44 = vpop.f32.mrb[46].mxu1 }
 0x5b5   : > { %v8227_v52 = vpop.f32.mrb[47].mxu1 }
 0x5b7   : > { %10994 = vmatmul.mubr.msk.bf16.vlgmr.msra.gmra.mrb[152].mxu1 %vm587_vm1, %v15123_v22 }
 0x5ba   : > { %v8263_v58 = vpop.f32.mrb[48].mxu1 }
 0x5bb   : > { %v15237_v63 = vadd.f32 %v8263_v58, %v7964_v59  ;;  %v8265_v18 = vpop.f32.mrb[49].mxu1 }
 0x5bc   : > { %v15240_v32 = vadd.f32 %v8265_v18, %v15188_v5  ;;  %v8267_v47 = vpop.f32.mrb[50].mxu1 }
 0x5bd   : > { %v8268_v20 = vpop.f32.mrb[51].mxu1 }
 0x5c2   : > { %v8304_v7 = vpop.f32.mrb[52].mxu1  ;;  %v8754_v28 = vpop.f32.mrb[16].mxu0 }
 0x5c3   : > { %v15242_v21 = vadd.f32 %v8304_v7, %v8005_v0  ;;  %v8306_v11 = vpop.f32.mrb[53].mxu1  ;;  %v8756_v19 = vpop.f32.mrb[17].mxu0 }
 0x5c4   : > { %v15244_v48 = vadd.f32 %v8306_v11, %v8007_v53  ;;  %v8308_v38 = vpop.f32.mrb[54].mxu1  ;;  %v8758_v16 = vpop.f32.mrb[18].mxu0 }
 0x5c5   : > { %v8309_v22 = vpop.f32.mrb[55].mxu1  ;;  %v8759_v36 = vpop.f32.mrb[19].mxu0 }
 0x5ca   : > { %v8345_v29 = vpop.f32.mrb[56].mxu1  ;;  %v8836_v8 = vpop.f32.mrb[20].mxu0 }
 0x5cb   : > { %v15246_v46 = vadd.f32 %v8345_v29, %v8046_v42  ;;  %v8347_v35 = vpop.f32.mrb[57].mxu1  ;;  %v8838_v17 = vpop.f32.mrb[21].mxu0 }
 0x5cc   : > { %v15248_v14 = vadd.f32 %v8347_v35, %v8048_v49  ;;  %v8349_v61 = vpop.f32.mrb[58].mxu1  ;;  %v8840_v59 = vpop.f32.mrb[22].mxu0 }
 0x5cd   : > { %v8350_v5 = vpop.f32.mrb[59].mxu1  ;;  %v8841_v9 = vpop.f32.mrb[23].mxu0 }
 0x5d2   : > { %v8441_v33 = vpop.f32.mrb[60].mxu1  ;;  %v8918_v54 = vpop.f32.mrb[24].mxu0 }
 0x5d3   : > { %v8653_v12 = vadd.f32 %v8441_v33, %v8141_v55  ;;  %v8443_v0 = vpop.f32.mrb[61].mxu1  ;;  %v8920_v53 = vpop.f32.mrb[25].mxu0 }
 0x5d4   : > { %v8654_v23 = vadd.f32 %v8443_v0, %v8143_v62  ;;  %v8445_v43 = vpop.f32.mrb[62].mxu1  ;;  %v8922_v1 = vpop.f32.mrb[26].mxu0 }
 0x5d5   : > { %v8966_v4 = vadd.f32 %v8754_v28, %v8653_v12  ;;  %v8446_v26 = vpop.f32.mrb[63].mxu1  ;;  %v8923_v42 = vpop.f32.mrb[27].mxu0 }
 0x5d6   : > { %v8967_v34 = vadd.f32 %v8756_v19, %v8654_v23 }
 0x5da   : > { %v8482_v39 = vpop.f32.mrb[64].mxu1 }
 0x5db   : > { %v15250_v41 = vadd.f32 %v8482_v39, %v8182_v13  ;;  %v8484_v49 = vpop.f32.mrb[65].mxu1 }
 0x5dc   : > { %v15252_v50 = vadd.f32 %v8484_v49, %v8184_v10  ;;  %v8486_v6 = vpop.f32.mrb[66].mxu1 }
 0x5dd   : > { %v8487_v57 = vpop.f32.mrb[67].mxu1 }
 0x5e0   : > { %v9067_v30 = vpop.f32.mrb[28].mxu0 }
 0x5e1   : > { %v9279_v27 = vadd.f32 %v9067_v30, %v8966_v4  ;;  %v9069_v55 = vpop.f32.mrb[29].mxu0 }
 0x5e2   : > { %v9280_v3 = vadd.f32 %v9069_v55, %v8967_v34  ;;  %v8523_v45 = vpop.f32.mrb[68].mxu1  ;;  %v9071_v62 = vpop.f32.mrb[30].mxu0 }
 0x5e3   : > { %v8657_v40 = vadd.f32 %v8523_v45, %v8223_v24  ;;  %v8525_v56 = vpop.f32.mrb[69].mxu1  ;;  %v9072_v25 = vpop.f32.mrb[31].mxu0 }
 0x5e4   : > { %v8658_v2 = vadd.f32 %v8525_v56, %v8225_v51  ;;  %v8527_v60 = vpop.f32.mrb[70].mxu1 }
 0x5e5   : > { %v8970_v31 = vadd.f32 %v8836_v8, %v8657_v40  ;;  %v8528_v15 = vpop.f32.mrb[71].mxu1 }
 0x5e6   : > { %v8971_v13 = vadd.f32 %v8838_v17, %v8658_v2 }
 0x5e8   : > { %v9149_v37 = vpop.f32.mrb[32].mxu0 }
 0x5e9   : > { %v9283_v44 = vadd.f32 %v9149_v37, %v8970_v31  ;;  %v9151_v10 = vpop.f32.mrb[33].mxu0 }
 0x5ea   : > { %v9284_v52 = vadd.f32 %v9151_v10, %v8971_v13  ;;  %v8564_v58 = vpop.f32.mrb[72].mxu1  ;;  %v9153_v18 = vpop.f32.mrb[34].mxu0 }
 0x5eb   : > { %v8659_v47 = vadd.f32 %v8564_v58, %v15237_v63  ;;  %v8566_v20 = vpop.f32.mrb[73].mxu1  ;;  %v9154_v7 = vpop.f32.mrb[35].mxu0 }
 0x5ec   : > { %v8660_v28 = vadd.f32 %v8566_v20, %v15240_v32  ;;  %v8568_v24 = vpop.f32.mrb[74].mxu1 }
 0x5ed   : > { %v8569_v11 = vpop.f32.mrb[75].mxu1 }
 0x5f0   : > { %v9231_v19 = vpop.f32.mrb[36].mxu0 }
 0x5f1   : > { %v9233_v51 = vpop.f32.mrb[37].mxu0 }
 0x5f2   : > { %v8605_v38 = vpop.f32.mrb[76].mxu1  ;;  %v9235_v16 = vpop.f32.mrb[38].mxu0 }
 0x5f3   : > { %v8661_v22 = vadd.f32 %v8605_v38, %v15242_v21  ;;  %v8607_v36 = vpop.f32.mrb[77].mxu1  ;;  %v9236_v29 = vpop.f32.mrb[39].mxu0 }
 0x5f4   : > { %v8662_v8 = vadd.f32 %v8607_v36, %v15244_v48  ;;  %v8609_v35 = vpop.f32.mrb[78].mxu1 }
 0x5f5   : > { %v8974_v17 = vadd.f32 %v8918_v54, %v8661_v22  ;;  %v8610_v61 = vpop.f32.mrb[79].mxu1 }
 0x5f6   : > { %v8975_v63 = vadd.f32 %v8920_v53, %v8662_v8 }
 0x5f7   : > { %v9287_v59 = vadd.f32 %v9231_v19, %v8974_v17 }
 0x5f8   : > { %v9288_v5 = vadd.f32 %v9233_v51, %v8975_v63  ;;  %v9380_v9 = vpop.f32.mrb[40].mxu0 }
 0x5f9   : > { %v9592_v32 = vadd.f32 %v9380_v9, %v9279_v27  ;;  %v9382_v33 = vpop.f32.mrb[41].mxu0 }
 0x5fa   : > { %v9593_v12 = vadd.f32 %v9382_v33, %v9280_v3  ;;  %v8646_v0 = vpop.f32.mrb[80].mxu1  ;;  %v9384_v23 = vpop.f32.mrb[42].mxu0 }
 0x5fb   : > { %v8663_v43 = vadd.f32 %v8646_v0, %v15246_v46  ;;  %v8648_v1 = vpop.f32.mrb[81].mxu1  ;;  %v9385_v21 = vpop.f32.mrb[43].mxu0 }
 0x5fc   : > { %v8664_v4 = vadd.f32 %v8648_v1, %v15248_v14  ;;  %v8650_v26 = vpop.f32.mrb[82].mxu1 }
 0x5fd   : > { %v8651_v48 = vpop.f32.mrb[83].mxu1 }
 0x600   : > { %v9462_v42 = vpop.f32.mrb[44].mxu0 }
 0x601   : > { %v9596_v54 = vadd.f32 %v9462_v42, %v9283_v44  ;;  %v9464_v34 = vpop.f32.mrb[45].mxu0 }
 0x602   : > { %v9597_v53 = vadd.f32 %v9464_v34, %v9284_v52  ;;  %v8795_v39 = vpop.f32.mrb[84].mxu1  ;;  %v9466_v49 = vpop.f32.mrb[46].mxu0 }
 0x603   : > { %v8968_v6 = vadd.f32 %v8795_v39, %v15250_v41  ;;  %v8797_v57 = vpop.f32.mrb[85].mxu1  ;;  %v9467_v30 = vpop.f32.mrb[47].mxu0 }
 0x604   : > { %v8969_v27 = vadd.f32 %v8797_v57, %v15252_v50  ;;  %v8799_v55 = vpop.f32.mrb[86].mxu1 }
 0x605   : > { %v8800_v46 = vpop.f32.mrb[87].mxu1 }
 0x608   : > { %v9544_v3 = vpop.f32.mrb[48].mxu0 }
 0x609   : > { %v9600_v45 = vadd.f32 %v9544_v3, %v9287_v59  ;;  %v9546_v62 = vpop.f32.mrb[49].mxu0 }
 0x60a   : > { %v9601_v14 = vadd.f32 %v9546_v62, %v9288_v5  ;;  %v8877_v40 = vpop.f32.mrb[88].mxu1  ;;  %v9548_v56 = vpop.f32.mrb[50].mxu0 }
 0x60b   : > { %v8972_v25 = vadd.f32 %v8877_v40, %v8659_v47  ;;  %v8879_v2 = vpop.f32.mrb[89].mxu1  ;;  %v9549_v60 = vpop.f32.mrb[51].mxu0 }
 0x60c   : > { %v8973_v31 = vadd.f32 %v8879_v2, %v8660_v28  ;;  %v8881_v15 = vpop.f32.mrb[90].mxu1 }
 0x60d   : > { %v8882_v13 = vpop.f32.mrb[91].mxu1 }
 0x612   : > { %v8959_v37 = vpop.f32.mrb[92].mxu1 }
 0x613   : > { %v8976_v41 = vadd.f32 %v8959_v37, %v8663_v43  ;;  %v9694_v44 = vpop.f32.mrb[52].mxu0  ;;  %v8961_v10 = vpop.f32.mrb[93].mxu1 }
 0x614   : > { %v9906_v52 = vadd.f32 %v9694_v44, %v9592_v32  ;;  %v8977_v50 = vadd.f32 %v8961_v10, %v8664_v4  ;;  %v9696_v58 = vpop.f32.mrb[53].mxu0  ;;  %v8963_v18 = vpop.f32.mrb[94].mxu1 }
 0x615   : > { %v9907_v20 = vadd.f32 %v9696_v58, %v9593_v12  ;;  %v8964_v7 = vpop.f32.mrb[95].mxu1  ;;  %v9698_v24 = vpop.f32.mrb[54].mxu0 }
 0x616   : > { %v9699_v11 = vpop.f32.mrb[55].mxu0 }
 0x61a   : > { %v9108_v19 = vpop.f32.mrb[96].mxu1 }
 0x61b   : > { %v9281_v51 = vadd.f32 %v9108_v19, %v8968_v6  ;;  %v9776_v47 = vpop.f32.mrb[56].mxu0  ;;  %v9110_v38 = vpop.f32.mrb[97].mxu1 }
 0x61c   : > { %v9910_v16 = vadd.f32 %v9776_v47, %v9596_v54  ;;  %v9282_v28 = vadd.f32 %v9110_v38, %v8969_v27  ;;  %v9778_v22 = vpop.f32.mrb[57].mxu0  ;;  %v9112_v36 = vpop.f32.mrb[98].mxu1 }
 0x61d   : > { %v9911_v29 = vadd.f32 %v9778_v22, %v9597_v53  ;;  %v9113_v8 = vpop.f32.mrb[99].mxu1  ;;  %v9780_v35 = vpop.f32.mrb[58].mxu0 }
 0x61e   : > { %v9781_v17 = vpop.f32.mrb[59].mxu0 }
 0x622   : > { %v9190_v61 = vpop.f32.mrb[100].mxu1 }
 0x623   : > { %v9285_v63 = vadd.f32 %v9190_v61, %v8972_v25  ;;  %v9858_v59 = vpop.f32.mrb[60].mxu0  ;;  %v9192_v5 = vpop.f32.mrb[101].mxu1 }
 0x624   : > { %v9914_v9 = vadd.f32 %v9858_v59, %v9600_v45  ;;  %v9286_v32 = vadd.f32 %v9192_v5, %v8973_v31  ;;  %v9860_v33 = vpop.f32.mrb[61].mxu0  ;;  %v9194_v12 = vpop.f32.mrb[102].mxu1 }
 0x625   : > { %v9915_v0 = vadd.f32 %v9860_v33, %v9601_v14  ;;  %v9195_v23 = vpop.f32.mrb[103].mxu1  ;;  %v9862_v43 = vpop.f32.mrb[62].mxu0 }
 0x626   : > { %v9863_v1 = vpop.f32.mrb[63].mxu0 }
 0x62a   : > { %v9272_v21 = vpop.f32.mrb[104].mxu1 }
 0x62b   : > { %v9289_v4 = vadd.f32 %v9272_v21, %v8976_v41  ;;  %v10007_v26 = vpop.f32.mrb[64].mxu0  ;;  %v9274_v48 = vpop.f32.mrb[105].mxu1 }
 0x62c   : > { %v10219_v42 = vadd.f32 %v10007_v26, %v9906_v52  ;;  %v9290_v54 = vadd.f32 %v9274_v48, %v8977_v50  ;;  %v10009_v34 = vpop.f32.mrb[65].mxu0  ;;  %v9276_v53 = vpop.f32.mrb[106].mxu1 }
 0x62d   : > { %v10220_v39 = vadd.f32 %v10009_v34, %v9907_v20  ;;  %v9277_v49 = vpop.f32.mrb[107].mxu1  ;;  %v10011_v6 = vpop.f32.mrb[66].mxu0 }
 0x62e   : > { %v10012_v57 = vpop.f32.mrb[67].mxu0 }
 0x632   : > { %v9421_v30 = vpop.f32.mrb[108].mxu1 }
 0x633   : > { %v9594_v27 = vadd.f32 %v9421_v30, %v9281_v51  ;;  %v10089_v55 = vpop.f32.mrb[68].mxu0  ;;  %v9423_v46 = vpop.f32.mrb[109].mxu1 }
 0x634   : > { %v10223_v3 = vadd.f32 %v10089_v55, %v9910_v16  ;;  %v9595_v45 = vadd.f32 %v9423_v46, %v9282_v28  ;;  %v10091_v62 = vpop.f32.mrb[69].mxu0  ;;  %v9425_v14 = vpop.f32.mrb[110].mxu1 }
 0x635   : > { %v10224_v40 = vadd.f32 %v10091_v62, %v9911_v29  ;;  %v9426_v56 = vpop.f32.mrb[111].mxu1  ;;  %v10093_v25 = vpop.f32.mrb[70].mxu0 }
 0x636   : > { %v10094_v2 = vpop.f32.mrb[71].mxu0  ;;  %v15263_v28 = vpop.permute.xlu0 %10547 }
 0x63a   : > { %v9503_v60 = vpop.f32.mrb[112].mxu1 }
 0x63b   : > { %v9598_v31 = vadd.f32 %v9503_v60, %v9285_v63  ;;  %v10171_v15 = vpop.f32.mrb[72].mxu0  ;;  %v9505_v13 = vpop.f32.mrb[113].mxu1 }
 0x63c   : > { %v10227_v37 = vadd.f32 %v10171_v15, %v9914_v9  ;;  %v9599_v41 = vadd.f32 %v9505_v13, %v9286_v32  ;;  %v10173_v44 = vpop.f32.mrb[73].mxu0  ;;  %v9507_v10 = vpop.f32.mrb[114].mxu1 }
 0x63d   : > { %v10228_v52 = vadd.f32 %v10173_v44, %v9915_v0  ;;  %v9508_v50 = vpop.f32.mrb[115].mxu1  ;;  %v10175_v58 = vpop.f32.mrb[74].mxu0 }
 0x63e   : > { %v10176_v18 = vpop.f32.mrb[75].mxu0 }
 0x642   : > { %v9585_v20 = vpop.f32.mrb[116].mxu1 }
 0x643   : > { %v9602_v7 = vadd.f32 %v9585_v20, %v9289_v4  ;;  %v9587_v24 = vpop.f32.mrb[117].mxu1 }
 0x644   : > { %v9603_v11 = vadd.f32 %v9587_v24, %v9290_v54  ;;  %v9589_v19 = vpop.f32.mrb[118].mxu1 }
 0x645   : > { %v9590_v51 = vpop.f32.mrb[119].mxu1 }
 0x647   : > { %v10320_v47 = vpop.f32.mrb[76].mxu0 }
 0x648   : > { %v10532_v38 = vadd.f32 %v10320_v47, %v10219_v42  ;;  %v10322_v16 = vpop.f32.mrb[77].mxu0 }
 0x649   : > { %v10533_v22 = vadd.f32 %v10322_v16, %v10220_v39  ;;  %v10324_v36 = vpop.f32.mrb[78].mxu0 }
 0x64a   : > { %v10550_v29 = vadd.f32 %v15263_v28, %v10532_v38  ;;  %v9735_v8 = vpop.f32.mrb[120].mxu1  ;;  %v10325_v35 = vpop.f32.mrb[79].mxu0 }
 0x64b   : > { %v10551_v17 = vadd.f32 %v15263_v28, %v10533_v22  ;;  %v9908_v61 = vadd.f32 %v9735_v8, %v9594_v27  ;;  %v9737_v63 = vpop.f32.mrb[121].mxu1 }
 0x64c   : > { %v10562_v59 = vmax.f32 %v10550_v29, 0.0  ;;  %v9909_v5 = vadd.f32 %v9737_v63, %v9595_v45  ;;  %v9739_v9 = vpop.f32.mrb[122].mxu1 }
 0x64d   : > { %v10563_v32 = vmax.f32 %v10551_v17, 0.0  ;;  %v9740_v33 = vpop.f32.mrb[123].mxu1 }
 0x64e   : > { %10574 = vst [vmem:[%s15267_s19] sm:$0xff] %v10562_v59 }
 0x64f   : > { %10575 = vst [vmem:[%s15267_s19 + $0x8] sm:$0xff] %v10563_v32  ;;  %v10402_v12 = vpop.f32.mrb[80].mxu0 }
 0x650   : > { %v10536_v0 = vadd.f32 %v10402_v12, %v10223_v3  ;;  %v10404_v23 = vpop.f32.mrb[81].mxu0 }
 0x651   : > { %v10537_v43 = vadd.f32 %v10404_v23, %v10224_v40  ;;  %v10406_v1 = vpop.f32.mrb[82].mxu0 }
 0x652   : > { %v10554_v21 = vadd.f32 %v15263_v28, %v10536_v0  ;;  %v9817_v4 = vpop.f32.mrb[124].mxu1  ;;  %v10407_v26 = vpop.f32.mrb[83].mxu0 }
 0x653   : > { %v10555_v48 = vadd.f32 %v15263_v28, %v10537_v43  ;;  %v9912_v42 = vadd.f32 %v9817_v4, %v9598_v31  ;;  %v9819_v54 = vpop.f32.mrb[125].mxu1 }
 0x654   : > { %v10566_v34 = vmax.f32 %v10554_v21, 0.0  ;;  %v9913_v53 = vadd.f32 %v9819_v54, %v9599_v41  ;;  %v9821_v39 = vpop.f32.mrb[126].mxu1 }
 0x655   : > { %v10567_v49 = vmax.f32 %v10555_v48, 0.0  ;;  %v9822_v6 = vpop.f32.mrb[127].mxu1 }
 0x656   : > { %10578 = vst [vmem:[%s15267_s19 + $0x20] sm:$0xff] %v10566_v34 }
 0x657   : > { %10579 = vst [vmem:[%s15267_s19 + $0x28] sm:$0xff] %v10567_v49  ;;  %v10484_v57 = vpop.f32.mrb[84].mxu0 }
 0x658   : > { %v10540_v30 = vadd.f32 %v10484_v57, %v10227_v37  ;;  %v10486_v27 = vpop.f32.mrb[85].mxu0 }
 0x659   : > { %v10541_v55 = vadd.f32 %v10486_v27, %v10228_v52  ;;  %v10488_v46 = vpop.f32.mrb[86].mxu0 }
 0x65a   : > { %v10558_v3 = vadd.f32 %v15263_v28, %v10540_v30  ;;  %v9899_v45 = vpop.f32.mrb[128].mxu1  ;;  %v10489_v62 = vpop.f32.mrb[87].mxu0 }
 0x65b   : > { %v10559_v14 = vadd.f32 %v15263_v28, %v10541_v55  ;;  %v9916_v40 = vadd.f32 %v9899_v45, %v9602_v7  ;;  %v9901_v56 = vpop.f32.mrb[129].mxu1 }
 0x65c   : > { %v10570_v25 = vmax.f32 %v10558_v3, 0.0  ;;  %v9917_v2 = vadd.f32 %v9901_v56, %v9603_v11  ;;  %v9903_v60 = vpop.f32.mrb[130].mxu1 }
 0x65d   : > { %v10571_v31 = vmax.f32 %v10559_v14, 0.0  ;;  %v9904_v15 = vpop.f32.mrb[131].mxu1 }
 0x65e   : > { %10582 = vst [vmem:[%s15267_s19 + $0x40] sm:$0xff] %v10570_v25 }
 0x65f   : > { %10583 = vst [vmem:[%s15267_s19 + $0x48] sm:$0xff] %v10571_v31 }
 0x662   : > { %v10048_v13 = vpop.f32.mrb[132].mxu1 }
 0x663   : > { %v10221_v37 = vadd.f32 %v10048_v13, %v9908_v61  ;;  %v10050_v41 = vpop.f32.mrb[133].mxu1 }
 0x664   : > { %v10222_v44 = vadd.f32 %v10050_v41, %v9909_v5  ;;  %v10052_v10 = vpop.f32.mrb[134].mxu1 }
 0x665   : > { %v10053_v52 = vpop.f32.mrb[135].mxu1 }
 0x66a   : > { %v10130_v50 = vpop.f32.mrb[136].mxu1 }
 0x66b   : > { %v10225_v58 = vadd.f32 %v10130_v50, %v9912_v42  ;;  %v10132_v18 = vpop.f32.mrb[137].mxu1 }
 0x66c   : > { %v10226_v20 = vadd.f32 %v10132_v18, %v9913_v53  ;;  %v10134_v24 = vpop.f32.mrb[138].mxu1 }
 0x66d   : > { %v10135_v7 = vpop.f32.mrb[139].mxu1 }
 0x672   : > { %v10212_v19 = vpop.f32.mrb[140].mxu1 }
 0x673   : > { %v10229_v11 = vadd.f32 %v10212_v19, %v9916_v40  ;;  %v10214_v51 = vpop.f32.mrb[141].mxu1 }
 0x674   : > { %v10230_v47 = vadd.f32 %v10214_v51, %v9917_v2  ;;  %v10216_v38 = vpop.f32.mrb[142].mxu1 }
 0x675   : > { %v10217_v16 = vpop.f32.mrb[143].mxu1 }
 0x67a   : > { %v10361_v22 = vpop.f32.mrb[144].mxu1 }
 0x67b   : > { %v10534_v36 = vadd.f32 %v10361_v22, %v10221_v37  ;;  %v10363_v29 = vpop.f32.mrb[145].mxu1 }
 0x67c   : > { %v10535_v8 = vadd.f32 %v10363_v29, %v10222_v44  ;;  %v10365_v35 = vpop.f32.mrb[146].mxu1 }
 0x67d   : > { %v10552_v17 = vadd.f32 %v15263_v28, %v10534_v36  ;;  %v10366_v61 = vpop.f32.mrb[147].mxu1 }
 0x67e   : > { %v10553_v63 = vadd.f32 %v15263_v28, %v10535_v8 }
 0x67f   : > { %v10564_v59 = vmax.f32 %v10552_v17, 0.0 }
 0x680   : > { %v10565_v5 = vmax.f32 %v10553_v63, 0.0 }
 0x681   : > { %10576 = vst [vmem:[%s15267_s19 + $0x10] sm:$0xff] %v10564_v59 }
 0x682   : > { %10577 = vst [vmem:[%s15267_s19 + $0x18] sm:$0xff] %v10565_v5  ;;  %v10443_v9 = vpop.f32.mrb[148].mxu1 }
 0x683   : > { %v10538_v32 = vadd.f32 %v10443_v9, %v10225_v58  ;;  %v10445_v33 = vpop.f32.mrb[149].mxu1 }
 0x684   : > { %v10539_v12 = vadd.f32 %v10445_v33, %v10226_v20  ;;  %v10447_v0 = vpop.f32.mrb[150].mxu1 }
 0x685   : > { %v10556_v23 = vadd.f32 %v15263_v28, %v10538_v32  ;;  %v10448_v43 = vpop.f32.mrb[151].mxu1 }
 0x686   : > { %v10557_v1 = vadd.f32 %v15263_v28, %v10539_v12 }
 0x687   : > { %v10568_v21 = vmax.f32 %v10556_v23, 0.0 }
 0x688   : > { %v10569_v4 = vmax.f32 %v10557_v1, 0.0 }
 0x689   : > { %10580 = vst [vmem:[%s15267_s19 + $0x30] sm:$0xff] %v10568_v21 }
 0x68a   : > { %10581 = vst [vmem:[%s15267_s19 + $0x38] sm:$0xff] %v10569_v4  ;;  %v10525_v26 = vpop.f32.mrb[152].mxu1 }
 0x68b   : > { %v10542_v48 = vadd.f32 %v10525_v26, %v10229_v11  ;;  %v10527_v42 = vpop.f32.mrb[153].mxu1 }
 0x68c   : > { %v10543_v54 = vadd.f32 %v10527_v42, %v10230_v47  ;;  %v10529_v34 = vpop.f32.mrb[154].mxu1 }
 0x68d   : > { %v10560_v53 = vadd.f32 %v15263_v28, %v10542_v48  ;;  %v10530_v39 = vpop.f32.mrb[155].mxu1 }
 0x68e   : > { %v10561_v49 = vadd.f32 %v15263_v28, %v10543_v54 }
 0x68f   : > { %v10572_v6 = vmax.f32 %v10560_v53, 0.0 }
 0x690   : > { %v10573_v57 = vmax.f32 %v10561_v49, 0.0 }
 0x691   : > { %10584 = vst [vmem:[%s15267_s19 + $0x50] sm:$0xff] %v10572_v6 }
 0x692   : > { %10585 = vst [vmem:[%s15267_s19 + $0x58] sm:$0xff] %v10573_v57 }
 0x693   : > { %11808 = shalt.err (!%p11805_p7)
}
 0x694   : > { %s11809_s21 = scalar_lea.hbm %s15294_s23, 1536  ;;  %s11813_s24 = scalar_lea.hbm %s15353_s8, 3072 }
 0x695   : > { %p11810_p11 = scmp.ne.s32.totalorder %s15294_s23, %s11809_s21  ;;  %p11814_p12 = scmp.lt.u32.totalorder %s15294_s23, %s15353_s8 }
 0x696   : > { %p11815_p13 = scmp.lt.u32.totalorder %s11813_s24, %s11809_s21  ;;  %p11817_p1 = scmp.lt.u32.totalorder %s11809_s21, %s15294_s23 }
 0x697   : > { %p11811_p2 = pnand %p11810_p11, %p15414_p6 }
 0x698   : > { %p11816_p0 = por %p11815_p13, %p11814_p12 }
 0x699   : > { %p11812_p8 = pneg %p11811_p2 }
 0x69a   : > { %p11818_p10 = por %p11817_p1, %p11816_p0 }
 0x69c   : > { %p11819_p3 = pnand %p11818_p10, %p11812_p8 }
 0x69e   : > { %11822 = shalt.err (!%p11819_p3)
}
 0x69f   : > { %11493 = dma.vmem_to_hbm [thread:$0]  (%p15414_p6), %s15296_s17, 1536, %s15294_s23, %s10587_s30  }
 0x6a0 PF: > { %s15415_s22 = sld [smem:[#allocation16_spill]]  ;;  %s15416_s11 = sld [smem:[#allocation17_spill]] }
 0x6a1   : > { %p15418_p9 = scmp.ge.s32.totalorder %s11889_s10, 2 }
 0x6a6   : > { %s10615_s13 = sand.u32 1, %s15415_s22   ;;  %p15417_p4 = scmp.ne.s32.totalorder %s15416_s11, 0 }
 0x6a7   : > { %s10616_s19 = scalar_lea.sflag [#allocation4], %s10615_s13 }
 0x6a8   : > { %p11510_p5 = pnand %p15418_p9, %p15417_p4 }
 0x6aa   : > { %11864 = dma.done.wait (!%p11510_p5), %s10616_s19, 1536  }
 0x6ab   : > { %11866 = vsyncadd (!%p11510_p5), %s10616_s19, 4294965760  ;;  %s28_s10 = sadd.s32 1, %s11889_s10   ;;  %s15419_s18 = sld [smem:[#allocation19_spill]] }
 0x6ac   : > { %p25_p7 = scmp.ge.s32.totalorder %s28_s10, 4   ;;  %s15420_s2 = sld [smem:[#allocation18_spill]] }
 0x6ad   : > { %s15421_s27 = smov %s11873_s28  ;;  %s15422_s28 = smov %s11877_s29 }
 0x6ae   : > { %s15424_s30 = smov %s11885_s9  ;;  %27 = sbr.rel (!%p25_p7) target bundleno = 13 (0xd), region = 145 }
 0x6b1   : > { %s15423_s29 = smov %s15419_s18 }
 0x6b2   : > { %s15425_s9 = smov %s15420_s2 }
 0x6b5   :  { %10621 = vsyncpa [#allocation3], 1 }
 0x6b6   :  { %10623 = vsyncpa [#allocation3 + $0x1], 1 }
 0x6b7   :  { %10624 = vsyncpa [#allocation6], 1 }
 0x6b8   :  { %10626 = vsyncpa [#allocation6 + $0x1], 1 }
 0x6b9   :  { %10627 = vsyncpa [#allocation9], 1 }
 0x6ba   :  { %10628 = vsyncpa [#allocation4], 1 }
 0x6bb   :  { %10630 = vsyncpa [#allocation4 + $0x1], 1 }

// kernel: tpu_custom_call.1
= control target key start
LH: loop header
LB: loop body
LE: loop exit
PB: predicated region body
PF: predicated region fallthrough
CT: control target
= control target key end

     0   :  { %s15345_s0 = inlined_call_operand.hbm [shape: bf16[2,1,16,1920], index: 0, kind: input, shape index: {}]   ;;  %s15346_s1 = inlined_call_operand.hbm [shape: bf16[2,1,16,1920], index: 1, kind: input, shape index: {}]   ;;  %s15347_s2 = inlined_call_operand.hbm [shape: bf16[9,16,16], index: 2, kind: input, shape index: {}]   ;;  %s15348_s3 = inlined_call_operand.hbm [shape: bf16[9,16,16], index: 3, kind: input, shape index: {}]   ;;  %s15349_s4 = inlined_call_operand.vmem [shape: bf16[9,8,16], index: 4, kind: input, shape index: {}]   ;;  %s15350_s5 = inlined_call_operand.vmem [shape: f32[16,1], index: 5, kind: input, shape index: {}]   ;;  %s15351_s6 = inlined_call_operand.vmem [shape: f32[8,1], index: 6, kind: input, shape index: {}]   ;;  %s15352_s7 = inlined_call_operand.vmem [shape: bf16[1,1,1728], index: 7, kind: input, shape index: {}]   ;;  %s15353_s8 = inlined_call_operand.hbm [shape: f32[2,8,1536], index: 8, kind: output, shape index: {}]  }
   0x1   :  { %15372 = sst [smem:[#allocation29_spill]] %s15345_s0 }
   0x2   :  { %15373 = sst [smem:[#allocation30_spill]] %s15347_s2 }
   0x3   :  { %15374 = sst [smem:[#allocation31_spill]] %s15348_s3 }
   0x4   :  { %13 = vsyncpa [#allocation3], 0 }
   0x5   :  { %15 = vsyncpa [#allocation3 + $0x1], 0 }
   0x6   :  { %16 = vsyncpa [#allocation6], 0 }
   0x7   :  { %18 = vsyncpa [#allocation6 + $0x1], 0 }
   0x8   :  { %19 = vsyncpa [#allocation9], 0 }
   0x9   :  { %20 = vsyncpa [#allocation4], 0 }
   0xa   :  { %22 = vsyncpa [#allocation4 + $0x1], 0  ;;  %s11956_s27 = smov 0   ;;  %s11958_s28 = smov 0  }
   0xb   :  { %s11960_s29 = smov 0   ;;  %s11962_s30 = smov 0  }
   0xc   :  { %s11964_s9 = smov 0   ;;  %s11966_s10 = smov 0  }
   0xd LB: > { %15375 = sst [smem:[#allocation16_spill]] %s11869_s27  ;;  %s11987_s11 = sadd.s32 4294967295, %s11889_s10   ;;  %s11889_s10 = sphi %s11966_s10, %s28_s10   ;;  %s11885_s9 = sphi %s11964_s9, %s15425_s9   ;;  %s11881_s30 = sphi %s11962_s30, %s15424_s30   ;;  %s11877_s29 = sphi %s11960_s29, %s15423_s29   ;;  %s11873_s28 = sphi %s11958_s28, %s15422_s28   ;;  %s11869_s27 = sphi %s11956_s27, %s15421_s27  }
   0xe   : > { %s10748_s12 = sadd.s32 4294967294, %s11889_s10   ;;  %p62_p0 = scmp.ne.s32.totalorder %s11873_s28, %s11869_s27 }
   0xf   : > { %p15354_p1 = scmp.eq.s32.totalorder %s11987_s11, 0  ;;  %p253_p3 = scmp.eq.s32.totalorder %s10748_s12, 1 }
  0x10   : > { %p10749_p5 = scmp.ge.s32.totalorder %s11889_s10, 1  ;;  %p260_p7 = scmp.lt.s32.totalorder %s11889_s10, 3 }
  0x11   : > { %p11996_p4 = por %p15354_p1, %p62_p0  ;;  %p12001_p6 = por %p253_p3, %p62_p0 }
  0x12   : > { %p12006_p8 = pnand %p10749_p5, %p260_p7  ;;  %s11891_s16 = smov [#allocation7]  }
  0x13   : > { %s15376_s13 = scalar_select %p11996_p4, 1, 0 }
  0x14   : > { %s15377_s14 = scalar_select %p12001_p6, 1, 0 }
  0x15   : > { %s272_s17 = sshll.u32 %s11891_s16, 4  ;;  %p11495_p9 = pneg %p12006_p8  ;;  %s12010_s17 = int_to_ptr.vmem [resolvable:$true] %s272_s17 }
  0x16   : > { %15378 = sst [smem:[#allocation17_spill]] %s15377_s14  ;;  %s11892_s19 = smov [#allocation8]  }
  0x17   : > { %p12017_p11 = pnand %p11495_p9, %p15354_p1  ;;  %s285_s20 = sshll.u32 %s11892_s19, 4  ;;  %s12021_s20 = int_to_ptr.vmem [resolvable:$true] %s285_s20 }
  0x18   : > { %s15381_s2 = sld [smem:[#allocation30_spill]] }
  0x19   : > { %p11681_p13 = pneg %p12017_p11 }
  0x1e   : > { %s11679_s23 = scalar_lea.hbm %s15381_s2, 1152 }
  0x1f   : > { %p11680_p12 = scmp.ne.s32.totalorder %s15381_s2, %s11679_s23  ;;  %p11686_p5 = scmp.lt.u32.totalorder %s11679_s23, %s15381_s2 }
  0x21   : > { %p11682_p0 = pnand %p11681_p13, %p11680_p12 }
  0x23   : > { %p11683_p3 = pneg %p11682_p0 }
  0x25   : > { %p11688_p7 = pnand %p11686_p5, %p11683_p3 }
  0x27   : > { %11691 = shalt.err (!%p11688_p7)
}
  0x28   : > { %s11692_s16 = scalar_lea.vmem %s12010_s17, 1152  ;;  %p11700_p2 = scmp.lt.s32.totalorder %s12010_s17, %s12010_s17 }
  0x29   : > { %p11693_p9 = scmp.ne.s32.totalorder %s12010_s17, %s11692_s16  ;;  %p11701_p12 = scmp.lt.s32.totalorder %s11692_s16, %s11692_s16 }
  0x2b   : > { %p11695_p10 = pnand %p11693_p9, %p11681_p13  ;;  %p11702_p0 = por %p11701_p12, %p11700_p2 }
  0x2d   : > { %p11696_p1 = pneg %p11695_p10 }
  0x2f   : > { %p11703_p6 = pnand %p11702_p0, %p11696_p1 }
  0x31   : > { %11706 = shalt.err (!%p11703_p6)
}
  0x32   : > { %s11893_s19 = smov 64   ;;  %s11894_s21 = smov 4  }
  0x33   : > { %11498 = dma.hbm_to_vmem [thread:$0]  (!%p12017_p11), %s15381_s2, 1152, %s12010_s17, [#allocation6], %s11893_s19, %s11893_s19, %s11894_s21  }
  0x34   : > { %s15382_s3 = sld [smem:[#allocation31_spill]] }
  0x3a   : > { %s11707_s26 = scalar_lea.hbm %s15382_s3, 1152 }
  0x3b   : > { %p11708_p2 = scmp.ne.s32.totalorder %s15382_s3, %s11707_s26  ;;  %p11714_p10 = scmp.lt.u32.totalorder %s11707_s26, %s15382_s3 }
  0x3d   : > { %p11710_p1 = pnand %p11708_p2, %p11681_p13 }
  0x3f   : > { %p11711_p6 = pneg %p11710_p1 }
  0x41   : > { %p11716_p3 = pnand %p11714_p10, %p11711_p6 }
  0x43   : > { %11719 = shalt.err (!%p11716_p3)
}
  0x44   : > { %s11720_s17 = scalar_lea.vmem %s12021_s20, 1152  ;;  %p11728_p12 = scmp.lt.s32.totalorder %s12021_s20, %s12021_s20 }
  0x45   : > { %p11721_p5 = scmp.ne.s32.totalorder %s12021_s20, %s11720_s17  ;;  %p11729_p0 = scmp.lt.s32.totalorder %s11720_s17, %s11720_s17 }
  0x47   : > { %p11723_p7 = pnand %p11721_p5, %p11681_p13  ;;  %p11730_p2 = por %p11729_p0, %p11728_p12 }
  0x49   : > { %p11724_p9 = pneg %p11723_p7 }
  0x4b   : > { %p11731_p1 = pnand %p11730_p2, %p11724_p9 }
  0x4d   : > { %11734 = shalt.err (!%p11731_p1)
}
  0x4e   : > { %11501 = dma.hbm_to_vmem [thread:$0]  (!%p12017_p11), %s15382_s3, 1152, %s12021_s20, [#allocation9], %s11893_s19, %s11893_s19, %s11894_s21  }
  0x4f   : > { %s40_s22 = sadd.s32 1, %s11885_s9  ;;  %s49_s23 = sadd.s32 1, %s11877_s29 }
  0x50   : > { %p42_p13 = scmp.ge.s32.totalorder %s40_s22, 2  ;;  %p56_p6 = scmp.ne.s32.totalorder %s11877_s29, %s11873_s28 }
  0x51   : > { %p57_p10 = scmp.eq.s32.totalorder %s11889_s10, 0  ;;  %p11515_p3 = scmp.lt.s32.totalorder %s11889_s10, 2 }
  0x52   : > { %s15427_s22 = smov (%p42_p13, %s40_s22), 0  ;;  %p15384_p7 = scmp.eq.s32.totalorder %s11987_s11, 1 }
  0x53   : > { %15383 = sst [smem:[#allocation18_spill]] %s15427_s22  ;;  %p58_p5 = por %p57_p10, %p56_p6 }
  0x54   : > { %p12085_p9 = por %p15384_p7, %p56_p6  ;;  %s44_s24 = ssub.s32 %s11885_s9, %s15427_s22 }
  0x55   : > { %s315_s25 = sand.u32 1, %s11877_s29   ;;  %p47_p11 = scmp.eq.s32.totalorder %s44_s24, 0 }
  0x56   : > { %s15385_s18 = scalar_select %p12085_p9, 1, 0 }
  0x57   : > { %s12092_s20 = smul.u32 120, %s315_s25  ;;  %p12094_p12 = pnand %p11515_p3, %p58_p5 }
  0x58   : > { %s12099_s21 = scalar_select %p47_p11, %s11877_s29, %s49_s23  }
  0x59   : > { %s15357_s26 = smul.u32 1920, %s11885_s9  ;;  %s319_s12 = scalar_lea.vmem [#allocation2], %s12092_s20 }
  0x5a   : > { %15387 = sst [smem:[#allocation19_spill]] %s12099_s21  ;;  %s328_s16 = sshll.u32 %s319_s12, 4  ;;  %s12110_s16 = int_to_ptr.vmem [resolvable:$true] %s328_s16 }
  0x5b   : > { %s15388_s0 = sld [smem:[#allocation29_spill]]  ;;  %s12112_s24 = scalar_lea.sflag [#allocation3], %s315_s25 }
  0x5c   : > { %p11737_p2 = pneg %p12094_p12 }
  0x61   : > { %s12108_s14 = scalar_lea.hbm %s15388_s0, %s15357_s26  ;;  %s11740_s17 = scalar_lea.hbm %s15388_s0, 3840 }
  0x62   : > { %s11735_s2 = scalar_lea.hbm %s12108_s14, 1920  ;;  %p11741_p6 = scmp.lt.u32.totalorder %s12108_s14, %s15388_s0 }
  0x63   : > { %p11736_p0 = scmp.ne.s32.totalorder %s12108_s14, %s11735_s2  ;;  %p11742_p10 = scmp.lt.u32.totalorder %s11740_s17, %s11735_s2 }
  0x64   : > { %p11744_p5 = scmp.lt.u32.totalorder %s11735_s2, %s12108_s14 }
  0x65   : > { %p11738_p1 = pnand %p11737_p2, %p11736_p0  ;;  %p11743_p3 = por %p11742_p10, %p11741_p6 }
  0x67   : > { %p11739_p13 = pneg %p11738_p1  ;;  %p11745_p7 = por %p11744_p5, %p11743_p3 }
  0x69   : > { %p11746_p11 = pnand %p11745_p7, %p11739_p13 }
  0x6b   : > { %11749 = shalt.err (!%p11746_p11)
}
  0x6c   : > { %s11750_s25 = scalar_lea.vmem %s12110_s16, 1920  ;;  %s11895_s23 = smov [#allocation2]  }
  0x6d   : > { %p11751_p0 = scmp.ne.s32.totalorder %s12110_s16, %s11750_s25  ;;  %s11755_s12 = sshll.u32 %s11895_s23, 4  ;;  %s11756_s12 = int_to_ptr.vmem [resolvable:$false] %s11755_s12 }
  0x6e   : > { %s11757_s26 = scalar_lea.vmem %s11756_s12, 3840  ;;  %p11758_p4 = scmp.lt.s32.totalorder %s12110_s16, %s11756_s12 }
  0x6f   : > { %p11753_p1 = pnand %p11751_p0, %p11737_p2  ;;  %p11759_p6 = scmp.lt.s32.totalorder %s11757_s26, %s11750_s25 }
  0x71   : > { %p11754_p9 = pneg %p11753_p1  ;;  %p11760_p10 = por %p11759_p6, %p11758_p4 }
  0x73   : > { %p11761_p3 = pnand %p11760_p10, %p11754_p9 }
  0x75   : > { %11764 = shalt.err (!%p11761_p3)
}
  0x76   : > { %s11896_s2 = smov 960   ;;  %s11897_s17 = smov 60  }
  0x77   : > { %11505 = dma.hbm_to_vmem [thread:$0]  (!%p12094_p12), %s12108_s14, 1920, %s12110_s16, %s12112_s24, %s11896_s2, %s11896_s2, %s11897_s17  }
  0x78   : > { %s338_s27 = sand.u32 1, %s11889_s10   ;;  %s15389_s25 = smul.u32 1920, %s11885_s9 }
  0x79   : > { %s342_s0 = scalar_lea.vmem [#allocation5], %s12092_s20  ;;  %s12154_s22 = scalar_lea.sflag [#allocation6], %s338_s27 }
  0x7a   : > { %s12149_s26 = scalar_lea.hbm %s15346_s1, %s15389_s25  ;;  %s351_s3 = sshll.u32 %s342_s0, 4  ;;  %s12152_s3 = int_to_ptr.vmem [resolvable:$true] %s351_s3 }
  0x7b   : > { %s11765_s21 = scalar_lea.hbm %s12149_s26, 1920  ;;  %s11770_s24 = scalar_lea.hbm %s15346_s1, 3840 }
  0x7c   : > { %p11766_p4 = scmp.ne.s32.totalorder %s12149_s26, %s11765_s21  ;;  %p11771_p5 = scmp.lt.u32.totalorder %s12149_s26, %s15346_s1 }
  0x7d   : > { %p11772_p7 = scmp.lt.u32.totalorder %s11770_s24, %s11765_s21  ;;  %p11774_p0 = scmp.lt.u32.totalorder %s11765_s21, %s12149_s26 }
  0x7e   : > { %p11768_p9 = pnand %p11766_p4, %p11737_p2 }
  0x7f   : > { %p11773_p11 = por %p11772_p7, %p11771_p5 }
  0x80   : > { %p11769_p13 = pneg %p11768_p9 }
  0x81   : > { %p11775_p1 = por %p11774_p0, %p11773_p11 }
  0x83   : > { %p11776_p6 = pnand %p11775_p1, %p11769_p13 }
  0x85   : > { %11779 = shalt.err (!%p11776_p6)
}
  0x86   : > { %s11780_s0 = scalar_lea.vmem %s12152_s3, 1920  ;;  %s11898_s20 = smov [#allocation5]  }
  0x87   : > { %p11781_p10 = scmp.ne.s32.totalorder %s12152_s3, %s11780_s0  ;;  %s11785_s27 = sshll.u32 %s11898_s20, 4  ;;  %s11786_s27 = int_to_ptr.vmem [resolvable:$false] %s11785_s27 }
  0x88   : > { %s11787_s12 = scalar_lea.vmem %s11786_s27, 3840  ;;  %p11788_p9 = scmp.lt.s32.totalorder %s12152_s3, %s11786_s27 }
  0x89   : > { %p11783_p3 = pnand %p11781_p10, %p11737_p2  ;;  %p11789_p5 = scmp.lt.s32.totalorder %s11787_s12, %s11780_s0 }
  0x8b   : > { %p11784_p4 = pneg %p11783_p3  ;;  %p11790_p7 = por %p11789_p5, %p11788_p9 }
  0x8d   : > { %p11791_p11 = pnand %p11790_p7, %p11784_p4 }
  0x8f   : > { %11794 = shalt.err (!%p11791_p11)
}
  0x90   : > { %11508 = dma.hbm_to_vmem [thread:$0]  (!%p12094_p12), %s12149_s26, 1920, %s12152_s3, %s12154_s22, %s11896_s2, %s11896_s2, %s11897_s17  }
  0x91   : > { %363 = sbr.rel (%p12006_p8) target bundleno = 1696 (0x6a0), region = 52 }
  0x98   : > { %s12186_s21 = sand.u32 1, %s11873_s28   ;;  %p15390_p2 = scmp.ne.s32.totalorder %s15376_s13, 0 }
  0x99   : > { %s11478_s16 = smul.u32 120, %s12186_s21  ;;  %s366_s14 = scalar_lea.sflag [#allocation3], %s12186_s21 }
  0x9b   : > { %s12190_s24 = scalar_lea.vmem [#allocation2], %s11478_s16 }
  0x9c   : > { %11848 = dma.done.wait (%p15390_p2), %s366_s14, 1920  }
  0x9d   : > { %11850 = vsyncadd (%p15390_p2), %s366_s14, 4294965376  ;;  %s374_s3 = sand.u32 1, %s11987_s11   ;;  %s12197_s22 = scalar_lea.vmem [#allocation5], %s11478_s16 }
  0x9e   : > { %s375_s15 = scalar_lea.sflag [#allocation6], %s374_s3 }
  0x9f   : > { %11852 = dma.done.wait (%p15390_p2), %s375_s15, 1920  }
  0xa0   : > { %11854 = vsyncadd (%p15390_p2), %s375_s15, 4294965376  ;;  %p15391_p8 = scmp.eq.s32.totalorder %s11987_s11, 0 }
  0xa2   : > { %11856 = dma.done.wait (%p15391_p8), [#allocation6], 1152   ;;  %p15392_p12 = pmov %p15391_p8 }
  0xa3   : > { %p15393_p13 = pmov %p15391_p8 }
  0xa4   : > { %11858 = vsyncadd (%p15392_p12), [#allocation6], 4294966144 }
  0xa5   : > { %11860 = dma.done.wait (%p15393_p13), [#allocation9], 1152   ;;  %p15394_p0 = pmov %p15391_p8 }
  0xa6   : > { %v15364_v0 = vmov 0   ;;  %v12216_v1 = vld [vmem:[%s12197_s22 + $0x4] ss:$60 sps:$4 sm:$0xff]   ;;  %s11900_s11 = smov 81   ;;  %v12229_v4 = vld [vmem:[%s12197_s22 + $0x14] ss:$60 sps:$4 sm:$0xff]  }
  0xa7   : > { %11862 = vsyncadd (%p15394_p0), [#allocation9], 4294966144  ;;  %623 = vmatprep.mubr.bf16.mxu0 %v15364_v0  ;;  %666 = vmatprep.mubr.bf16.mxu1 %v15364_v0  ;;  %v12219_v2 = vld [vmem:[%s12197_s22] ss:$60 sps:$4 sm:$0xff]   ;;  %v12224_v3 = vld [vmem:[%s12197_s22 + $0x8] ss:$60 sps:$4 sm:$0xff]  }
  0xa8   : > { %11584 = vset.pattern.permute.xlu0 %v15364_v0  ;;  %11585 = vset.pattern.permute.xlu1 %v15364_v0  ;;  %v12234_v5 = vld [vmem:[%s12197_s22 + $0x18] ss:$60 sps:$4 sm:$0xff]   ;;  %v12239_v6 = vld [vmem:[%s12197_s22 + $0x10] ss:$60 sps:$4 sm:$0xff]   ;;  %v12244_v7 = vld [vmem:[%s12197_s22 + $0x24] ss:$60 sps:$4 sm:$0xff]  }
  0xa9   : > { %533 = vrot.lane.b32.xlu0 %v12216_v1, %s11900_s11  ;;  %531 = vrot.lane.b32.xlu1 %v12219_v2, %s11900_s11  ;;  %v12249_v8 = vld [vmem:[%s12197_s22 + $0x28] ss:$60 sps:$4 sm:$0xff]   ;;  %v12254_v9 = vld [vmem:[%s12197_s22 + $0x20] ss:$60 sps:$4 sm:$0xff]   ;;  %s11901_s13 = smov 80   ;;  %s11902_s19 = smov 79  }
  0xaa   : > { %v12259_v10 = vld [vmem:[%s12197_s22 + $0x30] ss:$60 sps:$4 sm:$0xff]   ;;  %v12272_v13 = vld [vmem:[%s12190_s24 + $0x8] ss:$60 sps:$4 sm:$0xff]   ;;  %v12282_v15 = vld [vmem:[%s12190_s24 + $0x14] ss:$60 sps:$4 sm:$0xff]  }
  0xab   : > { %v12264_v11 = vld [vmem:[%s12197_s22 + $0x34] ss:$60 sps:$4 sm:$0xff]   ;;  %v12285_v16 = vld [vmem:[%s12190_s24 + $0x18] ss:$60 sps:$4 sm:$0xff]   ;;  %v12292_v17 = vld [vmem:[%s12190_s24 + $0x10] ss:$60 sps:$4 sm:$0xff]  }
  0xac   : > { %v12269_v12 = vld [vmem:[%s12190_s24 + $0x4] ss:$60 sps:$4 sm:$0xff]   ;;  %v12314_v21 = vld [vmem:[%s12190_s24 + $0x30] ss:$60 sps:$4 sm:$0xff]   ;;  %v12378_v23 = vld [vmem:[%s12197_s22 + $0xc] ss:$60 sps:$4 sm:$0xff]  }
  0xad   : > { %535 = vrot.lane.b32.xlu0 %v12224_v3, %s11900_s11  ;;  %541 = vrot.lane.b32.xlu1 %v12229_v4, %s11900_s11  ;;  %v12275_v14 = vld [vmem:[%s12190_s24] ss:$60 sps:$4 sm:$0xff]   ;;  %v12304_v19 = vld [vmem:[%s12190_s24 + $0x28] ss:$60 sps:$4 sm:$0xff]   ;;  %vm559_vm0 = vcmask 662528   ;;  %vm587_vm1 = vcmask 130048  }
  0xae   : > { %v12295_v18 = vld [vmem:[%s12190_s24 + $0x24] ss:$60 sps:$4 sm:$0xff]   ;;  %15395 = vst [vmem:[#allocation20_spill] sm:$0xff] %v12304_v19  ;;  %v12319_v22 = vld [vmem:[%s12190_s24 + $0x34] ss:$60 sps:$4 sm:$0xff]   ;;  %s11903_s2 = smov 33  }
  0xaf   : > { %v12309_v20 = vld [vmem:[%s12190_s24 + $0x20] ss:$60 sps:$4 sm:$0xff]   ;;  %15397 = vst [vmem:[#allocation22_spill] sm:$0xff] %v12319_v22  ;;  %v12389_v24 = vld [vmem:[%s12197_s22 + $0x1c] ss:$60 sps:$4 sm:$0xff]   ;;  %vm1351_vm2 = vcmask 654336  }
  0xb0   : > { %15396 = vst [vmem:[#allocation21_spill] sm:$0xff] %v12309_v20  ;;  %v12396_v25 = vld [vmem:[%s12197_s22 + $0x2c] ss:$60 sps:$4 sm:$0xff]   ;;  %v12409_v28 = vld [vmem:[%s12190_s24 + $0xc] ss:$60 sps:$4 sm:$0xff]   ;;  %s11904_s17 = smov 32  }
  0xb1   : > { %543 = vrot.lane.b32.xlu0 %v12234_v5, %s11900_s11  ;;  %539 = vrot.lane.b32.xlu1 %v12239_v6, %s11900_s11  ;;  %v12420_v33 = vld [vmem:[#allocation8] sm:$0xff]   ;;  %v12439_v38 = vld [vmem:[%s12190_s24 + $0x1c] ss:$60 sps:$4 sm:$0xff]   ;;  %v12505_v60 = vld [vmem:[#allocation7] sm:$0xff]   ;;  %vm2114_vm3 = vcmask 646144   ;;  %s11905_s26 = smov 31  }
  0xb2   : > { %v12463_v45 = vld [vmem:[%s12190_s24 + $0x2c] ss:$60 sps:$4 sm:$0xff]   ;;  %vm2884_vm4 = vcmask 269312   ;;  %s11906_s25 = smov 113   ;;  %vm3658_vm5 = vcmask 261120   ;;  %s11907_s23 = smov 112  }
  0xb3   : > { %vm4427_vm6 = vcmask 252928   ;;  %s11908_s0 = smov 111   ;;  %vm5194_vm7 = vcmask 924672   ;;  %vm5957_vm8 = vcmask 916480   ;;  %vm6720_vm9 = vcmask 908288   ;;  %p15414_p6 = scmp.ne.s32.totalorder %s15385_s18, 0 }
  0xb4   : > { %s11910_s27 = smov [#allocation10]  }
  0xb5   : > { %549 = vrot.lane.b32.xlu0 %v12244_v7, %s11900_s11  ;;  %551 = vrot.lane.b32.xlu1 %v12249_v8, %s11900_s11  ;;  %s11799_s12 = sshll.u32 %s11910_s27, 4  ;;  %s11800_s12 = int_to_ptr.vmem [resolvable:$false] %s11799_s12 }
  0xb9   : > { %547 = vrot.lane.b32.xlu0 %v12254_v9, %s11900_s11  ;;  %555 = vrot.lane.b32.xlu1 %v12259_v10, %s11900_s11 }
  0xbd   : > { %557 = vrot.lane.b32.xlu0 %v12264_v11, %s11900_s11  ;;  %955 = vrot.lane.b32.xlu1 %v12269_v12, %s11900_s11 }
  0xc1   : > { %957 = vrot.lane.b32.xlu0 %v12272_v13, %s11900_s11  ;;  %953 = vrot.lane.b32.xlu1 %v12275_v14, %s11900_s11 }
  0xc5   : > { %963 = vrot.lane.b32.xlu0 %v12282_v15, %s11900_s11  ;;  %965 = vrot.lane.b32.xlu1 %v12285_v16, %s11900_s11 }
  0xc9   : > { %961 = vrot.lane.b32.xlu0 %v12292_v17, %s11900_s11  ;;  %971 = vrot.lane.b32.xlu1 %v12295_v18, %s11900_s11 }
  0xcd   : > { %973 = vrot.lane.b32.xlu0 %v12304_v19, %s11900_s11  ;;  %969 = vrot.lane.b32.xlu1 %v12309_v20, %s11900_s11 }
  0xd1   : > { %977 = vrot.lane.b32.xlu0 %v12314_v21, %s11900_s11  ;;  %979 = vrot.lane.b32.xlu1 %v12319_v22, %s11900_s11 }
  0xd5   : > { %1325 = vrot.lane.b32.xlu0 %v12216_v1, %s11901_s13  ;;  %1327 = vrot.lane.b32.xlu1 %v12224_v3, %s11901_s13 }
  0xd9   : > { %1323 = vrot.lane.b32.xlu0 %v12219_v2, %s11901_s13  ;;  %1333 = vrot.lane.b32.xlu1 %v12229_v4, %s11901_s13 }
  0xdd   : > { %1335 = vrot.lane.b32.xlu0 %v12234_v5, %s11901_s13  ;;  %1331 = vrot.lane.b32.xlu1 %v12239_v6, %s11901_s13 }
  0xe1   : > { %1341 = vrot.lane.b32.xlu0 %v12244_v7, %s11901_s13  ;;  %1343 = vrot.lane.b32.xlu1 %v12249_v8, %s11901_s13 }
  0xe5   : > { %1339 = vrot.lane.b32.xlu0 %v12254_v9, %s11901_s13  ;;  %1347 = vrot.lane.b32.xlu1 %v12259_v10, %s11901_s13 }
  0xe9   : > { %1349 = vrot.lane.b32.xlu0 %v12264_v11, %s11901_s13  ;;  %1690 = vrot.lane.b32.xlu1 %v12269_v12, %s11901_s13 }
  0xed   : > { %1692 = vrot.lane.b32.xlu0 %v12272_v13, %s11901_s13  ;;  %1688 = vrot.lane.b32.xlu1 %v12275_v14, %s11901_s13 }
  0xf1   : > { %1698 = vrot.lane.b32.xlu0 %v12282_v15, %s11901_s13  ;;  %1700 = vrot.lane.b32.xlu1 %v12285_v16, %s11901_s13 }
  0xf5   : > { %1696 = vrot.lane.b32.xlu0 %v12292_v17, %s11901_s13  ;;  %1706 = vrot.lane.b32.xlu1 %v12295_v18, %s11901_s13 }
  0xf9   : > { %1708 = vrot.lane.b32.xlu0 %v12304_v19, %s11901_s13  ;;  %1704 = vrot.lane.b32.xlu1 %v12309_v20, %s11901_s13 }
  0xfd   : > { %1712 = vrot.lane.b32.xlu0 %v12314_v21, %s11901_s13  ;;  %1714 = vrot.lane.b32.xlu1 %v12319_v22, %s11901_s13 }
 0x101   : > { %2088 = vrot.lane.b32.xlu0 %v12216_v1, %s11902_s19  ;;  %2090 = vrot.lane.b32.xlu1 %v12224_v3, %s11902_s19 }
 0x105   : > { %2086 = vrot.lane.b32.xlu0 %v12219_v2, %s11902_s19  ;;  %2096 = vrot.lane.b32.xlu1 %v12229_v4, %s11902_s19 }
 0x109   : > { %2098 = vrot.lane.b32.xlu0 %v12234_v5, %s11902_s19  ;;  %537 = vrot.lane.b32.xlu1 %v12378_v23, %s11900_s11 }
 0x10d   : > { %2094 = vrot.lane.b32.xlu0 %v12239_v6, %s11902_s19  ;;  %2104 = vrot.lane.b32.xlu1 %v12244_v7, %s11902_s19 }
 0x111   : > { %2106 = vrot.lane.b32.xlu0 %v12249_v8, %s11902_s19  ;;  %545 = vrot.lane.b32.xlu1 %v12389_v24, %s11900_s11 }
 0x115   : > { %2102 = vrot.lane.b32.xlu0 %v12254_v9, %s11902_s19  ;;  %553 = vrot.lane.b32.xlu1 %v12396_v25, %s11900_s11 }
 0x119   : > { %2110 = vrot.lane.b32.xlu0 %v12259_v10, %s11902_s19  ;;  %2112 = vrot.lane.b32.xlu1 %v12264_v11, %s11902_s19 }
 0x11b   : > { %v534_v26 = vpop.permute.xlu0 %533  ;;  %v532_v27 = vpop.permute.xlu1 %531 }
 0x11c   : > { %v560_v32 = vsel %vm559_vm0, %v532_v27, %v534_v26 }
 0x11d   : > { %2453 = vrot.lane.b32.xlu0 %v12269_v12, %s11902_s19  ;;  %2455 = vrot.lane.b32.xlu1 %v12272_v13, %s11902_s19 }
 0x11f   : > { %v12413_v29 = vpop.permute.xlu0 %535  ;;  %v542_v30 = vpop.permute.xlu1 %541 }
 0x120   : > { %v561_v31 = vsel %vm559_vm0, %v534_v26, %v12413_v29 }
 0x121   : > { %591 = vmatprep.subr.bf16.mxu0 %v561_v31  ;;  %959 = vrot.lane.b32.xlu0 %v12409_v28, %s11900_s11 }
 0x122   : > { %2451 = vrot.lane.b32.xlu1 %v12275_v14, %s11902_s19  ;;  %592 = vmatpush1.bf16.msra.mxu0 %v560_v32 }
 0x123   : > { %v12424_v34 = vpop.permute.xlu0 %543  ;;  %v12426_v35 = vpop.permute.xlu1 %539 }
 0x124   : > { %v565_v36 = vsel %vm559_vm0, %v542_v30, %v12424_v34  ;;  %v564_v37 = vsel %vm559_vm0, %v12426_v35, %v542_v30 }
 0x125   : > { %10774 = vmatmul.mubr.msk.bf16.vlgmr.msra.gmra.mrb[0].mxu0 %vm587_vm1, %v12420_v33  ;;  %677 = vmatprep.subr.bf16.mxu0 %v565_v36 }
 0x126   : > { %2461 = vrot.lane.b32.xlu0 %v12282_v15, %s11902_s19  ;;  %2463 = vrot.lane.b32.xlu1 %v12285_v16, %s11902_s19 }
 0x127   : > { %678 = vmatpush1.bf16.msra.mxu0 %v564_v37  ;;  %v550_v39 = vpop.permute.xlu0 %549  ;;  %709 = vmatprep.mubr.bf16.mxu0 %v15364_v0  ;;  %v12442_v40 = vpop.permute.xlu1 %551 }
 0x128   : > { %v569_v41 = vsel %vm559_vm0, %v550_v39, %v12442_v40 }
 0x129   : > { %763 = vmatprep.subr.bf16.mxu0 %v569_v41  ;;  %v12548_v41 = vld [vmem:[%s12197_s22 + $0x38] ss:$60 sps:$4 sm:$0xff]  }
 0x12a   : > { %967 = vrot.lane.b32.xlu0 %v12439_v38, %s11900_s11  ;;  %2459 = vrot.lane.b32.xlu1 %v12292_v17, %s11902_s19 }
 0x12b   : > { %v12450_v42 = vpop.permute.xlu0 %547  ;;  %v12452_v43 = vpop.permute.xlu1 %555 }
 0x12c   : > { %v568_v44 = vsel %vm559_vm0, %v12450_v42, %v550_v39 }
 0x12d   : > { %10776 = vmatmul.mubr.msk.bf16.vlgmr.msra.gmra.mrb[4].mxu0 %vm587_vm1, %v12420_v33 }
 0x12e   : > { %2469 = vrot.lane.b32.xlu0 %v12295_v18, %s11902_s19  ;;  %2471 = vrot.lane.b32.xlu1 %v12304_v19, %s11902_s19 }
 0x12f   : > { %764 = vmatpush1.bf16.msra.mxu0 %v568_v44  ;;  %v558_v46 = vpop.permute.xlu0 %557  ;;  %795 = vmatprep.mubr.bf16.mxu0 %v15364_v0  ;;  %v956_v47 = vpop.permute.xlu1 %955 }
 0x130   : > { %849 = vmatprep.subr.bf16.mxu0 %v558_v46  ;;  %v572_v50 = vsel %vm559_vm0, %v12452_v43, %v558_v46 }
 0x132   : > { %975 = vrot.lane.b32.xlu0 %v12463_v45, %s11900_s11  ;;  %2467 = vrot.lane.b32.xlu1 %v12309_v20, %s11902_s19 }
 0x133   : > { %v12470_v48 = vpop.permute.xlu0 %957  ;;  %v954_v49 = vpop.permute.xlu1 %953 }
 0x134   : > { %v982_v51 = vsel %vm559_vm0, %v956_v47, %v12470_v48  ;;  %v981_v55 = vsel %vm559_vm0, %v954_v49, %v956_v47 }
 0x135   : > { %10778 = vmatmul.mubr.msk.bf16.vlgmr.msra.gmra.mrb[8].mxu0 %vm587_vm1, %v12420_v33 }
 0x136   : > { %1329 = vrot.lane.b32.xlu0 %v12378_v23, %s11901_s13  ;;  %2475 = vrot.lane.b32.xlu1 %v12314_v21, %s11902_s19 }
 0x137   : > { %v964_v52 = vpop.permute.xlu0 %963  ;;  %850 = vmatpush1.bf16.msra.mxu0 %v572_v50  ;;  %881 = vmatprep.mubr.bf16.mxu0 %v15364_v0  ;;  %v12483_v53 = vpop.permute.xlu1 %965 }
 0x138   : > { %1011 = vmatprep.subr.bf16.mxu0 %v982_v51  ;;  %v986_v57 = vsel %vm559_vm0, %v964_v52, %v12483_v53 }
 0x13a   : > { %2477 = vrot.lane.b32.xlu0 %v12319_v22, %s11902_s19  ;;  %2856 = vrot.lane.b32.xlu1 %v12216_v1, %s11903_s2 }
 0x13b   : > { %v12489_v54 = vpop.permute.xlu0 %961  ;;  %v972_v56 = vpop.permute.xlu1 %971 }
 0x13c   : > { %v985_v63 = vsel %vm559_vm0, %v12489_v54, %v964_v52 }
 0x13d   : > { %10780 = vmatmul.mubr.msk.bf16.vlgmr.msra.gmra.mrb[12].mxu0 %vm587_vm1, %v12420_v33 }
 0x13e   : > { %2858 = vrot.lane.b32.xlu0 %v12224_v3, %s11903_s2  ;;  %1337 = vrot.lane.b32.xlu1 %v12389_v24, %s11901_s13 }
 0x13f   : > { %1012 = vmatpush1.bf16.msra.mxu0 %v981_v55  ;;  %v12500_v58 = vpop.permute.xlu0 %973  ;;  %1043 = vmatprep.mubr.bf16.mxu0 %v15364_v0  ;;  %v12503_v59 = vpop.permute.xlu1 %969 }
 0x140   : > { %1097 = vmatprep.subr.bf16.mxu0 %v986_v57  ;;  %v990_v26 = vsel %vm559_vm0, %v972_v56, %v12500_v58  ;;  %v989_v36 = vsel %vm559_vm0, %v12503_v59, %v972_v56 }
 0x142   : > { %2854 = vrot.lane.b32.xlu0 %v12219_v2, %s11903_s2  ;;  %2864 = vrot.lane.b32.xlu1 %v12229_v4, %s11903_s2 }
 0x143   : > { %v12511_v61 = vpop.permute.xlu0 %977  ;;  %v980_v62 = vpop.permute.xlu1 %979 }
 0x144   : > { %v993_v47 = vsel %vm559_vm0, %v12511_v61, %v980_v62 }
 0x145   : > { %10796 = vmatmul.mubr.msk.bf16.vlgmr.msra.gmra.mrb[0].mxu0 %vm587_vm1, %v12505_v60 }
 0x146   : > { %2866 = vrot.lane.b32.xlu0 %v12234_v5, %s11903_s2  ;;  %1345 = vrot.lane.b32.xlu1 %v12396_v25, %s11901_s13 }
 0x147   : > { %1098 = vmatpush1.bf16.msra.mxu0 %v985_v63  ;;  %v1326_v27 = vpop.permute.xlu0 %1325  ;;  %1129 = vmatprep.mubr.bf16.mxu0 %v15364_v0  ;;  %v12524_v30 = vpop.permute.xlu1 %1327 }
 0x148   : > { %1183 = vmatprep.subr.bf16.mxu0 %v990_v26  ;;  %v1353_v49 = vsel %vm1351_vm2, %v1326_v27, %v12524_v30  ;;  %v12583_v26 = vld [vmem:[#allocation8 + $0x8] sm:$0xff]  }
 0x14a   : > { %2862 = vrot.lane.b32.xlu0 %v12239_v6, %s11903_s2  ;;  %2872 = vrot.lane.b32.xlu1 %v12244_v7, %s11903_s2 }
 0x14b   : > { %v1324_v31 = vpop.permute.xlu0 %1323  ;;  %v1334_v32 = vpop.permute.xlu1 %1333 }
 0x14c   : > { %v1352_v55 = vsel %vm1351_vm2, %v1324_v31, %v1326_v27 }
 0x14d   : > { %10798 = vmatmul.mubr.msk.bf16.vlgmr.msra.gmra.mrb[4].mxu0 %vm587_vm1, %v12505_v60 }
 0x14e   : > { %2874 = vrot.lane.b32.xlu0 %v12249_v8, %s11903_s2  ;;  %1694 = vrot.lane.b32.xlu1 %v12409_v28, %s11901_s13 }
 0x14f   : > { %1184 = vmatpush1.bf16.msra.mxu0 %v989_v36  ;;  %v12538_v37 = vpop.permute.xlu0 %1335  ;;  %1215 = vmatprep.mubr.bf16.mxu0 %v15364_v0  ;;  %v12541_v39 = vpop.permute.xlu1 %1331 }
 0x150   : > { %15398 = vst [vmem:[#allocation23_spill] sm:$0xff] %v12538_v37  ;;  %1269 = vmatprep.subr.bf16.mxu0 %v980_v62  ;;  %v1357_v57 = vsel %vm1351_vm2, %v1334_v32, %v12538_v37  ;;  %v1356_v36 = vsel %vm1351_vm2, %v12541_v39, %v1334_v32 }
 0x152   : > { %2870 = vrot.lane.b32.xlu0 %v12254_v9, %s11903_s2  ;;  %2880 = vrot.lane.b32.xlu1 %v12264_v11, %s11903_s2 }
 0x153   : > { %v1342_v44 = vpop.permute.xlu0 %1341  ;;  %v12550_v46 = vpop.permute.xlu1 %1343 }
 0x154   : > { %15399 = vst [vmem:[#allocation24_spill] sm:$0xff] %v12550_v46 }
 0x155   : > { %10800 = vmatmul.mubr.msk.bf16.vlgmr.msra.gmra.mrb[8].mxu0 %vm587_vm1, %v12505_v60 }
 0x156   : > { %2882 = vrot.lane.b32.xlu0 %v12548_v41, %s11903_s2  ;;  %1702 = vrot.lane.b32.xlu1 %v12439_v38, %s11901_s13 }
 0x157   : > { %v12562_v50 = vpop.permute.xlu0 %1339  ;;  %1270 = vmatpush1.bf16.msra.mxu0 %v993_v47  ;;  %1301 = vmatprep.mubr.bf16.mxu0 %v15364_v0  ;;  %v12565_v51 = vpop.permute.xlu1 %1347  ;;  %v1361_v47 = vsel %vm1351_vm2, %v1342_v44, %v12550_v46 }
 0x158   : > { %15400 = vst [vmem:[#allocation25_spill] sm:$0xff] %v12562_v50  ;;  %15401 = vst [vmem:[#allocation26_spill] sm:$0xff] %v12565_v51  ;;  %1382 = vmatprep.subr.bf16.mxu0 %v1353_v49 }
 0x15a   : > { %2878 = vrot.lane.b32.xlu0 %v12259_v10, %s11903_s2  ;;  %3229 = vrot.lane.b32.xlu1 %v12269_v12, %s11903_s2 }
 0x15b   : > { %v1350_v52 = vpop.permute.xlu0 %1349  ;;  %v1691_v56 = vpop.permute.xlu1 %1690 }
 0x15d   : > { %10802 = vmatmul.mubr.msk.bf16.vlgmr.msra.gmra.mrb[12].mxu0 %vm587_vm1, %v12505_v60 }
 0x15e   : > { %3231 = vrot.lane.b32.xlu0 %v12272_v13, %s11903_s2  ;;  %1710 = vrot.lane.b32.xlu1 %v12463_v45, %s11901_s13 }
 0x15f   : > { %1383 = vmatpush1.bf16.msra.mxu0 %v1352_v55  ;;  %v12580_v62 = vpop.permute.xlu0 %1692  ;;  %1414 = vmatprep.mubr.bf16.mxu0 %v15364_v0  ;;  %v1689_v63 = vpop.permute.xlu1 %1688 }
 0x160   : > { %15402 = vst [vmem:[#allocation27_spill] sm:$0xff] %v12580_v62  ;;  %1468 = vmatprep.subr.bf16.mxu0 %v1357_v57 }
 0x162   : > { %3227 = vrot.lane.b32.xlu0 %v12275_v14, %s11903_s2  ;;  %3237 = vrot.lane.b32.xlu1 %v12282_v15, %s11903_s2 }
 0x163   : > { %v12589_v27 = vpop.permute.xlu0 %1698  ;;  %v12591_v31 = vpop.permute.xlu1 %1700 }
 0x164   : > { %15403 = vst [vmem:[#allocation28_spill] sm:$0xff] %v12591_v31 }
 0x165   : > { %10804 = vmatmul.mubr.msk.bf16.vlgmr.msra.gmra.mrb[0].mxu0 %vm587_vm1, %v12583_v26 }
 0x166   : > { %3239 = vrot.lane.b32.xlu0 %v12285_v16, %s11903_s2  ;;  %2092 = vrot.lane.b32.xlu1 %v12378_v23, %s11902_s19 }
 0x167   : > { %1469 = vmatpush1.bf16.msra.mxu0 %v1356_v36  ;;  %v12603_v49 = vpop.permute.xlu0 %1696  ;;  %1500 = vmatprep.mubr.bf16.mxu0 %v15364_v0  ;;  %v12606_v55 = vpop.permute.xlu1 %1706  ;;  %v1360_v36 = vsel %vm1351_vm2, %v12562_v50, %v1342_v44  ;;  %v12634_v44 = vld [vmem:[%s12190_s24 + $0x38] ss:$60 sps:$4 sm:$0xff]  }
 0x168   : > { %1554 = vmatprep.subr.bf16.mxu0 %v1361_v47 }
 0x16a   : > { %3235 = vrot.lane.b32.xlu0 %v12292_v17, %s11903_s2  ;;  %3245 = vrot.lane.b32.xlu1 %v12295_v18, %s11903_s2 }
 0x16b   : > { %v12612_v32 = vpop.permute.xlu0 %1708  ;;  %v12614_v57 = vpop.permute.xlu1 %1704 }
 0x16d   : > { %10806 = vmatmul.mubr.msk.bf16.vlgmr.msra.gmra.mrb[4].mxu0 %vm587_vm1, %v12583_v26 }
 0x16e   : > { %3247 = vrot.lane.b32.xlu0 %v12304_v19, %s11903_s2  ;;  %2100 = vrot.lane.b32.xlu1 %v12389_v24, %s11902_s19 }
 0x16f   : > { %1555 = vmatpush1.bf16.msra.mxu0 %v1360_v36  ;;  %v12624_v47 = vpop.permute.xlu0 %1712  ;;  %1586 = vmatprep.mubr.bf16.mxu0 %v15364_v0  ;;  %v12627_v46 = vpop.permute.xlu1 %1714  ;;  %v1364_v36 = vsel %vm1351_vm2, %v12565_v51, %v1350_v52  ;;  %v1717_v0 = vsel %vm1351_vm2, %v1691_v56, %v12580_v62  ;;  %v1716_v62 = vsel %vm1351_vm2, %v1689_v63, %v1691_v56 }
 0x170   : > { %1640 = vmatprep.subr.bf16.mxu0 %v1350_v52  ;;  %v1721_v56 = vsel %vm1351_vm2, %v12589_v27, %v12591_v31 }
 0x172   : > { %3243 = vrot.lane.b32.xlu0 %v12309_v20, %s11903_s2  ;;  %3253 = vrot.lane.b32.xlu1 %v12319_v22, %s11903_s2  ;;  %v15404_v20 = vmov 0  }
 0x173   : > { %v12636_v37 = vpop.permute.xlu0 %2088  ;;  %v12638_v50 = vpop.permute.xlu1 %2090 }
 0x175   : > { %10808 = vmatmul.mubr.msk.bf16.vlgmr.msra.gmra.mrb[8].mxu0 %vm587_vm1, %v12583_v26 }
 0x176   : > { %3255 = vrot.lane.b32.xlu0 %v12634_v44, %s11903_s2  ;;  %2108 = vrot.lane.b32.xlu1 %v12396_v25, %s11902_s19 }
 0x177   : > { %v12650_v22 = vpop.permute.xlu0 %2086  ;;  %1641 = vmatpush1.bf16.msra.mxu0 %v1364_v36  ;;  %1672 = vmatprep.mubr.bf16.mxu0 %v15404_v20  ;;  %v12653_v19 = vpop.permute.xlu1 %2096 }
 0x178   : > { %1746 = vmatprep.subr.bf16.mxu0 %v1717_v0 }
 0x17a   : > { %3251 = vrot.lane.b32.xlu0 %v12314_v21, %s11903_s2  ;;  %3630 = vrot.lane.b32.xlu1 %v12216_v1, %s11904_s17 }
 0x17b   : > { %v12659_v52 = vpop.permute.xlu0 %2098  ;;  %v538_v51 = vpop.permute.xlu1 %537 }
 0x17c   : > { %v563_v36 = vsel %vm559_vm0, %v538_v51, %v12426_v35  ;;  %v562_v0 = vsel %vm559_vm0, %v12413_v29, %v538_v51  ;;  %v12680_v29 = vld [vmem:[#allocation7 + $0x8] sm:$0xff]  }
 0x17d   : > { %10810 = vmatmul.mubr.msk.bf16.vlgmr.msra.gmra.mrb[12].mxu0 %vm587_vm1, %v12583_v26  ;;  %634 = vmatprep.subr.bf16.mxu1 %v563_v36  ;;  %v1720_v36 = vsel %vm1351_vm2, %v12603_v49, %v12589_v27  ;;  %v1725_v27 = vsel %vm1351_vm2, %v12606_v55, %v12612_v32 }
 0x17e   : > { %3632 = vrot.lane.b32.xlu0 %v12224_v3, %s11904_s17  ;;  %2457 = vrot.lane.b32.xlu1 %v12409_v28, %s11902_s19 }
 0x17f   : > { %1747 = vmatpush1.bf16.msra.mxu0 %v1716_v62  ;;  %v12675_v63 = vpop.permute.xlu0 %2094  ;;  %635 = vmatpush1.bf16.msra.mxu1 %v562_v0  ;;  %v12677_v35 = vpop.permute.xlu1 %2104 }
 0x180   : > { %1778 = vmatprep.mubr.bf16.mxu0 %v15404_v20  ;;  %1832 = vmatprep.subr.bf16.mxu0 %v1721_v56 }
 0x182   : > { %3628 = vrot.lane.b32.xlu0 %v12219_v2, %s11904_s17  ;;  %3638 = vrot.lane.b32.xlu1 %v12229_v4, %s11904_s17 }
 0x183   : > { %10775 = vmatmul.mubr.msk.bf16.vlgmr.msra.gmra.mrb[0].mxu1 %vm587_vm1, %v12420_v33  ;;  %v12688_v51 = vpop.permute.xlu0 %2106  ;;  %v546_v62 = vpop.permute.xlu1 %545 }
 0x184   : > { %752 = vmatprep.mubr.bf16.mxu1 %v15404_v20  ;;  %v567_v0 = vsel %vm559_vm0, %v546_v62, %v12450_v42  ;;  %v566_v56 = vsel %vm559_vm0, %v12424_v34, %v546_v62 }
 0x185   : > { %10812 = vmatmul.mubr.msk.bf16.vlgmr.msra.gmra.mrb[0].mxu0 %vm587_vm1, %v12680_v29  ;;  %720 = vmatprep.subr.bf16.mxu1 %v567_v0 }
 0x186   : > { %3640 = vrot.lane.b32.xlu0 %v12234_v5, %s11904_s17  ;;  %2465 = vrot.lane.b32.xlu1 %v12439_v38, %s11902_s19 }
 0x187   : > { %1833 = vmatpush1.bf16.msra.mxu0 %v1720_v36  ;;  %v12707_v31 = vpop.permute.xlu0 %2102  ;;  %721 = vmatpush1.bf16.msra.mxu1 %v566_v56  ;;  %v554_v42 = vpop.permute.xlu1 %553 }
 0x188   : > { %1864 = vmatprep.mubr.bf16.mxu0 %v15404_v20  ;;  %v571_v34 = vsel %vm559_vm0, %v554_v42, %v12452_v43  ;;  %v570_v62 = vsel %vm559_vm0, %v12442_v40, %v554_v42  ;;  %1918 = vmatprep.subr.bf16.mxu0 %v1725_v27  ;;  %v1724_v40 = vsel %vm1351_vm2, %v12614_v57, %v12606_v55 }
 0x189   : > { %806 = vmatprep.subr.bf16.mxu1 %v571_v34 }
 0x18a   : > { %3636 = vrot.lane.b32.xlu0 %v12239_v6, %s11904_s17  ;;  %3646 = vrot.lane.b32.xlu1 %v12244_v7, %s11904_s17 }
 0x18b   : > { %10777 = vmatmul.mubr.msk.bf16.vlgmr.msra.gmra.mrb[4].mxu1 %vm587_vm1, %v12420_v33  ;;  %v12720_v36 = vpop.permute.xlu0 %2110  ;;  %v12722_v0 = vpop.permute.xlu1 %2112 }
 0x18c   : > { %807 = vmatpush1.bf16.msra.mxu1 %v570_v62  ;;  %838 = vmatprep.mubr.bf16.mxu1 %v15404_v20 }
 0x18d   : > { %10814 = vmatmul.mubr.msk.bf16.vlgmr.msra.gmra.mrb[4].mxu0 %vm587_vm1, %v12680_v29 }
 0x18e   : > { %3648 = vrot.lane.b32.xlu0 %v12249_v8, %s11904_s17  ;;  %2473 = vrot.lane.b32.xlu1 %v12463_v45, %s11902_s19 }
 0x18f   : > { %1919 = vmatpush1.bf16.msra.mxu0 %v1724_v40  ;;  %v12734_v43 = vpop.permute.xlu0 %2453  ;;  %1950 = vmatprep.mubr.bf16.mxu0 %v15404_v20  ;;  %v12737_v56 = vpop.permute.xlu1 %2455 }
 0x190   : > { %2004 = vmatprep.subr.bf16.mxu0 %v12627_v46 }
 0x192   : > { %3644 = vrot.lane.b32.xlu0 %v12254_v9, %s11904_s17  ;;  %3654 = vrot.lane.b32.xlu1 %v12264_v11, %s11904_s17  ;;  %v1728_v9 = vsel %vm1351_vm2, %v12624_v47, %v12627_v46  ;;  %v2115_v46 = vsel %vm2114_vm3, %v12650_v22, %v12636_v37 }
 0x193   : > { %10779 = vmatmul.mubr.msk.bf16.vlgmr.msra.gmra.mrb[8].mxu1 %vm587_vm1, %v12420_v33  ;;  %v960_v55 = vpop.permute.xlu0 %959  ;;  %v2116_v33 = vsel %vm2114_vm3, %v12636_v37, %v12638_v50 }
 0x194   : > { %v12746_v27 = vpop.permute.xlu1 %2451  ;;  %v984_v42 = vsel %vm559_vm0, %v960_v55, %v12489_v54  ;;  %v983_v34 = vsel %vm559_vm0, %v12470_v48, %v960_v55  ;;  %1086 = vmatprep.mubr.bf16.mxu1 %v15404_v20 }
 0x195   : > { %1054 = vmatprep.subr.bf16.mxu1 %v984_v42  ;;  %10816 = vmatmul.mubr.msk.bf16.vlgmr.msra.gmra.mrb[8].mxu0 %vm587_vm1, %v12680_v29  ;;  %v2119_v42 = vsel %vm2114_vm3, %v12675_v63, %v12653_v19 }
 0x196   : > { %3656 = vrot.lane.b32.xlu0 %v12548_v41, %s11904_s17  ;;  %2860 = vrot.lane.b32.xlu1 %v12378_v23, %s11903_s2 }
 0x197   : > { %1055 = vmatpush1.bf16.msra.mxu1 %v983_v34  ;;  %2005 = vmatpush1.bf16.msra.mxu0 %v1728_v9 }
 0x198   : > { %v12765_v48 = vpop.permute.xlu0 %2461  ;;  %v12767_v54 = vpop.permute.xlu1 %2463  ;;  %2036 = vmatprep.mubr.bf16.mxu0 %v15404_v20  ;;  %2145 = vmatprep.subr.bf16.mxu0 %v2116_v33 }
 0x19a   : > { %3652 = vrot.lane.b32.xlu0 %v12259_v10, %s11904_s17  ;;  %3998 = vrot.lane.b32.xlu1 %v12269_v12, %s11904_s17  ;;  %v2120_v12 = vsel %vm2114_vm3, %v12653_v19, %v12659_v52 }
 0x19b   : > { %10797 = vmatmul.mubr.msk.bf16.vlgmr.msra.gmra.mrb[0].mxu1 %vm587_vm1, %v12505_v60 }
 0x19c   : > { %v968_v62 = vpop.permute.xlu0 %967  ;;  %v12779_v40 = vpop.permute.xlu1 %2459  ;;  %1172 = vmatprep.mubr.bf16.mxu1 %v15404_v20 }
 0x19d   : > { %v988_v55 = vsel %vm559_vm0, %v968_v62, %v12503_v59  ;;  %10818 = vmatmul.mubr.msk.bf16.vlgmr.msra.gmra.mrb[12].mxu0 %vm587_vm1, %v12680_v29  ;;  %v987_v10 = vsel %vm559_vm0, %v12483_v53, %v968_v62  ;;  %v12800_v53 = vld [vmem:[#allocation8 + $0x10] sm:$0xff]  }
 0x19e   : > { %4000 = vrot.lane.b32.xlu0 %v12272_v13, %s11904_s17  ;;  %2868 = vrot.lane.b32.xlu1 %v12389_v24, %s11903_s2 }
 0x19f   : > { %1140 = vmatprep.subr.bf16.mxu1 %v988_v55  ;;  %2146 = vmatpush1.bf16.msra.mxu0 %v2115_v46  ;;  %v15407_v46 = vld [vmem:[#allocation23_spill] sm:$0xff]  ;;  %v15408_v55 = vld [vmem:[#allocation21_spill] sm:$0xff] }
 0x1a0   : > { %1141 = vmatpush1.bf16.msra.mxu1 %v987_v10  ;;  %v12795_v22 = vpop.permute.xlu0 %2469  ;;  %v12797_v59 = vpop.permute.xlu1 %2471  ;;  %2177 = vmatprep.mubr.bf16.mxu0 %v15404_v20  ;;  %v15409_v10 = vld [vmem:[#allocation22_spill] sm:$0xff] }
 0x1a1   : > { %2231 = vmatprep.subr.bf16.mxu0 %v2120_v12 }
 0x1a2   : > { %3996 = vrot.lane.b32.xlu0 %v12275_v14, %s11904_s17  ;;  %4006 = vrot.lane.b32.xlu1 %v12282_v15, %s11904_s17  ;;  %v2124_v15 = vsel %vm2114_vm3, %v12677_v35, %v12688_v51 }
 0x1a3   : > { %10799 = vmatmul.mubr.msk.bf16.vlgmr.msra.gmra.mrb[4].mxu1 %vm587_vm1, %v12505_v60 }
 0x1a4   : > { %v976_v13 = vpop.permute.xlu0 %975  ;;  %v12808_v37 = vpop.permute.xlu1 %2467  ;;  %1258 = vmatprep.mubr.bf16.mxu1 %v15404_v20 }
 0x1a5   : > { %v992_v34 = vsel %vm559_vm0, %v976_v13, %v12511_v61  ;;  %10820 = vmatmul.mubr.msk.bf16.vlgmr.msra.gmra.mrb[0].mxu0 %vm587_vm1, %v12800_v53  ;;  %v991_v14 = vsel %vm559_vm0, %v12500_v58, %v976_v13 }
 0x1a6   : > { %4008 = vrot.lane.b32.xlu0 %v12285_v16, %s11904_s17  ;;  %2876 = vrot.lane.b32.xlu1 %v12396_v25, %s11903_s2 }
 0x1a7   : > { %1226 = vmatprep.subr.bf16.mxu1 %v992_v34  ;;  %2232 = vmatpush1.bf16.msra.mxu0 %v2119_v42  ;;  %v2127_v42 = vsel %vm2114_vm3, %v12720_v36, %v12722_v0  ;;  %v2480_v34 = vsel %vm2114_vm3, %v12734_v43, %v12737_v56 }
 0x1a8   : > { %1227 = vmatpush1.bf16.msra.mxu1 %v991_v14  ;;  %v1330_v19 = vpop.permute.xlu0 %1329  ;;  %v12827_v61 = vpop.permute.xlu1 %2475  ;;  %2263 = vmatprep.mubr.bf16.mxu0 %v15404_v20 }
 0x1a9   : > { %v1355_v58 = vsel %vm1351_vm2, %v1330_v19, %v12541_v39  ;;  %v1354_v16 = vsel %vm1351_vm2, %v12524_v30, %v1330_v19  ;;  %2317 = vmatprep.subr.bf16.mxu0 %v2124_v15  ;;  %v2123_v30 = vsel %vm2114_vm3, %v12707_v31, %v12677_v35  ;;  %v15406_v39 = vld [vmem:[#allocation25_spill] sm:$0xff] }
 0x1aa   : > { %4004 = vrot.lane.b32.xlu0 %v12292_v17, %s11904_s17  ;;  %4014 = vrot.lane.b32.xlu1 %v12295_v18, %s11904_s17  ;;  %v15405_v17 = vld [vmem:[#allocation20_spill] sm:$0xff] }
 0x1ab   : > { %10801 = vmatmul.mubr.msk.bf16.vlgmr.msra.gmra.mrb[8].mxu1 %vm587_vm1, %v12505_v60  ;;  %1425 = vmatprep.subr.bf16.mxu1 %v1355_v58  ;;  %v15411_v58 = vld [vmem:[#allocation24_spill] sm:$0xff] }
 0x1ac   : > { %1426 = vmatpush1.bf16.msra.mxu1 %v1354_v16  ;;  %v12840_v9 = vpop.permute.xlu0 %2477  ;;  %v12842_v33 = vpop.permute.xlu1 %2856  ;;  %1457 = vmatprep.mubr.bf16.mxu1 %v15404_v20 }
 0x1ad   : > { %10822 = vmatmul.mubr.msk.bf16.vlgmr.msra.gmra.mrb[4].mxu0 %vm587_vm1, %v12800_v53 }
 0x1ae   : > { %4016 = vrot.lane.b32.xlu0 %v15405_v17, %s11904_s17  ;;  %3233 = vrot.lane.b32.xlu1 %v12409_v28, %s11903_s2 }
 0x1af   : > { %2318 = vmatpush1.bf16.msra.mxu0 %v2123_v30  ;;  %2349 = vmatprep.mubr.bf16.mxu0 %v15404_v20  ;;  %v2479_v30 = vsel %vm2114_vm3, %v12746_v27, %v12734_v43 }
 0x1b0   : > { %v12855_v18 = vpop.permute.xlu0 %2858  ;;  %v1338_v60 = vpop.permute.xlu1 %1337  ;;  %2403 = vmatprep.subr.bf16.mxu0 %v12722_v0  ;;  %v15410_v0 = vld [vmem:[#allocation26_spill] sm:$0xff] }
 0x1b1   : > { %v1359_v35 = vsel %vm1351_vm2, %v1338_v60, %v15406_v39  ;;  %v1358_v62 = vsel %vm1351_vm2, %v15407_v46, %v1338_v60  ;;  %v15412_v39 = vld [vmem:[#allocation27_spill] sm:$0xff]  ;;  %v12922_v46 = vld [vmem:[#allocation7 + $0x10] sm:$0xff]  }
 0x1b2   : > { %4012 = vrot.lane.b32.xlu0 %v15408_v55, %s11904_s17  ;;  %4022 = vrot.lane.b32.xlu1 %v15409_v10, %s11904_s17  ;;  %v15413_v55 = vld [vmem:[#allocation28_spill] sm:$0xff] }
 0x1b3   : > { %10805 = vmatmul.mubr.msk.bf16.vlgmr.msra.gmra.mrb[0].mxu1 %vm587_vm1, %v12583_v26  ;;  %1511 = vmatprep.subr.bf16.mxu1 %v1359_v35 }
 0x1b4   : > { %1512 = vmatpush1.bf16.msra.mxu1 %v1358_v62  ;;  %v12868_v12 = vpop.permute.xlu0 %2854  ;;  %v12870_v13 = vpop.permute.xlu1 %2864  ;;  %1543 = vmatprep.mubr.bf16.mxu1 %v15404_v20 }
 0x1b5   : > { %10824 = vmatmul.mubr.msk.bf16.vlgmr.msra.gmra.mrb[8].mxu0 %vm587_vm1, %v12800_v53 }
 0x1b6   : > { %4024 = vrot.lane.b32.xlu0 %v12634_v44, %s11904_s17  ;;  %3241 = vrot.lane.b32.xlu1 %v12439_v38, %s11903_s2 }
 0x1b7   : > { %2404 = vmatpush1.bf16.msra.mxu0 %v2127_v42  ;;  %2435 = vmatprep.mubr.bf16.mxu0 %v15404_v20 }
 0x1b8   : > { %v12886_v14 = vpop.permute.xlu0 %2866  ;;  %v1346_v15 = vpop.permute.xlu1 %1345  ;;  %2509 = vmatprep.subr.bf16.mxu0 %v2480_v34 }
 0x1b9   : > { %v1363_v19 = vsel %vm1351_vm2, %v1346_v15, %v15410_v0  ;;  %v1362_v16 = vsel %vm1351_vm2, %v15411_v58, %v1346_v15  ;;  %v12983_v15 = vld [vmem:[%s12197_s22 + $0x20] ss:$60 sps:$4 sm:$0xff]   ;;  %v13016_v58 = vld [vmem:[%s12197_s22 + $0x30] ss:$60 sps:$4 sm:$0xff]  }
 0x1ba   : > { %4020 = vrot.lane.b32.xlu0 %v12314_v21, %s11904_s17  ;;  %4399 = vrot.lane.b32.xlu1 %v12216_v1, %s11905_s26  ;;  %v2484_v1 = vsel %vm2114_vm3, %v12765_v48, %v12767_v54 }
 0x1bb   : > { %10807 = vmatmul.mubr.msk.bf16.vlgmr.msra.gmra.mrb[4].mxu1 %vm587_vm1, %v12583_v26  ;;  %1597 = vmatprep.subr.bf16.mxu1 %v1363_v19 }
 0x1bc   : > { %1598 = vmatpush1.bf16.msra.mxu1 %v1362_v16  ;;  %v12901_v17 = vpop.permute.xlu0 %2862  ;;  %v12903_v60 = vpop.permute.xlu1 %2872  ;;  %1629 = vmatprep.mubr.bf16.mxu1 %v15404_v20 }
 0x1bd   : > { %10826 = vmatmul.mubr.msk.bf16.vlgmr.msra.gmra.mrb[12].mxu0 %vm587_vm1, %v12800_v53 }
 0x1be   : > { %4401 = vrot.lane.b32.xlu0 %v12224_v3, %s11905_s26  ;;  %3249 = vrot.lane.b32.xlu1 %v12463_v45, %s11903_s2 }
 0x1bf   : > { %2510 = vmatpush1.bf16.msra.mxu0 %v2479_v30  ;;  %2541 = vmatprep.mubr.bf16.mxu0 %v15404_v20  ;;  %v13041_v30 = vld [vmem:[%s12190_s24 + $0x8] ss:$60 sps:$4 sm:$0xff]  }
 0x1c0   : > { %v12916_v21 = vpop.permute.xlu0 %2874  ;;  %v1695_v43 = vpop.permute.xlu1 %1694  ;;  %2595 = vmatprep.subr.bf16.mxu0 %v2484_v1 }
 0x1c1   : > { %v1719_v27 = vsel %vm1351_vm2, %v1695_v43, %v12603_v49  ;;  %v1718_v35 = vsel %vm1351_vm2, %v15412_v39, %v1695_v43  ;;  %v2483_v49 = vsel %vm2114_vm3, %v12779_v40, %v12765_v48  ;;  %v11654_v39 = vld [vmem:[%s12190_s24] ss:$60 sps:$4 sm:$0xff]  }
 0x1c2   : > { %4397 = vrot.lane.b32.xlu0 %v12219_v2, %s11905_s26  ;;  %4407 = vrot.lane.b32.xlu1 %v12229_v4, %s11905_s26  ;;  %v2488_v2 = vsel %vm2114_vm3, %v12795_v22, %v12797_v59 }
 0x1c3   : > { %10809 = vmatmul.mubr.msk.bf16.vlgmr.msra.gmra.mrb[8].mxu1 %vm587_vm1, %v12583_v26  ;;  %1789 = vmatprep.subr.bf16.mxu1 %v1719_v27  ;;  %v13054_v27 = vld [vmem:[#allocation8 + $0x18] sm:$0xff]  }
 0x1c4   : > { %1790 = vmatpush1.bf16.msra.mxu1 %v1718_v35  ;;  %v12930_v3 = vpop.permute.xlu0 %2870  ;;  %v12932_v62 = vpop.permute.xlu1 %2880  ;;  %1821 = vmatprep.mubr.bf16.mxu1 %v15404_v20 }
 0x1c5   : > { %10828 = vmatmul.mubr.msk.bf16.vlgmr.msra.gmra.mrb[0].mxu0 %vm587_vm1, %v12922_v46 }
 0x1c6   : > { %4409 = vrot.lane.b32.xlu0 %v12234_v5, %s11905_s26  ;;  %3634 = vrot.lane.b32.xlu1 %v12378_v23, %s11904_s17 }
 0x1c7   : > { %2596 = vmatpush1.bf16.msra.mxu0 %v2483_v49  ;;  %2627 = vmatprep.mubr.bf16.mxu0 %v15404_v20  ;;  %v2894_v49 = vsel %vm2884_vm4, %v12903_v60, %v12916_v21 }
 0x1c8   : > { %v12948_v4 = vpop.permute.xlu0 %2882  ;;  %v1703_v26 = vpop.permute.xlu1 %1702  ;;  %2681 = vmatprep.subr.bf16.mxu0 %v2488_v2  ;;  %v13079_v2 = vld [vmem:[%s12190_s24 + $0x18] ss:$60 sps:$4 sm:$0xff]  }
 0x1c9   : > { %v1723_v48 = vsel %vm1351_vm2, %v1703_v26, %v12614_v57  ;;  %v1722_v10 = vsel %vm1351_vm2, %v15413_v55, %v1703_v26  ;;  %v2487_v57 = vsel %vm2114_vm3, %v12808_v37, %v12795_v22 }
 0x1ca   : > { %4405 = vrot.lane.b32.xlu0 %v12239_v6, %s11905_s26  ;;  %4415 = vrot.lane.b32.xlu1 %v12244_v7, %s11905_s26 }
 0x1cb   : > { %10813 = vmatmul.mubr.msk.bf16.vlgmr.msra.gmra.mrb[0].mxu1 %vm587_vm1, %v12680_v29  ;;  %1875 = vmatprep.subr.bf16.mxu1 %v1723_v48 }
 0x1cc   : > { %1876 = vmatpush1.bf16.msra.mxu1 %v1722_v10  ;;  %v12960_v5 = vpop.permute.xlu0 %2878  ;;  %v12962_v42 = vpop.permute.xlu1 %3229  ;;  %1907 = vmatprep.mubr.bf16.mxu1 %v15404_v20  ;;  %v13093_v10 = vld [vmem:[%s12190_s24 + $0x10] ss:$60 sps:$4 sm:$0xff]  }
 0x1cd   : > { %10830 = vmatmul.mubr.msk.bf16.vlgmr.msra.gmra.mrb[4].mxu0 %vm587_vm1, %v12922_v46 }
 0x1ce   : > { %4417 = vrot.lane.b32.xlu0 %v12249_v8, %s11905_s26  ;;  %3642 = vrot.lane.b32.xlu1 %v12389_v24, %s11904_s17 }
 0x1cf   : > { %2682 = vmatpush1.bf16.msra.mxu0 %v2487_v57  ;;  %2713 = vmatprep.mubr.bf16.mxu0 %v15404_v20 }
 0x1d0   : > { %v12975_v6 = vpop.permute.xlu0 %3231  ;;  %v1711_v7 = vpop.permute.xlu1 %1710  ;;  %2767 = vmatprep.subr.bf16.mxu0 %v12840_v9 }
 0x1d1   : > { %v1727_v22 = vsel %vm1351_vm2, %v1711_v7, %v12624_v47  ;;  %v1726_v34 = vsel %vm1351_vm2, %v12612_v32, %v1711_v7  ;;  %v2491_v32 = vsel %vm2114_vm3, %v12827_v61, %v12840_v9  ;;  %v2898_v7 = vsel %vm2884_vm4, %v12932_v62, %v12948_v4 }
 0x1d2   : > { %4413 = vrot.lane.b32.xlu0 %v12983_v15, %s11905_s26  ;;  %4423 = vrot.lane.b32.xlu1 %v12264_v11, %s11905_s26  ;;  %v2886_v11 = vsel %vm2884_vm4, %v12842_v33, %v12855_v18 }
 0x1d3   : > { %10815 = vmatmul.mubr.msk.bf16.vlgmr.msra.gmra.mrb[4].mxu1 %vm587_vm1, %v12680_v29  ;;  %1961 = vmatprep.subr.bf16.mxu1 %v1727_v22  ;;  %v13118_v22 = vld [vmem:[%s12190_s24 + $0x28] ss:$60 sps:$4 sm:$0xff]  }
 0x1d4   : > { %1962 = vmatpush1.bf16.msra.mxu1 %v1726_v34  ;;  %v12991_v8 = vpop.permute.xlu0 %3227  ;;  %v12993_v24 = vpop.permute.xlu1 %3237  ;;  %1993 = vmatprep.mubr.bf16.mxu1 %v15404_v20 }
 0x1d5   : > { %10832 = vmatmul.mubr.msk.bf16.vlgmr.msra.gmra.mrb[8].mxu0 %vm587_vm1, %v12922_v46 }
 0x1d6   : > { %4425 = vrot.lane.b32.xlu0 %v12548_v41, %s11905_s26  ;;  %3650 = vrot.lane.b32.xlu1 %v12396_v25, %s11904_s17  ;;  %v13021_v25 = vld [vmem:[%s12190_s24 + $0x4] ss:$60 sps:$4 sm:$0xff]  }
 0x1d7   : > { %2768 = vmatpush1.bf16.msra.mxu0 %v2491_v32  ;;  %2799 = vmatprep.mubr.bf16.mxu0 %v15404_v20 }
 0x1d8   : > { %v13009_v47 = vpop.permute.xlu0 %3239  ;;  %v2093_v0 = vpop.permute.xlu1 %2092  ;;  %2916 = vmatprep.subr.bf16.mxu0 %v2886_v11  ;;  %v13132_v11 = vld [vmem:[%s12190_s24 + $0x20] ss:$60 sps:$4 sm:$0xff]  }
 0x1d9   : > { %v2118_v9 = vsel %vm2114_vm3, %v2093_v0, %v12675_v63  ;;  %v2117_v19 = vsel %vm2114_vm3, %v12638_v50, %v2093_v0  ;;  %v2885_v63 = vsel %vm2884_vm4, %v12868_v12, %v12842_v33  ;;  %v13137_v0 = vld [vmem:[%s12190_s24 + $0x34] ss:$60 sps:$4 sm:$0xff]  }
 0x1da   : > { %4421 = vrot.lane.b32.xlu0 %v13016_v58, %s11905_s26  ;;  %4767 = vrot.lane.b32.xlu1 %v13021_v25, %s11905_s26 }
 0x1db   : > { %10817 = vmatmul.mubr.msk.bf16.vlgmr.msra.gmra.mrb[8].mxu1 %vm587_vm1, %v12680_v29  ;;  %2188 = vmatprep.subr.bf16.mxu1 %v2118_v9  ;;  %v2890_v29 = vsel %vm2884_vm4, %v12870_v13, %v12886_v14 }
 0x1dc   : > { %2189 = vmatpush1.bf16.msra.mxu1 %v2117_v19  ;;  %v13030_v50 = vpop.permute.xlu0 %3235  ;;  %v13032_v16 = vpop.permute.xlu1 %3245  ;;  %2220 = vmatprep.mubr.bf16.mxu1 %v15404_v20 }
 0x1dd   : > { %10834 = vmatmul.mubr.msk.bf16.vlgmr.msra.gmra.mrb[12].mxu0 %vm587_vm1, %v12922_v46 }
 0x1de   : > { %4769 = vrot.lane.b32.xlu0 %v13041_v30, %s11905_s26  ;;  %4002 = vrot.lane.b32.xlu1 %v12409_v28, %s11904_s17  ;;  %v13059_v28 = vld [vmem:[%s12190_s24 + $0x14] ss:$60 sps:$4 sm:$0xff]  }
 0x1df   : > { %2917 = vmatpush1.bf16.msra.mxu0 %v2885_v63  ;;  %2948 = vmatprep.mubr.bf16.mxu0 %v15404_v20 }
 0x1e0   : > { %v13048_v33 = vpop.permute.xlu0 %3247  ;;  %v2101_v12 = vpop.permute.xlu1 %2100  ;;  %3002 = vmatprep.subr.bf16.mxu0 %v2890_v29  ;;  %v13168_v29 = vld [vmem:[%s12190_s24 + $0x30] ss:$60 sps:$4 sm:$0xff]  }
 0x1e1   : > { %v2122_v1 = vsel %vm2114_vm3, %v2101_v12, %v12707_v31  ;;  %v2121_v43 = vsel %vm2114_vm3, %v12659_v52, %v2101_v12  ;;  %v2889_v52 = vsel %vm2884_vm4, %v12901_v17, %v12870_v13 }
 0x1e2   : > { %4765 = vrot.lane.b32.xlu0 %v11654_v39, %s11905_s26  ;;  %4775 = vrot.lane.b32.xlu1 %v13059_v28, %s11905_s26 }
 0x1e3   : > { %10821 = vmatmul.mubr.msk.bf16.vlgmr.msra.gmra.mrb[0].mxu1 %vm587_vm1, %v12800_v53  ;;  %2274 = vmatprep.subr.bf16.mxu1 %v2122_v1  ;;  %v3262_v1 = vsel %vm2884_vm4, %v12993_v24, %v13009_v47 }
 0x1e4   : > { %2275 = vmatpush1.bf16.msra.mxu1 %v2121_v43  ;;  %v13065_v31 = vpop.permute.xlu0 %3243  ;;  %v13067_v35 = vpop.permute.xlu1 %3253  ;;  %2306 = vmatprep.mubr.bf16.mxu1 %v15404_v20  ;;  %v13193_v43 = vld [vmem:[%s12197_s22 + $0xc] ss:$60 sps:$4 sm:$0xff]  }
 0x1e5   : > { %10837 = vmatmul.mubr.msk.bf16.vlgmr.msra.gmra.mrb[0].mxu0 %vm587_vm1, %v13054_v27 }
 0x1e6   : > { %4777 = vrot.lane.b32.xlu0 %v13079_v2, %s11905_s26  ;;  %4010 = vrot.lane.b32.xlu1 %v12439_v38, %s11904_s17  ;;  %v13098_v38 = vld [vmem:[%s12190_s24 + $0x24] ss:$60 sps:$4 sm:$0xff]  }
 0x1e7   : > { %3003 = vmatpush1.bf16.msra.mxu0 %v2889_v52  ;;  %3034 = vmatprep.mubr.bf16.mxu0 %v15404_v20 }
 0x1e8   : > { %v13086_v13 = vpop.permute.xlu0 %3255  ;;  %v2109_v26 = vpop.permute.xlu1 %2108  ;;  %3088 = vmatprep.subr.bf16.mxu0 %v2894_v49 }
 0x1e9   : > { %v2126_v48 = vsel %vm2114_vm3, %v2109_v26, %v12720_v36  ;;  %v2125_v55 = vsel %vm2114_vm3, %v12688_v51, %v2109_v26  ;;  %v2893_v51 = vsel %vm2884_vm4, %v12930_v3, %v12903_v60  ;;  %v13209_v26 = vld [vmem:[#allocation7 + $0x18] sm:$0xff]  }
 0x1ea   : > { %4773 = vrot.lane.b32.xlu0 %v13093_v10, %s11905_s26  ;;  %4783 = vrot.lane.b32.xlu1 %v13098_v38, %s11905_s26 }
 0x1eb   : > { %10823 = vmatmul.mubr.msk.bf16.vlgmr.msra.gmra.mrb[4].mxu1 %vm587_vm1, %v12800_v53  ;;  %2360 = vmatprep.subr.bf16.mxu1 %v2126_v48  ;;  %v13212_v48 = vld [vmem:[%s12197_s22 + $0x4] ss:$60 sps:$4 sm:$0xff]  }
 0x1ec   : > { %2361 = vmatpush1.bf16.msra.mxu1 %v2125_v55  ;;  %v13104_v57 = vpop.permute.xlu0 %3251  ;;  %v13106_v36 = vpop.permute.xlu1 %3630  ;;  %2392 = vmatprep.mubr.bf16.mxu1 %v15404_v20  ;;  %v13217_v55 = vld [vmem:[%s12197_s22 + $0x18] ss:$60 sps:$4 sm:$0xff]  }
 0x1ed   : > { %10839 = vmatmul.mubr.msk.bf16.vlgmr.msra.gmra.mrb[4].mxu0 %vm587_vm1, %v13054_v27 }
 0x1ee   : > { %4785 = vrot.lane.b32.xlu0 %v13118_v22, %s11905_s26  ;;  %4018 = vrot.lane.b32.xlu1 %v12463_v45, %s11904_s17 }
 0x1ef   : > { %3089 = vmatpush1.bf16.msra.mxu0 %v2893_v51  ;;  %3120 = vmatprep.mubr.bf16.mxu0 %v15404_v20  ;;  %v3261_v51 = vsel %vm2884_vm4, %v13030_v50, %v12993_v24 }
 0x1f0   : > { %v13125_v60 = vpop.permute.xlu0 %3632  ;;  %v2458_v34 = vpop.permute.xlu1 %2457  ;;  %3174 = vmatprep.subr.bf16.mxu0 %v2898_v7  ;;  %v3266_v7 = vsel %vm2884_vm4, %v13032_v16, %v13048_v33 }
 0x1f1   : > { %v2482_v32 = vsel %vm2114_vm3, %v2458_v34, %v12779_v40  ;;  %v2481_v4 = vsel %vm2114_vm3, %v12737_v56, %v2458_v34  ;;  %v2897_v56 = vsel %vm2884_vm4, %v12960_v5, %v12932_v62  ;;  %v13239_v34 = vld [vmem:[%s12197_s22 + $0x2c] ss:$60 sps:$4 sm:$0xff]  }
 0x1f2   : > { %4781 = vrot.lane.b32.xlu0 %v13132_v11, %s11905_s26  ;;  %4791 = vrot.lane.b32.xlu1 %v13137_v0, %s11905_s26 }
 0x1f3   : > { %10825 = vmatmul.mubr.msk.bf16.vlgmr.msra.gmra.mrb[8].mxu1 %vm587_vm1, %v12800_v53  ;;  %2552 = vmatprep.subr.bf16.mxu1 %v2482_v32  ;;  %v3258_v53 = vsel %vm2884_vm4, %v12962_v42, %v12975_v6 }
 0x1f4   : > { %2553 = vmatpush1.bf16.msra.mxu1 %v2481_v4  ;;  %v13143_v45 = vpop.permute.xlu0 %3628  ;;  %v13145_v40 = vpop.permute.xlu1 %3638  ;;  %2584 = vmatprep.mubr.bf16.mxu1 %v15404_v20 }
 0x1f5   : > { %10841 = vmatmul.mubr.msk.bf16.vlgmr.msra.gmra.mrb[8].mxu0 %vm587_vm1, %v13054_v27 }
 0x1f6   : > { %4793 = vrot.lane.b32.xlu0 %v12634_v44, %s11905_s26  ;;  %4403 = vrot.lane.b32.xlu1 %v12378_v23, %s11905_s26  ;;  %v13173_v23 = vld [vmem:[%s12197_s22 + $0x8] ss:$60 sps:$4 sm:$0xff]  }
 0x1f7   : > { %3175 = vmatpush1.bf16.msra.mxu0 %v2897_v56  ;;  %3206 = vmatprep.mubr.bf16.mxu0 %v15404_v20 }
 0x1f8   : > { %v13161_v9 = vpop.permute.xlu0 %3640  ;;  %v2466_v62 = vpop.permute.xlu1 %2465  ;;  %3288 = vmatprep.subr.bf16.mxu0 %v3258_v53  ;;  %v13251_v53 = vld [vmem:[%s12197_s22 + $0x14] ss:$60 sps:$4 sm:$0xff]  }
 0x1f9   : > { %v2486_v19 = vsel %vm2114_vm3, %v2466_v62, %v12808_v37  ;;  %v2485_v63 = vsel %vm2114_vm3, %v12767_v54, %v2466_v62  ;;  %v3257_v54 = vsel %vm2884_vm4, %v12991_v8, %v12962_v42  ;;  %v13198_v42 = vld [vmem:[%s12197_s22 + $0x1c] ss:$60 sps:$4 sm:$0xff]   ;;  %v13256_v62 = vld [vmem:[%s12197_s22 + $0x28] ss:$60 sps:$4 sm:$0xff]  }
 0x1fa   : > { %4789 = vrot.lane.b32.xlu0 %v13168_v29, %s11905_s26  ;;  %5168 = vrot.lane.b32.xlu1 %v13173_v23, %s11906_s25 }
 0x1fb   : > { %10829 = vmatmul.mubr.msk.bf16.vlgmr.msra.gmra.mrb[0].mxu1 %vm587_vm1, %v12922_v46  ;;  %2638 = vmatprep.subr.bf16.mxu1 %v2486_v19 }
 0x1fc   : > { %2639 = vmatpush1.bf16.msra.mxu1 %v2485_v63  ;;  %v13182_v37 = vpop.permute.xlu0 %3636  ;;  %v13184_v12 = vpop.permute.xlu1 %3646  ;;  %2670 = vmatprep.mubr.bf16.mxu1 %v15404_v20  ;;  %v13278_v63 = vld [vmem:[%s12190_s24 + $0xc] ss:$60 sps:$4 sm:$0xff]  }
 0x1fd   : > { %10843 = vmatmul.mubr.msk.bf16.vlgmr.msra.gmra.mrb[12].mxu0 %vm587_vm1, %v13054_v27 }
 0x1fe   : > { %5170 = vrot.lane.b32.xlu0 %v13193_v43, %s11906_s25  ;;  %4411 = vrot.lane.b32.xlu1 %v13198_v42, %s11905_s26 }
 0x1ff   : > { %3289 = vmatpush1.bf16.msra.mxu0 %v3257_v54  ;;  %3320 = vmatprep.mubr.bf16.mxu0 %v15404_v20 }
 0x200   : > { %v13203_v8 = vpop.permute.xlu0 %3648  ;;  %v2474_v39 = vpop.permute.xlu1 %2473  ;;  %3374 = vmatprep.subr.bf16.mxu0 %v3262_v1 }
 0x201   : > { %v2490_v52 = vsel %vm2114_vm3, %v2474_v39, %v12827_v61  ;;  %v2489_v49 = vsel %vm2114_vm3, %v12797_v59, %v2474_v39  ;;  %v13290_v39 = vld [vmem:[%s12197_s22 + $0x24] ss:$60 sps:$4 sm:$0xff]  }
 0x202   : > { %5166 = vrot.lane.b32.xlu0 %v13212_v48, %s11906_s25  ;;  %5176 = vrot.lane.b32.xlu1 %v13217_v55, %s11906_s25 }
 0x203   : > { %10831 = vmatmul.mubr.msk.bf16.vlgmr.msra.gmra.mrb[4].mxu1 %vm587_vm1, %v12922_v46  ;;  %2724 = vmatprep.subr.bf16.mxu1 %v2490_v52  ;;  %v13297_v52 = vld [vmem:[%s12190_s24 + $0x1c] ss:$60 sps:$4 sm:$0xff]  }
 0x204   : > { %2725 = vmatpush1.bf16.msra.mxu1 %v2489_v49  ;;  %v13223_v61 = vpop.permute.xlu0 %3644  ;;  %v13225_v59 = vpop.permute.xlu1 %3654  ;;  %2756 = vmatprep.mubr.bf16.mxu1 %v15404_v20 }
 0x205   : > { %10846 = vmatmul.mubr.msk.bf16.vlgmr.msra.gmra.mrb[0].mxu0 %vm587_vm1, %v13209_v26 }
 0x206   : > { %5178 = vrot.lane.b32.xlu0 %v13198_v42, %s11906_s25  ;;  %4419 = vrot.lane.b32.xlu1 %v13239_v34, %s11905_s26 }
 0x207   : > { %3375 = vmatpush1.bf16.msra.mxu0 %v3261_v51  ;;  %3406 = vmatprep.mubr.bf16.mxu0 %v15404_v20  ;;  %v3660_v51 = vsel %vm3658_vm5, %v13106_v36, %v13125_v60 }
 0x208   : > { %v13244_v24 = vpop.permute.xlu0 %3656  ;;  %v2861_v32 = vpop.permute.xlu1 %2860  ;;  %3460 = vmatprep.subr.bf16.mxu0 %v3266_v7  ;;  %v13315_v7 = vld [vmem:[%s12197_s22 + $0x34] ss:$60 sps:$4 sm:$0xff]  }
 0x209   : > { %v2888_v4 = vsel %vm2884_vm4, %v2861_v32, %v12901_v17  ;;  %v2887_v56 = vsel %vm2884_vm4, %v12855_v18, %v2861_v32  ;;  %v3265_v18 = vsel %vm2884_vm4, %v13065_v31, %v13032_v16 }
 0x20a   : > { %5174 = vrot.lane.b32.xlu0 %v13251_v53, %s11906_s25  ;;  %5184 = vrot.lane.b32.xlu1 %v13256_v62, %s11906_s25 }
 0x20b   : > { %10833 = vmatmul.mubr.msk.bf16.vlgmr.msra.gmra.mrb[8].mxu1 %vm587_vm1, %v12922_v46  ;;  %2959 = vmatprep.subr.bf16.mxu1 %v2888_v4  ;;  %v3270_v46 = vsel %vm2884_vm4, %v13067_v35, %v13086_v13 }
 0x20c   : > { %2960 = vmatpush1.bf16.msra.mxu1 %v2887_v56  ;;  %v13262_v17 = vpop.permute.xlu0 %3652  ;;  %v13264_v19 = vpop.permute.xlu1 %3998  ;;  %2991 = vmatprep.mubr.bf16.mxu1 %v15404_v20 }
 0x20d   : > { %10848 = vmatmul.mubr.msk.bf16.vlgmr.msra.gmra.mrb[4].mxu0 %vm587_vm1, %v13209_v26 }
 0x20e   : > { %5186 = vrot.lane.b32.xlu0 %v13239_v34, %s11906_s25  ;;  %4771 = vrot.lane.b32.xlu1 %v13278_v63, %s11905_s26 }
 0x20f   : > { %3461 = vmatpush1.bf16.msra.mxu0 %v3265_v18  ;;  %3492 = vmatprep.mubr.bf16.mxu0 %v15404_v20  ;;  %v3659_v18 = vsel %vm3658_vm5, %v13143_v45, %v13106_v36  ;;  %v13348_v36 = vld [vmem:[%s12190_s24 + $0x2c] ss:$60 sps:$4 sm:$0xff]  }
 0x210   : > { %v13283_v16 = vpop.permute.xlu0 %4000  ;;  %v2869_v54 = vpop.permute.xlu1 %2868  ;;  %3546 = vmatprep.subr.bf16.mxu0 %v3270_v46 }
 0x211   : > { %v2892_v1 = vsel %vm2884_vm4, %v2869_v54, %v12930_v3  ;;  %v2891_v13 = vsel %vm2884_vm4, %v12886_v14, %v2869_v54  ;;  %v3269_v3 = vsel %vm2884_vm4, %v13104_v57, %v13067_v35 }
 0x212   : > { %5182 = vrot.lane.b32.xlu0 %v13290_v39, %s11906_s25  ;;  %3045 = vmatprep.subr.bf16.mxu1 %v2892_v1 }
 0x213   : > { %10838 = vmatmul.mubr.msk.bf16.vlgmr.msra.gmra.mrb[0].mxu1 %vm587_vm1, %v13054_v27  ;;  %4779 = vrot.lane.b32.xlu1 %v13297_v52, %s11905_s26 }
 0x214   : > { %3046 = vmatpush1.bf16.msra.mxu1 %v2891_v13  ;;  %v13304_v14 = vpop.permute.xlu0 %3996  ;;  %v13306_v49 = vpop.permute.xlu1 %4006  ;;  %3077 = vmatprep.mubr.bf16.mxu1 %v15404_v20  ;;  %v13361_v13 = vld [vmem:[#allocation8 + $0x20] sm:$0xff]  }
 0x215   : > { %10850 = vmatmul.mubr.msk.bf16.vlgmr.msra.gmra.mrb[8].mxu0 %vm587_vm1, %v13209_v26 }
 0x216   : > { %5190 = vrot.lane.b32.xlu0 %v13315_v7, %s11906_s25  ;;  %3547 = vmatpush1.bf16.msra.mxu0 %v3269_v3  ;;  %v3663_v3 = vsel %vm3658_vm5, %v13182_v37, %v13145_v40 }
 0x217   : > { %3578 = vmatprep.mubr.bf16.mxu0 %v15404_v20  ;;  %5192 = vrot.lane.b32.xlu1 %v12548_v41, %s11906_s25 }
 0x218   : > { %v13322_v35 = vpop.permute.xlu0 %4008  ;;  %v2877_v32 = vpop.permute.xlu1 %2876  ;;  %3690 = vmatprep.subr.bf16.mxu0 %v3660_v51  ;;  %v13383_v51 = vld [vmem:[%s12197_s22 + $0x10] ss:$60 sps:$4 sm:$0xff]  }
 0x219   : > { %v2896_v4 = vsel %vm2884_vm4, %v2877_v32, %v12960_v5  ;;  %v2895_v56 = vsel %vm2884_vm4, %v12916_v21, %v2877_v32  ;;  %v3664_v21 = vsel %vm3658_vm5, %v13145_v40, %v13161_v9 }
 0x21a   : > { %5533 = vrot.lane.b32.xlu0 %v13041_v30, %s11906_s25  ;;  %3131 = vmatprep.subr.bf16.mxu1 %v2896_v4 }
 0x21b   : > { %10840 = vmatmul.mubr.msk.bf16.vlgmr.msra.gmra.mrb[4].mxu1 %vm587_vm1, %v13054_v27  ;;  %5535 = vrot.lane.b32.xlu1 %v13278_v63, %s11906_s25 }
 0x21c   : > { %3132 = vmatpush1.bf16.msra.mxu1 %v2895_v56  ;;  %v13337_v41 = vpop.permute.xlu0 %4004  ;;  %v13339_v5 = vpop.permute.xlu1 %4014  ;;  %3163 = vmatprep.mubr.bf16.mxu1 %v15404_v20 }
 0x21d   : > { %10852 = vmatmul.mubr.msk.bf16.vlgmr.msra.gmra.mrb[12].mxu0 %vm587_vm1, %v13209_v26 }
 0x21e   : > { %4787 = vrot.lane.b32.xlu0 %v13348_v36, %s11905_s26  ;;  %3691 = vmatpush1.bf16.msra.mxu0 %v3659_v18  ;;  %v3667_v18 = vsel %vm3658_vm5, %v13223_v61, %v13184_v12 }
 0x21f   : > { %3722 = vmatprep.mubr.bf16.mxu0 %v15404_v20  ;;  %5531 = vrot.lane.b32.xlu1 %v13021_v25, %s11906_s25 }
 0x220   : > { %v13355_v45 = vpop.permute.xlu0 %4016  ;;  %v3234_v46 = vpop.permute.xlu1 %3233  ;;  %3776 = vmatprep.subr.bf16.mxu0 %v3664_v21 }
 0x221   : > { %v3260_v54 = vsel %vm2884_vm4, %v3234_v46, %v13030_v50  ;;  %v3259_v1 = vsel %vm2884_vm4, %v12975_v6, %v3234_v46 }
 0x222   : > { %3331 = vmatprep.subr.bf16.mxu1 %v3260_v54  ;;  %5541 = vrot.lane.b32.xlu0 %v13079_v2, %s11906_s25 }
 0x223   : > { %10842 = vmatmul.mubr.msk.bf16.vlgmr.msra.gmra.mrb[8].mxu1 %vm587_vm1, %v13054_v27  ;;  %5543 = vrot.lane.b32.xlu1 %v13297_v52, %s11906_s25  ;;  %v3668_v27 = vsel %vm3658_vm5, %v13184_v12, %v13203_v8 }
 0x224   : > { %3332 = vmatpush1.bf16.msra.mxu1 %v3259_v1  ;;  %v13372_v50 = vpop.permute.xlu0 %4012  ;;  %v13374_v6 = vpop.permute.xlu1 %4022  ;;  %3363 = vmatprep.mubr.bf16.mxu1 %v15404_v20 }
 0x225   : > { %10854 = vmatmul.mubr.msk.bf16.vlgmr.msra.gmra.mrb[0].mxu0 %vm587_vm1, %v13361_v13 }
 0x226   : > { %3777 = vmatpush1.bf16.msra.mxu0 %v3663_v3  ;;  %5172 = vrot.lane.b32.xlu0 %v13383_v51, %s11906_s25 }
 0x227   : > { %3808 = vmatprep.mubr.bf16.mxu0 %v15404_v20  ;;  %5539 = vrot.lane.b32.xlu1 %v13059_v28, %s11906_s25 }
 0x228   : > { %v13390_v40 = vpop.permute.xlu0 %4024  ;;  %v3242_v32 = vpop.permute.xlu1 %3241  ;;  %3862 = vmatprep.subr.bf16.mxu0 %v3668_v27 }
 0x229   : > { %v3264_v4 = vsel %vm2884_vm4, %v3242_v32, %v13065_v31  ;;  %v3263_v56 = vsel %vm2884_vm4, %v13009_v47, %v3242_v32  ;;  %v3672_v47 = vsel %vm3658_vm5, %v13225_v59, %v13244_v24  ;;  %v3671_v24 = vsel %vm3658_vm5, %v13262_v17, %v13225_v59 }
 0x22a   : > { %3417 = vmatprep.subr.bf16.mxu1 %v3264_v4  ;;  %5549 = vrot.lane.b32.xlu0 %v13118_v22, %s11906_s25 }
 0x22b   : > { %10847 = vmatmul.mubr.msk.bf16.vlgmr.msra.gmra.mrb[0].mxu1 %vm587_vm1, %v13209_v26  ;;  %5551 = vrot.lane.b32.xlu1 %v13348_v36, %s11906_s25 }
 0x22c   : > { %3418 = vmatpush1.bf16.msra.mxu1 %v3263_v56  ;;  %v13405_v21 = vpop.permute.xlu0 %4020  ;;  %v13407_v31 = vpop.permute.xlu1 %4399  ;;  %3449 = vmatprep.mubr.bf16.mxu1 %v15404_v20  ;;  %v4026_v56 = vsel %vm3658_vm5, %v13304_v14, %v13264_v19 }
 0x22d   : > { %10856 = vmatmul.mubr.msk.bf16.vlgmr.msra.gmra.mrb[4].mxu0 %vm587_vm1, %v13361_v13 }
 0x22e   : > { %3863 = vmatpush1.bf16.msra.mxu0 %v3667_v18  ;;  %5180 = vrot.lane.b32.xlu0 %v12983_v15, %s11906_s25 }
 0x22f   : > { %3894 = vmatprep.mubr.bf16.mxu0 %v15404_v20  ;;  %5547 = vrot.lane.b32.xlu1 %v13098_v38, %s11906_s25 }
 0x230   : > { %v13420_v12 = vpop.permute.xlu0 %4401  ;;  %v3250_v46 = vpop.permute.xlu1 %3249  ;;  %3948 = vmatprep.subr.bf16.mxu0 %v3672_v47  ;;  %v13486_v47 = vld [vmem:[#allocation7 + $0x20] sm:$0xff]  }
 0x231   : > { %v3268_v54 = vsel %vm2884_vm4, %v3250_v46, %v13104_v57  ;;  %v3267_v1 = vsel %vm2884_vm4, %v13048_v33, %v3250_v46  ;;  %v4027_v33 = vsel %vm3658_vm5, %v13264_v19, %v13283_v16  ;;  %v4030_v46 = vsel %vm3658_vm5, %v13337_v41, %v13306_v49 }
 0x232   : > { %3503 = vmatprep.subr.bf16.mxu1 %v3268_v54  ;;  %5188 = vrot.lane.b32.xlu0 %v13016_v58, %s11906_s25  ;;  %v4035_v54 = vsel %vm3658_vm5, %v13339_v5, %v13355_v45 }
 0x233   : > { %10849 = vmatmul.mubr.msk.bf16.vlgmr.msra.gmra.mrb[4].mxu1 %vm587_vm1, %v13209_v26  ;;  %5555 = vrot.lane.b32.xlu1 %v13137_v0, %s11906_s25 }
 0x234   : > { %3504 = vmatpush1.bf16.msra.mxu1 %v3267_v1  ;;  %v13435_v3 = vpop.permute.xlu0 %4397  ;;  %v13437_v57 = vpop.permute.xlu1 %4407  ;;  %3535 = vmatprep.mubr.bf16.mxu1 %v15404_v20 }
 0x235   : > { %10858 = vmatmul.mubr.msk.bf16.vlgmr.msra.gmra.mrb[8].mxu0 %vm587_vm1, %v13361_v13 }
 0x236   : > { %3949 = vmatpush1.bf16.msra.mxu0 %v3671_v24  ;;  %3980 = vmatprep.mubr.bf16.mxu0 %v15404_v20 }
 0x237   : > { %5557 = vrot.lane.b32.xlu0 %v12634_v44, %s11906_s25  ;;  %5931 = vrot.lane.b32.xlu1 %v13173_v23, %s11907_s23 }
 0x238   : > { %v13450_v59 = vpop.permute.xlu0 %4409  ;;  %v3635_v27 = vpop.permute.xlu1 %3634  ;;  %4057 = vmatprep.subr.bf16.mxu0 %v4027_v33 }
 0x239   : > { %v3662_v32 = vsel %vm3658_vm5, %v3635_v27, %v13182_v37  ;;  %v3661_v4 = vsel %vm3658_vm5, %v13125_v60, %v3635_v27  ;;  %v4031_v60 = vsel %vm3658_vm5, %v13306_v49, %v13322_v35  ;;  %v4034_v27 = vsel %vm3658_vm5, %v13372_v50, %v13339_v5 }
 0x23a   : > { %3733 = vmatprep.subr.bf16.mxu1 %v3662_v32 }
 0x23b   : > { %10851 = vmatmul.mubr.msk.bf16.vlgmr.msra.gmra.mrb[8].mxu1 %vm587_vm1, %v13209_v26  ;;  %5933 = vrot.lane.b32.xlu0 %v13193_v43, %s11907_s23 }
 0x23c   : > { %3734 = vmatpush1.bf16.msra.mxu1 %v3661_v4  ;;  %v13463_v44 = vpop.permute.xlu0 %4405  ;;  %v13465_v18 = vpop.permute.xlu1 %4415  ;;  %3765 = vmatprep.mubr.bf16.mxu1 %v15404_v20 }
 0x23d   : > { %10860 = vmatmul.mubr.msk.bf16.vlgmr.msra.gmra.mrb[12].mxu0 %vm587_vm1, %v13361_v13  ;;  %5537 = vrot.lane.b32.xlu1 %v13093_v10, %s11906_s25 }
 0x23e   : > { %4058 = vmatpush1.bf16.msra.mxu0 %v4026_v56  ;;  %4089 = vmatprep.mubr.bf16.mxu0 %v15404_v20 }
 0x23f   : > { %5929 = vrot.lane.b32.xlu0 %v13212_v48, %s11907_s23  ;;  %4143 = vmatprep.subr.bf16.mxu0 %v4031_v60  ;;  %v4038_v60 = vsel %vm3658_vm5, %v13405_v21, %v13374_v6 }
 0x240   : > { %v13478_v37 = vpop.permute.xlu0 %4417  ;;  %v3643_v26 = vpop.permute.xlu1 %3642 }
 0x241   : > { %v3666_v19 = vsel %vm3658_vm5, %v3643_v26, %v13223_v61  ;;  %v3665_v14 = vsel %vm3658_vm5, %v13161_v9, %v3643_v26  ;;  %5939 = vrot.lane.b32.xlu1 %v13217_v55, %s11907_s23 }
 0x242   : > { %3819 = vmatprep.subr.bf16.mxu1 %v3666_v19 }
 0x243   : > { %10855 = vmatmul.mubr.msk.bf16.vlgmr.msra.gmra.mrb[0].mxu1 %vm587_vm1, %v13361_v13  ;;  %5941 = vrot.lane.b32.xlu0 %v13198_v42, %s11907_s23 }
 0x244   : > { %3820 = vmatpush1.bf16.msra.mxu1 %v3665_v14  ;;  %v13495_v61 = vpop.permute.xlu0 %4413  ;;  %v13497_v9 = vpop.permute.xlu1 %4423  ;;  %3851 = vmatprep.mubr.bf16.mxu1 %v15404_v20 }
 0x245   : > { %10862 = vmatmul.mubr.msk.bf16.vlgmr.msra.gmra.mrb[0].mxu0 %vm587_vm1, %v13486_v47  ;;  %5545 = vrot.lane.b32.xlu1 %v13132_v11, %s11906_s25 }
 0x246   : > { %4144 = vmatpush1.bf16.msra.mxu0 %v4030_v46  ;;  %4175 = vmatprep.mubr.bf16.mxu0 %v15404_v20 }
 0x247   : > { %5937 = vrot.lane.b32.xlu0 %v13251_v53, %s11907_s23  ;;  %4229 = vmatprep.subr.bf16.mxu0 %v4035_v54  ;;  %v4428_v54 = vsel %vm4427_vm6, %v13435_v3, %v13407_v31 }
 0x248   : > { %v13510_v49 = vpop.permute.xlu0 %4425  ;;  %v3651_v1 = vpop.permute.xlu1 %3650 }
 0x249   : > { %v3670_v24 = vsel %vm3658_vm5, %v3651_v1, %v13262_v17  ;;  %v3669_v33 = vsel %vm3658_vm5, %v13203_v8, %v3651_v1  ;;  %5947 = vrot.lane.b32.xlu1 %v13256_v62, %s11907_s23  ;;  %v4039_v8 = vsel %vm3658_vm5, %v13374_v6, %v13390_v40 }
 0x24a   : > { %3905 = vmatprep.subr.bf16.mxu1 %v3670_v24 }
 0x24b   : > { %10857 = vmatmul.mubr.msk.bf16.vlgmr.msra.gmra.mrb[4].mxu1 %vm587_vm1, %v13361_v13  ;;  %5949 = vrot.lane.b32.xlu0 %v13239_v34, %s11907_s23 }
 0x24c   : > { %3906 = vmatpush1.bf16.msra.mxu1 %v3669_v33  ;;  %v13525_v32 = vpop.permute.xlu0 %4421  ;;  %v13527_v17 = vpop.permute.xlu1 %4767  ;;  %3937 = vmatprep.mubr.bf16.mxu1 %v15404_v20 }
 0x24d   : > { %10864 = vmatmul.mubr.msk.bf16.vlgmr.msra.gmra.mrb[4].mxu0 %vm587_vm1, %v13486_v47  ;;  %5553 = vrot.lane.b32.xlu1 %v13168_v29, %s11906_s25 }
 0x24e   : > { %4230 = vmatpush1.bf16.msra.mxu0 %v4034_v27  ;;  %4261 = vmatprep.mubr.bf16.mxu0 %v15404_v20  ;;  %v13609_v27 = vld [vmem:[#allocation8 + $0x28] sm:$0xff]  }
 0x24f   : > { %5945 = vrot.lane.b32.xlu0 %v13290_v39, %s11907_s23  ;;  %4315 = vmatprep.subr.bf16.mxu0 %v4039_v8  ;;  %v4432_v8 = vsel %vm4427_vm6, %v13463_v44, %v13437_v57 }
 0x250   : > { %v13540_v5 = vpop.permute.xlu0 %4769  ;;  %v4003_v4 = vpop.permute.xlu1 %4002 }
 0x251   : > { %v4029_v40 = vsel %vm3658_vm5, %v4003_v4, %v13337_v41  ;;  %v4028_v56 = vsel %vm3658_vm5, %v13283_v16, %v4003_v4  ;;  %5935 = vrot.lane.b32.xlu1 %v13383_v51, %s11907_s23  ;;  %v4429_v16 = vsel %vm4427_vm6, %v13407_v31, %v13420_v12  ;;  %v4437_v4 = vsel %vm4427_vm6, %v13465_v18, %v13478_v37 }
 0x252   : > { %4100 = vmatprep.subr.bf16.mxu1 %v4029_v40 }
 0x253   : > { %10859 = vmatmul.mubr.msk.bf16.vlgmr.msra.gmra.mrb[8].mxu1 %vm587_vm1, %v13361_v13  ;;  %5953 = vrot.lane.b32.xlu0 %v13315_v7, %s11907_s23  ;;  %v13566_v13 = vld [vmem:[%s12197_s22 + $0x38] ss:$60 sps:$4 sm:$0xff]  }
 0x254   : > { %4101 = vmatpush1.bf16.msra.mxu1 %v4028_v56  ;;  %v13555_v26 = vpop.permute.xlu0 %4765  ;;  %v13557_v41 = vpop.permute.xlu1 %4775  ;;  %4132 = vmatprep.mubr.bf16.mxu1 %v15404_v20 }
 0x255   : > { %10866 = vmatmul.mubr.msk.bf16.vlgmr.msra.gmra.mrb[8].mxu0 %vm587_vm1, %v13486_v47  ;;  %5955 = vrot.lane.b32.xlu1 %v13566_v13, %s11907_s23 }
 0x256   : > { %4316 = vmatpush1.bf16.msra.mxu0 %v4038_v60  ;;  %4347 = vmatprep.mubr.bf16.mxu0 %v15404_v20 }
 0x257   : > { %6296 = vrot.lane.b32.xlu0 %v13041_v30, %s11907_s23  ;;  %4459 = vmatprep.subr.bf16.mxu0 %v4429_v16  ;;  %v4436_v16 = vsel %vm4427_vm6, %v13495_v61, %v13465_v18 }
 0x258   : > { %v13573_v6 = vpop.permute.xlu0 %4777  ;;  %v4011_v19 = vpop.permute.xlu1 %4010 }
 0x259   : > { %v4033_v14 = vsel %vm3658_vm5, %v4011_v19, %v13372_v50  ;;  %v4032_v46 = vsel %vm3658_vm5, %v13322_v35, %v4011_v19  ;;  %6298 = vrot.lane.b32.xlu1 %v13278_v63, %s11907_s23  ;;  %v4433_v35 = vsel %vm4427_vm6, %v13437_v57, %v13450_v59 }
 0x25a   : > { %4186 = vmatprep.subr.bf16.mxu1 %v4033_v14 }
 0x25b   : > { %10863 = vmatmul.mubr.msk.bf16.vlgmr.msra.gmra.mrb[0].mxu1 %vm587_vm1, %v13486_v47  ;;  %5943 = vrot.lane.b32.xlu0 %v12983_v15, %s11907_s23 }
 0x25c   : > { %4187 = vmatpush1.bf16.msra.mxu1 %v4032_v46  ;;  %v13588_v1 = vpop.permute.xlu0 %4773  ;;  %v13590_v50 = vpop.permute.xlu1 %4783  ;;  %4218 = vmatprep.mubr.bf16.mxu1 %v15404_v20  ;;  %v4440_v46 = vsel %vm4427_vm6, %v13525_v32, %v13497_v9 }
 0x25d   : > { %10868 = vmatmul.mubr.msk.bf16.vlgmr.msra.gmra.mrb[12].mxu0 %vm587_vm1, %v13486_v47  ;;  %6294 = vrot.lane.b32.xlu1 %v13021_v25, %s11907_s23 }
 0x25e   : > { %4460 = vmatpush1.bf16.msra.mxu0 %v4428_v54  ;;  %4491 = vmatprep.mubr.bf16.mxu0 %v15404_v20  ;;  %v13679_v54 = vld [vmem:[%s12190_s24 + $0x38] ss:$60 sps:$4 sm:$0xff]  }
 0x25f   : > { %6304 = vrot.lane.b32.xlu0 %v13079_v2, %s11907_s23  ;;  %4545 = vmatprep.subr.bf16.mxu0 %v4433_v35  ;;  %v4796_v35 = vsel %vm4427_vm6, %v13527_v17, %v13540_v5 }
 0x260   : > { %v13603_v31 = vpop.permute.xlu0 %4785  ;;  %v4019_v3 = vpop.permute.xlu1 %4018 }
 0x261   : > { %v4037_v24 = vsel %vm3658_vm5, %v4019_v3, %v13405_v21  ;;  %v4036_v33 = vsel %vm3658_vm5, %v13355_v45, %v4019_v3  ;;  %6306 = vrot.lane.b32.xlu1 %v13297_v52, %s11907_s23 }
 0x262   : > { %4272 = vmatprep.subr.bf16.mxu1 %v4037_v24 }
 0x263   : > { %10865 = vmatmul.mubr.msk.bf16.vlgmr.msra.gmra.mrb[4].mxu1 %vm587_vm1, %v13486_v47  ;;  %5951 = vrot.lane.b32.xlu0 %v13016_v58, %s11907_s23 }
 0x264   : > { %4273 = vmatpush1.bf16.msra.mxu1 %v4036_v33  ;;  %v13620_v21 = vpop.permute.xlu0 %4781  ;;  %v13622_v45 = vpop.permute.xlu1 %4791  ;;  %4304 = vmatprep.mubr.bf16.mxu1 %v15404_v20 }
 0x265   : > { %10870 = vmatmul.mubr.msk.bf16.vlgmr.msra.gmra.mrb[0].mxu0 %vm587_vm1, %v13609_v27  ;;  %6302 = vrot.lane.b32.xlu1 %v13059_v28, %s11907_s23 }
 0x266   : > { %4546 = vmatpush1.bf16.msra.mxu0 %v4432_v8  ;;  %4577 = vmatprep.mubr.bf16.mxu0 %v15404_v20 }
 0x267   : > { %6312 = vrot.lane.b32.xlu0 %v13118_v22, %s11907_s23  ;;  %4631 = vmatprep.subr.bf16.mxu0 %v4437_v4  ;;  %v13734_v4 = vld [vmem:[#allocation7 + $0x28] sm:$0xff]  }
 0x268   : > { %v13635_v57 = vpop.permute.xlu0 %4793  ;;  %v4404_v40 = vpop.permute.xlu1 %4403 }
 0x269   : > { %v4431_v56 = vsel %vm4427_vm6, %v4404_v40, %v13463_v44  ;;  %v4430_v60 = vsel %vm4427_vm6, %v13420_v12, %v4404_v40  ;;  %6314 = vrot.lane.b32.xlu1 %v13348_v36, %s11907_s23  ;;  %v4441_v12 = vsel %vm4427_vm6, %v13497_v9, %v13510_v49 }
 0x26a   : > { %4502 = vmatprep.subr.bf16.mxu1 %v4431_v56 }
 0x26b   : > { %10867 = vmatmul.mubr.msk.bf16.vlgmr.msra.gmra.mrb[8].mxu1 %vm587_vm1, %v13486_v47  ;;  %6300 = vrot.lane.b32.xlu0 %v13093_v10, %s11907_s23 }
 0x26c   : > { %4503 = vmatpush1.bf16.msra.mxu1 %v4430_v60  ;;  %v13650_v19 = vpop.permute.xlu0 %4789  ;;  %v13652_v44 = vpop.permute.xlu1 %5168  ;;  %4534 = vmatprep.mubr.bf16.mxu1 %v15404_v20 }
 0x26d   : > { %10872 = vmatmul.mubr.msk.bf16.vlgmr.msra.gmra.mrb[4].mxu0 %vm587_vm1, %v13609_v27  ;;  %6310 = vrot.lane.b32.xlu1 %v13098_v38, %s11907_s23 }
 0x26e   : > { %4632 = vmatpush1.bf16.msra.mxu0 %v4436_v16  ;;  %4663 = vmatprep.mubr.bf16.mxu0 %v15404_v20 }
 0x26f   : > { %6308 = vrot.lane.b32.xlu0 %v13132_v11, %s11907_s23  ;;  %4717 = vmatprep.subr.bf16.mxu0 %v4441_v12 }
 0x270   : > { %v13665_v18 = vpop.permute.xlu0 %5170  ;;  %v4412_v47 = vpop.permute.xlu1 %4411 }
 0x271   : > { %v4435_v14 = vsel %vm4427_vm6, %v4412_v47, %v13495_v61  ;;  %v4434_v49 = vsel %vm4427_vm6, %v13450_v59, %v4412_v47  ;;  %6318 = vrot.lane.b32.xlu1 %v13137_v0, %s11907_s23 }
 0x272   : > { %4588 = vmatprep.subr.bf16.mxu1 %v4435_v14 }
 0x273   : > { %10871 = vmatmul.mubr.msk.bf16.vlgmr.msra.gmra.mrb[0].mxu1 %vm587_vm1, %v13609_v27  ;;  %6320 = vrot.lane.b32.xlu0 %v13679_v54, %s11907_s23 }
 0x274   : > { %4589 = vmatpush1.bf16.msra.mxu1 %v4434_v49  ;;  %v13683_v61 = vpop.permute.xlu0 %5166  ;;  %v13685_v59 = vpop.permute.xlu1 %5176  ;;  %4620 = vmatprep.mubr.bf16.mxu1 %v15404_v20 }
 0x275   : > { %10874 = vmatmul.mubr.msk.bf16.vlgmr.msra.gmra.mrb[8].mxu0 %vm587_vm1, %v13609_v27  ;;  %6694 = vrot.lane.b32.xlu1 %v13173_v23, %s11908_s0  ;;  %v4795_v23 = vsel %vm4427_vm6, %v13555_v26, %v13527_v17 }
 0x276   : > { %4718 = vmatpush1.bf16.msra.mxu0 %v4440_v46  ;;  %4749 = vmatprep.mubr.bf16.mxu0 %v15404_v20 }
 0x277   : > { %6696 = vrot.lane.b32.xlu0 %v13193_v43, %s11908_s0  ;;  %4826 = vmatprep.subr.bf16.mxu0 %v4796_v35 }
 0x278   : > { %v13698_v9 = vpop.permute.xlu0 %5178  ;;  %v4420_v3 = vpop.permute.xlu1 %4419 }
 0x279   : > { %v4439_v24 = vsel %vm4427_vm6, %v4420_v3, %v13525_v32  ;;  %v4438_v33 = vsel %vm4427_vm6, %v13478_v37, %v4420_v3  ;;  %6316 = vrot.lane.b32.xlu1 %v13168_v29, %s11907_s23  ;;  %v4800_v37 = vsel %vm4427_vm6, %v13557_v41, %v13573_v6  ;;  %v13928_v3 = vld [vmem:[#allocation7 + $0x30] sm:$0xff]  }
 0x27a   : > { %4674 = vmatprep.subr.bf16.mxu1 %v4439_v24 }
 0x27b   : > { %10873 = vmatmul.mubr.msk.bf16.vlgmr.msra.gmra.mrb[4].mxu1 %vm587_vm1, %v13609_v27  ;;  %6692 = vrot.lane.b32.xlu0 %v13212_v48, %s11908_s0 }
 0x27c   : > { %4675 = vmatpush1.bf16.msra.mxu1 %v4438_v33  ;;  %v13713_v43 = vpop.permute.xlu0 %5174  ;;  %v13715_v32 = vpop.permute.xlu1 %5184  ;;  %4706 = vmatprep.mubr.bf16.mxu1 %v15404_v20 }
 0x27d   : > { %10876 = vmatmul.mubr.msk.bf16.vlgmr.msra.gmra.mrb[12].mxu0 %vm587_vm1, %v13609_v27  ;;  %6702 = vrot.lane.b32.xlu1 %v13217_v55, %s11908_s0 }
 0x27e   : > { %4827 = vmatpush1.bf16.msra.mxu0 %v4795_v23  ;;  %4858 = vmatprep.mubr.bf16.mxu0 %v15404_v20 }
 0x27f   : > { %6704 = vrot.lane.b32.xlu0 %v13198_v42, %s11908_s0  ;;  %4912 = vmatprep.subr.bf16.mxu0 %v4800_v37  ;;  %v4799_v42 = vsel %vm4427_vm6, %v13588_v1, %v13557_v41 }
 0x280   : > { %v13728_v48 = vpop.permute.xlu0 %5186  ;;  %v4772_v17 = vpop.permute.xlu1 %4771 }
 0x281   : > { %v4798_v26 = vsel %vm4427_vm6, %v4772_v17, %v13588_v1  ;;  %v4797_v8 = vsel %vm4427_vm6, %v13540_v5, %v4772_v17  ;;  %6698 = vrot.lane.b32.xlu1 %v13383_v51, %s11908_s0  ;;  %v4804_v51 = vsel %vm4427_vm6, %v13590_v50, %v13603_v31 }
 0x282   : > { %4869 = vmatprep.subr.bf16.mxu1 %v4798_v26 }
 0x283   : > { %10875 = vmatmul.mubr.msk.bf16.vlgmr.msra.gmra.mrb[8].mxu1 %vm587_vm1, %v13609_v27  ;;  %6700 = vrot.lane.b32.xlu0 %v13251_v53, %s11908_s0  ;;  %v4803_v27 = vsel %vm4427_vm6, %v13620_v21, %v13590_v50 }
 0x284   : > { %4870 = vmatpush1.bf16.msra.mxu1 %v4797_v8  ;;  %v13745_v55 = vpop.permute.xlu0 %5182  ;;  %4901 = vmatprep.mubr.bf16.mxu1 %v15404_v20 }
 0x285   : > { %v4780_v5 = vpop.permute.xlu1 %4779  ;;  %10878 = vmatmul.mubr.msk.bf16.vlgmr.msra.gmra.mrb[0].mxu0 %vm587_vm1, %v13734_v4  ;;  %6710 = vrot.lane.b32.xlu1 %v13256_v62, %s11908_s0 }
 0x286   : > { %4913 = vmatpush1.bf16.msra.mxu0 %v4799_v42  ;;  %v4802_v53 = vsel %vm4427_vm6, %v4780_v5, %v13620_v21  ;;  %4944 = vmatprep.mubr.bf16.mxu0 %v15404_v20  ;;  %v4801_v62 = vsel %vm4427_vm6, %v13573_v6, %v4780_v5 }
 0x287   : > { %4955 = vmatprep.subr.bf16.mxu1 %v4802_v53  ;;  %6712 = vrot.lane.b32.xlu0 %v13239_v34, %s11908_s0 }
 0x288   : > { %v13760_v41 = vpop.permute.xlu0 %5190  ;;  %4998 = vmatprep.subr.bf16.mxu0 %v4804_v51 }
 0x289   : > { %v13762_v1 = vpop.permute.xlu1 %5192  ;;  %6706 = vrot.lane.b32.xlu1 %v12983_v15, %s11908_s0  ;;  %v4808_v15 = vsel %vm4427_vm6, %v13622_v45, %v13635_v57 }
 0x28b   : > { %10879 = vmatmul.mubr.msk.bf16.vlgmr.msra.gmra.mrb[0].mxu1 %vm587_vm1, %v13734_v4  ;;  %6708 = vrot.lane.b32.xlu0 %v13290_v39, %s11908_s0 }
 0x28c   : > { %4956 = vmatpush1.bf16.msra.mxu1 %v4801_v62  ;;  %v13775_v34 = vpop.permute.xlu0 %5533  ;;  %4987 = vmatprep.mubr.bf16.mxu1 %v15404_v20 }
 0x28d   : > { %10880 = vmatmul.mubr.msk.bf16.vlgmr.msra.gmra.mrb[4].mxu0 %vm587_vm1, %v13734_v4  ;;  %v13783_v6 = vpop.permute.xlu1 %5535  ;;  %6714 = vrot.lane.b32.xlu1 %v13016_v58, %s11908_s0  ;;  %v4807_v58 = vsel %vm4427_vm6, %v13650_v19, %v13622_v45 }
 0x28e   : > { %4999 = vmatpush1.bf16.msra.mxu0 %v4803_v27  ;;  %5030 = vmatprep.mubr.bf16.mxu0 %v15404_v20  ;;  %v5560_v35 = vsel %vm5194_vm7, %v13775_v34, %v13783_v6 }
 0x28f   : > { %6716 = vrot.lane.b32.xlu0 %v13315_v7, %s11908_s0  ;;  %5084 = vmatprep.subr.bf16.mxu0 %v4808_v15 }
 0x290   : > { %v4788_v39 = vpop.permute.xlu0 %4787 }
 0x291   : > { %v4806_v50 = vsel %vm4427_vm6, %v4788_v39, %v13650_v19  ;;  %v4805_v21 = vsel %vm4427_vm6, %v13603_v31, %v4788_v39  ;;  %v13794_v57 = vpop.permute.xlu1 %5531  ;;  %6718 = vrot.lane.b32.xlu1 %v13566_v13, %s11908_s0  ;;  %v5196_v13 = vsel %vm5194_vm7, %v13652_v44, %v13665_v18 }
 0x292   : > { %5041 = vmatprep.subr.bf16.mxu1 %v4806_v50  ;;  %v13993_v50 = vld [vmem:[#allocation8 + $0x38] sm:$0xff]  }
 0x293   : > { %10881 = vmatmul.mubr.msk.bf16.vlgmr.msra.gmra.mrb[4].mxu1 %vm587_vm1, %v13734_v4  ;;  %7059 = vrot.lane.b32.xlu0 %v13041_v30, %s11908_s0 }
 0x294   : > { %5042 = vmatpush1.bf16.msra.mxu1 %v4805_v21  ;;  %v13805_v7 = vpop.permute.xlu0 %5541  ;;  %5073 = vmatprep.mubr.bf16.mxu1 %v15404_v20 }
 0x295   : > { %10882 = vmatmul.mubr.msk.bf16.vlgmr.msra.gmra.mrb[8].mxu0 %vm587_vm1, %v13734_v4  ;;  %v13813_v31 = vpop.permute.xlu1 %5543  ;;  %7061 = vrot.lane.b32.xlu1 %v13278_v63, %s11908_s0  ;;  %v5195_v63 = vsel %vm5194_vm7, %v13683_v61, %v13652_v44 }
 0x296   : > { %5085 = vmatpush1.bf16.msra.mxu0 %v4807_v58  ;;  %5116 = vmatprep.mubr.bf16.mxu0 %v15404_v20 }
 0x297   : > { %7057 = vrot.lane.b32.xlu0 %v13021_v25, %s11908_s0  ;;  %5225 = vmatprep.subr.bf16.mxu0 %v5196_v13 }
 0x298   : > { %v5173_v30 = vpop.permute.xlu0 %5172 }
 0x299   : > { %v5198_v45 = vsel %vm5194_vm7, %v5173_v30, %v13713_v43  ;;  %v5197_v40 = vsel %vm5194_vm7, %v13665_v18, %v5173_v30  ;;  %v13824_v56 = vpop.permute.xlu1 %5539  ;;  %7063 = vrot.lane.b32.xlu1 %v13093_v10, %s11908_s0  ;;  %v5200_v10 = vsel %vm5194_vm7, %v13685_v59, %v13698_v9  ;;  %v5204_v18 = vsel %vm5194_vm7, %v13715_v32, %v13728_v48 }
 0x29a   : > { %5268 = vmatprep.subr.bf16.mxu1 %v5198_v45 }
 0x29b   : > { %10883 = vmatmul.mubr.msk.bf16.vlgmr.msra.gmra.mrb[8].mxu1 %vm587_vm1, %v13734_v4  ;;  %7065 = vrot.lane.b32.xlu0 %v13059_v28, %s11908_s0  ;;  %v13848_v28 = vld [vmem:[#allocation8 + $0x30] sm:$0xff]  }
 0x29c   : > { %5269 = vmatpush1.bf16.msra.mxu1 %v5197_v40  ;;  %v13835_v25 = vpop.permute.xlu0 %5549  ;;  %5300 = vmatprep.mubr.bf16.mxu1 %v15404_v20 }
 0x29d   : > { %10884 = vmatmul.mubr.msk.bf16.vlgmr.msra.gmra.mrb[12].mxu0 %vm587_vm1, %v13734_v4  ;;  %v13843_v60 = vpop.permute.xlu1 %5551  ;;  %7067 = vrot.lane.b32.xlu1 %v13079_v2, %s11908_s0  ;;  %v5199_v2 = vsel %vm5194_vm7, %v13713_v43, %v13685_v59 }
 0x29e   : > { %5226 = vmatpush1.bf16.msra.mxu0 %v5195_v63  ;;  %5257 = vmatprep.mubr.bf16.mxu0 %v15404_v20  ;;  %v5568_v51 = vsel %vm5194_vm7, %v13835_v25, %v13843_v60 }
 0x29f   : > { %7069 = vrot.lane.b32.xlu0 %v13297_v52, %s11908_s0  ;;  %5311 = vmatprep.subr.bf16.mxu0 %v5200_v10 }
 0x2a0   : > { %v5181_v16 = vpop.permute.xlu0 %5180 }
 0x2a1   : > { %v5202_v19 = vsel %vm5194_vm7, %v5181_v16, %v13745_v55  ;;  %v5201_v44 = vsel %vm5194_vm7, %v13698_v9, %v5181_v16  ;;  %v13856_v12 = vpop.permute.xlu1 %5547  ;;  %7071 = vrot.lane.b32.xlu1 %v13132_v11, %s11908_s0  ;;  %v7444_v16 = vld [vmem:[%s15350_s5] sm:$0xff] }
 0x2a2   : > { %5354 = vmatprep.subr.bf16.mxu1 %v5202_v19  ;;  %v7445_v19 = vld [vmem:[%s15350_s5 + $0x8] sm:$0xff] }
 0x2a3   : > { %10887 = vmatmul.mubr.msk.bf16.vlgmr.msra.gmra.mrb[0].mxu1 %vm587_vm1, %v13848_v28  ;;  %7073 = vrot.lane.b32.xlu0 %v13098_v38, %s11908_s0 }
 0x2a4   : > { %5355 = vmatpush1.bf16.msra.mxu1 %v5201_v44  ;;  %5386 = vmatprep.mubr.bf16.mxu1 %v15404_v20  ;;  %v5189_v52 = vpop.permute.xlu0 %5188 }
 0x2a5   : > { %10886 = vmatmul.mubr.msk.bf16.vlgmr.msra.gmra.mrb[0].mxu0 %vm587_vm1, %v13848_v28  ;;  %v13873_v11 = vpop.permute.xlu1 %5555  ;;  %7075 = vrot.lane.b32.xlu1 %v13118_v22, %s11908_s0  ;;  %v5206_v47 = vsel %vm5194_vm7, %v5189_v52, %v13760_v41  ;;  %v5205_v38 = vsel %vm5194_vm7, %v13728_v48, %v5189_v52  ;;  %v5203_v22 = vsel %vm5194_vm7, %v13745_v55, %v13715_v32 }
 0x2a6   : > { %5312 = vmatpush1.bf16.msra.mxu0 %v5199_v2  ;;  %5343 = vmatprep.mubr.bf16.mxu0 %v15404_v20  ;;  %v5559_v32 = vsel %vm5194_vm7, %v13794_v57, %v13775_v34  ;;  %v5564_v48 = vsel %vm5194_vm7, %v13805_v7, %v13813_v31  ;;  %v5563_v55 = vsel %vm5194_vm7, %v13824_v56, %v13805_v7 }
 0x2a7   : > { %7077 = vrot.lane.b32.xlu0 %v13348_v36, %s11908_s0  ;;  %5397 = vmatprep.subr.bf16.mxu0 %v5204_v18  ;;  %v5567_v34 = vsel %vm5194_vm7, %v13856_v12, %v13835_v25 }
 0x2a8   : > { %5440 = vmatprep.subr.bf16.mxu1 %v5206_v47 }
 0x2a9   : > { %v13884_v14 = vpop.permute.xlu0 %5557  ;;  %v13886_v49 = vpop.permute.xlu1 %5931  ;;  %7079 = vrot.lane.b32.xlu1 %v13168_v29, %s11908_s0 }
 0x2aa   : > { %v5571_v7 = vsel %vm5194_vm7, %v13873_v11, %v13884_v14 }
 0x2ab   : > { %10889 = vmatmul.mubr.msk.bf16.vlgmr.msra.gmra.mrb[4].mxu1 %vm587_vm1, %v13848_v28  ;;  %7081 = vrot.lane.b32.xlu0 %v13137_v0, %s11908_s0 }
 0x2ac   : > { %5441 = vmatpush1.bf16.msra.mxu1 %v5205_v38  ;;  %5472 = vmatprep.mubr.bf16.mxu1 %v15404_v20 }
 0x2ad   : > { %10888 = vmatmul.mubr.msk.bf16.vlgmr.msra.gmra.mrb[4].mxu0 %vm587_vm1, %v13848_v28  ;;  %v13900_v36 = vpop.permute.xlu0 %5933  ;;  %7083 = vrot.lane.b32.xlu1 %v13679_v54, %s11908_s0  ;;  %v5207_v54 = vsel %vm5194_vm7, %v13760_v41, %v13762_v1 }
 0x2ae   : > { %5398 = vmatpush1.bf16.msra.mxu0 %v5203_v22  ;;  %5429 = vmatprep.mubr.bf16.mxu0 %v15404_v20 }
 0x2af   : > { %v5538_v29 = vpop.permute.xlu1 %5537  ;;  %5483 = vmatprep.subr.bf16.mxu0 %v13762_v1  ;;  %7448 = vperm.xlu0 %11584, %v7444_v16  }
 0x2b0   : > { %v5562_v0 = vsel %vm5194_vm7, %v5538_v29, %v13824_v56  ;;  %v5561_v46 = vsel %vm5194_vm7, %v13783_v6, %v5538_v29 }
 0x2b1   : > { %5632 = vmatprep.subr.bf16.mxu1 %v5562_v0  ;;  %v13910_v61 = vpop.permute.xlu0 %5929  ;;  %7453 = vperm.xlu1 %11585, %v7445_v19  }
 0x2b2   : > { %v5958_v25 = vsel %vm5957_vm8, %v13910_v61, %v13886_v49 }
 0x2b3   : > { %10891 = vmatmul.mubr.msk.bf16.vlgmr.msra.gmra.mrb[8].mxu1 %vm587_vm1, %v13848_v28  ;;  %v13914_v59 = vpop.permute.xlu1 %5939 }
 0x2b4   : > { %5633 = vmatpush1.bf16.msra.mxu1 %v5561_v46  ;;  %5664 = vmatprep.mubr.bf16.mxu1 %v15404_v20 }
 0x2b5   : > { %10890 = vmatmul.mubr.msk.bf16.vlgmr.msra.gmra.mrb[8].mxu0 %vm587_vm1, %v13848_v28  ;;  %v13925_v9 = vpop.permute.xlu0 %5941 }
 0x2b6   : > { %5484 = vmatpush1.bf16.msra.mxu0 %v5207_v54  ;;  %5515 = vmatprep.mubr.bf16.mxu0 %v15404_v20 }
 0x2b7   : > { %v5546_v24 = vpop.permute.xlu1 %5545  ;;  %5589 = vmatprep.subr.bf16.mxu0 %v5560_v35 }
 0x2b8   : > { %v5566_v33 = vsel %vm5194_vm7, %v5546_v24, %v13856_v12  ;;  %v5565_v23 = vsel %vm5194_vm7, %v13813_v31, %v5546_v24  ;;  %v5959_v31 = vsel %vm5957_vm8, %v13886_v49, %v13900_v36  ;;  %v14068_v49 = vld [vmem:[#allocation7 + $0x38] sm:$0xff]  }
 0x2b9   : > { %5718 = vmatprep.subr.bf16.mxu1 %v5566_v33  ;;  %v13934_v43 = vpop.permute.xlu0 %5937 }
 0x2bb   : > { %10895 = vmatmul.mubr.msk.bf16.vlgmr.msra.gmra.mrb[0].mxu1 %vm587_vm1, %v13928_v3  ;;  %v13941_v37 = vpop.permute.xlu1 %5947 }
 0x2bc   : > { %5719 = vmatpush1.bf16.msra.mxu1 %v5565_v23  ;;  %5750 = vmatprep.mubr.bf16.mxu1 %v15404_v20 }
 0x2bd   : > { %10892 = vmatmul.mubr.msk.bf16.vlgmr.msra.gmra.mrb[12].mxu0 %vm587_vm1, %v13848_v28  ;;  %v13949_v17 = vpop.permute.xlu0 %5949 }
 0x2be   : > { %5590 = vmatpush1.bf16.msra.mxu0 %v5559_v32  ;;  %5621 = vmatprep.mubr.bf16.mxu0 %v15404_v20  ;;  %v5967_v38 = vsel %vm5957_vm8, %v13941_v37, %v13949_v17 }
 0x2bf   : > { %v5554_v26 = vpop.permute.xlu1 %5553  ;;  %5675 = vmatprep.subr.bf16.mxu0 %v5564_v48 }
 0x2c0   : > { %v5570_v8 = vsel %vm5194_vm7, %v5554_v26, %v13873_v11  ;;  %v5569_v4 = vsel %vm5194_vm7, %v13843_v60, %v5554_v26  ;;  %v5963_v60 = vsel %vm5957_vm8, %v13914_v59, %v13925_v9  ;;  %v5962_v11 = vsel %vm5957_vm8, %v13934_v43, %v13914_v59 }
 0x2c1   : > { %5804 = vmatprep.subr.bf16.mxu1 %v5570_v8  ;;  %v13956_v42 = vpop.permute.xlu0 %5945 }
 0x2c2   : > { %v5966_v0 = vsel %vm5957_vm8, %v13956_v42, %v13941_v37 }
 0x2c3   : > { %10897 = vmatmul.mubr.msk.bf16.vlgmr.msra.gmra.mrb[4].mxu1 %vm587_vm1, %v13928_v3  ;;  %v5936_v5 = vpop.permute.xlu1 %5935 }
 0x2c4   : > { %5805 = vmatpush1.bf16.msra.mxu1 %v5569_v4  ;;  %5836 = vmatprep.mubr.bf16.mxu1 %v15404_v20  ;;  %v5961_v53 = vsel %vm5957_vm8, %v5936_v5, %v13934_v43  ;;  %v5960_v62 = vsel %vm5957_vm8, %v13900_v36, %v5936_v5 }
 0x2c5   : > { %10894 = vmatmul.mubr.msk.bf16.vlgmr.msra.gmra.mrb[0].mxu0 %vm587_vm1, %v13928_v3  ;;  %v13971_v41 = vpop.permute.xlu0 %5953  ;;  %6031 = vmatprep.subr.bf16.mxu1 %v5961_v53 }
 0x2c6   : > { %5676 = vmatpush1.bf16.msra.mxu0 %v5563_v55  ;;  %5707 = vmatprep.mubr.bf16.mxu0 %v15404_v20  ;;  %v14134_v55 = vld [vmem:[#allocation8 + $0x40] sm:$0xff]  }
 0x2c7   : > { %5761 = vmatprep.subr.bf16.mxu0 %v5568_v51  ;;  %v13974_v1 = vpop.permute.xlu1 %5955 }
 0x2c9   : > { %v13978_v27 = vpop.permute.xlu0 %6296 }
 0x2cb   : > { %10899 = vmatmul.mubr.msk.bf16.vlgmr.msra.gmra.mrb[8].mxu1 %vm587_vm1, %v13928_v3  ;;  %v13985_v15 = vpop.permute.xlu1 %6298 }
 0x2cc   : > { %6032 = vmatpush1.bf16.msra.mxu1 %v5960_v62  ;;  %6063 = vmatprep.mubr.bf16.mxu1 %v15404_v20  ;;  %v6323_v33 = vsel %vm5957_vm8, %v13978_v27, %v13985_v15 }
 0x2cd   : > { %10896 = vmatmul.mubr.msk.bf16.vlgmr.msra.gmra.mrb[4].mxu0 %vm587_vm1, %v13928_v3  ;;  %v5944_v6 = vpop.permute.xlu0 %5943 }
 0x2ce   : > { %5762 = vmatpush1.bf16.msra.mxu0 %v5567_v34  ;;  %5793 = vmatprep.mubr.bf16.mxu0 %v15404_v20  ;;  %v5965_v39 = vsel %vm5957_vm8, %v5944_v6, %v13956_v42  ;;  %v5964_v57 = vsel %vm5957_vm8, %v13925_v9, %v5944_v6 }
 0x2cf   : > { %6117 = vmatprep.subr.bf16.mxu1 %v5965_v39  ;;  %v13995_v21 = vpop.permute.xlu1 %6294  ;;  %5847 = vmatprep.subr.bf16.mxu0 %v13884_v14 }
 0x2d1   : > { %v14000_v58 = vpop.permute.xlu0 %6304 }
 0x2d3   : > { %10903 = vmatmul.mubr.msk.bf16.vlgmr.msra.gmra.mrb[0].mxu1 %vm587_vm1, %v13993_v50  ;;  %v14007_v13 = vpop.permute.xlu1 %6306 }
 0x2d4   : > { %6118 = vmatpush1.bf16.msra.mxu1 %v5964_v57  ;;  %6149 = vmatprep.mubr.bf16.mxu1 %v15404_v20  ;;  %v6327_v8 = vsel %vm5957_vm8, %v14000_v58, %v14007_v13 }
 0x2d5   : > { %10898 = vmatmul.mubr.msk.bf16.vlgmr.msra.gmra.mrb[8].mxu0 %vm587_vm1, %v13928_v3  ;;  %v5952_v30 = vpop.permute.xlu0 %5951 }
 0x2d6   : > { %5848 = vmatpush1.bf16.msra.mxu0 %v5571_v7  ;;  %5879 = vmatprep.mubr.bf16.mxu0 %v15404_v20  ;;  %v5969_v45 = vsel %vm5957_vm8, %v5952_v30, %v13971_v41  ;;  %v5968_v56 = vsel %vm5957_vm8, %v13949_v17, %v5952_v30  ;;  %v6322_v17 = vsel %vm5957_vm8, %v13995_v21, %v13978_v27 }
 0x2d7   : > { %5988 = vmatprep.subr.bf16.mxu0 %v5959_v31  ;;  %6203 = vmatprep.subr.bf16.mxu1 %v5969_v45  ;;  %v14018_v40 = vpop.permute.xlu1 %6302 }
 0x2d9   : > { %v14022_v63 = vpop.permute.xlu0 %6312 }
 0x2db   : > { %10905 = vmatmul.mubr.msk.bf16.vlgmr.msra.gmra.mrb[4].mxu1 %vm587_vm1, %v13993_v50  ;;  %v14029_v10 = vpop.permute.xlu1 %6314 }
 0x2dc   : > { %6204 = vmatpush1.bf16.msra.mxu1 %v5968_v56  ;;  %6235 = vmatprep.mubr.bf16.mxu1 %v15404_v20  ;;  %v6331_v27 = vsel %vm5957_vm8, %v14022_v63, %v14029_v10 }
 0x2dd   : > { %10900 = vmatmul.mubr.msk.bf16.vlgmr.msra.gmra.mrb[12].mxu0 %vm587_vm1, %v13928_v3  ;;  %v6301_v28 = vpop.permute.xlu0 %6300  ;;  %v5970_v3 = vsel %vm5957_vm8, %v13971_v41, %v13974_v1 }
 0x2de   : > { %5989 = vmatpush1.bf16.msra.mxu0 %v5958_v25  ;;  %6020 = vmatprep.mubr.bf16.mxu0 %v15404_v20  ;;  %v6325_v44 = vsel %vm5957_vm8, %v6301_v28, %v14018_v40  ;;  %v6324_v2 = vsel %vm5957_vm8, %v13985_v15, %v6301_v28  ;;  %v14195_v25 = vld [vmem:[#allocation7 + $0x40] sm:$0xff]  }
 0x2df   : > { %6074 = vmatprep.subr.bf16.mxu0 %v5963_v60  ;;  %6395 = vmatprep.subr.bf16.mxu1 %v6325_v44  ;;  %v14046_v12 = vpop.permute.xlu1 %6310 }
 0x2e1   : > { %v6309_v52 = vpop.permute.xlu0 %6308 }
 0x2e2   : > { %v6329_v18 = vsel %vm5957_vm8, %v6309_v52, %v14046_v12  ;;  %v6328_v36 = vsel %vm5957_vm8, %v14007_v13, %v6309_v52 }
 0x2e3   : > { %10907 = vmatmul.mubr.msk.bf16.vlgmr.msra.gmra.mrb[8].mxu1 %vm587_vm1, %v13993_v50  ;;  %v14057_v47 = vpop.permute.xlu1 %6318 }
 0x2e4   : > { %6396 = vmatpush1.bf16.msra.mxu1 %v6324_v2  ;;  %6427 = vmatprep.mubr.bf16.mxu1 %v15404_v20 }
 0x2e5   : > { %10902 = vmatmul.mubr.msk.bf16.vlgmr.msra.gmra.mrb[0].mxu0 %vm587_vm1, %v13993_v50  ;;  %v14065_v14 = vpop.permute.xlu0 %6320  ;;  %6481 = vmatprep.subr.bf16.mxu1 %v6329_v18 }
 0x2e6   : > { %6075 = vmatpush1.bf16.msra.mxu0 %v5962_v11  ;;  %6106 = vmatprep.mubr.bf16.mxu0 %v15404_v20  ;;  %v6334_v30 = vsel %vm5957_vm8, %v14057_v47, %v14065_v14 }
 0x2e7   : > { %6160 = vmatprep.subr.bf16.mxu0 %v5967_v38  ;;  %v14070_v22 = vpop.permute.xlu1 %6694 }
 0x2e9   : > { %v14074_v29 = vpop.permute.xlu0 %6696 }
 0x2eb   : > { %10911 = vmatmul.mubr.msk.bf16.vlgmr.msra.gmra.mrb[0].mxu1 %vm587_vm1, %v14068_v49  ;;  %v6317_v46 = vpop.permute.xlu1 %6316 }
 0x2ec   : > { %6482 = vmatpush1.bf16.msra.mxu1 %v6328_v36  ;;  %6513 = vmatprep.mubr.bf16.mxu1 %v15404_v20  ;;  %v6333_v61 = vsel %vm5957_vm8, %v6317_v46, %v14057_v47  ;;  %v6332_v35 = vsel %vm5957_vm8, %v14029_v10, %v6317_v46 }
 0x2ed   : > { %10904 = vmatmul.mubr.msk.bf16.vlgmr.msra.gmra.mrb[4].mxu0 %vm587_vm1, %v13993_v50  ;;  %v14086_v59 = vpop.permute.xlu0 %6692  ;;  %6567 = vmatprep.subr.bf16.mxu1 %v6333_v61 }
 0x2ee   : > { %6161 = vmatpush1.bf16.msra.mxu0 %v5966_v0  ;;  %6192 = vmatprep.mubr.bf16.mxu0 %v15404_v20  ;;  %v6721_v16 = vsel %vm6720_vm9, %v14086_v59, %v14070_v22  ;;  %v11909_v59 = vmov 1966171168  }
 0x2ef   : > { %v14089_v54 = vpop.permute.xlu1 %6702  ;;  %6246 = vmatprep.subr.bf16.mxu0 %v13974_v1  ;;  %v6326_v1 = vsel %vm5957_vm8, %v14018_v40, %v14000_v58  ;;  %v6722_v40 = vsel %vm6720_vm9, %v14070_v22, %v14074_v29 }
 0x2f1   : > { %v14094_v9 = vpop.permute.xlu0 %6704 }
 0x2f2   : > { %v6726_v44 = vsel %vm6720_vm9, %v14089_v54, %v14094_v9 }
 0x2f3   : > { %10913 = vmatmul.mubr.msk.bf16.vlgmr.msra.gmra.mrb[4].mxu1 %vm587_vm1, %v14068_v49  ;;  %v6699_v24 = vpop.permute.xlu1 %6698 }
 0x2f4   : > { %6568 = vmatpush1.bf16.msra.mxu1 %v6332_v35  ;;  %6599 = vmatprep.mubr.bf16.mxu1 %v15404_v20  ;;  %v6723_v37 = vsel %vm6720_vm9, %v14074_v29, %v6699_v24  ;;  %v7534_v35 = vlaneseq }
 0x2f5   : > { %10906 = vmatmul.mubr.msk.bf16.vlgmr.msra.gmra.mrb[8].mxu0 %vm587_vm1, %v13993_v50  ;;  %v14107_v23 = vpop.permute.xlu0 %6700 }
 0x2f6   : > { %6247 = vmatpush1.bf16.msra.mxu0 %v5970_v3  ;;  %6278 = vmatprep.mubr.bf16.mxu0 %v15404_v20  ;;  %v6724_v43 = vsel %vm6720_vm9, %v6699_v24, %v14107_v23  ;;  %v6725_v18 = vsel %vm6720_vm9, %v14107_v23, %v14089_v54  ;;  %v7532_v54 = vunpack.c.l.s4 %v11909_v59  ;;  %v7535_v3 = vshrl.u32 %v7534_v35, 7 }
 0x2f7   : > { %6352 = vmatprep.subr.bf16.mxu0 %v6323_v33  ;;  %6794 = vmatprep.subr.bf16.mxu1 %v6724_v43  ;;  %v14112_v32 = vpop.permute.xlu1 %6710  ;;  %v7526_v33 = vld [vmem:[%s15352_s7] sm:$0xff] }
 0x2f9   : > { %v14116_v48 = vpop.permute.xlu0 %6712 }
 0x2fa   : > { %v6730_v11 = vsel %vm6720_vm9, %v14112_v32, %v14116_v48 }
 0x2fb   : > { %10915 = vmatmul.mubr.msk.bf16.vlgmr.msra.gmra.mrb[8].mxu1 %vm587_vm1, %v14068_v49  ;;  %v6707_v26 = vpop.permute.xlu1 %6706 }
 0x2fc   : > { %6795 = vmatpush1.bf16.msra.mxu1 %v6723_v37  ;;  %6826 = vmatprep.mubr.bf16.mxu1 %v15404_v20  ;;  %v6727_v51 = vsel %vm6720_vm9, %v14094_v9, %v6707_v26  ;;  %v7533_v9 = vunpack.c.0.s8 %v7532_v54  ;;  %v7530_v54 = vcombine.high %v7526_v33, %v7526_v33 }
 0x2fd   : > { %10908 = vmatmul.mubr.msk.bf16.vlgmr.msra.gmra.mrb[12].mxu0 %vm587_vm1, %v13993_v50  ;;  %v14129_v4 = vpop.permute.xlu0 %6708  ;;  %v6330_v50 = vsel %vm5957_vm8, %v14046_v12, %v14022_v63 }
 0x2fe   : > { %6353 = vmatpush1.bf16.msra.mxu0 %v6322_v17  ;;  %6384 = vmatprep.mubr.bf16.mxu0 %v15404_v20  ;;  %v6728_v42 = vsel %vm6720_vm9, %v6707_v26, %v14129_v4  ;;  %v6729_v47 = vsel %vm6720_vm9, %v14129_v4, %v14112_v32  ;;  %v14269_v24 = vsub.s32 %v7533_v9, %v7535_v3 }
 0x2ff   : > { %6438 = vmatprep.subr.bf16.mxu0 %v6327_v8  ;;  %6880 = vmatprep.subr.bf16.mxu1 %v6728_v42  ;;  %v6715_v5 = vpop.permute.xlu1 %6714 }
 0x300   : > { %v6731_v6 = vsel %vm6720_vm9, %v14116_v48, %v6715_v5  ;;  %v7537_v23 = vrot.slane %v7526_v33, %v14269_v24  ;;  %v7544_v35 = vrot.slane %v7530_v54, %v14269_v24 }
 0x301   : > { %v14138_v53 = vpop.permute.xlu0 %6716 }
 0x302   : > { %v6732_v41 = vsel %vm6720_vm9, %v6715_v5, %v14138_v53  ;;  %v7545_v43 = vcombine.high %v7537_v23, %v7537_v23  ;;  %v14276_v32 = vrot.slane %v7537_v23, %v14269_v24  ;;  %v14290_v5 = vsub.s32 0, %v7535_v3  ;;  %v7527_v3 = vld [vmem:[%s15352_s7 + $0x8] sm:$0x3f] }
 0x303   : > { %10919 = vmatmul.mubr.msk.bf16.vlgmr.msra.gmra.mrb[0].mxu1 %vm587_vm1, %v14134_v55  ;;  %v14147_v62 = vpop.permute.xlu1 %6718  ;;  %v7546_v9 = vcombine.high %v7544_v35, %v7544_v35 }
 0x304   : > { %6881 = vmatpush1.bf16.msra.mxu1 %v6727_v51  ;;  %6912 = vmatprep.mubr.bf16.mxu1 %v15404_v20  ;;  %v6733_v38 = vsel %vm6720_vm9, %v14138_v53, %v14147_v62  ;;  %v14279_v37 = vrot.slane %v7545_v43, %v14269_v24  ;;  %v7575_v48 = vcombine.high %v14276_v32, %v14276_v32 }
 0x305   : > { %10910 = vmatmul.mubr.msk.bf16.vlgmr.msra.gmra.mrb[0].mxu0 %vm587_vm1, %v14068_v49  ;;  %v14155_v34 = vpop.permute.xlu0 %7059  ;;  %6966 = vmatprep.subr.bf16.mxu1 %v6732_v41 }
 0x306   : > { %6439 = vmatpush1.bf16.msra.mxu0 %v6326_v1  ;;  %6470 = vmatprep.mubr.bf16.mxu0 %v15404_v20  ;;  %v7641_v51 = vpack.i.b16 %v7575_v48, %v7575_v48 }
 0x307   : > { %6524 = vmatprep.subr.bf16.mxu0 %v6331_v27  ;;  %v14158_v15 = vpop.permute.xlu1 %7061 }
 0x309   : > { %v14162_v39 = vpop.permute.xlu0 %7057 }
 0x30b   : > { %10921 = vmatmul.mubr.msk.bf16.vlgmr.msra.gmra.mrb[4].mxu1 %vm587_vm1, %v14134_v55  ;;  %v7064_v21 = vpop.permute.xlu1 %7063 }
 0x30c   : > { %6967 = vmatpush1.bf16.msra.mxu1 %v6731_v6  ;;  %6998 = vmatprep.mubr.bf16.mxu1 %v15404_v20  ;;  %v7087_v13 = vsel %vm6720_vm9, %v14158_v15, %v7064_v21  ;;  %v7646_v6 = vrot.slane %v7641_v51, %v14290_v5 }
 0x30d   : > { %10912 = vmatmul.mubr.msk.bf16.vlgmr.msra.gmra.mrb[4].mxu0 %vm587_vm1, %v14068_v49  ;;  %v14172_v57 = vpop.permute.xlu0 %7065 }
 0x30e   : > { %6525 = vmatpush1.bf16.msra.mxu0 %v6330_v50  ;;  %6556 = vmatprep.mubr.bf16.mxu0 %v15404_v20  ;;  %v7088_v58 = vsel %vm6720_vm9, %v7064_v21, %v14172_v57 }
 0x30f   : > { %7158 = vmatprep.subr.bf16.mxu1 %v7088_v58  ;;  %v14177_v7 = vpop.permute.xlu1 %7067  ;;  %6610 = vmatprep.subr.bf16.mxu0 %v14065_v14  ;;  %v7086_v14 = vsel %vm6720_vm9, %v14155_v34, %v14158_v15 }
 0x310   : > { %v7089_v36 = vsel %vm6720_vm9, %v14172_v57, %v14177_v7 }
 0x311   : > { %v7070_v31 = vpop.permute.xlu0 %7069 }
 0x312   : > { %v7090_v22 = vsel %vm6720_vm9, %v14177_v7, %v7070_v31 }
 0x313   : > { %10923 = vmatmul.mubr.msk.bf16.vlgmr.msra.gmra.mrb[8].mxu1 %vm587_vm1, %v14134_v55  ;;  %v7072_v45 = vpop.permute.xlu1 %7071 }
 0x314   : > { %7159 = vmatpush1.bf16.msra.mxu1 %v7087_v13  ;;  %7190 = vmatprep.mubr.bf16.mxu1 %v15404_v20  ;;  %v7091_v60 = vsel %vm6720_vm9, %v7070_v31, %v7072_v45 }
 0x315   : > { %10914 = vmatmul.mubr.msk.bf16.vlgmr.msra.gmra.mrb[8].mxu0 %vm587_vm1, %v14068_v49  ;;  %v7074_v56 = vpop.permute.xlu0 %7073 }
 0x316   : > { %6611 = vmatpush1.bf16.msra.mxu0 %v6334_v30  ;;  %6642 = vmatprep.mubr.bf16.mxu0 %v15404_v20  ;;  %v7092_v63 = vsel %vm6720_vm9, %v7072_v45, %v7074_v56 }
 0x317   : > { %6751 = vmatprep.subr.bf16.mxu0 %v6722_v40  ;;  %7244 = vmatprep.subr.bf16.mxu1 %v7092_v63  ;;  %v7076_v10 = vpop.permute.xlu1 %7075 }
 0x318   : > { %v7093_v0 = vsel %vm6720_vm9, %v7074_v56, %v7076_v10 }
 0x319   : > { %v7078_v28 = vpop.permute.xlu0 %7077 }
 0x31a   : > { %v7094_v29 = vsel %vm6720_vm9, %v7076_v10, %v7078_v28 }
 0x31b   : > { %10927 = vmatmul.mubr.msk.bf16.vlgmr.msra.gmra.mrb[0].mxu1 %vm587_vm1, %v14195_v25  ;;  %v7080_v19 = vpop.permute.xlu1 %7079 }
 0x31c   : > { %7245 = vmatpush1.bf16.msra.mxu1 %v7091_v60  ;;  %7276 = vmatprep.mubr.bf16.mxu1 %v15404_v20  ;;  %v7095_v52 = vsel %vm6720_vm9, %v7078_v28, %v7080_v19 }
 0x31d   : > { %10916 = vmatmul.mubr.msk.bf16.vlgmr.msra.gmra.mrb[12].mxu0 %vm587_vm1, %v14068_v49  ;;  %v7082_v12 = vpop.permute.xlu0 %7081  ;;  %v7085_v49 = vsel %vm6720_vm9, %v14162_v39, %v14155_v34 }
 0x31e   : > { %6752 = vmatpush1.bf16.msra.mxu0 %v6721_v16  ;;  %6783 = vmatprep.mubr.bf16.mxu0 %v15404_v20  ;;  %v7096_v2 = vsel %vm6720_vm9, %v7080_v19, %v7082_v12 }
 0x31f   : > { %6837 = vmatprep.subr.bf16.mxu0 %v6726_v44  ;;  %7330 = vmatprep.subr.bf16.mxu1 %v7096_v2  ;;  %v7084_v46 = vpop.permute.xlu1 %7083 }
 0x320   : > { %v7097_v61 = vsel %vm6720_vm9, %v7082_v12, %v7084_v46 }
 0x323   : > { %10929 = vmatmul.mubr.msk.bf16.vlgmr.msra.gmra.mrb[4].mxu1 %vm587_vm1, %v14195_v25 }
 0x324   : > { %7331 = vmatpush1.bf16.msra.mxu1 %v7095_v52  ;;  %7362 = vmatprep.mubr.bf16.mxu1 %v15404_v20 }
 0x325   : > { %10918 = vmatmul.mubr.msk.bf16.vlgmr.msra.gmra.mrb[0].mxu0 %vm587_vm1, %v14134_v55 }
 0x326   : > { %6838 = vmatpush1.bf16.msra.mxu0 %v6725_v18  ;;  %6869 = vmatprep.mubr.bf16.mxu0 %v15404_v20 }
 0x327   : > { %6923 = vmatprep.subr.bf16.mxu0 %v6730_v11 }
 0x32b   : > { %10931 = vmatmul.mubr.msk.bf16.vlgmr.msra.gmra.mrb[8].mxu1 %vm587_vm1, %v14195_v25 }
 0x32c   : > { %7839 = vmatprep.mubr.bf16.mxu1 %v15404_v20 }
 0x32d   : > { %10920 = vmatmul.mubr.msk.bf16.vlgmr.msra.gmra.mrb[4].mxu0 %vm587_vm1, %v14134_v55 }
 0x32e   : > { %6924 = vmatpush1.bf16.msra.mxu0 %v6729_v47  ;;  %6955 = vmatprep.mubr.bf16.mxu0 %v15404_v20  ;;  %v14283_v17 = vpop.permute.xlu0 %7448 }
 0x32f   : > { %7009 = vmatprep.subr.bf16.mxu0 %v14147_v62 }
 0x330   : > { %v14285_v8 = vpop.permute.xlu1 %7453 }
 0x335   : > { %10922 = vmatmul.mubr.msk.bf16.vlgmr.msra.gmra.mrb[8].mxu0 %vm587_vm1, %v14134_v55 }
 0x336   : > { %7010 = vmatpush1.bf16.msra.mxu0 %v6733_v38  ;;  %7041 = vmatprep.mubr.bf16.mxu0 %v15404_v20 }
 0x337   : > { %7115 = vmatprep.subr.bf16.mxu0 %v7086_v14 }
 0x33d   : > { %10924 = vmatmul.mubr.msk.bf16.vlgmr.msra.gmra.mrb[12].mxu0 %vm587_vm1, %v14134_v55  ;;  %v7577_v55 = vcombine.high %v14279_v37, %v14279_v37 }
 0x33e   : > { %7116 = vmatpush1.bf16.msra.mxu0 %v7085_v49  ;;  %7147 = vmatprep.mubr.bf16.mxu0 %v15404_v20 }
 0x33f   : > { %7201 = vmatprep.subr.bf16.mxu0 %v7090_v22  ;;  %v7648_v39 = vpack.i.b16 %v7577_v55, %v7577_v55  ;;  %v7586_v55 = vrot.slane %v7527_v3, %v14269_v24 }
 0x341   : > { %v7653_v13 = vrot.slane %v7648_v39, %v14290_v5  ;;  %v7594_v39 = vcombine.high %v7586_v55, %v7586_v55 }
 0x345   : > { %10926 = vmatmul.mubr.msk.bf16.vlgmr.msra.gmra.mrb[0].mxu0 %vm587_vm1, %v14195_v25 }
 0x346   : > { %7202 = vmatpush1.bf16.msra.mxu0 %v7089_v36  ;;  %7233 = vmatprep.mubr.bf16.mxu0 %v15404_v20 }
 0x347   : > { %7287 = vmatprep.subr.bf16.mxu0 %v7094_v29 }
 0x34d   : > { %10928 = vmatmul.mubr.msk.bf16.vlgmr.msra.gmra.mrb[4].mxu0 %vm587_vm1, %v14195_v25 }
 0x34e   : > { %7288 = vmatpush1.bf16.msra.mxu0 %v7093_v0  ;;  %7319 = vmatprep.mubr.bf16.mxu0 %v15404_v20 }
 0x34f   : > { %7373 = vmatprep.subr.bf16.mxu0 %v7084_v46 }
 0x355   : > { %10930 = vmatmul.mubr.msk.bf16.vlgmr.msra.gmra.mrb[8].mxu0 %vm587_vm1, %v14195_v25 }
 0x356   : > { %7374 = vmatpush1.bf16.msra.mxu0 %v7097_v61  ;;  %7405 = vmatprep.mubr.bf16.mxu0 %v15404_v20 }
 0x35d   : > { %10932 = vmatmul.mubr.msk.bf16.vlgmr.msra.gmra.mrb[12].mxu0 %vm587_vm1, %v14195_v25 }
 0x35e   : > { %8752 = vmatprep.mubr.bf16.mxu0 %v15404_v20 }
 0x3ee   : > { %v7192_v26 = vpop.f32.mrb[0].mxu1 }
 0x3ef   : > { %v7458_v4 = vadd.f32 %v14283_v17, %v7192_v26  ;;  %v7194_v42 = vpop.f32.mrb[1].mxu1 }
 0x3f0   : > { %v7459_v53 = vadd.f32 %v14283_v17, %v7194_v42  ;;  %v7196_v41 = vpop.f32.mrb[2].mxu1  ;;  %v7634_v42 = vpack.i.b16 %v14279_v37, %v14279_v37 }
 0x3f1   : > { %v7198_v1 = vpop.f32.mrb[3].mxu1  ;;  %v7472_v62 = vadd.f32 %v14285_v8, %v7196_v41  ;;  %v7486_v34 = vmax.f32 %v7458_v4, 0.0  ;;  %v7574_v41 = vrot.slane %v7546_v9, %v14269_v24 }
 0x3f2   : > { %v7473_v27 = vadd.f32 %v14285_v8, %v7198_v1  ;;  %v7487_v50 = vmax.f32 %v7459_v53, 0.0  ;;  %v7560_v53 = vrot.slane %v7544_v35, %v14269_v24  ;;  %v7639_v37 = vrot.slane %v7634_v42, %v14290_v5 }
 0x3f3   : > { %v7500_v15 = vmax.f32 %v7472_v62, 0.0 }
 0x3f4   : > { %v7501_v21 = vmax.f32 %v7473_v27, 0.0 }
 0x3f5   : > { %v7514_v57 = vpack.c.bf16 %v7500_v15, %v7486_v34  ;;  %v7627_v15 = vpack.i.b16 %v14276_v32, %v14276_v32 }
 0x3f6   : > { %v7515_v58 = vpack.c.bf16 %v7501_v21, %v7487_v50  ;;  %v7278_v7 = vpop.f32.mrb[4].mxu1  ;;  %v7576_v21 = vcombine.high %v7560_v53, %v7560_v53 }
 0x3f7   : > { %v14297_v31 = vmul.bf16 %v7646_v6, %v7514_v57  ;;  %v7462_v30 = vadd.f32 %v14283_v17, %v7278_v7  ;;  %v7280_v45 = vpop.f32.mrb[5].mxu1  ;;  %v7578_v57 = vcombine.high %v7574_v41, %v7574_v41 }
 0x3f8   : > { %v7463_v40 = vadd.f32 %v14283_v17, %v7280_v45  ;;  %v7282_v56 = vpop.f32.mrb[6].mxu1  ;;  %v14305_v60 = vmul.bf16 %v7653_v13, %v7515_v58  ;;  %v7655_v45 = vpack.i.b16 %v7560_v53, %v7560_v53 }
 0x3f9   : > { %v7476_v63 = vadd.f32 %v14285_v8, %v7282_v56  ;;  %v7284_v25 = vpop.f32.mrb[7].mxu1  ;;  %7758 = vrot.lane.b32.xlu0 %v14297_v31, %s11901_s13  ;;  %v7490_v28 = vmax.f32 %v7462_v30, 0.0  ;;  %v7632_v56 = vrot.slane %v7627_v15, %v14290_v5 }
 0x3fa   : > { %v7477_v10 = vadd.f32 %v14285_v8, %v7284_v25  ;;  %v7491_v19 = vmax.f32 %v7463_v40, 0.0  ;;  %v7579_v40 = vcombine.high %v7527_v3, %v7527_v3 }
 0x3fb   : > { %v7504_v16 = vmax.f32 %v7476_v63, 0.0 }
 0x3fc   : > { %v7505_v44 = vmax.f32 %v7477_v10, 0.0  ;;  %v7662_v10 = vpack.i.b16 %v7574_v41, %v7574_v41 }
 0x3fd   : > { %v14307_v12 = vpack.c.bf16 %v7504_v16, %v7490_v28  ;;  %7760 = vrot.lane.b32.xlu0 %v14305_v60, %s11901_s13  ;;  %v7602_v28 = vrot.slane %v7586_v55, %v14269_v24  ;;  %v7616_v16 = vrot.slane %v7594_v39, %v14269_v24 }
 0x3fe   : > { %v14311_v2 = vpack.c.bf16 %v7505_v44, %v7491_v19  ;;  %v7364_v52 = vpop.f32.mrb[8].mxu1 }
 0x3ff   : > { %v7466_v18 = vadd.f32 %v14283_v17, %v7364_v52  ;;  %v7366_v11 = vpop.f32.mrb[9].mxu1  ;;  %v7669_v52 = vpack.i.b16 %v7576_v21, %v7576_v21  ;;  %v7625_v54 = vcombine.high %v7616_v16, %v7616_v16 }
 0x400   : > { %v7467_v47 = vadd.f32 %v14283_v17, %v7366_v11  ;;  %v7368_v38 = vpop.f32.mrb[10].mxu1 }
 0x401   : > { %v7480_v14 = vadd.f32 %v14285_v8, %v7368_v38  ;;  %v7370_v49 = vpop.f32.mrb[11].mxu1  ;;  %v7494_v36 = vmax.f32 %v7466_v18, 0.0  ;;  %v7676_v18 = vpack.i.b16 %v7578_v57, %v7578_v57  ;;  %v7674_v55 = vrot.slane %v7669_v52, %v14290_v5 }
 0x402   : > { %v7481_v22 = vadd.f32 %v14285_v8, %v7370_v49  ;;  %v7495_v0 = vmax.f32 %v7467_v47, 0.0  ;;  %v7593_v49 = vrot.slane %v7579_v40, %v14269_v24 }
 0x403   : > { %v7508_v29 = vmax.f32 %v7480_v14, 0.0  ;;  %v7660_v14 = vrot.slane %v7655_v45, %v14290_v5 }
 0x404   : > { %v7509_v46 = vmax.f32 %v7481_v22, 0.0  ;;  %v7595_v42 = vcombine.high %v7593_v49, %v7593_v49  ;;  %v7609_v21 = vrot.slane %v7593_v49, %v14269_v24 }
 0x405   : > { %v14317_v61 = vpack.c.bf16 %v7508_v29, %v7494_v36 }
 0x406   : > { %v14319_v59 = vpack.c.bf16 %v7509_v46, %v7495_v0  ;;  %v7667_v0 = vrot.slane %v7662_v10, %v14290_v5  ;;  %v7624_v46 = vcombine.high %v7602_v28, %v7602_v28  ;;  %v7623_v57 = vrot.slane %v7595_v42, %v14269_v24 }
 0x408   : > { %v7718_v10 = vpack.i.b16 %v7623_v57, %v7623_v57 }
 0x40a   : > { %v7723_v49 = vrot.slane %v7718_v10, %v14290_v5 }
 0x418   : > { %v7149_v23 = vpop.f32.mrb[0].mxu0 }
 0x419   : > { %v7456_v43 = vadd.f32 %v14283_v17, %v7149_v23  ;;  %v7151_v48 = vpop.f32.mrb[1].mxu0  ;;  %v7683_v23 = vpack.i.b16 %v7602_v28, %v7602_v28 }
 0x41a   : > { %v7457_v26 = vadd.f32 %v14283_v17, %v7151_v48  ;;  %v7153_v4 = vpop.f32.mrb[2].mxu0 }
 0x41b   : > { %v7470_v33 = vadd.f32 %v14285_v8, %v7153_v4  ;;  %v7155_v51 = vpop.f32.mrb[3].mxu0  ;;  %v7484_v62 = vmax.f32 %v7456_v43, 0.0  ;;  %v7690_v43 = vpack.i.b16 %v7616_v16, %v7616_v16  ;;  %v7688_v15 = vrot.slane %v7683_v23, %v14290_v5 }
 0x41c   : > { %v7471_v1 = vadd.f32 %v14285_v8, %v7155_v51  ;;  %v7485_v34 = vmax.f32 %v7457_v26, 0.0 }
 0x41d   : > { %v7498_v27 = vmax.f32 %v7470_v33, 0.0  ;;  %v7681_v33 = vrot.slane %v7676_v18, %v14290_v5 }
 0x41e   : > { %v7499_v6 = vmax.f32 %v7471_v1, 0.0  ;;  %v7697_v1 = vpack.i.b16 %v7624_v46, %v7624_v46 }
 0x41f   : > { %v7512_v50 = vpack.c.bf16 %v7498_v27, %v7484_v62  ;;  %v7704_v62 = vpack.i.b16 %v7625_v54, %v7625_v54 }
 0x420   : > { %v7513_v58 = vpack.c.bf16 %v7499_v6, %v7485_v34  ;;  %v7235_v7 = vpop.f32.mrb[4].mxu0 }
 0x421   : > { %v7460_v13 = vadd.f32 %v14283_v17, %v7235_v7  ;;  %v7237_v30 = vpop.f32.mrb[5].mxu0  ;;  %v14350_v22 = vmul.bf16 %v7632_v56, %v7512_v50  ;;  %v14377_v7 = vmul.bf16 %v7681_v33, %v14311_v2  ;;  %v7702_v2 = vrot.slane %v7697_v1, %v14290_v5 }
 0x422   : > { %v14339_v63 = vmul.bf16 %v7639_v37, %v7513_v58  ;;  %v7461_v32 = vadd.f32 %v14283_v17, %v7237_v30  ;;  %v7239_v25 = vpop.f32.mrb[6].mxu0  ;;  %v7695_v37 = vrot.slane %v7690_v43, %v14290_v5  ;;  %v14374_v58 = vmul.bf16 %v7674_v55, %v14307_v12  ;;  %v14516_v43 = vld [vmem:[%s15349_s4 + $0x4] sm:$0xf] }
 0x423   : > { %v7474_v19 = vadd.f32 %v14285_v8, %v7239_v25  ;;  %v7241_v44 = vpop.f32.mrb[7].mxu0  ;;  %v7488_v47 = vmax.f32 %v7460_v13, 0.0  ;;  %v7711_v25 = vpack.i.b16 %v7609_v21, %v7609_v21  ;;  %v7709_v28 = vrot.slane %v7704_v62, %v14290_v5 }
 0x424   : > { %v7475_v11 = vadd.f32 %v14285_v8, %v7241_v44  ;;  %7756 = vrot.lane.b32.xlu1 %v14339_v63, %s11901_s13  ;;  %v7489_v36 = vmax.f32 %v7461_v32, 0.0 }
 0x425   : > { %v7502_v38 = vmax.f32 %v7474_v19, 0.0 }
 0x426   : > { %v7503_v29 = vmax.f32 %v7475_v11, 0.0 }
 0x427   : > { %v7516_v35 = vpack.c.bf16 %v7502_v38, %v7488_v47 }
 0x428   : > { %v7517_v9 = vpack.c.bf16 %v7503_v29, %v7489_v36  ;;  %v7321_v3 = vpop.f32.mrb[8].mxu0  ;;  %7754 = vrot.lane.b32.xlu1 %v14350_v22, %s11901_s13  ;;  %v14403_v36 = vmul.bf16 %v7709_v28, %v14319_v59 }
 0x429   : > { %v14355_v48 = vmul.bf16 %v7660_v14, %v7516_v35  ;;  %v7464_v26 = vadd.f32 %v14283_v17, %v7321_v3  ;;  %v7323_v4 = vpop.f32.mrb[9].mxu0  ;;  %v7716_v14 = vrot.slane %v7711_v25, %v14290_v5 }
 0x42a   : > { %v14360_v51 = vmul.bf16 %v7667_v0, %v7517_v9  ;;  %v7465_v53 = vadd.f32 %v14283_v17, %v7323_v4  ;;  %v7325_v41 = vpop.f32.mrb[10].mxu0 }
 0x42b   : > { %v7478_v27 = vadd.f32 %v14285_v8, %v7325_v41  ;;  %v7327_v34 = vpop.f32.mrb[11].mxu0  ;;  %v7492_v39 = vmax.f32 %v7464_v26, 0.0 }
 0x42c   : > { %v7479_v6 = vadd.f32 %v14285_v8, %v7327_v34  ;;  %7764 = vrot.lane.b32.xlu0 %v14360_v51, %s11901_s13  ;;  %7762 = vrot.lane.b32.xlu1 %v14355_v48, %s11901_s13  ;;  %v7493_v13 = vmax.f32 %v7465_v53, 0.0 }
 0x42d   : > { %v7506_v50 = vmax.f32 %v7478_v27, 0.0 }
 0x42e   : > { %v7507_v30 = vmax.f32 %v7479_v6, 0.0 }
 0x42f   : > { %v7520_v45 = vpack.c.bf16 %v7506_v50, %v7492_v39 }
 0x430   : > { %v7521_v40 = vpack.c.bf16 %v7507_v30, %v7493_v13  ;;  %v7407_v56 = vpop.f32.mrb[12].mxu0  ;;  %7768 = vrot.lane.b32.xlu0 %v14377_v7, %s11901_s13  ;;  %7766 = vrot.lane.b32.xlu1 %v14374_v58, %s11901_s13 }
 0x431   : > { %v14383_v32 = vmul.bf16 %v7688_v15, %v7520_v45  ;;  %v7468_v24 = vadd.f32 %v14283_v17, %v7407_v56  ;;  %v7409_v12 = vpop.f32.mrb[13].mxu0 }
 0x432   : > { %v14388_v16 = vmul.bf16 %v7695_v37, %v7521_v40  ;;  %v7469_v19 = vadd.f32 %v14283_v17, %v7409_v12  ;;  %v7411_v44 = vpop.f32.mrb[14].mxu0  ;;  %v14400_v17 = vmul.bf16 %v7702_v2, %v14317_v61 }
 0x433   : > { %v7482_v52 = vadd.f32 %v14285_v8, %v7411_v44  ;;  %v7413_v18 = vpop.f32.mrb[15].mxu0  ;;  %v7496_v47 = vmax.f32 %v7468_v24, 0.0 }
 0x434   : > { %v7483_v11 = vadd.f32 %v14285_v8, %v7413_v18  ;;  %7772 = vrot.lane.b32.xlu0 %v14388_v16, %s11901_s13  ;;  %7770 = vrot.lane.b32.xlu1 %v14383_v32, %s11901_s13  ;;  %v7497_v29 = vmax.f32 %v7469_v19, 0.0 }
 0x435   : > { %v7510_v38 = vmax.f32 %v7482_v52, 0.0 }
 0x436   : > { %v7511_v8 = vmax.f32 %v7483_v11, 0.0 }
 0x437   : > { %v7524_v0 = vpack.c.bf16 %v7510_v38, %v7496_v47 }
 0x438   : > { %v7525_v46 = vpack.c.bf16 %v7511_v8, %v7497_v29  ;;  %7776 = vrot.lane.b32.xlu0 %v14403_v36, %s11901_s13  ;;  %7774 = vrot.lane.b32.xlu1 %v14400_v17, %s11901_s13 }
 0x439   : > { %v14409_v54 = vmul.bf16 %v7716_v14, %v7524_v0  ;;  %v14616_v14 = vld [vmem:[%s15349_s4] sm:$0xf] }
 0x43a   : > { %v14411_v35 = vmul.bf16 %v7723_v49, %v7525_v46 }
 0x43c   : > { %8055 = vrot.lane.b32.xlu0 %v14339_v63, %s11900_s11  ;;  %7778 = vrot.lane.b32.xlu1 %v14409_v54, %s11901_s13  ;;  %s11479_s13 = smul.u32 96, %s12186_s21 }
 0x440   : > { %8053 = vrot.lane.b32.xlu0 %v14350_v22, %s11900_s11  ;;  %8057 = vrot.lane.b32.xlu1 %v14297_v31, %s11900_s11 }
 0x444   : > { %8061 = vrot.lane.b32.xlu0 %v14355_v48, %s11900_s11  ;;  %8059 = vrot.lane.b32.xlu1 %v14305_v60, %s11900_s11 }
 0x448   : > { %8065 = vrot.lane.b32.xlu0 %v14374_v58, %s11900_s11  ;;  %8063 = vrot.lane.b32.xlu1 %v14360_v51, %s11900_s11 }
 0x44c   : > { %8069 = vrot.lane.b32.xlu0 %v14383_v32, %s11900_s11  ;;  %8067 = vrot.lane.b32.xlu1 %v14377_v7, %s11900_s11 }
 0x450   : > { %8073 = vrot.lane.b32.xlu0 %v14400_v17, %s11900_s11  ;;  %8071 = vrot.lane.b32.xlu1 %v14388_v16, %s11900_s11 }
 0x454   : > { %8077 = vrot.lane.b32.xlu0 %v14409_v54, %s11900_s11  ;;  %8075 = vrot.lane.b32.xlu1 %v14403_v36, %s11900_s11 }
 0x458   : > { %8358 = vrot.lane.b32.xlu0 %v14297_v31, %s11902_s19  ;;  %8356 = vrot.lane.b32.xlu1 %v14339_v63, %s11902_s19 }
 0x45c   : > { %8360 = vrot.lane.b32.xlu0 %v14305_v60, %s11902_s19  ;;  %8354 = vrot.lane.b32.xlu1 %v14350_v22, %s11902_s19 }
 0x460   : > { %8364 = vrot.lane.b32.xlu0 %v14360_v51, %s11902_s19  ;;  %8362 = vrot.lane.b32.xlu1 %v14355_v48, %s11902_s19 }
 0x464   : > { %8368 = vrot.lane.b32.xlu0 %v14377_v7, %s11902_s19  ;;  %8366 = vrot.lane.b32.xlu1 %v14374_v58, %s11902_s19 }
 0x468   : > { %8372 = vrot.lane.b32.xlu0 %v14388_v16, %s11902_s19  ;;  %8370 = vrot.lane.b32.xlu1 %v14383_v32, %s11902_s19 }
 0x46b   : > { %v7759_v5 = vpop.permute.xlu0 %7758 }
 0x46c   : > { %8376 = vrot.lane.b32.xlu0 %v14403_v36, %s11902_s19  ;;  %8374 = vrot.lane.b32.xlu1 %v14400_v17, %s11902_s19 }
 0x46f   : > { %v7761_v9 = vpop.permute.xlu0 %7760 }
 0x470   : > { %8669 = vrot.lane.b32.xlu0 %v14339_v63, %s11903_s2  ;;  %8671 = vrot.lane.b32.xlu1 %v14297_v31, %s11903_s2  ;;  %v7782_v55 = vsel %vm1351_vm2, %v7759_v5, %v7761_v9 }
 0x474   : > { %8673 = vrot.lane.b32.xlu0 %v14305_v60, %s11903_s2  ;;  %8675 = vrot.lane.b32.xlu1 %v14355_v48, %s11903_s2 }
 0x478   : > { %8667 = vrot.lane.b32.xlu0 %v14350_v22, %s11903_s2  ;;  %8677 = vrot.lane.b32.xlu1 %v14360_v51, %s11903_s2 }
 0x47c   : > { %8679 = vrot.lane.b32.xlu0 %v14374_v58, %s11903_s2  ;;  %8378 = vrot.lane.b32.xlu1 %v14409_v54, %s11902_s19  ;;  %s15267_s19 = scalar_lea.vmem [#allocation10], %s11479_s13 }
 0x480   : > { %8683 = vrot.lane.b32.xlu0 %v14383_v32, %s11903_s2  ;;  %8681 = vrot.lane.b32.xlu1 %v14377_v7, %s11903_s2 }
 0x484   : > { %8687 = vrot.lane.b32.xlu0 %v14400_v17, %s11903_s2  ;;  %8685 = vrot.lane.b32.xlu1 %v14388_v16, %s11903_s2 }
 0x488   : > { %8984 = vrot.lane.b32.xlu0 %v14297_v31, %s11904_s17  ;;  %8689 = vrot.lane.b32.xlu1 %v14403_v36, %s11903_s2 }
 0x48c   : > { %8988 = vrot.lane.b32.xlu0 %v14355_v48, %s11904_s17  ;;  %8982 = vrot.lane.b32.xlu1 %v14339_v63, %s11904_s17 }
 0x490   : > { %8691 = vrot.lane.b32.xlu0 %v14409_v54, %s11903_s2  ;;  %8986 = vrot.lane.b32.xlu1 %v14305_v60, %s11904_s17  ;;  %s11480_s2 = smul.u32 1536, %s11881_s30  ;;  %s10587_s30 = scalar_lea.sflag [#allocation4], %s12186_s21 }
 0x494   : > { %8990 = vrot.lane.b32.xlu0 %v14360_v51, %s11904_s17  ;;  %8980 = vrot.lane.b32.xlu1 %v14350_v22, %s11904_s17 }
 0x496   : > { %v7757_v61 = vpop.permute.xlu1 %7756 }
 0x497   : > { %v7781_v59 = vsel %vm1351_vm2, %v7757_v61, %v7759_v5 }
 0x498   : > { %7807 = vmatprep.subr.bf16.mxu1 %v7781_v59  ;;  %8994 = vrot.lane.b32.xlu0 %v14377_v7, %s11904_s17 }
 0x499   : > { %8992 = vrot.lane.b32.xlu1 %v14374_v58, %s11904_s17 }
 0x49a   : > { %v7755_v3 = vpop.permute.xlu1 %7754 }
 0x49b   : > { %v7780_v23 = vsel %vm1351_vm2, %v7755_v3, %v7757_v61 }
 0x49c   : > { %8998 = vrot.lane.b32.xlu0 %v14388_v16, %s11904_s17  ;;  %7808 = vmatpush1.bf16.msra.mxu1 %v7780_v23 }
 0x49d   : > { %8996 = vrot.lane.b32.xlu1 %v14383_v32, %s11904_s17 }
 0x49e   : > { %v7765_v26 = vpop.permute.xlu0 %7764  ;;  %v7763_v4 = vpop.permute.xlu1 %7762 }
 0x49f   : > { %10934 = vmatmul.mubr.msk.bf16.vlgmr.msra.gmra.mrb[12].mxu1 %vm587_vm1, %v14516_v43  ;;  %v7783_v42 = vsel %vm1351_vm2, %v7761_v9, %v7763_v4  ;;  %v7784_v27 = vsel %vm1351_vm2, %v7763_v4, %v7765_v26 }
 0x4a0   : > { %9002 = vrot.lane.b32.xlu0 %v14403_v36, %s11904_s17  ;;  %7848 = vmatprep.subr.bf16.mxu1 %v7783_v42 }
 0x4a1   : > { %9000 = vrot.lane.b32.xlu1 %v14400_v17, %s11904_s17  ;;  %7849 = vmatpush1.bf16.msra.mxu1 %v7782_v55 }
 0x4a2   : > { %v7769_v33 = vpop.permute.xlu0 %7768  ;;  %v7767_v53 = vpop.permute.xlu1 %7766  ;;  %7880 = vmatprep.mubr.bf16.mxu1 %v15404_v20 }
 0x4a3   : > { %v7785_v41 = vsel %vm1351_vm2, %v7765_v26, %v7767_v53  ;;  %v7786_v50 = vsel %vm1351_vm2, %v7767_v53, %v7769_v33 }
 0x4a4   : > { %9295 = vrot.lane.b32.xlu0 %v14339_v63, %s11905_s26  ;;  %7889 = vmatprep.subr.bf16.mxu1 %v7785_v41 }
 0x4a5   : > { %9297 = vrot.lane.b32.xlu1 %v14297_v31, %s11905_s26 }
 0x4a6   : > { %v7773_v1 = vpop.permute.xlu0 %7772  ;;  %v7771_v62 = vpop.permute.xlu1 %7770 }
 0x4a7   : > { %10935 = vmatmul.mubr.msk.bf16.vlgmr.msra.gmra.mrb[16].mxu1 %vm587_vm1, %v14516_v43  ;;  %v7787_v34 = vsel %vm1351_vm2, %v7769_v33, %v7771_v62  ;;  %v7788_v45 = vsel %vm1351_vm2, %v7771_v62, %v7773_v1 }
 0x4a8   : > { %7890 = vmatpush1.bf16.msra.mxu1 %v7784_v27  ;;  %9299 = vrot.lane.b32.xlu0 %v14305_v60, %s11905_s26 }
 0x4a9   : > { %9301 = vrot.lane.b32.xlu1 %v14355_v48, %s11905_s26  ;;  %7930 = vmatprep.subr.bf16.mxu1 %v7787_v34 }
 0x4aa   : > { %v7777_v15 = vpop.permute.xlu0 %7776  ;;  %v7775_v6 = vpop.permute.xlu1 %7774  ;;  %7921 = vmatprep.mubr.bf16.mxu1 %v15404_v20 }
 0x4ab   : > { %v7789_v21 = vsel %vm1351_vm2, %v7773_v1, %v7775_v6  ;;  %v7790_v10 = vsel %vm1351_vm2, %v7775_v6, %v7777_v15 }
 0x4ac   : > { %9293 = vrot.lane.b32.xlu0 %v14350_v22, %s11905_s26 }
 0x4ad   : > { %9004 = vrot.lane.b32.xlu1 %v14409_v54, %s11904_s17  ;;  %s10603_s17 = sshll.u32 %s15267_s19, 4  ;;  %s15296_s17 = int_to_ptr.vmem [resolvable:$true] %s10603_s17 }
 0x4ae   : > { %v8056_v37 = vpop.permute.xlu0 %8055  ;;  %v7779_v39 = vpop.permute.xlu1 %7778  ;;  %s11795_s20 = scalar_lea.vmem %s15296_s17, 1536  ;;  %p11802_p4 = scmp.lt.s32.totalorder %s15296_s17, %s11800_s12 }
 0x4af   : > { %10936 = vmatmul.mubr.msk.bf16.vlgmr.msra.gmra.mrb[20].mxu1 %vm587_vm1, %v14516_v43  ;;  %v7791_v40 = vsel %vm1351_vm2, %v7777_v15, %v7779_v39  ;;  %p11796_p1 = scmp.ne.s32.totalorder %s15296_s17, %s11795_s20 }
 0x4b0   : > { %7931 = vmatpush1.bf16.msra.mxu1 %v7786_v50  ;;  %9305 = vrot.lane.b32.xlu0 %v14374_v58, %s11905_s26 }
 0x4b1   : > { %9303 = vrot.lane.b32.xlu1 %v14360_v51, %s11905_s26  ;;  %7971 = vmatprep.subr.bf16.mxu1 %v7789_v21  ;;  %v14717_v21 = vld [vmem:[%s15349_s4 + $0xc] sm:$0xf]  ;;  %p11797_p10 = pnand %p11796_p1, %p15414_p6 }
 0x4b2   : > { %v8054_v22 = vpop.permute.xlu0 %8053  ;;  %v8058_v57 = vpop.permute.xlu1 %8057  ;;  %7962 = vmatprep.mubr.bf16.mxu1 %v15404_v20 }
 0x4b3   : > { %v8080_v2 = vsel %vm559_vm0, %v8056_v37, %v8058_v57  ;;  %v8079_v18 = vsel %vm559_vm0, %v8054_v22, %v8056_v37  ;;  %p11798_p3 = pneg %p11797_p10 }
 0x4b4   : > { %9309 = vrot.lane.b32.xlu0 %v14383_v32, %s11905_s26 }
 0x4b5   : > { %9307 = vrot.lane.b32.xlu1 %v14377_v7, %s11905_s26 }
 0x4b6   : > { %v8062_v13 = vpop.permute.xlu0 %8061  ;;  %v8060_v30 = vpop.permute.xlu1 %8059 }
 0x4b7   : > { %10937 = vmatmul.mubr.msk.bf16.vlgmr.msra.gmra.mrb[24].mxu1 %vm587_vm1, %v14516_v43  ;;  %v8082_v11 = vsel %vm559_vm0, %v8060_v30, %v8062_v13  ;;  %v8081_v8 = vsel %vm559_vm0, %v8058_v57, %v8060_v30 }
 0x4b8   : > { %7972 = vmatpush1.bf16.msra.mxu1 %v7788_v45  ;;  %9313 = vrot.lane.b32.xlu0 %v14400_v17, %s11905_s26 }
 0x4b9   : > { %9311 = vrot.lane.b32.xlu1 %v14388_v16, %s11905_s26  ;;  %8012 = vmatprep.subr.bf16.mxu1 %v7791_v40 }
 0x4ba   : > { %v14568_v56 = vpop.permute.xlu0 %8065  ;;  %v8064_v24 = vpop.permute.xlu1 %8063  ;;  %8003 = vmatprep.mubr.bf16.mxu1 %v15404_v20 }
 0x4bb   : > { %v8084_v0 = vsel %vm559_vm0, %v8064_v24, %v14568_v56  ;;  %v8083_v9 = vsel %vm559_vm0, %v8062_v13, %v8064_v24 }
 0x4bc   : > { %9611 = vrot.lane.b32.xlu0 %v14305_v60, %s11906_s25 }
 0x4bd   : > { %9315 = vrot.lane.b32.xlu1 %v14403_v36, %s11905_s26 }
 0x4be   : > { %v14575_v12 = vpop.permute.xlu0 %8069  ;;  %v8068_v25 = vpop.permute.xlu1 %8067 }
 0x4bf   : > { %10938 = vmatmul.mubr.msk.bf16.vlgmr.msra.gmra.mrb[28].mxu1 %vm587_vm1, %v14516_v43  ;;  %v8086_v3 = vsel %vm559_vm0, %v8068_v25, %v14575_v12  ;;  %v8085_v42 = vsel %vm559_vm0, %v14568_v56, %v8068_v25 }
 0x4c0   : > { %8013 = vmatpush1.bf16.msra.mxu1 %v7790_v10  ;;  %9317 = vrot.lane.b32.xlu0 %v14409_v54, %s11905_s26 }
 0x4c1   : > { %9609 = vrot.lane.b32.xlu1 %v14297_v31, %s11906_s25  ;;  %8106 = vmatprep.subr.bf16.mxu1 %v8080_v2 }
 0x4c2   : > { %v14585_v28 = vpop.permute.xlu0 %8073  ;;  %v14587_v19 = vpop.permute.xlu1 %8071  ;;  %8044 = vmatprep.mubr.bf16.mxu1 %v15404_v20 }
 0x4c3   : > { %v8088_v33 = vsel %vm559_vm0, %v14587_v19, %v14585_v28  ;;  %v8087_v34 = vsel %vm559_vm0, %v14575_v12, %v14587_v19 }
 0x4c4   : > { %9615 = vrot.lane.b32.xlu0 %v14360_v51, %s11906_s25 }
 0x4c5   : > { %9613 = vrot.lane.b32.xlu1 %v14355_v48, %s11906_s25 }
 0x4c6   : > { %v14594_v44 = vpop.permute.xlu0 %8077  ;;  %v14596_v52 = vpop.permute.xlu1 %8075 }
 0x4c7   : > { %10939 = vmatmul.mubr.msk.bf16.vlgmr.msra.gmra.mrb[32].mxu1 %vm587_vm1, %v14516_v43  ;;  %v8090_v6 = vsel %vm559_vm0, %v14596_v52, %v14594_v44  ;;  %v8089_v13 = vsel %vm559_vm0, %v14585_v28, %v14596_v52 }
 0x4c8   : > { %8107 = vmatpush1.bf16.msra.mxu1 %v8079_v18  ;;  %9617 = vrot.lane.b32.xlu0 %v14374_v58, %s11906_s25 }
 0x4c9   : > { %9607 = vrot.lane.b32.xlu1 %v14339_v63, %s11906_s25  ;;  %8147 = vmatprep.subr.bf16.mxu1 %v8082_v11 }
 0x4ca   : > { %v14606_v47 = vpop.permute.xlu0 %8358  ;;  %v14608_v38 = vpop.permute.xlu1 %8356  ;;  %8138 = vmatprep.mubr.bf16.mxu1 %v15404_v20 }
 0x4cb   : > { %v8381_v45 = vsel %vm2114_vm3, %v14608_v38, %v14606_v47 }
 0x4cc   : > { %9621 = vrot.lane.b32.xlu0 %v14383_v32, %s11906_s25 }
 0x4cd   : > { %9619 = vrot.lane.b32.xlu1 %v14377_v7, %s11906_s25 }
 0x4ce   : > { %v14620_v49 = vpop.permute.xlu0 %8360  ;;  %v14622_v29 = vpop.permute.xlu1 %8354 }
 0x4cf   : > { %10940 = vmatmul.mubr.msk.bf16.vlgmr.msra.gmra.mrb[36].mxu1 %vm587_vm1, %v14616_v14  ;;  %v8380_v10 = vsel %vm2114_vm3, %v14622_v29, %v14608_v38  ;;  %v8382_v52 = vsel %vm2114_vm3, %v14606_v47, %v14620_v49 }
 0x4d0   : > { %8148 = vmatpush1.bf16.msra.mxu1 %v8081_v8  ;;  %9625 = vrot.lane.b32.xlu0 %v14400_v17, %s11906_s25 }
 0x4d1   : > { %9623 = vrot.lane.b32.xlu1 %v14388_v16, %s11906_s25  ;;  %8188 = vmatprep.subr.bf16.mxu1 %v8084_v0 }
 0x4d2   : > { %v14633_v46 = vpop.permute.xlu0 %8364  ;;  %v14635_v5 = vpop.permute.xlu1 %8362  ;;  %8179 = vmatprep.mubr.bf16.mxu1 %v15404_v20 }
 0x4d4   : > { %9922 = vrot.lane.b32.xlu0 %v14297_v31, %s11907_s23 }
 0x4d5   : > { %9627 = vrot.lane.b32.xlu1 %v14403_v36, %s11906_s25 }
 0x4d6   : > { %v14642_v61 = vpop.permute.xlu0 %8368  ;;  %v14644_v59 = vpop.permute.xlu1 %8366 }
 0x4d7   : > { %10941 = vmatmul.mubr.msk.bf16.vlgmr.msra.gmra.mrb[40].mxu1 %vm587_vm1, %v14616_v14  ;;  %v8386_v0 = vsel %vm2114_vm3, %v14644_v59, %v14642_v61 }
 0x4d8   : > { %8189 = vmatpush1.bf16.msra.mxu1 %v8083_v9  ;;  %9629 = vrot.lane.b32.xlu0 %v14409_v54, %s11906_s25 }
 0x4d9   : > { %9924 = vrot.lane.b32.xlu1 %v14305_v60, %s11907_s23  ;;  %8229 = vmatprep.subr.bf16.mxu1 %v8086_v3 }
 0x4da   : > { %v14655_v23 = vpop.permute.xlu0 %8372  ;;  %v14657_v43 = vpop.permute.xlu1 %8370  ;;  %8220 = vmatprep.mubr.bf16.mxu1 %v15404_v20 }
 0x4dc   : > { %9926 = vrot.lane.b32.xlu0 %v14355_v48, %s11907_s23 }
 0x4dd   : > { %9631 = vrot.lane.b32.xlu1 %v14411_v35, %s11906_s25 }
 0x4de   : > { %v14664_v26 = vpop.permute.xlu0 %8376  ;;  %v14666_v4 = vpop.permute.xlu1 %8374 }
 0x4df   : > { %v14673_v55 = vsel %vm2114_vm3, %v14666_v4, %v14664_v26  ;;  %10942 = vmatmul.mubr.msk.bf16.vlgmr.msra.gmra.mrb[44].mxu1 %vm587_vm1, %v14616_v14 }
 0x4e0   : > { %8230 = vmatpush1.bf16.msra.mxu1 %v8085_v42  ;;  %9920 = vrot.lane.b32.xlu0 %v14339_v63, %s11907_s23 }
 0x4e1   : > { %9928 = vrot.lane.b32.xlu1 %v14360_v51, %s11907_s23  ;;  %8270 = vmatprep.subr.bf16.mxu1 %v8088_v33 }
 0x4e2   : > { %v8670_v53 = vpop.permute.xlu0 %8669  ;;  %v8672_v41 = vpop.permute.xlu1 %8671  ;;  %8261 = vmatprep.mubr.bf16.mxu1 %v15404_v20 }
 0x4e3   : > { %v8694_v1 = vsel %vm2884_vm4, %v8670_v53, %v8672_v41 }
 0x4e4   : > { %9932 = vrot.lane.b32.xlu0 %v14377_v7, %s11907_s23  ;;  %8720 = vmatprep.subr.bf16.mxu0 %v8694_v1 }
 0x4e5   : > { %9930 = vrot.lane.b32.xlu1 %v14374_v58, %s11907_s23 }
 0x4e6   : > { %v14690_v62 = vpop.permute.xlu0 %8673  ;;  %v14692_v27 = vpop.permute.xlu1 %8675 }
 0x4e7   : > { %v14699_v15 = vsel %vm2884_vm4, %v8672_v41, %v14690_v62  ;;  %10943 = vmatmul.mubr.msk.bf16.vlgmr.msra.gmra.mrb[48].mxu1 %vm587_vm1, %v14616_v14 }
 0x4e8   : > { %8271 = vmatpush1.bf16.msra.mxu1 %v8087_v34  ;;  %9936 = vrot.lane.b32.xlu0 %v14388_v16, %s11907_s23  ;;  %v8696_v34 = vsel %vm2884_vm4, %v14690_v62, %v14692_v27 }
 0x4e9   : > { %9934 = vrot.lane.b32.xlu1 %v14383_v32, %s11907_s23  ;;  %8311 = vmatprep.subr.bf16.mxu1 %v8090_v6 }
 0x4ea   : > { %v8668_v37 = vpop.permute.xlu0 %8667  ;;  %v8678_v39 = vpop.permute.xlu1 %8677  ;;  %8302 = vmatprep.mubr.bf16.mxu1 %v15404_v20 }
 0x4eb   : > { %v8693_v50 = vsel %vm2884_vm4, %v8668_v37, %v8670_v53  ;;  %v8697_v40 = vsel %vm2884_vm4, %v14692_v27, %v8678_v39  ;;  %v14908_v37 = vld [vmem:[%s15349_s4 + $0x14] sm:$0xf] }
 0x4ec   : > { %9940 = vrot.lane.b32.xlu0 %v14403_v36, %s11907_s23  ;;  %8721 = vmatpush1.bf16.msra.mxu0 %v8693_v50 }
 0x4ed   : > { %9938 = vrot.lane.b32.xlu1 %v14400_v17, %s11907_s23 }
 0x4ee   : > { %v14721_v22 = vpop.permute.xlu0 %8679  ;;  %v14723_v57 = vpop.permute.xlu1 %8378 }
 0x4ef   : > { %10944 = vmatmul.mubr.msk.bf16.vlgmr.msra.gmra.mrb[52].mxu1 %vm587_vm1, %v14616_v14  ;;  %v8698_v30 = vsel %vm2884_vm4, %v8678_v39, %v14721_v22  ;;  %10954 = vmatmul.mubr.msk.bf16.vlgmr.msra.gmra.mrb[16].mxu0 %vm587_vm1, %v14717_v21  ;;  %v8391_v33 = vsel %vm2114_vm3, %v14664_v26, %v14723_v57 }
 0x4f0   : > { %8312 = vmatpush1.bf16.msra.mxu1 %v8089_v13  ;;  %9944 = vrot.lane.b32.xlu0 %v14411_v35, %s11907_s23 }
 0x4f1   : > { %9942 = vrot.lane.b32.xlu1 %v14409_v54, %s11907_s23  ;;  %8407 = vmatprep.subr.bf16.mxu1 %v8381_v45  ;;  %s15294_s23 = scalar_lea.hbm %s15353_s8, %s11480_s2 }
 0x4f2   : > { %8802 = vmatprep.subr.bf16.mxu0 %v8698_v30  ;;  %v14743_v56 = vpop.permute.xlu0 %8683  ;;  %v14745_v24 = vpop.permute.xlu1 %8681  ;;  %8343 = vmatprep.mubr.bf16.mxu1 %v15404_v20 }
 0x4f3   : > { %8803 = vmatpush1.bf16.msra.mxu0 %v8697_v40  ;;  %8834 = vmatprep.mubr.bf16.mxu0 %v15404_v20  ;;  %v8700_v57 = vsel %vm2884_vm4, %v14745_v24, %v14743_v56 }
 0x4f4   : > { %10237 = vrot.lane.b32.xlu0 %v14305_v60, %s11908_s0 }
 0x4f5   : > { %10235 = vrot.lane.b32.xlu1 %v14297_v31, %s11908_s0  ;;  %v8383_v31 = vsel %vm2114_vm3, %v14620_v49, %v14635_v5  ;;  %v14837_v49 = vld [vmem:[%s15349_s4 + $0x10] sm:$0xf] }
 0x4f6   : > { %v14753_v12 = vpop.permute.xlu0 %8687  ;;  %v8686_v25 = vpop.permute.xlu1 %8685 }
 0x4f7   : > { %10945 = vmatmul.mubr.msk.bf16.vlgmr.msra.gmra.mrb[56].mxu1 %vm587_vm1, %v14616_v14  ;;  %v8702_v2 = vsel %vm2884_vm4, %v8686_v25, %v14753_v12  ;;  %10956 = vmatmul.mubr.msk.bf16.vlgmr.msra.gmra.mrb[20].mxu0 %vm587_vm1, %v14717_v21  ;;  %v8701_v60 = vsel %vm2884_vm4, %v14743_v56, %v8686_v25  ;;  %v8699_v56 = vsel %vm2884_vm4, %v14721_v22, %v14745_v24 }
 0x4f8   : > { %8408 = vmatpush1.bf16.msra.mxu1 %v8380_v10  ;;  %10241 = vrot.lane.b32.xlu0 %v14360_v51, %s11908_s0  ;;  %v14784_v51 = vld [vmem:[%s15349_s4 + $0x8] sm:$0xf] }
 0x4f9   : > { %10239 = vrot.lane.b32.xlu1 %v14355_v48, %s11908_s0  ;;  %8448 = vmatprep.subr.bf16.mxu1 %v8383_v31 }
 0x4fa   : > { %8884 = vmatprep.subr.bf16.mxu0 %v8702_v2  ;;  %v14773_v28 = vpop.permute.xlu0 %8984  ;;  %v14775_v19 = vpop.permute.xlu1 %8689  ;;  %8439 = vmatprep.mubr.bf16.mxu1 %v15404_v20 }
 0x4fb   : > { %8885 = vmatpush1.bf16.msra.mxu0 %v8701_v60  ;;  %8916 = vmatprep.mubr.bf16.mxu0 %v15404_v20  ;;  %v8703_v24 = vsel %vm2884_vm4, %v14753_v12, %v14775_v19  ;;  %v14974_v12 = vld [vmem:[%s15349_s4 + $0x18] sm:$0xf] }
 0x4fc   : > { %10243 = vrot.lane.b32.xlu0 %v14374_v58, %s11908_s0 }
 0x4fd   : > { %10233 = vrot.lane.b32.xlu1 %v14339_v63, %s11908_s0  ;;  %v8385_v63 = vsel %vm2114_vm3, %v14633_v46, %v14644_v59 }
 0x4fe   : > { %v14788_v48 = vpop.permute.xlu0 %8988  ;;  %v8983_v44 = vpop.permute.xlu1 %8982 }
 0x4ff   : > { %10947 = vmatmul.mubr.msk.bf16.vlgmr.msra.gmra.mrb[60].mxu1 %vm587_vm1, %v14784_v51  ;;  %v9007_v58 = vsel %vm3658_vm5, %v8983_v44, %v14773_v28  ;;  %10958 = vmatmul.mubr.msk.bf16.vlgmr.msra.gmra.mrb[24].mxu0 %vm587_vm1, %v14717_v21 }
 0x500   : > { %8449 = vmatpush1.bf16.msra.mxu1 %v8382_v52  ;;  %10247 = vrot.lane.b32.xlu0 %v14383_v32, %s11908_s0 }
 0x501   : > { %10245 = vrot.lane.b32.xlu1 %v14377_v7, %s11908_s0  ;;  %8489 = vmatprep.subr.bf16.mxu1 %v8385_v63  ;;  %v8384_v7 = vsel %vm2114_vm3, %v14635_v5, %v14633_v46 }
 0x502   : > { %9033 = vmatprep.subr.bf16.mxu0 %v9007_v58  ;;  %v14806_v18 = vpop.permute.xlu0 %8691  ;;  %v14808_v11 = vpop.permute.xlu1 %8986  ;;  %8480 = vmatprep.mubr.bf16.mxu1 %v15404_v20 }
 0x503   : > { %9065 = vmatprep.mubr.bf16.mxu0 %v15404_v20  ;;  %v8704_v10 = vsel %vm2884_vm4, %v14775_v19, %v14806_v18  ;;  %v9008_v18 = vsel %vm3658_vm5, %v14773_v28, %v14808_v11 }
 0x504   : > { %10251 = vrot.lane.b32.xlu0 %v14400_v17, %s11908_s0  ;;  %v8387_v17 = vsel %vm2114_vm3, %v14642_v61, %v14657_v43 }
 0x505   : > { %10249 = vrot.lane.b32.xlu1 %v14388_v16, %s11908_s0  ;;  %v10544_v16 = vld [vmem:[%s15351_s6] sm:$0xff] }
 0x506   : > { %v8991_v32 = vpop.permute.xlu0 %8990  ;;  %v8981_v47 = vpop.permute.xlu1 %8980 }
 0x507   : > { %v9006_v38 = vsel %vm3658_vm5, %v8981_v47, %v8983_v44  ;;  %10948 = vmatmul.mubr.msk.bf16.vlgmr.msra.gmra.mrb[64].mxu1 %vm587_vm1, %v14784_v51  ;;  %v9010_v29 = vsel %vm3658_vm5, %v14788_v48, %v8991_v32  ;;  %v9009_v44 = vsel %vm3658_vm5, %v14808_v11, %v14788_v48 }
 0x508   : > { %8490 = vmatpush1.bf16.msra.mxu1 %v8384_v7  ;;  %10255 = vrot.lane.b32.xlu0 %v14409_v54, %s11908_s0 }
 0x509   : > { %10253 = vrot.lane.b32.xlu1 %v14403_v36, %s11908_s0  ;;  %8530 = vmatprep.subr.bf16.mxu1 %v8387_v17 }
 0x50a   : > { %9034 = vmatpush1.bf16.msra.mxu0 %v9006_v38  ;;  %v14832_v14 = vpop.permute.xlu0 %8994  ;;  %8521 = vmatprep.mubr.bf16.mxu1 %v15404_v20 }
 0x50b   : > { %v14840_v54 = vpop.permute.xlu1 %8992 }
 0x50c   : > { %10547 = vperm.xlu0 %11584, %v10544_v16   ;;  %v9011_v36 = vsel %vm3658_vm5, %v8991_v32, %v14840_v54  ;;  %v9012_v38 = vsel %vm3658_vm5, %v14840_v54, %v14832_v14 }
 0x50d   : > { %10961 = vmatmul.mubr.msk.bf16.vlgmr.msra.gmra.mrb[28].mxu0 %vm587_vm1, %v14837_v49  ;;  %10257 = vrot.lane.b32.xlu1 %v14411_v35, %s11908_s0  ;;  %v8389_v35 = vsel %vm2114_vm3, %v14655_v23, %v14666_v4  ;;  %v8388_v4 = vsel %vm2114_vm3, %v14657_v43, %v14655_v23  ;;  %s11801_s0 = scalar_lea.vmem %s11800_s12, 3072 }
 0x50e   : > { %9115 = vmatprep.subr.bf16.mxu0 %v9011_v36  ;;  %v8999_v8 = vpop.permute.xlu0 %8998  ;;  %9147 = vmatprep.mubr.bf16.mxu0 %v15404_v20  ;;  %p11803_p9 = scmp.lt.s32.totalorder %s11801_s0, %s11795_s20 }
 0x50f   : > { %9116 = vmatpush1.bf16.msra.mxu0 %v9010_v29  ;;  %v14854_v46 = vpop.permute.xlu1 %8996  ;;  %10949 = vmatmul.mubr.msk.bf16.vlgmr.msra.gmra.mrb[68].mxu1 %vm587_vm1, %v14784_v51 }
 0x510   : > { %8531 = vmatpush1.bf16.msra.mxu1 %v8386_v0  ;;  %8562 = vmatprep.mubr.bf16.mxu1 %v15404_v20  ;;  %v9014_v59 = vsel %vm3658_vm5, %v14854_v46, %v8999_v8  ;;  %v9013_v32 = vsel %vm3658_vm5, %v14832_v14, %v14854_v46  ;;  %p11804_p5 = por %p11803_p9, %p11802_p4 }
 0x511   : > { %8571 = vmatprep.subr.bf16.mxu1 %v8389_v35 }
 0x512   : > { %v14862_v5 = vpop.permute.xlu0 %9002  ;;  %p11805_p7 = pnand %p11804_p5, %p11798_p3 }
 0x513   : > { %v14864_v9 = vpop.permute.xlu1 %9000 }
 0x514   : > { %v9015_v61 = vsel %vm3658_vm5, %v8999_v8, %v14864_v9  ;;  %v9016_v46 = vsel %vm3658_vm5, %v14864_v9, %v14862_v5 }
 0x515   : > { %10963 = vmatmul.mubr.msk.bf16.vlgmr.msra.gmra.mrb[32].mxu0 %vm587_vm1, %v14837_v49  ;;  %9197 = vmatprep.subr.bf16.mxu0 %v9015_v61 }
 0x516   : > { %9198 = vmatpush1.bf16.msra.mxu0 %v9014_v59  ;;  %v9296_v3 = vpop.permute.xlu0 %9295  ;;  %9229 = vmatprep.mubr.bf16.mxu0 %v15404_v20 }
 0x517   : > { %v14876_v42 = vpop.permute.xlu1 %9297  ;;  %10950 = vmatmul.mubr.msk.bf16.vlgmr.msra.gmra.mrb[72].mxu1 %vm587_vm1, %v14784_v51 }
 0x518   : > { %8572 = vmatpush1.bf16.msra.mxu1 %v8388_v4  ;;  %v9320_v53 = vsel %vm4427_vm6, %v9296_v3, %v14876_v42  ;;  %8603 = vmatprep.mubr.bf16.mxu1 %v15404_v20 }
 0x519   : > { %8612 = vmatprep.subr.bf16.mxu1 %v8391_v33  ;;  %9346 = vmatprep.subr.bf16.mxu0 %v9320_v53 }
 0x51a   : > { %v14886_v41 = vpop.permute.xlu0 %9299 }
 0x51b   : > { %v14888_v23 = vpop.permute.xlu1 %9301  ;;  %v9321_v33 = vsel %vm4427_vm6, %v14876_v42, %v14886_v41 }
 0x51c   : > { %v9322_v61 = vsel %vm4427_vm6, %v14886_v41, %v14888_v23 }
 0x51d   : > { %10965 = vmatmul.mubr.msk.bf16.vlgmr.msra.gmra.mrb[36].mxu0 %vm587_vm1, %v14837_v49 }
 0x51e   : > { %v9294_v43 = vpop.permute.xlu0 %9293  ;;  %9378 = vmatprep.mubr.bf16.mxu0 %v15404_v20 }
 0x51f   : > { %v9319_v1 = vsel %vm4427_vm6, %v9294_v43, %v9296_v3  ;;  %v14894_v26 = vpop.permute.xlu1 %9004  ;;  %10951 = vmatmul.mubr.msk.bf16.vlgmr.msra.gmra.mrb[76].mxu1 %vm587_vm1, %v14784_v51  ;;  %v15044_v3 = vld [vmem:[%s15349_s4 + $0x1c] sm:$0xf] }
 0x520   : > { %8613 = vmatpush1.bf16.msra.mxu1 %v14673_v55  ;;  %9347 = vmatpush1.bf16.msra.mxu0 %v9319_v1  ;;  %v9017_v16 = vsel %vm3658_vm5, %v14862_v5, %v14894_v26 }
 0x521   : > { %8761 = vmatprep.subr.bf16.mxu1 %v8696_v34  ;;  %8644 = vmatprep.mubr.bf16.mxu1 %v15404_v20 }
 0x522   : > { %v14903_v6 = vpop.permute.xlu0 %9305 }
 0x523   : > { %v9304_v39 = vpop.permute.xlu1 %9303 }
 0x524   : > { %v9323_v50 = vsel %vm4427_vm6, %v14888_v23, %v9304_v39  ;;  %v9324_v55 = vsel %vm4427_vm6, %v9304_v39, %v14903_v6 }
 0x525   : > { %10968 = vmatmul.mubr.msk.bf16.vlgmr.msra.gmra.mrb[40].mxu0 %vm587_vm1, %v14908_v37  ;;  %9428 = vmatprep.subr.bf16.mxu0 %v9324_v55 }
 0x526   : > { %9429 = vmatpush1.bf16.msra.mxu0 %v9323_v50  ;;  %v14916_v62 = vpop.permute.xlu0 %9309  ;;  %9460 = vmatprep.mubr.bf16.mxu0 %v15404_v20 }
 0x527   : > { %v14919_v27 = vpop.permute.xlu1 %9307  ;;  %10952 = vmatmul.mubr.msk.bf16.vlgmr.msra.gmra.mrb[80].mxu1 %vm587_vm1, %v14784_v51 }
 0x528   : > { %8762 = vmatpush1.bf16.msra.mxu1 %v14699_v15  ;;  %8793 = vmatprep.mubr.bf16.mxu1 %v15404_v20  ;;  %v9326_v43 = vsel %vm4427_vm6, %v14919_v27, %v14916_v62  ;;  %v9325_v26 = vsel %vm4427_vm6, %v14903_v6, %v14919_v27 }
 0x529   : > { %8843 = vmatprep.subr.bf16.mxu1 %v8700_v57 }
 0x52a   : > { %v14928_v13 = vpop.permute.xlu0 %9313 }
 0x52b   : > { %v9312_v30 = vpop.permute.xlu1 %9311 }
 0x52c   : > { %v9327_v45 = vsel %vm4427_vm6, %v14916_v62, %v9312_v30  ;;  %v9328_v40 = vsel %vm4427_vm6, %v9312_v30, %v14928_v13 }
 0x52d   : > { %10970 = vmatmul.mubr.msk.bf16.vlgmr.msra.gmra.mrb[44].mxu0 %vm587_vm1, %v14908_v37  ;;  %9510 = vmatprep.subr.bf16.mxu0 %v9328_v40 }
 0x52e   : > { %9511 = vmatpush1.bf16.msra.mxu0 %v9327_v45  ;;  %v14936_v15 = vpop.permute.xlu0 %9611  ;;  %9542 = vmatprep.mubr.bf16.mxu0 %v15404_v20 }
 0x52f   : > { %v14942_v25 = vpop.permute.xlu1 %9315  ;;  %10955 = vmatmul.mubr.msk.bf16.vlgmr.msra.gmra.mrb[84].mxu1 %vm587_vm1, %v14717_v21 }
 0x530   : > { %8844 = vmatpush1.bf16.msra.mxu1 %v8699_v56  ;;  %8875 = vmatprep.mubr.bf16.mxu1 %v15404_v20  ;;  %v9329_v57 = vsel %vm4427_vm6, %v14928_v13, %v14942_v25 }
 0x531   : > { %8925 = vmatprep.subr.bf16.mxu1 %v8704_v10 }
 0x532   : > { %v14950_v2 = vpop.permute.xlu0 %9317 }
 0x533   : > { %v9610_v60 = vpop.permute.xlu1 %9609  ;;  %v9330_v50 = vsel %vm4427_vm6, %v14942_v25, %v14950_v2 }
 0x534   : > { %v9634_v31 = vsel %vm5194_vm7, %v9610_v60, %v14936_v15 }
 0x535   : > { %10972 = vmatmul.mubr.msk.bf16.vlgmr.msra.gmra.mrb[48].mxu0 %vm587_vm1, %v14908_v37  ;;  %9660 = vmatprep.subr.bf16.mxu0 %v9634_v31 }
 0x536   : > { %v14956_v22 = vpop.permute.xlu0 %9615  ;;  %9692 = vmatprep.mubr.bf16.mxu0 %v15404_v20 }
 0x537   : > { %v14962_v51 = vpop.permute.xlu1 %9613  ;;  %10957 = vmatmul.mubr.msk.bf16.vlgmr.msra.gmra.mrb[88].mxu1 %vm587_vm1, %v14717_v21 }
 0x538   : > { %8926 = vmatpush1.bf16.msra.mxu1 %v8703_v24  ;;  %8957 = vmatprep.mubr.bf16.mxu1 %v15404_v20  ;;  %v9636_v45 = vsel %vm5194_vm7, %v14962_v51, %v14956_v22  ;;  %v9635_v10 = vsel %vm5194_vm7, %v14936_v15, %v14962_v51 }
 0x539   : > { %9074 = vmatprep.subr.bf16.mxu1 %v9009_v44 }
 0x53a   : > { %v9618_v52 = vpop.permute.xlu0 %9617 }
 0x53b   : > { %v9608_v58 = vpop.permute.xlu1 %9607  ;;  %v9637_v7 = vsel %vm5194_vm7, %v14956_v22, %v9618_v52  ;;  %v15123_v22 = vld [vmem:[%s15349_s4 + $0x20] sm:$0xf] }
 0x53c   : > { %v9633_v63 = vsel %vm5194_vm7, %v9608_v58, %v9610_v60 }
 0x53d   : > { %9661 = vmatpush1.bf16.msra.mxu0 %v9633_v63 }
 0x53e   : > { %v14976_v19 = vpop.permute.xlu0 %9621 }
 0x53f   : > { %v14981_v48 = vpop.permute.xlu1 %9619  ;;  %10959 = vmatmul.mubr.msk.bf16.vlgmr.msra.gmra.mrb[92].mxu1 %vm587_vm1, %v14717_v21 }
 0x540   : > { %9075 = vmatpush1.bf16.msra.mxu1 %v9008_v18  ;;  %10975 = vmatmul.mubr.msk.bf16.vlgmr.msra.gmra.mrb[52].mxu0 %vm587_vm1, %v14974_v12  ;;  %v9638_v47 = vsel %vm5194_vm7, %v9618_v52, %v14981_v48  ;;  %v9639_v18 = vsel %vm5194_vm7, %v14981_v48, %v14976_v19 }
 0x541   : > { %9156 = vmatprep.subr.bf16.mxu1 %v9013_v32  ;;  %9742 = vmatprep.subr.bf16.mxu0 %v9638_v47 }
 0x542   : > { %9743 = vmatpush1.bf16.msra.mxu0 %v9637_v7  ;;  %v9626_v28 = vpop.permute.xlu0 %9625  ;;  %9106 = vmatprep.mubr.bf16.mxu1 %v15404_v20 }
 0x543   : > { %v14995_v21 = vpop.permute.xlu1 %9623  ;;  %9774 = vmatprep.mubr.bf16.mxu0 %v15404_v20 }
 0x544   : > { %v9641_v29 = vsel %vm5194_vm7, %v14995_v21, %v9626_v28  ;;  %v9640_v31 = vsel %vm5194_vm7, %v14976_v19, %v14995_v21 }
 0x546   : > { %v9923_v11 = vpop.permute.xlu0 %9922 }
 0x547   : > { %v15001_v17 = vpop.permute.xlu1 %9627  ;;  %10962 = vmatmul.mubr.msk.bf16.vlgmr.msra.gmra.mrb[96].mxu1 %vm587_vm1, %v14837_v49 }
 0x548   : > { %9157 = vmatpush1.bf16.msra.mxu1 %v9012_v38  ;;  %10977 = vmatmul.mubr.msk.bf16.vlgmr.msra.gmra.mrb[56].mxu0 %vm587_vm1, %v14974_v12  ;;  %v9642_v36 = vsel %vm5194_vm7, %v9626_v28, %v15001_v17 }
 0x549   : > { %9238 = vmatprep.subr.bf16.mxu1 %v9017_v16  ;;  %9824 = vmatprep.subr.bf16.mxu0 %v9642_v36 }
 0x54a   : > { %9825 = vmatpush1.bf16.msra.mxu0 %v9641_v29  ;;  %v15014_v14 = vpop.permute.xlu0 %9629  ;;  %9188 = vmatprep.mubr.bf16.mxu1 %v15404_v20 }
 0x54b   : > { %v15017_v54 = vpop.permute.xlu1 %9924  ;;  %9856 = vmatprep.mubr.bf16.mxu0 %v15404_v20  ;;  %v9643_v36 = vsel %vm5194_vm7, %v15001_v17, %v15014_v14 }
 0x54c   : > { %v9947_v8 = vsel %vm5957_vm8, %v9923_v11, %v15017_v54 }
 0x54d   : > { %9973 = vmatprep.subr.bf16.mxu0 %v9947_v8 }
 0x54e   : > { %v15022_v0 = vpop.permute.xlu0 %9926 }
 0x54f   : > { %v15027_v35 = vpop.permute.xlu1 %9631  ;;  %10964 = vmatmul.mubr.msk.bf16.vlgmr.msra.gmra.mrb[100].mxu1 %vm587_vm1, %v14837_v49 }
 0x550   : > { %9239 = vmatpush1.bf16.msra.mxu1 %v9016_v46  ;;  %10979 = vmatmul.mubr.msk.bf16.vlgmr.msra.gmra.mrb[60].mxu0 %vm587_vm1, %v14974_v12  ;;  %v9644_v47 = vsel %vm5194_vm7, %v15014_v14, %v15027_v35  ;;  %v9948_v14 = vsel %vm5957_vm8, %v15017_v54, %v15022_v0 }
 0x551   : > { %9387 = vmatprep.subr.bf16.mxu1 %v9322_v61  ;;  %9270 = vmatprep.mubr.bf16.mxu1 %v15404_v20 }
 0x552   : > { %v9921_v59 = vpop.permute.xlu0 %9920  ;;  %10005 = vmatprep.mubr.bf16.mxu0 %v15404_v20 }
 0x553   : > { %v9946_v5 = vsel %vm5957_vm8, %v9921_v59, %v9923_v11  ;;  %v15039_v9 = vpop.permute.xlu1 %9928 }
 0x554   : > { %9974 = vmatpush1.bf16.msra.mxu0 %v9946_v5  ;;  %v9949_v29 = vsel %vm5957_vm8, %v15022_v0, %v15039_v9 }
 0x556   : > { %v15046_v4 = vpop.permute.xlu0 %9932 }
 0x557   : > { %v9931_v53 = vpop.permute.xlu1 %9930  ;;  %10966 = vmatmul.mubr.msk.bf16.vlgmr.msra.gmra.mrb[104].mxu1 %vm587_vm1, %v14837_v49 }
 0x558   : > { %v9950_v23 = vsel %vm5957_vm8, %v15039_v9, %v9931_v53  ;;  %9388 = vmatpush1.bf16.msra.mxu1 %v9321_v33  ;;  %10982 = vmatmul.mubr.msk.bf16.vlgmr.msra.gmra.mrb[64].mxu0 %vm587_vm1, %v15044_v3  ;;  %v9951_v1 = vsel %vm5957_vm8, %v9931_v53, %v15046_v4 }
 0x559   : > { %9469 = vmatprep.subr.bf16.mxu1 %v9326_v43  ;;  %10055 = vmatprep.subr.bf16.mxu0 %v9951_v1 }
 0x55a   : > { %10056 = vmatpush1.bf16.msra.mxu0 %v9950_v23  ;;  %v15062_v42 = vpop.permute.xlu0 %9936  ;;  %9419 = vmatprep.mubr.bf16.mxu1 %v15404_v20 }
 0x55b   : > { %v15065_v49 = vpop.permute.xlu1 %9934  ;;  %10087 = vmatprep.mubr.bf16.mxu0 %v15404_v20 }
 0x55c   : > { %v9953_v61 = vsel %vm5957_vm8, %v15065_v49, %v15062_v42  ;;  %v9952_v54 = vsel %vm5957_vm8, %v15046_v4, %v15065_v49 }
 0x55e   : > { %v15068_v41 = vpop.permute.xlu0 %9940 }
 0x55f   : > { %v9939_v34 = vpop.permute.xlu1 %9938  ;;  %10969 = vmatmul.mubr.msk.bf16.vlgmr.msra.gmra.mrb[108].mxu1 %vm587_vm1, %v14908_v37 }
 0x560   : > { %v9954_v39 = vsel %vm5957_vm8, %v15062_v42, %v9939_v34  ;;  %9470 = vmatpush1.bf16.msra.mxu1 %v9325_v26  ;;  %10984 = vmatmul.mubr.msk.bf16.vlgmr.msra.gmra.mrb[68].mxu0 %vm587_vm1, %v15044_v3  ;;  %v9955_v55 = vsel %vm5957_vm8, %v9939_v34, %v15068_v41 }
 0x561   : > { %9551 = vmatprep.subr.bf16.mxu1 %v9330_v50  ;;  %10137 = vmatprep.subr.bf16.mxu0 %v9955_v55 }
 0x562   : > { %10138 = vmatpush1.bf16.msra.mxu0 %v9954_v39  ;;  %v15084_v6 = vpop.permute.xlu0 %9944  ;;  %9501 = vmatprep.mubr.bf16.mxu1 %v15404_v20 }
 0x563   : > { %v15087_v62 = vpop.permute.xlu1 %9942  ;;  %10169 = vmatprep.mubr.bf16.mxu0 %v15404_v20 }
 0x564   : > { %v9956_v1 = vsel %vm5957_vm8, %v15068_v41, %v15087_v62 }
 0x566   : > { %v15090_v27 = vpop.permute.xlu0 %10237 }
 0x567   : > { %v10236_v30 = vpop.permute.xlu1 %10235  ;;  %10971 = vmatmul.mubr.msk.bf16.vlgmr.msra.gmra.mrb[112].mxu1 %vm587_vm1, %v14908_v37 }
 0x568   : > { %9552 = vmatpush1.bf16.msra.mxu1 %v9329_v57  ;;  %10986 = vmatmul.mubr.msk.bf16.vlgmr.msra.gmra.mrb[72].mxu0 %vm587_vm1, %v15044_v3  ;;  %v10260_v40 = vsel %vm6720_vm9, %v10236_v30, %v15090_v27 }
 0x569   : > { %9701 = vmatprep.subr.bf16.mxu1 %v9636_v45  ;;  %10286 = vmatprep.subr.bf16.mxu0 %v10260_v40 }
 0x56a   : > { %v15104_v56 = vpop.permute.xlu0 %10241  ;;  %9583 = vmatprep.mubr.bf16.mxu1 %v15404_v20  ;;  %10318 = vmatprep.mubr.bf16.mxu0 %v15404_v20 }
 0x56b   : > { %v15108_v13 = vpop.permute.xlu1 %10239 }
 0x56c   : > { %v10262_v4 = vsel %vm6720_vm9, %v15108_v13, %v15104_v56  ;;  %v10261_v39 = vsel %vm6720_vm9, %v15090_v27, %v15108_v13 }
 0x56e   : > { %v10244_v25 = vpop.permute.xlu0 %10243 }
 0x56f   : > { %v10234_v2 = vpop.permute.xlu1 %10233  ;;  %10973 = vmatmul.mubr.msk.bf16.vlgmr.msra.gmra.mrb[116].mxu1 %vm587_vm1, %v14908_v37  ;;  %v10263_v58 = vsel %vm6720_vm9, %v15104_v56, %v10244_v25 }
 0x570   : > { %v10259_v60 = vsel %vm6720_vm9, %v10234_v2, %v10236_v30  ;;  %9702 = vmatpush1.bf16.msra.mxu1 %v9635_v10  ;;  %9733 = vmatprep.mubr.bf16.mxu1 %v15404_v20 }
 0x571   : > { %9783 = vmatprep.subr.bf16.mxu1 %v9640_v31  ;;  %10287 = vmatpush1.bf16.msra.mxu0 %v10259_v60 }
 0x572   : > { %v15125_v15 = vpop.f32.mrb[12].mxu1  ;;  %v15131_v51 = vpop.permute.xlu0 %10247 }
 0x573   : > { %v15127_v24 = vpop.permute.xlu1 %10245  ;;  %v15129_v37 = vpop.f32.mrb[13].mxu1 }
 0x574   : > { %10989 = vmatmul.mubr.msk.bf16.vlgmr.msra.gmra.mrb[76].mxu0 %vm587_vm1, %v15123_v22  ;;  %v10264_v44 = vsel %vm6720_vm9, %v10244_v25, %v15127_v24  ;;  %v7845_v52 = vpop.f32.mrb[14].mxu1 }
 0x575   : > { %10368 = vmatprep.subr.bf16.mxu0 %v10264_v44  ;;  %v7846_v63 = vpop.f32.mrb[15].mxu1  ;;  %10400 = vmatprep.mubr.bf16.mxu0 %v15404_v20 }
 0x576   : > { %10369 = vmatpush1.bf16.msra.mxu0 %v10263_v58  ;;  %v10252_v7 = vpop.permute.xlu0 %10251 }
 0x577   : > { %v15143_v32 = vpop.permute.xlu1 %10249  ;;  %10976 = vmatmul.mubr.msk.bf16.vlgmr.msra.gmra.mrb[120].mxu1 %vm587_vm1, %v14974_v12 }
 0x578   : > { %9784 = vmatpush1.bf16.msra.mxu1 %v9639_v18  ;;  %9815 = vmatprep.mubr.bf16.mxu1 %v15404_v20  ;;  %v10267_v38 = vsel %vm6720_vm9, %v15143_v32, %v10252_v7  ;;  %v10266_v41 = vsel %vm6720_vm9, %v15131_v51, %v15143_v32 }
 0x579   : > { %9865 = vmatprep.subr.bf16.mxu1 %v9644_v47 }
 0x57a   : > { %v15151_v28 = vpop.f32.mrb[16].mxu1  ;;  %v10256_v45 = vpop.permute.xlu0 %10255 }
 0x57b   : > { %v15153_v21 = vpop.permute.xlu1 %10253  ;;  %v15155_v11 = vpop.f32.mrb[17].mxu1 }
 0x57c   : > { %10991 = vmatmul.mubr.msk.bf16.vlgmr.msra.gmra.mrb[80].mxu0 %vm587_vm1, %v15123_v22  ;;  %v10268_v19 = vsel %vm6720_vm9, %v10252_v7, %v15153_v21  ;;  %v7886_v48 = vpop.f32.mrb[18].mxu1  ;;  %v10269_v31 = vsel %vm6720_vm9, %v15153_v21, %v10256_v45 }
 0x57d   : > { %10450 = vmatprep.subr.bf16.mxu0 %v10268_v19  ;;  %v7887_v16 = vpop.f32.mrb[19].mxu1  ;;  %10482 = vmatprep.mubr.bf16.mxu0 %v15404_v20 }
 0x57e   : > { %10451 = vmatpush1.bf16.msra.mxu0 %v10267_v38 }
 0x57f   : > { %10978 = vmatmul.mubr.msk.bf16.vlgmr.msra.gmra.mrb[124].mxu1 %vm587_vm1, %v14974_v12  ;;  %v10258_v30 = vpop.permute.xlu1 %10257 }
 0x580   : > { %9866 = vmatpush1.bf16.msra.mxu1 %v9643_v36  ;;  %9897 = vmatprep.mubr.bf16.mxu1 %v15404_v20  ;;  %v10270_v40 = vsel %vm6720_vm9, %v10256_v45, %v10258_v30 }
 0x581   : > { %10014 = vmatprep.subr.bf16.mxu1 %v9949_v29 }
 0x582   : > { %v15173_v8 = vpop.f32.mrb[20].mxu1 }
 0x583   : > { %v15175_v46 = vpop.f32.mrb[21].mxu1 }
 0x584   : > { %10993 = vmatmul.mubr.msk.bf16.vlgmr.msra.gmra.mrb[84].mxu0 %vm587_vm1, %v15123_v22  ;;  %v7927_v35 = vpop.f32.mrb[22].mxu1 }
 0x585   : > { %v7928_v17 = vpop.f32.mrb[23].mxu1 }
 0x587   : > { %10980 = vmatmul.mubr.msk.bf16.vlgmr.msra.gmra.mrb[128].mxu1 %vm587_vm1, %v14974_v12  ;;  %v9957_v12 = vsel %vm5957_vm8, %v15087_v62, %v15084_v6 }
 0x588   : > { %10015 = vmatpush1.bf16.msra.mxu1 %v9948_v14  ;;  %10046 = vmatprep.mubr.bf16.mxu1 %v15404_v20 }
 0x589   : > { %10096 = vmatprep.subr.bf16.mxu1 %v9953_v61 }
 0x58a   : > { %v7964_v59 = vpop.f32.mrb[24].mxu1 }
 0x58b   : > { %v15188_v5 = vpop.f32.mrb[25].mxu1 }
 0x58c   : > { %v7968_v9 = vpop.f32.mrb[26].mxu1 }
 0x58d   : > { %v7969_v33 = vpop.f32.mrb[27].mxu1 }
 0x58f   : > { %10983 = vmatmul.mubr.msk.bf16.vlgmr.msra.gmra.mrb[132].mxu1 %vm587_vm1, %v15044_v3 }
 0x590   : > { %10097 = vmatpush1.bf16.msra.mxu1 %v9952_v54  ;;  %10128 = vmatprep.mubr.bf16.mxu1 %v15404_v20 }
 0x591   : > { %10178 = vmatprep.subr.bf16.mxu1 %v9957_v12 }
 0x592   : > { %v8005_v0 = vpop.f32.mrb[28].mxu1 }
 0x593   : > { %v8007_v53 = vpop.f32.mrb[29].mxu1 }
 0x594   : > { %v8009_v23 = vpop.f32.mrb[30].mxu1 }
 0x595   : > { %v8010_v43 = vpop.f32.mrb[31].mxu1 }
 0x597   : > { %10985 = vmatmul.mubr.msk.bf16.vlgmr.msra.gmra.mrb[136].mxu1 %vm587_vm1, %v15044_v3 }
 0x598   : > { %10179 = vmatpush1.bf16.msra.mxu1 %v9956_v1  ;;  %10210 = vmatprep.mubr.bf16.mxu1 %v15404_v20 }
 0x599   : > { %10327 = vmatprep.subr.bf16.mxu1 %v10262_v4 }
 0x59a   : > { %v8046_v42 = vpop.f32.mrb[32].mxu1 }
 0x59b   : > { %v8048_v49 = vpop.f32.mrb[33].mxu1 }
 0x59c   : > { %v8050_v26 = vpop.f32.mrb[34].mxu1 }
 0x59d   : > { %v8051_v34 = vpop.f32.mrb[35].mxu1 }
 0x59f   : > { %10987 = vmatmul.mubr.msk.bf16.vlgmr.msra.gmra.mrb[140].mxu1 %vm587_vm1, %v15044_v3  ;;  %v10265_v3 = vsel %vm6720_vm9, %v15127_v24, %v15131_v51 }
 0x5a0   : > { %10328 = vmatpush1.bf16.msra.mxu1 %v10261_v39  ;;  %10359 = vmatprep.mubr.bf16.mxu1 %v15404_v20 }
 0x5a1   : > { %10409 = vmatprep.subr.bf16.mxu1 %v10266_v41 }
 0x5a2   : > { %v8140_v50 = vpop.f32.mrb[36].mxu1 }
 0x5a3   : > { %v8141_v55 = vadd.f32 %v8140_v50, %v15125_v15  ;;  %v8142_v6 = vpop.f32.mrb[37].mxu1 }
 0x5a4   : > { %v8143_v62 = vadd.f32 %v8142_v6, %v15129_v37  ;;  %v8144_v57 = vpop.f32.mrb[38].mxu1 }
 0x5a5   : > { %v8145_v27 = vpop.f32.mrb[39].mxu1 }
 0x5a7   : > { %10990 = vmatmul.mubr.msk.bf16.vlgmr.msra.gmra.mrb[144].mxu1 %vm587_vm1, %v15123_v22 }
 0x5a8   : > { %10410 = vmatpush1.bf16.msra.mxu1 %v10265_v3  ;;  %10441 = vmatprep.mubr.bf16.mxu1 %v15404_v20 }
 0x5a9   : > { %10491 = vmatprep.subr.bf16.mxu1 %v10270_v40 }
 0x5aa   : > { %v8181_v56 = vpop.f32.mrb[40].mxu1 }
 0x5ab   : > { %v8182_v13 = vadd.f32 %v8181_v56, %v15151_v28  ;;  %v8183_v25 = vpop.f32.mrb[41].mxu1 }
 0x5ac   : > { %v8184_v10 = vadd.f32 %v8183_v25, %v15155_v11  ;;  %v8185_v2 = vpop.f32.mrb[42].mxu1 }
 0x5ad   : > { %v8186_v60 = vpop.f32.mrb[43].mxu1 }
 0x5af   : > { %10992 = vmatmul.mubr.msk.bf16.vlgmr.msra.gmra.mrb[148].mxu1 %vm587_vm1, %v15123_v22 }
 0x5b0   : > { %10492 = vmatpush1.bf16.msra.mxu1 %v10269_v31  ;;  %10523 = vmatprep.mubr.bf16.mxu1 %v15404_v20 }
 0x5b2   : > { %v8222_v15 = vpop.f32.mrb[44].mxu1 }
 0x5b3   : > { %v8223_v24 = vadd.f32 %v8222_v15, %v15173_v8  ;;  %v8224_v37 = vpop.f32.mrb[45].mxu1 }
 0x5b4   : > { %v8225_v51 = vadd.f32 %v8224_v37, %v15175_v46  ;;  %v8226_v44 = vpop.f32.mrb[46].mxu1 }
 0x5b5   : > { %v8227_v52 = vpop.f32.mrb[47].mxu1 }
 0x5b7   : > { %10994 = vmatmul.mubr.msk.bf16.vlgmr.msra.gmra.mrb[152].mxu1 %vm587_vm1, %v15123_v22 }
 0x5ba   : > { %v8263_v58 = vpop.f32.mrb[48].mxu1 }
 0x5bb   : > { %v15237_v63 = vadd.f32 %v8263_v58, %v7964_v59  ;;  %v8265_v18 = vpop.f32.mrb[49].mxu1 }
 0x5bc   : > { %v15240_v32 = vadd.f32 %v8265_v18, %v15188_v5  ;;  %v8267_v47 = vpop.f32.mrb[50].mxu1 }
 0x5bd   : > { %v8268_v20 = vpop.f32.mrb[51].mxu1 }
 0x5c2   : > { %v8304_v7 = vpop.f32.mrb[52].mxu1  ;;  %v8754_v28 = vpop.f32.mrb[16].mxu0 }
 0x5c3   : > { %v15242_v21 = vadd.f32 %v8304_v7, %v8005_v0  ;;  %v8306_v11 = vpop.f32.mrb[53].mxu1  ;;  %v8756_v19 = vpop.f32.mrb[17].mxu0 }
 0x5c4   : > { %v15244_v48 = vadd.f32 %v8306_v11, %v8007_v53  ;;  %v8308_v38 = vpop.f32.mrb[54].mxu1  ;;  %v8758_v16 = vpop.f32.mrb[18].mxu0 }
 0x5c5   : > { %v8309_v22 = vpop.f32.mrb[55].mxu1  ;;  %v8759_v36 = vpop.f32.mrb[19].mxu0 }
 0x5ca   : > { %v8345_v29 = vpop.f32.mrb[56].mxu1  ;;  %v8836_v8 = vpop.f32.mrb[20].mxu0 }
 0x5cb   : > { %v15246_v46 = vadd.f32 %v8345_v29, %v8046_v42  ;;  %v8347_v35 = vpop.f32.mrb[57].mxu1  ;;  %v8838_v17 = vpop.f32.mrb[21].mxu0 }
 0x5cc   : > { %v15248_v14 = vadd.f32 %v8347_v35, %v8048_v49  ;;  %v8349_v61 = vpop.f32.mrb[58].mxu1  ;;  %v8840_v59 = vpop.f32.mrb[22].mxu0 }
 0x5cd   : > { %v8350_v5 = vpop.f32.mrb[59].mxu1  ;;  %v8841_v9 = vpop.f32.mrb[23].mxu0 }
 0x5d2   : > { %v8441_v33 = vpop.f32.mrb[60].mxu1  ;;  %v8918_v54 = vpop.f32.mrb[24].mxu0 }
 0x5d3   : > { %v8653_v12 = vadd.f32 %v8441_v33, %v8141_v55  ;;  %v8443_v0 = vpop.f32.mrb[61].mxu1  ;;  %v8920_v53 = vpop.f32.mrb[25].mxu0 }
 0x5d4   : > { %v8654_v23 = vadd.f32 %v8443_v0, %v8143_v62  ;;  %v8445_v43 = vpop.f32.mrb[62].mxu1  ;;  %v8922_v1 = vpop.f32.mrb[26].mxu0 }
 0x5d5   : > { %v8966_v4 = vadd.f32 %v8754_v28, %v8653_v12  ;;  %v8446_v26 = vpop.f32.mrb[63].mxu1  ;;  %v8923_v42 = vpop.f32.mrb[27].mxu0 }
 0x5d6   : > { %v8967_v34 = vadd.f32 %v8756_v19, %v8654_v23 }
 0x5da   : > { %v8482_v39 = vpop.f32.mrb[64].mxu1 }
 0x5db   : > { %v15250_v41 = vadd.f32 %v8482_v39, %v8182_v13  ;;  %v8484_v49 = vpop.f32.mrb[65].mxu1 }
 0x5dc   : > { %v15252_v50 = vadd.f32 %v8484_v49, %v8184_v10  ;;  %v8486_v6 = vpop.f32.mrb[66].mxu1 }
 0x5dd   : > { %v8487_v57 = vpop.f32.mrb[67].mxu1 }
 0x5e0   : > { %v9067_v30 = vpop.f32.mrb[28].mxu0 }
 0x5e1   : > { %v9279_v27 = vadd.f32 %v9067_v30, %v8966_v4  ;;  %v9069_v55 = vpop.f32.mrb[29].mxu0 }
 0x5e2   : > { %v9280_v3 = vadd.f32 %v9069_v55, %v8967_v34  ;;  %v8523_v45 = vpop.f32.mrb[68].mxu1  ;;  %v9071_v62 = vpop.f32.mrb[30].mxu0 }
 0x5e3   : > { %v8657_v40 = vadd.f32 %v8523_v45, %v8223_v24  ;;  %v8525_v56 = vpop.f32.mrb[69].mxu1  ;;  %v9072_v25 = vpop.f32.mrb[31].mxu0 }
 0x5e4   : > { %v8658_v2 = vadd.f32 %v8525_v56, %v8225_v51  ;;  %v8527_v60 = vpop.f32.mrb[70].mxu1 }
 0x5e5   : > { %v8970_v31 = vadd.f32 %v8836_v8, %v8657_v40  ;;  %v8528_v15 = vpop.f32.mrb[71].mxu1 }
 0x5e6   : > { %v8971_v13 = vadd.f32 %v8838_v17, %v8658_v2 }
 0x5e8   : > { %v9149_v37 = vpop.f32.mrb[32].mxu0 }
 0x5e9   : > { %v9283_v44 = vadd.f32 %v9149_v37, %v8970_v31  ;;  %v9151_v10 = vpop.f32.mrb[33].mxu0 }
 0x5ea   : > { %v9284_v52 = vadd.f32 %v9151_v10, %v8971_v13  ;;  %v8564_v58 = vpop.f32.mrb[72].mxu1  ;;  %v9153_v18 = vpop.f32.mrb[34].mxu0 }
 0x5eb   : > { %v8659_v47 = vadd.f32 %v8564_v58, %v15237_v63  ;;  %v8566_v20 = vpop.f32.mrb[73].mxu1  ;;  %v9154_v7 = vpop.f32.mrb[35].mxu0 }
 0x5ec   : > { %v8660_v28 = vadd.f32 %v8566_v20, %v15240_v32  ;;  %v8568_v24 = vpop.f32.mrb[74].mxu1 }
 0x5ed   : > { %v8569_v11 = vpop.f32.mrb[75].mxu1 }
 0x5f0   : > { %v9231_v19 = vpop.f32.mrb[36].mxu0 }
 0x5f1   : > { %v9233_v51 = vpop.f32.mrb[37].mxu0 }
 0x5f2   : > { %v8605_v38 = vpop.f32.mrb[76].mxu1  ;;  %v9235_v16 = vpop.f32.mrb[38].mxu0 }
 0x5f3   : > { %v8661_v22 = vadd.f32 %v8605_v38, %v15242_v21  ;;  %v8607_v36 = vpop.f32.mrb[77].mxu1  ;;  %v9236_v29 = vpop.f32.mrb[39].mxu0 }
 0x5f4   : > { %v8662_v8 = vadd.f32 %v8607_v36, %v15244_v48  ;;  %v8609_v35 = vpop.f32.mrb[78].mxu1 }
 0x5f5   : > { %v8974_v17 = vadd.f32 %v8918_v54, %v8661_v22  ;;  %v8610_v61 = vpop.f32.mrb[79].mxu1 }
 0x5f6   : > { %v8975_v63 = vadd.f32 %v8920_v53, %v8662_v8 }
 0x5f7   : > { %v9287_v59 = vadd.f32 %v9231_v19, %v8974_v17 }
 0x5f8   : > { %v9288_v5 = vadd.f32 %v9233_v51, %v8975_v63  ;;  %v9380_v9 = vpop.f32.mrb[40].mxu0 }
 0x5f9   : > { %v9592_v32 = vadd.f32 %v9380_v9, %v9279_v27  ;;  %v9382_v33 = vpop.f32.mrb[41].mxu0 }
 0x5fa   : > { %v9593_v12 = vadd.f32 %v9382_v33, %v9280_v3  ;;  %v8646_v0 = vpop.f32.mrb[80].mxu1  ;;  %v9384_v23 = vpop.f32.mrb[42].mxu0 }
 0x5fb   : > { %v8663_v43 = vadd.f32 %v8646_v0, %v15246_v46  ;;  %v8648_v1 = vpop.f32.mrb[81].mxu1  ;;  %v9385_v21 = vpop.f32.mrb[43].mxu0 }
 0x5fc   : > { %v8664_v4 = vadd.f32 %v8648_v1, %v15248_v14  ;;  %v8650_v26 = vpop.f32.mrb[82].mxu1 }
 0x5fd   : > { %v8651_v48 = vpop.f32.mrb[83].mxu1 }
 0x600   : > { %v9462_v42 = vpop.f32.mrb[44].mxu0 }
 0x601   : > { %v9596_v54 = vadd.f32 %v9462_v42, %v9283_v44  ;;  %v9464_v34 = vpop.f32.mrb[45].mxu0 }
 0x602   : > { %v9597_v53 = vadd.f32 %v9464_v34, %v9284_v52  ;;  %v8795_v39 = vpop.f32.mrb[84].mxu1  ;;  %v9466_v49 = vpop.f32.mrb[46].mxu0 }
 0x603   : > { %v8968_v6 = vadd.f32 %v8795_v39, %v15250_v41  ;;  %v8797_v57 = vpop.f32.mrb[85].mxu1  ;;  %v9467_v30 = vpop.f32.mrb[47].mxu0 }
 0x604   : > { %v8969_v27 = vadd.f32 %v8797_v57, %v15252_v50  ;;  %v8799_v55 = vpop.f32.mrb[86].mxu1 }
 0x605   : > { %v8800_v46 = vpop.f32.mrb[87].mxu1 }
 0x608   : > { %v9544_v3 = vpop.f32.mrb[48].mxu0 }
 0x609   : > { %v9600_v45 = vadd.f32 %v9544_v3, %v9287_v59  ;;  %v9546_v62 = vpop.f32.mrb[49].mxu0 }
 0x60a   : > { %v9601_v14 = vadd.f32 %v9546_v62, %v9288_v5  ;;  %v8877_v40 = vpop.f32.mrb[88].mxu1  ;;  %v9548_v56 = vpop.f32.mrb[50].mxu0 }
 0x60b   : > { %v8972_v25 = vadd.f32 %v8877_v40, %v8659_v47  ;;  %v8879_v2 = vpop.f32.mrb[89].mxu1  ;;  %v9549_v60 = vpop.f32.mrb[51].mxu0 }
 0x60c   : > { %v8973_v31 = vadd.f32 %v8879_v2, %v8660_v28  ;;  %v8881_v15 = vpop.f32.mrb[90].mxu1 }
 0x60d   : > { %v8882_v13 = vpop.f32.mrb[91].mxu1 }
 0x612   : > { %v8959_v37 = vpop.f32.mrb[92].mxu1 }
 0x613   : > { %v8976_v41 = vadd.f32 %v8959_v37, %v8663_v43  ;;  %v9694_v44 = vpop.f32.mrb[52].mxu0  ;;  %v8961_v10 = vpop.f32.mrb[93].mxu1 }
 0x614   : > { %v9906_v52 = vadd.f32 %v9694_v44, %v9592_v32  ;;  %v8977_v50 = vadd.f32 %v8961_v10, %v8664_v4  ;;  %v9696_v58 = vpop.f32.mrb[53].mxu0  ;;  %v8963_v18 = vpop.f32.mrb[94].mxu1 }
 0x615   : > { %v9907_v20 = vadd.f32 %v9696_v58, %v9593_v12  ;;  %v8964_v7 = vpop.f32.mrb[95].mxu1  ;;  %v9698_v24 = vpop.f32.mrb[54].mxu0 }
 0x616   : > { %v9699_v11 = vpop.f32.mrb[55].mxu0 }
 0x61a   : > { %v9108_v19 = vpop.f32.mrb[96].mxu1 }
 0x61b   : > { %v9281_v51 = vadd.f32 %v9108_v19, %v8968_v6  ;;  %v9776_v47 = vpop.f32.mrb[56].mxu0  ;;  %v9110_v38 = vpop.f32.mrb[97].mxu1 }
 0x61c   : > { %v9910_v16 = vadd.f32 %v9776_v47, %v9596_v54  ;;  %v9282_v28 = vadd.f32 %v9110_v38, %v8969_v27  ;;  %v9778_v22 = vpop.f32.mrb[57].mxu0  ;;  %v9112_v36 = vpop.f32.mrb[98].mxu1 }
 0x61d   : > { %v9911_v29 = vadd.f32 %v9778_v22, %v9597_v53  ;;  %v9113_v8 = vpop.f32.mrb[99].mxu1  ;;  %v9780_v35 = vpop.f32.mrb[58].mxu0 }
 0x61e   : > { %v9781_v17 = vpop.f32.mrb[59].mxu0 }
 0x622   : > { %v9190_v61 = vpop.f32.mrb[100].mxu1 }
 0x623   : > { %v9285_v63 = vadd.f32 %v9190_v61, %v8972_v25  ;;  %v9858_v59 = vpop.f32.mrb[60].mxu0  ;;  %v9192_v5 = vpop.f32.mrb[101].mxu1 }
 0x624   : > { %v9914_v9 = vadd.f32 %v9858_v59, %v9600_v45  ;;  %v9286_v32 = vadd.f32 %v9192_v5, %v8973_v31  ;;  %v9860_v33 = vpop.f32.mrb[61].mxu0  ;;  %v9194_v12 = vpop.f32.mrb[102].mxu1 }
 0x625   : > { %v9915_v0 = vadd.f32 %v9860_v33, %v9601_v14  ;;  %v9195_v23 = vpop.f32.mrb[103].mxu1  ;;  %v9862_v43 = vpop.f32.mrb[62].mxu0 }
 0x626   : > { %v9863_v1 = vpop.f32.mrb[63].mxu0 }
 0x62a   : > { %v9272_v21 = vpop.f32.mrb[104].mxu1 }
 0x62b   : > { %v9289_v4 = vadd.f32 %v9272_v21, %v8976_v41  ;;  %v10007_v26 = vpop.f32.mrb[64].mxu0  ;;  %v9274_v48 = vpop.f32.mrb[105].mxu1 }
 0x62c   : > { %v10219_v42 = vadd.f32 %v10007_v26, %v9906_v52  ;;  %v9290_v54 = vadd.f32 %v9274_v48, %v8977_v50  ;;  %v10009_v34 = vpop.f32.mrb[65].mxu0  ;;  %v9276_v53 = vpop.f32.mrb[106].mxu1 }
 0x62d   : > { %v10220_v39 = vadd.f32 %v10009_v34, %v9907_v20  ;;  %v9277_v49 = vpop.f32.mrb[107].mxu1  ;;  %v10011_v6 = vpop.f32.mrb[66].mxu0 }
 0x62e   : > { %v10012_v57 = vpop.f32.mrb[67].mxu0 }
 0x632   : > { %v9421_v30 = vpop.f32.mrb[108].mxu1 }
 0x633   : > { %v9594_v27 = vadd.f32 %v9421_v30, %v9281_v51  ;;  %v10089_v55 = vpop.f32.mrb[68].mxu0  ;;  %v9423_v46 = vpop.f32.mrb[109].mxu1 }
 0x634   : > { %v10223_v3 = vadd.f32 %v10089_v55, %v9910_v16  ;;  %v9595_v45 = vadd.f32 %v9423_v46, %v9282_v28  ;;  %v10091_v62 = vpop.f32.mrb[69].mxu0  ;;  %v9425_v14 = vpop.f32.mrb[110].mxu1 }
 0x635   : > { %v10224_v40 = vadd.f32 %v10091_v62, %v9911_v29  ;;  %v9426_v56 = vpop.f32.mrb[111].mxu1  ;;  %v10093_v25 = vpop.f32.mrb[70].mxu0 }
 0x636   : > { %v10094_v2 = vpop.f32.mrb[71].mxu0  ;;  %v15263_v28 = vpop.permute.xlu0 %10547 }
 0x63a   : > { %v9503_v60 = vpop.f32.mrb[112].mxu1 }
 0x63b   : > { %v9598_v31 = vadd.f32 %v9503_v60, %v9285_v63  ;;  %v10171_v15 = vpop.f32.mrb[72].mxu0  ;;  %v9505_v13 = vpop.f32.mrb[113].mxu1 }
 0x63c   : > { %v10227_v37 = vadd.f32 %v10171_v15, %v9914_v9  ;;  %v9599_v41 = vadd.f32 %v9505_v13, %v9286_v32  ;;  %v10173_v44 = vpop.f32.mrb[73].mxu0  ;;  %v9507_v10 = vpop.f32.mrb[114].mxu1 }
 0x63d   : > { %v10228_v52 = vadd.f32 %v10173_v44, %v9915_v0  ;;  %v9508_v50 = vpop.f32.mrb[115].mxu1  ;;  %v10175_v58 = vpop.f32.mrb[74].mxu0 }
 0x63e   : > { %v10176_v18 = vpop.f32.mrb[75].mxu0 }
 0x642   : > { %v9585_v20 = vpop.f32.mrb[116].mxu1 }
 0x643   : > { %v9602_v7 = vadd.f32 %v9585_v20, %v9289_v4  ;;  %v9587_v24 = vpop.f32.mrb[117].mxu1 }
 0x644   : > { %v9603_v11 = vadd.f32 %v9587_v24, %v9290_v54  ;;  %v9589_v19 = vpop.f32.mrb[118].mxu1 }
 0x645   : > { %v9590_v51 = vpop.f32.mrb[119].mxu1 }
 0x647   : > { %v10320_v47 = vpop.f32.mrb[76].mxu0 }
 0x648   : > { %v10532_v38 = vadd.f32 %v10320_v47, %v10219_v42  ;;  %v10322_v16 = vpop.f32.mrb[77].mxu0 }
 0x649   : > { %v10533_v22 = vadd.f32 %v10322_v16, %v10220_v39  ;;  %v10324_v36 = vpop.f32.mrb[78].mxu0 }
 0x64a   : > { %v10550_v29 = vadd.f32 %v15263_v28, %v10532_v38  ;;  %v9735_v8 = vpop.f32.mrb[120].mxu1  ;;  %v10325_v35 = vpop.f32.mrb[79].mxu0 }
 0x64b   : > { %v10551_v17 = vadd.f32 %v15263_v28, %v10533_v22  ;;  %v9908_v61 = vadd.f32 %v9735_v8, %v9594_v27  ;;  %v9737_v63 = vpop.f32.mrb[121].mxu1 }
 0x64c   : > { %v10562_v59 = vmax.f32 %v10550_v29, 0.0  ;;  %v9909_v5 = vadd.f32 %v9737_v63, %v9595_v45  ;;  %v9739_v9 = vpop.f32.mrb[122].mxu1 }
 0x64d   : > { %v10563_v32 = vmax.f32 %v10551_v17, 0.0  ;;  %v9740_v33 = vpop.f32.mrb[123].mxu1 }
 0x64e   : > { %10574 = vst [vmem:[%s15267_s19] sm:$0xff] %v10562_v59 }
 0x64f   : > { %10575 = vst [vmem:[%s15267_s19 + $0x8] sm:$0xff] %v10563_v32  ;;  %v10402_v12 = vpop.f32.mrb[80].mxu0 }
 0x650   : > { %v10536_v0 = vadd.f32 %v10402_v12, %v10223_v3  ;;  %v10404_v23 = vpop.f32.mrb[81].mxu0 }
 0x651   : > { %v10537_v43 = vadd.f32 %v10404_v23, %v10224_v40  ;;  %v10406_v1 = vpop.f32.mrb[82].mxu0 }
 0x652   : > { %v10554_v21 = vadd.f32 %v15263_v28, %v10536_v0  ;;  %v9817_v4 = vpop.f32.mrb[124].mxu1  ;;  %v10407_v26 = vpop.f32.mrb[83].mxu0 }
 0x653   : > { %v10555_v48 = vadd.f32 %v15263_v28, %v10537_v43  ;;  %v9912_v42 = vadd.f32 %v9817_v4, %v9598_v31  ;;  %v9819_v54 = vpop.f32.mrb[125].mxu1 }
 0x654   : > { %v10566_v34 = vmax.f32 %v10554_v21, 0.0  ;;  %v9913_v53 = vadd.f32 %v9819_v54, %v9599_v41  ;;  %v9821_v39 = vpop.f32.mrb[126].mxu1 }
 0x655   : > { %v10567_v49 = vmax.f32 %v10555_v48, 0.0  ;;  %v9822_v6 = vpop.f32.mrb[127].mxu1 }
 0x656   : > { %10578 = vst [vmem:[%s15267_s19 + $0x20] sm:$0xff] %v10566_v34 }
 0x657   : > { %10579 = vst [vmem:[%s15267_s19 + $0x28] sm:$0xff] %v10567_v49  ;;  %v10484_v57 = vpop.f32.mrb[84].mxu0 }
 0x658   : > { %v10540_v30 = vadd.f32 %v10484_v57, %v10227_v37  ;;  %v10486_v27 = vpop.f32.mrb[85].mxu0 }
 0x659   : > { %v10541_v55 = vadd.f32 %v10486_v27, %v10228_v52  ;;  %v10488_v46 = vpop.f32.mrb[86].mxu0 }
 0x65a   : > { %v10558_v3 = vadd.f32 %v15263_v28, %v10540_v30  ;;  %v9899_v45 = vpop.f32.mrb[128].mxu1  ;;  %v10489_v62 = vpop.f32.mrb[87].mxu0 }
 0x65b   : > { %v10559_v14 = vadd.f32 %v15263_v28, %v10541_v55  ;;  %v9916_v40 = vadd.f32 %v9899_v45, %v9602_v7  ;;  %v9901_v56 = vpop.f32.mrb[129].mxu1 }
 0x65c   : > { %v10570_v25 = vmax.f32 %v10558_v3, 0.0  ;;  %v9917_v2 = vadd.f32 %v9901_v56, %v9603_v11  ;;  %v9903_v60 = vpop.f32.mrb[130].mxu1 }
 0x65d   : > { %v10571_v31 = vmax.f32 %v10559_v14, 0.0  ;;  %v9904_v15 = vpop.f32.mrb[131].mxu1 }
 0x65e   : > { %10582 = vst [vmem:[%s15267_s19 + $0x40] sm:$0xff] %v10570_v25 }
 0x65f   : > { %10583 = vst [vmem:[%s15267_s19 + $0x48] sm:$0xff] %v10571_v31 }
 0x662   : > { %v10048_v13 = vpop.f32.mrb[132].mxu1 }
 0x663   : > { %v10221_v37 = vadd.f32 %v10048_v13, %v9908_v61  ;;  %v10050_v41 = vpop.f32.mrb[133].mxu1 }
 0x664   : > { %v10222_v44 = vadd.f32 %v10050_v41, %v9909_v5  ;;  %v10052_v10 = vpop.f32.mrb[134].mxu1 }
 0x665   : > { %v10053_v52 = vpop.f32.mrb[135].mxu1 }
 0x66a   : > { %v10130_v50 = vpop.f32.mrb[136].mxu1 }
 0x66b   : > { %v10225_v58 = vadd.f32 %v10130_v50, %v9912_v42  ;;  %v10132_v18 = vpop.f32.mrb[137].mxu1 }
 0x66c   : > { %v10226_v20 = vadd.f32 %v10132_v18, %v9913_v53  ;;  %v10134_v24 = vpop.f32.mrb[138].mxu1 }
 0x66d   : > { %v10135_v7 = vpop.f32.mrb[139].mxu1 }
 0x672   : > { %v10212_v19 = vpop.f32.mrb[140].mxu1 }
 0x673   : > { %v10229_v11 = vadd.f32 %v10212_v19, %v9916_v40  ;;  %v10214_v51 = vpop.f32.mrb[141].mxu1 }
 0x674   : > { %v10230_v47 = vadd.f32 %v10214_v51, %v9917_v2  ;;  %v10216_v38 = vpop.f32.mrb[142].mxu1 }
 0x675   : > { %v10217_v16 = vpop.f32.mrb[143].mxu1 }
 0x67a   : > { %v10361_v22 = vpop.f32.mrb[144].mxu1 }
 0x67b   : > { %v10534_v36 = vadd.f32 %v10361_v22, %v10221_v37  ;;  %v10363_v29 = vpop.f32.mrb[145].mxu1 }
 0x67c   : > { %v10535_v8 = vadd.f32 %v10363_v29, %v10222_v44  ;;  %v10365_v35 = vpop.f32.mrb[146].mxu1 }
 0x67d   : > { %v10552_v17 = vadd.f32 %v15263_v28, %v10534_v36  ;;  %v10366_v61 = vpop.f32.mrb[147].mxu1 }
 0x67e   : > { %v10553_v63 = vadd.f32 %v15263_v28, %v10535_v8 }
 0x67f   : > { %v10564_v59 = vmax.f32 %v10552_v17, 0.0 }
 0x680   : > { %v10565_v5 = vmax.f32 %v10553_v63, 0.0 }
 0x681   : > { %10576 = vst [vmem:[%s15267_s19 + $0x10] sm:$0xff] %v10564_v59 }
 0x682   : > { %10577 = vst [vmem:[%s15267_s19 + $0x18] sm:$0xff] %v10565_v5  ;;  %v10443_v9 = vpop.f32.mrb[148].mxu1 }
 0x683   : > { %v10538_v32 = vadd.f32 %v10443_v9, %v10225_v58  ;;  %v10445_v33 = vpop.f32.mrb[149].mxu1 }
 0x684   : > { %v10539_v12 = vadd.f32 %v10445_v33, %v10226_v20  ;;  %v10447_v0 = vpop.f32.mrb[150].mxu1 }
 0x685   : > { %v10556_v23 = vadd.f32 %v15263_v28, %v10538_v32  ;;  %v10448_v43 = vpop.f32.mrb[151].mxu1 }
 0x686   : > { %v10557_v1 = vadd.f32 %v15263_v28, %v10539_v12 }
 0x687   : > { %v10568_v21 = vmax.f32 %v10556_v23, 0.0 }
 0x688   : > { %v10569_v4 = vmax.f32 %v10557_v1, 0.0 }
 0x689   : > { %10580 = vst [vmem:[%s15267_s19 + $0x30] sm:$0xff] %v10568_v21 }
 0x68a   : > { %10581 = vst [vmem:[%s15267_s19 + $0x38] sm:$0xff] %v10569_v4  ;;  %v10525_v26 = vpop.f32.mrb[152].mxu1 }
 0x68b   : > { %v10542_v48 = vadd.f32 %v10525_v26, %v10229_v11  ;;  %v10527_v42 = vpop.f32.mrb[153].mxu1 }
 0x68c   : > { %v10543_v54 = vadd.f32 %v10527_v42, %v10230_v47  ;;  %v10529_v34 = vpop.f32.mrb[154].mxu1 }
 0x68d   : > { %v10560_v53 = vadd.f32 %v15263_v28, %v10542_v48  ;;  %v10530_v39 = vpop.f32.mrb[155].mxu1 }
 0x68e   : > { %v10561_v49 = vadd.f32 %v15263_v28, %v10543_v54 }
 0x68f   : > { %v10572_v6 = vmax.f32 %v10560_v53, 0.0 }
 0x690   : > { %v10573_v57 = vmax.f32 %v10561_v49, 0.0 }
 0x691   : > { %10584 = vst [vmem:[%s15267_s19 + $0x50] sm:$0xff] %v10572_v6 }
 0x692   : > { %10585 = vst [vmem:[%s15267_s19 + $0x58] sm:$0xff] %v10573_v57 }
 0x693   : > { %11808 = shalt.err (!%p11805_p7)
}
 0x694   : > { %s11809_s21 = scalar_lea.hbm %s15294_s23, 1536  ;;  %s11813_s24 = scalar_lea.hbm %s15353_s8, 3072 }
 0x695   : > { %p11810_p11 = scmp.ne.s32.totalorder %s15294_s23, %s11809_s21  ;;  %p11814_p12 = scmp.lt.u32.totalorder %s15294_s23, %s15353_s8 }
 0x696   : > { %p11815_p13 = scmp.lt.u32.totalorder %s11813_s24, %s11809_s21  ;;  %p11817_p1 = scmp.lt.u32.totalorder %s11809_s21, %s15294_s23 }
 0x697   : > { %p11811_p2 = pnand %p11810_p11, %p15414_p6 }
 0x698   : > { %p11816_p0 = por %p11815_p13, %p11814_p12 }
 0x699   : > { %p11812_p8 = pneg %p11811_p2 }
 0x69a   : > { %p11818_p10 = por %p11817_p1, %p11816_p0 }
 0x69c   : > { %p11819_p3 = pnand %p11818_p10, %p11812_p8 }
 0x69e   : > { %11822 = shalt.err (!%p11819_p3)
}
 0x69f   : > { %11493 = dma.vmem_to_hbm [thread:$0]  (%p15414_p6), %s15296_s17, 1536, %s15294_s23, %s10587_s30  }
 0x6a0 PF: > { %s15415_s22 = sld [smem:[#allocation16_spill]]  ;;  %s15416_s11 = sld [smem:[#allocation17_spill]] }
 0x6a1   : > { %p15418_p9 = scmp.ge.s32.totalorder %s11889_s10, 2 }
 0x6a6   : > { %s10615_s13 = sand.u32 1, %s15415_s22   ;;  %p15417_p4 = scmp.ne.s32.totalorder %s15416_s11, 0 }
 0x6a7   : > { %s10616_s19 = scalar_lea.sflag [#allocation4], %s10615_s13 }
 0x6a8   : > { %p11510_p5 = pnand %p15418_p9, %p15417_p4 }
 0x6aa   : > { %11864 = dma.done.wait (!%p11510_p5), %s10616_s19, 1536  }
 0x6ab   : > { %11866 = vsyncadd (!%p11510_p5), %s10616_s19, 4294965760  ;;  %s28_s10 = sadd.s32 1, %s11889_s10   ;;  %s15419_s18 = sld [smem:[#allocation19_spill]] }
 0x6ac   : > { %p25_p7 = scmp.ge.s32.totalorder %s28_s10, 4   ;;  %s15420_s2 = sld [smem:[#allocation18_spill]] }
 0x6ad   : > { %s15421_s27 = smov %s11873_s28  ;;  %s15422_s28 = smov %s11877_s29 }
 0x6ae   : > { %s15424_s30 = smov %s11885_s9  ;;  %27 = sbr.rel (!%p25_p7) target bundleno = 13 (0xd), region = 145 }
 0x6b1   : > { %s15423_s29 = smov %s15419_s18 }
 0x6b2   : > { %s15425_s9 = smov %s15420_s2 }
 0x6b5   :  { %10621 = vsyncpa [#allocation3], 1 }
 0x6b6   :  { %10623 = vsyncpa [#allocation3 + $0x1], 1 }
 0x6b7   :  { %10624 = vsyncpa [#allocation6], 1 }
 0x6b8   :  { %10626 = vsyncpa [#allocation6 + $0x1], 1 }
 0x6b9   :  { %10627 = vsyncpa [#allocation9], 1 }
 0x6ba   :  { %10628 = vsyncpa [#allocation4], 1 }
 0x6bb   :  { %10630 = vsyncpa [#allocation4 + $0x1], 1 }

</bundles_post_ra>
